<compile_context>
chip_gen: v5e
topology: v5e:2x2
jax: 0.10.0
libtpu: 0.0.40
codegen_flags: <defaults>
</compile_context>

<pallas_src>
import math
import jax
import jax.numpy as jnp
from jax.experimental import pallas as pl
from jax.experimental.pallas import tpu as pltpu


def _graph_decoder_kernel(
    x_ref,      # (1, 1, TB*L)   batch tile of latents, batch folded into lanes
    w1c_ref,    # (TB*L, TB*H)   block-diag fused mlp1+conv1 weight (w1 @ wc1)
    b1c_ref,    # (1, TB*H)      fused bias (b1 @ wc1), tiled TB times
    a1s_ref,    # (N, 1)         row-sums of att1
    bc1_ref,    # (1, TB*H)      conv1 bias, tiled TB times
    att2_ref,   # (N, N)         conv2 att
    wc2_ref,    # (TB*H, TB*H)   block-diag conv2 weight
    bc2_ref,    # (1, TB*H)      conv2 bias, tiled TB times
    w2_ref,     # (TB*H, TB*I)   block-diag mlp2 weight
    b2_ref,     # (1, TB*I)      mlp2 bias, tiled TB times
    out_ref,    # (1, N, TB*I)   lane-dense output slab for this batch tile
):
    # mlp1 + conv1 weight (fused): every node row of mlp1's output is
    # identical per sample, so one folded (1, TB*L) @ (TB*L, TB*H) matmul
    # gives the per-sample support row directly in the folded layout.
    x = x_ref[0]                                                     # (1, TB*L)
    s1 = jnp.dot(x, w1c_ref[...],
                 preferred_element_type=jnp.float32) + b1c_ref[...]  # (1, TB*H)

    # conv1: att1 @ (identical rows)  ==  rowsum(att1)[n] * support_row.
    # Pure VPU broadcast multiply-add, no MXU push, no relayout.
    y1 = jnp.maximum(a1s_ref[...] * s1 + bc1_ref[...], 0.0)          # (N, TB*H)

    # conv2: per-sample y1 @ wc2 via the block-diagonal weight (stays folded),
    # then a single wide att2 @ s2 with the batch tile in the lanes.
    s2 = jnp.dot(y1, wc2_ref[...],
                 preferred_element_type=jnp.float32)                 # (N, TB*H)
    y2 = jnp.dot(att2_ref[...], s2,
                 preferred_element_type=jnp.float32) + bc2_ref[...]  # (N, TB*H)
    y2 = jnp.maximum(y2, 0.0)

    # mlp2 via the block-diagonal weight; output is a lane-dense (N, TB*I)
    # slab.  The module's permute(0, 2, 1) happens in the wrapper.
    out = jnp.dot(y2, w2_ref[...],
                  preferred_element_type=jnp.float32) + b2_ref[...]  # (N, TB*I)
    out_ref[0] = out


def graph_decoder(x, params, tb=32):
    """x: (B, latent).  Returns (B, input_size, num_nodes)."""
    B, L = x.shape
    w1, b1, att1, wc1, bc1, att2, wc2, bc2, w2, b2 = params
    H = w1.shape[1]
    N = att1.shape[0]
    I = w2.shape[1]

    # Pad the batch up to a multiple of the batch tile; pick the grid size.
    Bp = pl.cdiv(B, tb) * tb
    G = Bp // tb
    xp = jnp.pad(x, ((0, Bp - B), (0, 0))) if Bp != B else x
    # Fold the batch tile into the lane dimension (contiguous HBM reshape).
    xf = xp.reshape(G, 1, tb * L)

    eye = jnp.eye(tb, dtype=jnp.float32)

    # Fuse mlp1 into conv1 (no activation between them): support_row =
    # (x @ w1 + b1) @ wc1 = x @ (w1 @ wc1) + (b1 @ wc1).
    w1c = w1 @ wc1                               # (L, H)
    b1c = b1 @ wc1                               # (1, H)

    # Block-diagonal weights so the kernel body never refolds sublanes/lanes.
    w1c_bd = jnp.kron(eye, w1c)                  # (tb*L, tb*H)
    wc2_bd = jnp.kron(eye, wc2)                  # (tb*H, tb*H)
    w2_bd = jnp.kron(eye, w2)                    # (tb*H, tb*I)

    # Biases tiled to the folded (rows, tb*feat) layout; att1 row-sum
    # precomputed once (grid-invariant).
    b1c_t = jnp.tile(b1c, (1, tb))               # (1, tb*H)
    bc1_t = jnp.tile(bc1, (1, tb))               # (1, tb*H)
    bc2_t = jnp.tile(bc2, (1, tb))               # (1, tb*H)
    b2_t = jnp.tile(b2, (1, tb))                 # (1, tb*I)
    a1s = jnp.sum(att1, axis=1, keepdims=True)   # (N, 1)

    full = lambda shape: pl.BlockSpec(shape, lambda g: (0,) * len(shape))

    out = pl.pallas_call(
        _graph_decoder_kernel,
        out_shape=jax.ShapeDtypeStruct((G, N, tb * I), jnp.float32),
        grid_spec=pltpu.PrefetchScalarGridSpec(
            num_scalar_prefetch=0,
            grid=(G,),
            in_specs=[
                pl.BlockSpec((1, 1, tb * L), lambda g: (g, 0, 0)),  # x tile
                full((tb * L, tb * H)),                             # w1c_bd
                full((1, tb * H)),                                  # b1c_t
                full((N, 1)),                                       # att1 rowsum
                full((1, tb * H)),                                  # bc1_t
                full((N, N)),                                       # att2
                full((tb * H, tb * H)),                             # wc2_bd
                full((1, tb * H)),                                  # bc2_t
                full((tb * H, tb * I)),                             # w2_bd
                full((1, tb * I)),                                  # b2_t
            ],
            out_specs=pl.BlockSpec((1, N, tb * I), lambda g: (g, 0, 0)),
        ),
        compiler_params=pltpu.CompilerParams(
            dimension_semantics=("parallel",),
            vmem_limit_bytes=32 * 1024 * 1024),
    )(xf, w1c_bd, b1c_t, a1s, bc1_t, att2, wc2_bd, bc2_t, w2_bd, b2_t)

    # Wrapper-side layout plumbing: (G, N, tb*I) -> (B, I, N), matching the
    # PyTorch module's final permute(0, 2, 1).
    out = out.reshape(G, N, tb, I)
    out = jnp.transpose(out, (0, 2, 3, 1))       # (G, tb, I, N)
    out = out.reshape(Bp, I, N)[:B]
    return out


def init_params(key, num_nodes, latent_size, hidden_size, input_size):
    """Deterministic synthetic parameter init mirroring the PyTorch shapes.

    Linear weights are stored (in, out) so the kernel computes x @ W + b,
    numerically equivalent to PyTorch's x @ W.T + b for an equivalent
    parameterization.
    """
    ks = jax.random.split(key, 10)
    u = lambda k, shape, s: jax.random.uniform(
        k, shape, jnp.float32, minval=-s, maxval=s)

    # mlp1: Linear(latent, hidden)
    s1 = 1.0 / math.sqrt(latent_size)
    w1 = u(ks[0], (latent_size, hidden_size), s1)
    b1 = u(ks[1], (1, hidden_size), s1)

    # conv1 / conv2: GraphConvolution(hidden, hidden, node_n=num_nodes),
    # init scale 1/sqrt(out_features)
    sg = 1.0 / math.sqrt(hidden_size)
    att1 = u(ks[2], (num_nodes, num_nodes), sg)
    wc1 = u(ks[3], (hidden_size, hidden_size), sg)
    bc1 = u(ks[4], (1, hidden_size), sg)
    att2 = u(ks[5], (num_nodes, num_nodes), sg)
    wc2 = u(ks[6], (hidden_size, hidden_size), sg)
    bc2 = u(ks[7], (1, hidden_size), sg)

    # mlp2: Linear(hidden, input_size)
    s2 = 1.0 / math.sqrt(hidden_size)
    w2 = u(ks[8], (hidden_size, input_size), s2)
    b2 = u(ks[9], (1, input_size), s2)

    return (w1, b1, att1, wc1, bc1, att2, wc2, bc2, w2, b2)


def reference(x, params):
    """Pure-JAX reference of the PyTorch forward for correctness check."""
    w1, b1, att1, wc1, bc1, att2, wc2, bc2, w2, b2 = params
    N = att1.shape[0]
    h = jnp.repeat(x[:, None, :], N, axis=1)          # (B, N, L)
    h = h @ w1 + b1                                   # mlp1
    h = att1 @ (h @ wc1) + bc1                        # conv1
    h = jnp.maximum(h, 0.0)
    h = att2 @ (h @ wc2) + bc2                        # conv2
    h = jnp.maximum(h, 0.0)
    h = h @ w2 + b2                                   # mlp2
    return jnp.transpose(h, (0, 2, 1))                # (B, I, N)


if __name__ == "__main__":
    # Small but grid-friendly demo: B=64, tb=32 -> grid G=2 (keeps both v7x
    # TensorCores busy); tb*I = 384 and tb*H = 1024 are lane-dense.
    B = 64
    num_nodes = 16
    latent_size = 8
    hidden_size = 32
    input_size = 12

    key = jax.random.PRNGKey(0)
    kx, kp = jax.random.split(key)
    x = jax.random.normal(kx, (B, latent_size), jnp.float32)
    params = init_params(kp, num_nodes, latent_size, hidden_size, input_size)

    out = graph_decoder(x, params, tb=32)
    out = jax.block_until_ready(out)

    ref = reference(x, params)
    assert out.shape == (B, input_size, num_nodes), out.shape
    assert jnp.allclose(out, ref, atol=1e-4, rtol=1e-4), float(
        jnp.max(jnp.abs(out - ref)))

    print("KERNEL_OK")
</pallas_src>

<mosaic_0001>
module attributes {stable_mosaic.version = 11 : i64} {
  func.func @_graph_decoder_kernel(%arg0: i32, %arg1: memref<1x1x256xf32, #tpu.memory_space<vmem>>, %arg2: memref<256x1024xf32, #tpu.memory_space<vmem>>, %arg3: memref<1x1024xf32, #tpu.memory_space<vmem>>, %arg4: memref<16x1xf32, #tpu.memory_space<vmem>>, %arg5: memref<1x1024xf32, #tpu.memory_space<vmem>>, %arg6: memref<16x16xf32, #tpu.memory_space<vmem>>, %arg7: memref<1024x1024xf32, #tpu.memory_space<vmem>>, %arg8: memref<1x1024xf32, #tpu.memory_space<vmem>>, %arg9: memref<1024x384xf32, #tpu.memory_space<vmem>>, %arg10: memref<1x384xf32, #tpu.memory_space<vmem>>, %arg11: memref<1x16x384xf32, #tpu.memory_space<vmem>>) attributes {dimension_semantics = [#tpu.dimension_semantics<parallel>], iteration_bounds = array<i64: 2>, scalar_prefetch = 0 : i64, scratch_operands = 0 : i64, tpu.core_type = #tpu.core_type<tc>, window_params = [{transform_indices = @transform_0, window_bounds = array<i64: 1, 1, 256>}, {pipeline_mode = #tpu.pipeline_mode<synchronous>, transform_indices = @transform_1, window_bounds = array<i64: 256, 1024>}, {pipeline_mode = #tpu.pipeline_mode<synchronous>, transform_indices = @transform_2, window_bounds = array<i64: 1, 1024>}, {pipeline_mode = #tpu.pipeline_mode<synchronous>, transform_indices = @transform_3, window_bounds = array<i64: 16, 1>}, {pipeline_mode = #tpu.pipeline_mode<synchronous>, transform_indices = @transform_4, window_bounds = array<i64: 1, 1024>}, {pipeline_mode = #tpu.pipeline_mode<synchronous>, transform_indices = @transform_5, window_bounds = array<i64: 16, 16>}, {pipeline_mode = #tpu.pipeline_mode<synchronous>, transform_indices = @transform_6, window_bounds = array<i64: 1024, 1024>}, {pipeline_mode = #tpu.pipeline_mode<synchronous>, transform_indices = @transform_7, window_bounds = array<i64: 1, 1024>}, {pipeline_mode = #tpu.pipeline_mode<synchronous>, transform_indices = @transform_8, window_bounds = array<i64: 1024, 384>}, {pipeline_mode = #tpu.pipeline_mode<synchronous>, transform_indices = @transform_9, window_bounds = array<i64: 1, 384>}, {transform_indices = @transform_10, window_bounds = array<i64: 1, 16, 384>}]} {
    %c0 = arith.constant 0 : index
    %c0_0 = arith.constant 0 : index
    %c0_1 = arith.constant 0 : index
    %0 = vector.load %arg1[%c0, %c0_0, %c0_1] : memref<1x1x256xf32, #tpu.memory_space<vmem>>, vector<1x1x256xf32>
    %1 = vector.shape_cast %0 : vector<1x1x256xf32> to vector<1x256xf32>
    %c0_2 = arith.constant 0 : index
    %c0_3 = arith.constant 0 : index
    %2 = vector.load %arg2[%c0_2, %c0_3] : memref<256x1024xf32, #tpu.memory_space<vmem>>, vector<256x1024xf32>
    %cst = arith.constant dense<0.000000e+00> : vector<1x1024xf32>
    %3 = tpu.matmul %1, %2, %cst {dimension_numbers = #tpu.dot_dimension_numbers<[1], [0], [0], [1], [0, 0, 1, 1], [], []>} : vector<1x256xf32>, vector<256x1024xf32>, vector<1x1024xf32> -> vector<1x1024xf32>
    %c0_4 = arith.constant 0 : index
    %c0_5 = arith.constant 0 : index
    %4 = vector.load %arg3[%c0_4, %c0_5] : memref<1x1024xf32, #tpu.memory_space<vmem>>, vector<1x1024xf32>
    %5 = arith.addf %3, %4 : vector<1x1024xf32>
    %c0_6 = arith.constant 0 : index
    %c0_7 = arith.constant 0 : index
    %6 = vector.load %arg4[%c0_6, %c0_7] : memref<16x1xf32, #tpu.memory_space<vmem>>, vector<16x1xf32>
    %7 = vector.broadcast %6 : vector<16x1xf32> to vector<16x1024xf32>
    %8 = vector.broadcast %5 : vector<1x1024xf32> to vector<16x1024xf32>
    %9 = arith.mulf %7, %8 : vector<16x1024xf32>
    %c0_8 = arith.constant 0 : index
    %c0_9 = arith.constant 0 : index
    %10 = vector.load %arg5[%c0_8, %c0_9] : memref<1x1024xf32, #tpu.memory_space<vmem>>, vector<1x1024xf32>
    %11 = vector.broadcast %10 : vector<1x1024xf32> to vector<16x1024xf32>
    %12 = arith.addf %9, %11 : vector<16x1024xf32>
    %cst_10 = arith.constant 0.000000e+00 : f32
    %13 = vector.broadcast %cst_10 : f32 to vector<16x1024xf32>
    %14 = arith.maximumf %12, %13 : vector<16x1024xf32>
    %c0_11 = arith.constant 0 : index
    %c0_12 = arith.constant 0 : index
    %15 = vector.load %arg7[%c0_11, %c0_12] : memref<1024x1024xf32, #tpu.memory_space<vmem>>, vector<1024x1024xf32>
    %cst_13 = arith.constant dense<0.000000e+00> : vector<16x1024xf32>
    %16 = tpu.matmul %14, %15, %cst_13 {dimension_numbers = #tpu.dot_dimension_numbers<[1], [0], [0], [1], [0, 0, 1, 1], [], []>} : vector<16x1024xf32>, vector<1024x1024xf32>, vector<16x1024xf32> -> vector<16x1024xf32>
    %c0_14 = arith.constant 0 : index
    %c0_15 = arith.constant 0 : index
    %17 = vector.load %arg6[%c0_14, %c0_15] : memref<16x16xf32, #tpu.memory_space<vmem>>, vector<16x16xf32>
    %cst_16 = arith.constant dense<0.000000e+00> : vector<16x1024xf32>
    %18 = tpu.matmul %17, %16, %cst_16 {dimension_numbers = #tpu.dot_dimension_numbers<[1], [0], [0], [1], [0, 0, 1, 1], [], []>} : vector<16x16xf32>, vector<16x1024xf32>, vector<16x1024xf32> -> vector<16x1024xf32>
    %c0_17 = arith.constant 0 : index
    %c0_18 = arith.constant 0 : index
    %19 = vector.load %arg8[%c0_17, %c0_18] : memref<1x1024xf32, #tpu.memory_space<vmem>>, vector<1x1024xf32>
    %20 = vector.broadcast %19 : vector<1x1024xf32> to vector<16x1024xf32>
    %21 = arith.addf %18, %20 : vector<16x1024xf32>
    %cst_19 = arith.constant 0.000000e+00 : f32
    %22 = vector.broadcast %cst_19 : f32 to vector<16x1024xf32>
    %23 = arith.maximumf %21, %22 : vector<16x1024xf32>
    %c0_20 = arith.constant 0 : index
    %c0_21 = arith.constant 0 : index
    %24 = vector.load %arg9[%c0_20, %c0_21] : memref<1024x384xf32, #tpu.memory_space<vmem>>, vector<1024x384xf32>
    %cst_22 = arith.constant dense<0.000000e+00> : vector<16x384xf32>
    %25 = tpu.matmul %23, %24, %cst_22 {dimension_numbers = #tpu.dot_dimension_numbers<[1], [0], [0], [1], [0, 0, 1, 1], [], []>} : vector<16x1024xf32>, vector<1024x384xf32>, vector<16x384xf32> -> vector<16x384xf32>
    %c0_23 = arith.constant 0 : index
    %c0_24 = arith.constant 0 : index
    %26 = vector.load %arg10[%c0_23, %c0_24] : memref<1x384xf32, #tpu.memory_space<vmem>>, vector<1x384xf32>
    %27 = vector.broadcast %26 : vector<1x384xf32> to vector<16x384xf32>
    %28 = arith.addf %25, %27 : vector<16x384xf32>
    %c0_25 = arith.constant 0 : index
    %c0_26 = arith.constant 0 : index
    %c0_27 = arith.constant 0 : index
    %29 = vector.load %arg11[%c0_25, %c0_26, %c0_27] : memref<1x16x384xf32, #tpu.memory_space<vmem>>, vector<1x16x384xf32>
    %30 = vector.shape_cast %29 : vector<1x16x384xf32> to vector<16x384xf32>
    %31 = vector.shape_cast %28 : vector<16x384xf32> to vector<1x16x384xf32>
    tpu.vector_store %arg11[%c0_25, %c0_26, %c0_27], %31 {strides = array<i32>} : memref<1x16x384xf32, #tpu.memory_space<vmem>>, vector<1x16x384xf32>,
    return
  }
  func.func @transform_0(%arg0: i32) -> (i32, i32, i32) {
    %c0_i32 = arith.constant 0 : i32
    %c0_i32_0 = arith.constant 0 : i32
    %c0_i32_1 = arith.constant 0 : i32
    return %arg0, %c0_i32, %c0_i32_0 : i32, i32, i32
  }
  func.func @transform_1(%arg0: i32) -> (i32, i32) {
    %c0_i32 = arith.constant 0 : i32
    %c0_i32_0 = arith.constant 0 : i32
    %c0_i32_1 = arith.constant 0 : i32
    return %c0_i32, %c0_i32_0 : i32, i32
  }
  func.func @transform_2(%arg0: i32) -> (i32, i32) {
    %c0_i32 = arith.constant 0 : i32
    %c0_i32_0 = arith.constant 0 : i32
    %c0_i32_1 = arith.constant 0 : i32
    return %c0_i32, %c0_i32_0 : i32, i32
  }
  func.func @transform_3(%arg0: i32) -> (i32, i32) {
    %c0_i32 = arith.constant 0 : i32
    %c0_i32_0 = arith.constant 0 : i32
    %c0_i32_1 = arith.constant 0 : i32
    return %c0_i32, %c0_i32_0 : i32, i32
  }
  func.func @transform_4(%arg0: i32) -> (i32, i32) {
    %c0_i32 = arith.constant 0 : i32
    %c0_i32_0 = arith.constant 0 : i32
    %c0_i32_1 = arith.constant 0 : i32
    return %c0_i32, %c0_i32_0 : i32, i32
  }
  func.func @transform_5(%arg0: i32) -> (i32, i32) {
    %c0_i32 = arith.constant 0 : i32
    %c0_i32_0 = arith.constant 0 : i32
    %c0_i32_1 = arith.constant 0 : i32
    return %c0_i32, %c0_i32_0 : i32, i32
  }
  func.func @transform_6(%arg0: i32) -> (i32, i32) {
    %c0_i32 = arith.constant 0 : i32
    %c0_i32_0 = arith.constant 0 : i32
    %c0_i32_1 = arith.constant 0 : i32
    return %c0_i32, %c0_i32_0 : i32, i32
  }
  func.func @transform_7(%arg0: i32) -> (i32, i32) {
    %c0_i32 = arith.constant 0 : i32
    %c0_i32_0 = arith.constant 0 : i32
    %c0_i32_1 = arith.constant 0 : i32
    return %c0_i32, %c0_i32_0 : i32, i32
  }
  func.func @transform_8(%arg0: i32) -> (i32, i32) {
    %c0_i32 = arith.constant 0 : i32
    %c0_i32_0 = arith.constant 0 : i32
    %c0_i32_1 = arith.constant 0 : i32
    return %c0_i32, %c0_i32_0 : i32, i32
  }
  func.func @transform_9(%arg0: i32) -> (i32, i32) {
    %c0_i32 = arith.constant 0 : i32
    %c0_i32_0 = arith.constant 0 : i32
    %c0_i32_1 = arith.constant 0 : i32
    return %c0_i32, %c0_i32_0 : i32, i32
  }
  func.func @transform_10(%arg0: i32) -> (i32, i32, i32) {
    %c0_i32 = arith.constant 0 : i32
    %c0_i32_0 = arith.constant 0 : i32
    %c0_i32_1 = arith.constant 0 : i32
    return %arg0, %c0_i32, %c0_i32_0 : i32, i32, i32
  }
}

</mosaic_0001>

<bundles_post_ra>
// kernel: tpu_custom_call.1
= control target key start
LH: loop header
LB: loop body
LE: loop exit
PB: predicated region body
PF: predicated region fallthrough
CT: control target
= control target key end

     0   :  { %s6504_s0 = inlined_call_operand.hbm [shape: f32[2,1,256], index: 0, kind: input, shape index: {}]   ;;  %s6505_s1 = inlined_call_operand.hbm [shape: f32[256,1024], index: 1, kind: input, shape index: {}]   ;;  %s6506_s2 = inlined_call_operand.hbm [shape: f32[1,1024], index: 2, kind: input, shape index: {}]   ;;  %s6507_s3 = inlined_call_operand.vmem [shape: f32[16,1], index: 3, kind: input, shape index: {}]   ;;  %s6508_s4 = inlined_call_operand.hbm [shape: f32[1,1024], index: 4, kind: input, shape index: {}]   ;;  %s6509_s5 = inlined_call_operand.hbm [shape: f32[16,16], index: 5, kind: input, shape index: {}]   ;;  %s6510_s6 = inlined_call_operand.hbm [shape: f32[1024,1024], index: 6, kind: input, shape index: {}]   ;;  %s6511_s7 = inlined_call_operand.hbm [shape: f32[1,1024], index: 7, kind: input, shape index: {}]   ;;  %s6512_s8 = inlined_call_operand.hbm [shape: f32[1024,384], index: 8, kind: input, shape index: {}]   ;;  %s6513_s9 = inlined_call_operand.hbm [shape: f32[1,384], index: 9, kind: input, shape index: {}]   ;;  %s6514_s10 = inlined_call_operand.hbm [shape: f32[2,16,384], index: 10, kind: output, shape index: {}]  }
   0x1   :  { %6519 = sst [smem:[#allocation61_spill]] %s6505_s1 }
   0x2   :  { %6520 = sst [smem:[#allocation62_spill]] %s6506_s2 }
   0x3   :  { %6521 = sst [smem:[#allocation63_spill]] %s6508_s4 }
   0x4   :  { %6522 = sst [smem:[#allocation64_spill]] %s6509_s5 }
   0x5   :  { %6523 = sst [smem:[#allocation65_spill]] %s6510_s6 }
   0x6   :  { %15 = vsyncpa [#allocation3], 0 }
   0x7   :  { %17 = vsyncpa [#allocation3 + $0x1], 0 }
   0x8   :  { %18 = vsyncpa [#allocation6], 0 }
   0x9   :  { %19 = vsyncpa [#allocation9], 0 }
   0xa   :  { %20 = vsyncpa [#allocation12], 0 }
   0xb   :  { %21 = vsyncpa [#allocation15], 0 }
   0xc   :  { %22 = vsyncpa [#allocation4], 0 }
   0xd   :  { %24 = vsyncpa [#allocation4 + $0x1], 0  ;;  %s5633_s13 = smov 0   ;;  %s5635_s14 = smov 0  }
   0xe   :  { %s5637_s15 = smov 0   ;;  %s5639_s16 = smov 0  }
   0xf LB: > { %s6524_s1 = sld [smem:[#allocation61_spill]]  ;;  %s5657_s20 = sadd.s32 4294967295, %s5559_s16   ;;  %s5559_s16 = sphi %s5639_s16, %s6614_s16   ;;  %s5555_s15 = sphi %s5637_s15, %s6613_s15   ;;  %s5551_s14 = sphi %s5635_s14, %s6612_s14   ;;  %s5547_s13 = sphi %s5633_s13, %s6611_s13  }
  0x10   : > { %p5026_p0 = scmp.ge.s32.totalorder %s5559_s16, 1  ;;  %p51_p1 = scmp.eq.s32.totalorder %s5657_s20, 0 }
  0x11   : > { %p276_p2 = scmp.lt.s32.totalorder %s5559_s16, 3  ;;  %s5561_s22 = smov [#allocation5]  }
  0x12   : > { %s289_s23 = sshll.u32 %s5561_s22, 4  ;;  %s6526_s4 = sld [smem:[#allocation63_spill]]  ;;  %s290_s23 = int_to_ptr.vmem [resolvable:$true] %s289_s23 }
  0x13   : > { %p5662_p3 = pnand %p5026_p0, %p276_p2  ;;  %s6528_s6 = sld [smem:[#allocation65_spill]] }
  0x14   : > { %s5562_s11 = smov [#allocation8]   ;;  %s5563_s17 = smov 1024  }
  0x15   : > { %s287_s19 = sshll.u32 %s6524_s1, 4  ;;  %p5105_p4 = pneg %p5662_p3  ;;  %s288_s19 = int_to_ptr.hbm [resolvable:$true] %s287_s19 }
  0x16   : > { %s319_s12 = sshll.u32 %s5562_s11, 4  ;;  %s5564_s18 = smov 64   ;;  %s320_s12 = int_to_ptr.vmem [resolvable:$true] %s319_s12 }
  0x17   : > { %p5674_p6 = pnand %p5105_p4, %p51_p1  ;;  %s368_s25 = sshll.u32 %s6512_s8, 4  ;;  %s369_s25 = int_to_ptr.hbm [resolvable:$true] %s368_s25 }
  0x18   : > { %s317_s26 = sshll.u32 %s6526_s4, 4  ;;  %s5565_s1 = smov [#allocation11]   ;;  %s318_s26 = int_to_ptr.hbm [resolvable:$true] %s317_s26 }
  0x19   : > { %s342_s30 = sshll.u32 %s6528_s6, 4  ;;  %s344_s4 = sshll.u32 %s5565_s1, 4  ;;  %s343_s30 = int_to_ptr.hbm [resolvable:$true] %s342_s30  ;;  %s345_s4 = int_to_ptr.vmem [resolvable:$true] %s344_s4 }
  0x1a   : > { %5108 = dma.hbm_to_vmem [thread:$0]  (!%p5674_p6), %s288_s19, 32768, %s290_s23, [#allocation6], %s5563_s17, %s5563_s17, %s5564_s18  }
  0x1b   : > { %5114 = dma.hbm_to_vmem [thread:$0]  (!%p5674_p6), %s318_s26, 128, %s320_s12, [#allocation9]  }
  0x1c   : > { %5120 = dma.hbm_to_vmem [thread:$0]  (!%p5674_p6), %s343_s30, 131072, %s345_s4, [#allocation12], %s5563_s17, %s5563_s17, %s5564_s18  }
  0x1d   : > { %s5566_s28 = smov [#allocation14]   ;;  %s5567_s11 = smov 384  }
  0x1e   : > { %s370_s29 = sshll.u32 %s5566_s28, 4  ;;  %s5568_s19 = smov 24   ;;  %s371_s29 = int_to_ptr.vmem [resolvable:$true] %s370_s29 }
  0x1f   : > { %5126 = dma.hbm_to_vmem [thread:$0]  (!%p5674_p6), %s369_s25, 49152, %s371_s29, [#allocation15], %s5567_s11, %s5567_s11, %s5568_s19  }
  0x20   : > { %s6529_s2 = sld [smem:[#allocation62_spill]]  ;;  %s5569_s22 = smov [#allocation7]  }
  0x21   : > { %s304_s1 = sshll.u32 %s5569_s22, 4  ;;  %s6530_s5 = sld [smem:[#allocation64_spill]]  ;;  %s305_s1 = int_to_ptr.vmem [resolvable:$true] %s304_s1 }
  0x22   : > { %s5570_s30 = smov [#allocation10]   ;;  %s5571_s18 = smov 128  }
  0x23   : > { %s330_s17 = sshll.u32 %s5570_s30, 4  ;;  %s5572_s25 = smov 8   ;;  %s331_s17 = int_to_ptr.vmem [resolvable:$true] %s330_s17 }
  0x24   : > { %s357_s6 = sshll.u32 %s6511_s7, 4  ;;  %s5573_s11 = smov [#allocation13]   ;;  %s358_s6 = int_to_ptr.hbm [resolvable:$true] %s357_s6 }
  0x25   : > { %s359_s19 = sshll.u32 %s5573_s11, 4  ;;  %s5574_s22 = smov [#allocation16]   ;;  %s360_s19 = int_to_ptr.vmem [resolvable:$true] %s359_s19 }
  0x26   : > { %s302_s12 = sshll.u32 %s6529_s2, 4  ;;  %s5025_s24 = sadd.s32 4294967294, %s5559_s16   ;;  %s303_s12 = int_to_ptr.hbm [resolvable:$true] %s302_s12 }
  0x27   : > { %s328_s4 = sshll.u32 %s6530_s5, 4  ;;  %p44_p8 = scmp.ne.s32.totalorder %s5555_s15, %s5551_s14  ;;  %s329_s4 = int_to_ptr.hbm [resolvable:$true] %s328_s4 }
  0x28   : > { %5111 = dma.hbm_to_vmem [thread:$0]  (!%p5674_p6), %s303_s12, 128, %s305_s1, [#allocation6]  }
  0x29   : > { %5117 = dma.hbm_to_vmem [thread:$0]  (!%p5674_p6), %s329_s4, 256, %s331_s17, [#allocation9], %s5571_s18, %s5571_s18, %s5572_s25  }
  0x2a   : > { %s383_s12 = sshll.u32 %s6513_s9, 4  ;;  %s385_s1 = sshll.u32 %s5574_s22, 4  ;;  %s384_s12 = int_to_ptr.hbm [resolvable:$true] %s383_s12  ;;  %s386_s1 = int_to_ptr.vmem [resolvable:$true] %s385_s1 }
  0x2b   : > { %5123 = dma.hbm_to_vmem [thread:$0]  (!%p5674_p6), %s358_s6, 128, %s360_s19, [#allocation12]  }
  0x2c   : > { %5129 = dma.hbm_to_vmem [thread:$0]  (!%p5674_p6), %s384_s12, 48, %s386_s1, [#allocation15]  }
  0x2d   : > { %s5714_s4 = sadd.s32 1, %s5559_s16   ;;  %s37_s17 = sadd.s32 1, %s5555_s15 }
  0x2e   : > { %s34_s30 = ssub.s32 %s5559_s16, %s5714_s4  ;;  %p45_p9 = scmp.eq.s32.totalorder %s5559_s16, 0 }
  0x2f   : > { %p35_p7 = scmp.eq.s32.totalorder %s34_s30, 0  ;;  %p50_p10 = scmp.ne.s32.totalorder %s5551_s14, %s5547_s13 }
  0x30   : > { %p5727_p11 = por %p45_p9, %p44_p8  ;;  %p263_p13 = scmp.eq.s32.totalorder %s5657_s20, 1 }
  0x31   : > { %s5725_s18 = scalar_select %p35_p7, %s5555_s15, %s37_s17  }
  0x32   : > { %p5733_p12 = por %p51_p1, %p50_p10  ;;  %p269_p0 = scmp.eq.s32.totalorder %s5025_s24, 1 }
  0x33   : > { %p5146_p2 = scmp.lt.s32.totalorder %s5559_s16, 2  ;;  %s396_s28 = sand.u32 1, %s5555_s15  }
  0x34   : > { %p5740_p4 = por %p263_p13, %p44_p8  ;;  %p5744_p6 = por %p269_p0, %p50_p10 }
  0x35   : > { %s5036_s11 = sshll.u32 %s396_s28, 1  ;;  %s5037_s19 = sshll.u32 %s5559_s16, 1 }
  0x36   : > { %s404_s12 = scalar_lea.hbm %s6504_s0, %s5037_s19  ;;  %s400_s22 = scalar_lea.vmem [#allocation2], %s5036_s11 }
  0x37   : > { %s408_s1 = sshll.u32 %s400_s22, 4  ;;  %s406_s30 = sshll.u32 %s404_s12, 4  ;;  %s409_s1 = int_to_ptr.vmem [resolvable:$true] %s408_s1  ;;  %s407_s30 = int_to_ptr.hbm [resolvable:$true] %s406_s30 }
  0x38   : > { %p5754_p7 = pnand %p5146_p2, %p5727_p11  ;;  %s397_s17 = scalar_lea.sflag [#allocation3], %s396_s28 }
  0x39   : > { %s5447_s2 = sshra.s32 %s407_s30, 4  ;;  %s5454_s23 = scalar_lea.hbm %s6504_s0, 4  ;;  %s5448_s2 = int_to_ptr.hbm [resolvable:$true] %s5447_s2 }
  0x3a   : > { %s5449_s5 = scalar_lea.hbm %s5448_s2, 2  ;;  %p5451_p9 = pneg %p5754_p7 }
  0x3b   : > { %p5450_p8 = scmp.ne.s32.totalorder %s5448_s2, %s5449_s5  ;;  %p5455_p11 = scmp.lt.s32.totalorder %s5448_s2, %s6504_s0 }
  0x3c   : > { %p5456_p0 = scmp.lt.s32.totalorder %s5454_s23, %s5449_s5 }
  0x3d   : > { %p5452_p10 = pnand %p5451_p9, %p5450_p8 }
  0x3e   : > { %p5457_p2 = por %p5456_p0, %p5455_p11 }
  0x3f   : > { %p5453_p13 = pneg %p5452_p10 }
  0x41   : > { %p5458_p5 = pnand %p5457_p2, %p5453_p13 }
  0x43   : > { %5461 = shalt.err (!%p5458_p5)
}
  0x44   : > { %5133 = dma.hbm_to_vmem [thread:$0]  (!%p5754_p7), %s407_s30, 32, %s409_s1, %s397_s17  }
  0x45   : > { %417 = sbr.rel (%p5662_p3) target bundleno = 1418 (0x58a), region = 60 }
  0x4a   : > { %s5771_s28 = sand.u32 1, %s5551_s14  }
  0x4b   : > { %s5039_s12 = sshll.u32 %s5771_s28, 1  ;;  %s420_s22 = scalar_lea.sflag [#allocation3], %s5771_s28 }
  0x4c   : > { %s5775_s11 = scalar_lea.vmem [#allocation2], %s5039_s12 }
  0x4d   : > { %5522 = dma.done.wait (%p5733_p12), %s420_s22, 32  }
  0x4e   : > { %5524 = vsyncadd (%p5733_p12), %s420_s22, 4294967264 }
  0x4f   : > { %5526 = dma.done.wait (%p51_p1), [#allocation6], 32896  }
  0x50   : > { %5528 = vsyncadd (%p51_p1), [#allocation6], 4294934400 }
  0x51   : > { %5530 = dma.done.wait (%p51_p1), [#allocation9], 384  }
  0x52   : > { %5532 = vsyncadd (%p51_p1), [#allocation9], 4294966912 }
  0x53   : > { %5534 = dma.done.wait (%p51_p1), [#allocation12], 131200  }
  0x54   : > { %5536 = vsyncadd (%p51_p1), [#allocation12], 4294836096 }
  0x55   : > { %5538 = dma.done.wait (%p51_p1), [#allocation15], 49200  }
  0x56   : > { %5540 = vsyncadd (%p51_p1), [#allocation15], 4294918096  ;;  %v622_v0 = vld [vmem:[#allocation5 + $0x3c0] sm:$0xff]  ;;  %v623_v1 = vld [vmem:[#allocation5 + $0x3c8] sm:$0xff]  ;;  %vm3703_vm0 = vcmask 130048   ;;  %s5067_s1 = smul.u32 48, %s5771_s28 }
  0x57   : > { %v614_v2 = vld [vmem:[#allocation5 + $0x380] sm:$0xff]  ;;  %781 = vmatpush.msra.mxu0 %v622_v0  ;;  %821 = vmatpush.msra.mxu2 %v623_v1  ;;  %v615_v4 = vld [vmem:[#allocation5 + $0x388] sm:$0xff]  ;;  %v624_v62 = vld [vmem:[#allocation5 + $0x3d0] sm:$0xff]  ;;  %s5068_s24 = smul.u32 48, %s5657_s20  ;;  %s4861_s20 = scalar_lea.sflag [#allocation4], %s5771_s28 }
  0x58   : > { %v750_v3 = vld [vmem:[#allocation5 + $0x7c0] sm:$0xff]  ;;  %v751_v5 = vld [vmem:[#allocation5 + $0x7c8] sm:$0xff]  ;;  %v625_v63 = vld [vmem:[#allocation5 + $0x3d8] sm:$0xff]  ;;  %s6460_s30 = scalar_lea.vmem [#allocation17], %s5067_s1  ;;  %s5497_s5 = scalar_lea.hbm %s6514_s10, 96 }
  0x59   : > { %801 = vmatpush.msra.mxu1 %v750_v3  ;;  %841 = vmatpush.msra.mxu3 %v751_v5  ;;  %v606_v6 = vld [vmem:[#allocation5 + $0x340] sm:$0xff]  ;;  %v607_v8 = vld [vmem:[#allocation5 + $0x348] sm:$0xff]  ;;  %v752_v3 = vld [vmem:[#allocation5 + $0x7d0] sm:$0xff]  ;;  %s4872_s23 = scalar_lea.hbm %s6514_s10, %s5068_s24  ;;  %s4873_s26 = sshll.u32 %s6460_s30, 4  ;;  %s4874_s26 = int_to_ptr.vmem [resolvable:$true] %s4873_s26 }
  0x5a   : > { %v742_v7 = vld [vmem:[#allocation5 + $0x780] sm:$0xff]  ;;  %782 = vmatpush.msra.mxu0 %v614_v2  ;;  %822 = vmatpush.msra.mxu2 %v615_v4  ;;  %v743_v9 = vld [vmem:[#allocation5 + $0x788] sm:$0xff]  ;;  %v616_v2 = vld [vmem:[#allocation5 + $0x390] sm:$0xff]  ;;  %s4875_s25 = sshll.u32 %s4872_s23, 4  ;;  %s4876_s25 = int_to_ptr.hbm [resolvable:$true] %s4875_s25 }
  0x5b   : > { %v734_v10 = vld [vmem:[#allocation5 + $0x740] sm:$0xff]  ;;  %802 = vmatpush.msra.mxu1 %v742_v7  ;;  %842 = vmatpush.msra.mxu3 %v743_v9  ;;  %v599_v12 = vld [vmem:[#allocation5 + $0x308] sm:$0xff]  ;;  %v617_v4 = vld [vmem:[#allocation5 + $0x398] sm:$0xff]  ;;  %s5491_s12 = sshra.s32 %s4876_s25, 4  ;;  %s5492_s12 = int_to_ptr.hbm [resolvable:$true] %s5491_s12 }
  0x5c   : > { %v598_v11 = vld [vmem:[#allocation5 + $0x300] sm:$0xff]  ;;  %v735_v13 = vld [vmem:[#allocation5 + $0x748] sm:$0xff]  ;;  %783 = vmatpush.msra.mxu0 %v606_v6  ;;  %823 = vmatpush.msra.mxu2 %v607_v8  ;;  %v753_v5 = vld [vmem:[#allocation5 + $0x7d8] sm:$0xff]  ;;  %s5493_s22 = scalar_lea.hbm %s5492_s12, 48  ;;  %p5498_p12 = scmp.lt.s32.totalorder %s5492_s12, %s6514_s10 }
  0x5d   : > { %v726_v14 = vld [vmem:[#allocation5 + $0x700] sm:$0xff]  ;;  %v727_v15 = vld [vmem:[#allocation5 + $0x708] sm:$0xff]  ;;  %803 = vmatpush.msra.mxu1 %v734_v10  ;;  %843 = vmatpush.msra.mxu3 %v735_v13  ;;  %v608_v6 = vld [vmem:[#allocation5 + $0x350] sm:$0xff]  ;;  %p5494_p1 = scmp.ne.s32.totalorder %s5492_s12, %s5493_s22  ;;  %p5499_p7 = scmp.lt.s32.totalorder %s5497_s5, %s5493_s22 }
  0x5e   : > { %v590_v16 = vld [vmem:[#allocation5 + $0x2c0] sm:$0xff]  ;;  %v591_v17 = vld [vmem:[#allocation5 + $0x2c8] sm:$0xff]  ;;  %784 = vmatpush.msra.mxu0 %v598_v11  ;;  %824 = vmatpush.msra.mxu2 %v599_v12  ;;  %v744_v7 = vld [vmem:[#allocation5 + $0x790] sm:$0xff] }
  0x5f   : > { %v718_v18 = vld [vmem:[#allocation5 + $0x6c0] sm:$0xff]  ;;  %v719_v19 = vld [vmem:[#allocation5 + $0x6c8] sm:$0xff]  ;;  %804 = vmatpush.msra.mxu1 %v726_v14  ;;  %844 = vmatpush.msra.mxu3 %v727_v15  ;;  %v609_v8 = vld [vmem:[#allocation5 + $0x358] sm:$0xff]  ;;  %p5495_p3 = pnand %p5494_p1, %p5740_p4  ;;  %p5500_p8 = por %p5499_p7, %p5498_p12 }
  0x60   : > { %v582_v20 = vld [vmem:[#allocation5 + $0x280] sm:$0xff]  ;;  %v583_v21 = vld [vmem:[#allocation5 + $0x288] sm:$0xff]  ;;  %785 = vmatpush.msra.mxu0 %v590_v16  ;;  %825 = vmatpush.msra.mxu2 %v591_v17  ;;  %v745_v9 = vld [vmem:[#allocation5 + $0x798] sm:$0xff] }
  0x61   : > { %v710_v22 = vld [vmem:[#allocation5 + $0x680] sm:$0xff]  ;;  %v711_v23 = vld [vmem:[#allocation5 + $0x688] sm:$0xff]  ;;  %805 = vmatpush.msra.mxu1 %v718_v18  ;;  %845 = vmatpush.msra.mxu3 %v719_v19  ;;  %v600_v10 = vld [vmem:[#allocation5 + $0x310] sm:$0xff]  ;;  %p5496_p5 = pneg %p5495_p3 }
  0x62   : > { %v574_v24 = vld [vmem:[#allocation5 + $0x240] sm:$0xff]  ;;  %v575_v25 = vld [vmem:[#allocation5 + $0x248] sm:$0xff]  ;;  %786 = vmatpush.msra.mxu0 %v582_v20  ;;  %826 = vmatpush.msra.mxu2 %v583_v21  ;;  %v736_v11 = vld [vmem:[#allocation5 + $0x750] sm:$0xff] }
  0x63   : > { %v702_v26 = vld [vmem:[#allocation5 + $0x640] sm:$0xff]  ;;  %v703_v27 = vld [vmem:[#allocation5 + $0x648] sm:$0xff]  ;;  %806 = vmatpush.msra.mxu1 %v710_v22  ;;  %846 = vmatpush.msra.mxu3 %v711_v23  ;;  %v601_v12 = vld [vmem:[#allocation5 + $0x318] sm:$0xff]  ;;  %p5501_p9 = pnand %p5500_p8, %p5496_p5 }
  0x64   : > { %v566_v28 = vld [vmem:[#allocation5 + $0x200] sm:$0xff]  ;;  %v567_v29 = vld [vmem:[#allocation5 + $0x208] sm:$0xff]  ;;  %787 = vmatpush.msra.mxu0 %v574_v24  ;;  %827 = vmatpush.msra.mxu2 %v575_v25  ;;  %v737_v13 = vld [vmem:[#allocation5 + $0x758] sm:$0xff] }
  0x65   : > { %v694_v30 = vld [vmem:[#allocation5 + $0x600] sm:$0xff]  ;;  %v695_v31 = vld [vmem:[#allocation5 + $0x608] sm:$0xff]  ;;  %807 = vmatpush.msra.mxu1 %v702_v26  ;;  %847 = vmatpush.msra.mxu3 %v703_v27  ;;  %v592_v14 = vld [vmem:[#allocation5 + $0x2d0] sm:$0xff] }
  0x66   : > { %v558_v32 = vld [vmem:[#allocation5 + $0x1c0] sm:$0xff]  ;;  %v559_v33 = vld [vmem:[#allocation5 + $0x1c8] sm:$0xff]  ;;  %788 = vmatpush.msra.mxu0 %v566_v28  ;;  %828 = vmatpush.msra.mxu2 %v567_v29  ;;  %v728_v15 = vld [vmem:[#allocation5 + $0x710] sm:$0xff] }
  0x67   : > { %v686_v34 = vld [vmem:[#allocation5 + $0x5c0] sm:$0xff]  ;;  %v687_v35 = vld [vmem:[#allocation5 + $0x5c8] sm:$0xff]  ;;  %808 = vmatpush.msra.mxu1 %v694_v30  ;;  %848 = vmatpush.msra.mxu3 %v695_v31  ;;  %v593_v16 = vld [vmem:[#allocation5 + $0x2d8] sm:$0xff] }
  0x68   : > { %v550_v36 = vld [vmem:[#allocation5 + $0x180] sm:$0xff]  ;;  %v551_v37 = vld [vmem:[#allocation5 + $0x188] sm:$0xff]  ;;  %789 = vmatpush.msra.mxu0 %v558_v32  ;;  %829 = vmatpush.msra.mxu2 %v559_v33  ;;  %v729_v17 = vld [vmem:[#allocation5 + $0x718] sm:$0xff] }
  0x69   : > { %v678_v38 = vld [vmem:[#allocation5 + $0x580] sm:$0xff]  ;;  %v679_v39 = vld [vmem:[#allocation5 + $0x588] sm:$0xff]  ;;  %809 = vmatpush.msra.mxu1 %v686_v34  ;;  %849 = vmatpush.msra.mxu3 %v687_v35  ;;  %v584_v18 = vld [vmem:[#allocation5 + $0x290] sm:$0xff] }
  0x6a   : > { %v542_v40 = vld [vmem:[#allocation5 + $0x140] sm:$0xff]  ;;  %v543_v41 = vld [vmem:[#allocation5 + $0x148] sm:$0xff]  ;;  %790 = vmatpush.msra.mxu0 %v550_v36  ;;  %830 = vmatpush.msra.mxu2 %v551_v37  ;;  %v720_v19 = vld [vmem:[#allocation5 + $0x6d0] sm:$0xff] }
  0x6b   : > { %v670_v42 = vld [vmem:[#allocation5 + $0x540] sm:$0xff]  ;;  %v671_v43 = vld [vmem:[#allocation5 + $0x548] sm:$0xff]  ;;  %810 = vmatpush.msra.mxu1 %v678_v38  ;;  %850 = vmatpush.msra.mxu3 %v679_v39  ;;  %v585_v20 = vld [vmem:[#allocation5 + $0x298] sm:$0xff] }
  0x6c   : > { %v534_v44 = vld [vmem:[#allocation5 + $0x100] sm:$0xff]  ;;  %v535_v45 = vld [vmem:[#allocation5 + $0x108] sm:$0xff]  ;;  %791 = vmatpush.msra.mxu0 %v542_v40  ;;  %831 = vmatpush.msra.mxu2 %v543_v41  ;;  %v721_v21 = vld [vmem:[#allocation5 + $0x6d8] sm:$0xff] }
  0x6d   : > { %v662_v46 = vld [vmem:[#allocation5 + $0x500] sm:$0xff]  ;;  %v663_v47 = vld [vmem:[#allocation5 + $0x508] sm:$0xff]  ;;  %811 = vmatpush.msra.mxu1 %v670_v42  ;;  %851 = vmatpush.msra.mxu3 %v671_v43  ;;  %v576_v22 = vld [vmem:[#allocation5 + $0x250] sm:$0xff] }
  0x6e   : > { %v526_v48 = vld [vmem:[#allocation5 + $0xc0] sm:$0xff]  ;;  %v527_v49 = vld [vmem:[#allocation5 + $0xc8] sm:$0xff]  ;;  %792 = vmatpush.msra.mxu0 %v534_v44  ;;  %832 = vmatpush.msra.mxu2 %v535_v45  ;;  %v712_v23 = vld [vmem:[#allocation5 + $0x690] sm:$0xff] }
  0x6f   : > { %v654_v50 = vld [vmem:[#allocation5 + $0x4c0] sm:$0xff]  ;;  %v655_v51 = vld [vmem:[#allocation5 + $0x4c8] sm:$0xff]  ;;  %812 = vmatpush.msra.mxu1 %v662_v46  ;;  %852 = vmatpush.msra.mxu3 %v663_v47  ;;  %v577_v24 = vld [vmem:[#allocation5 + $0x258] sm:$0xff] }
  0x70   : > { %v518_v52 = vld [vmem:[#allocation5 + $0x80] sm:$0xff]  ;;  %v519_v53 = vld [vmem:[#allocation5 + $0x88] sm:$0xff]  ;;  %793 = vmatpush.msra.mxu0 %v526_v48  ;;  %833 = vmatpush.msra.mxu2 %v527_v49  ;;  %v713_v25 = vld [vmem:[#allocation5 + $0x698] sm:$0xff] }
  0x71   : > { %v646_v54 = vld [vmem:[#allocation5 + $0x480] sm:$0xff]  ;;  %v647_v55 = vld [vmem:[#allocation5 + $0x488] sm:$0xff]  ;;  %813 = vmatpush.msra.mxu1 %v654_v50  ;;  %853 = vmatpush.msra.mxu3 %v655_v51  ;;  %v568_v26 = vld [vmem:[#allocation5 + $0x210] sm:$0xff] }
  0x72   : > { %v510_v56 = vld [vmem:[#allocation5 + $0x40] sm:$0xff]  ;;  %v511_v57 = vld [vmem:[#allocation5 + $0x48] sm:$0xff]  ;;  %794 = vmatpush.msra.mxu0 %v518_v52  ;;  %834 = vmatpush.msra.mxu2 %v519_v53  ;;  %v704_v27 = vld [vmem:[#allocation5 + $0x650] sm:$0xff] }
  0x73   : > { %v638_v58 = vld [vmem:[#allocation5 + $0x440] sm:$0xff]  ;;  %v639_v59 = vld [vmem:[#allocation5 + $0x448] sm:$0xff]  ;;  %814 = vmatpush.msra.mxu1 %v646_v54  ;;  %854 = vmatpush.msra.mxu3 %v647_v55  ;;  %v569_v28 = vld [vmem:[#allocation5 + $0x218] sm:$0xff] }
  0x74   : > { %v502_v60 = vld [vmem:[#allocation5] sm:$0xff]  ;;  %v503_v61 = vld [vmem:[#allocation5 + $0x8] sm:$0xff]  ;;  %795 = vmatpush.msra.mxu0 %v510_v56  ;;  %835 = vmatpush.msra.mxu2 %v511_v57  ;;  %v705_v29 = vld [vmem:[#allocation5 + $0x658] sm:$0xff] }
  0x75   : > { %815 = vmatpush.msra.mxu1 %v638_v58  ;;  %855 = vmatpush.msra.mxu3 %v639_v59  ;;  %v630_v0 = vld [vmem:[#allocation5 + $0x400] sm:$0xff]  ;;  %v631_v1 = vld [vmem:[#allocation5 + $0x408] sm:$0xff]  ;;  %v560_v30 = vld [vmem:[#allocation5 + $0x1d0] sm:$0xff] }
  0x76   : > { %796 = vmatpush.msra.mxu0 %v502_v60  ;;  %836 = vmatpush.msra.mxu2 %v503_v61  ;;  %v696_v31 = vld [vmem:[#allocation5 + $0x610] sm:$0xff]  ;;  %v561_v32 = vld [vmem:[#allocation5 + $0x1d8] sm:$0xff] }
  0x77   : > { %816 = vmatpush.msra.mxu1 %v630_v0  ;;  %856 = vmatpush.msra.mxu3 %v631_v1  ;;  %v697_v33 = vld [vmem:[#allocation5 + $0x618] sm:$0xff]  ;;  %v552_v34 = vld [vmem:[#allocation5 + $0x190] sm:$0xff]  ;;  %v626_v1 = vld [vmem:[#allocation5 + $0x3e0] sm:$0xff] }
  0x78   : > { %861 = vmatpush.msrb.mxu0 %v624_v62  ;;  %901 = vmatpush.msrb.mxu2 %v625_v63  ;;  %v688_v35 = vld [vmem:[#allocation5 + $0x5d0] sm:$0xff]  ;;  %v501_v36 = vld [vmem:[%s5775_s11] sm:$0x3] }
  0x79   : > { %881 = vmatpush.msrb.mxu1 %v752_v3  ;;  %921 = vmatpush.msrb.mxu3 %v753_v5  ;;  %v553_v37 = vld [vmem:[#allocation5 + $0x198] sm:$0xff]  ;;  %v544_v39 = vld [vmem:[#allocation5 + $0x150] sm:$0xff]  ;;  %v5798_v43 = vperm.slane %v501_v36, 0  ;;  %v5800_v48 = vperm.slane %v501_v36, 1  ;;  %v618_v5 = vld [vmem:[#allocation5 + $0x3a0] sm:$0xff] }
  0x7a   : > { %862 = vmatpush.msrb.mxu0 %v616_v2  ;;  %902 = vmatpush.msrb.mxu2 %v617_v4  ;;  %v689_v38 = vld [vmem:[#allocation5 + $0x5d8] sm:$0xff]  ;;  %v680_v40 = vld [vmem:[#allocation5 + $0x590] sm:$0xff]  ;;  %v627_v2 = vld [vmem:[#allocation5 + $0x3e8] sm:$0xff] }
  0x7b   : > { %882 = vmatpush.msrb.mxu1 %v744_v7  ;;  %922 = vmatpush.msrb.mxu3 %v745_v9  ;;  %v545_v41 = vld [vmem:[#allocation5 + $0x158] sm:$0xff]  ;;  %v536_v44 = vld [vmem:[#allocation5 + $0x110] sm:$0xff]  ;;  %v619_v7 = vld [vmem:[#allocation5 + $0x3a8] sm:$0xff] }
  0x7c   : > { %863 = vmatpush.msrb.mxu0 %v608_v6  ;;  %903 = vmatpush.msrb.mxu2 %v609_v8  ;;  %v681_v42 = vld [vmem:[#allocation5 + $0x598] sm:$0xff]  ;;  %v672_v45 = vld [vmem:[#allocation5 + $0x550] sm:$0xff]  ;;  %v754_v6 = vld [vmem:[#allocation5 + $0x7e0] sm:$0xff] }
  0x7d   : > { %883 = vmatpush.msrb.mxu1 %v736_v11  ;;  %923 = vmatpush.msrb.mxu3 %v737_v13  ;;  %v537_v46 = vld [vmem:[#allocation5 + $0x118] sm:$0xff]  ;;  %v528_v49 = vld [vmem:[#allocation5 + $0xd0] sm:$0xff]  ;;  %v755_v8 = vld [vmem:[#allocation5 + $0x7e8] sm:$0xff] }
  0x7e   : > { %864 = vmatpush.msrb.mxu0 %v600_v10  ;;  %904 = vmatpush.msrb.mxu2 %v601_v12  ;;  %v673_v47 = vld [vmem:[#allocation5 + $0x558] sm:$0xff]  ;;  %v664_v50 = vld [vmem:[#allocation5 + $0x510] sm:$0xff]  ;;  %v610_v9 = vld [vmem:[#allocation5 + $0x360] sm:$0xff] }
  0x7f   : > { %884 = vmatpush.msrb.mxu1 %v728_v15  ;;  %924 = vmatpush.msrb.mxu3 %v729_v17  ;;  %v529_v51 = vld [vmem:[#allocation5 + $0xd8] sm:$0xff]  ;;  %v520_v53 = vld [vmem:[#allocation5 + $0x90] sm:$0xff]  ;;  %v746_v10 = vld [vmem:[#allocation5 + $0x7a0] sm:$0xff] }
  0x80   : > { %865 = vmatpush.msrb.mxu0 %v592_v14  ;;  %905 = vmatpush.msrb.mxu2 %v593_v16  ;;  %v665_v52 = vld [vmem:[#allocation5 + $0x518] sm:$0xff]  ;;  %v656_v54 = vld [vmem:[#allocation5 + $0x4d0] sm:$0xff]  ;;  %v611_v11 = vld [vmem:[#allocation5 + $0x368] sm:$0xff] }
  0x81   : > { %885 = vmatpush.msrb.mxu1 %v720_v19  ;;  %925 = vmatpush.msrb.mxu3 %v721_v21  ;;  %v521_v55 = vld [vmem:[#allocation5 + $0x98] sm:$0xff]  ;;  %v512_v57 = vld [vmem:[#allocation5 + $0x50] sm:$0xff]  ;;  %v747_v12 = vld [vmem:[#allocation5 + $0x7a8] sm:$0xff] }
  0x82   : > { %866 = vmatpush.msrb.mxu0 %v584_v18  ;;  %906 = vmatpush.msrb.mxu2 %v585_v20  ;;  %v657_v56 = vld [vmem:[#allocation5 + $0x4d8] sm:$0xff]  ;;  %v648_v58 = vld [vmem:[#allocation5 + $0x490] sm:$0xff]  ;;  %v602_v13 = vld [vmem:[#allocation5 + $0x320] sm:$0xff] }
  0x83   : > { %886 = vmatpush.msrb.mxu1 %v712_v23  ;;  %926 = vmatpush.msrb.mxu3 %v713_v25  ;;  %v513_v59 = vld [vmem:[#allocation5 + $0x58] sm:$0xff]  ;;  %v504_v61 = vld [vmem:[#allocation5 + $0x10] sm:$0xff]  ;;  %v738_v14 = vld [vmem:[#allocation5 + $0x760] sm:$0xff] }
  0x84   : > { %867 = vmatpush.msrb.mxu0 %v576_v22  ;;  %907 = vmatpush.msrb.mxu2 %v577_v24  ;;  %v649_v60 = vld [vmem:[#allocation5 + $0x498] sm:$0xff]  ;;  %v640_v62 = vld [vmem:[#allocation5 + $0x450] sm:$0xff]  ;;  %v603_v15 = vld [vmem:[#allocation5 + $0x328] sm:$0xff] }
  0x85   : > { %887 = vmatpush.msrb.mxu1 %v704_v27  ;;  %927 = vmatpush.msrb.mxu3 %v705_v29  ;;  %v505_v63 = vld [vmem:[#allocation5 + $0x18] sm:$0xff]  ;;  %v632_v3 = vld [vmem:[#allocation5 + $0x410] sm:$0xff]  ;;  %v739_v16 = vld [vmem:[#allocation5 + $0x768] sm:$0xff] }
  0x86   : > { %868 = vmatpush.msrb.mxu0 %v568_v26  ;;  %908 = vmatpush.msrb.mxu2 %v569_v28  ;;  %v641_v0 = vld [vmem:[#allocation5 + $0x458] sm:$0xff]  ;;  %v594_v17 = vld [vmem:[#allocation5 + $0x2e0] sm:$0xff]  ;;  %v595_v19 = vld [vmem:[#allocation5 + $0x2e8] sm:$0xff] }
  0x87   : > { %888 = vmatpush.msrb.mxu1 %v696_v31  ;;  %928 = vmatpush.msrb.mxu3 %v697_v33  ;;  %v633_v4 = vld [vmem:[#allocation5 + $0x418] sm:$0xff]  ;;  %v730_v18 = vld [vmem:[#allocation5 + $0x720] sm:$0xff]  ;;  %v731_v20 = vld [vmem:[#allocation5 + $0x728] sm:$0xff] }
  0x88   : > { %869 = vmatpush.msrb.mxu0 %v560_v30  ;;  %909 = vmatpush.msrb.mxu2 %v561_v32  ;;  %v586_v21 = vld [vmem:[#allocation5 + $0x2a0] sm:$0xff]  ;;  %v587_v23 = vld [vmem:[#allocation5 + $0x2a8] sm:$0xff]  ;;  %v5575_v30 = vmov 0  }
  0x89   : > { %889 = vmatpush.msrb.mxu1 %v688_v35  ;;  %929 = vmatpush.msrb.mxu3 %v689_v38  ;;  %v722_v22 = vld [vmem:[#allocation5 + $0x6e0] sm:$0xff]  ;;  %v723_v24 = vld [vmem:[#allocation5 + $0x6e8] sm:$0xff] }
  0x8a   : > { %870 = vmatpush.msrb.mxu0 %v552_v34  ;;  %910 = vmatpush.msrb.mxu2 %v553_v37  ;;  %v578_v25 = vld [vmem:[#allocation5 + $0x260] sm:$0xff]  ;;  %v579_v27 = vld [vmem:[#allocation5 + $0x268] sm:$0xff] }
  0x8b   : > { %890 = vmatpush.msrb.mxu1 %v680_v40  ;;  %930 = vmatpush.msrb.mxu3 %v681_v42  ;;  %v714_v26 = vld [vmem:[#allocation5 + $0x6a0] sm:$0xff]  ;;  %v715_v28 = vld [vmem:[#allocation5 + $0x6a8] sm:$0xff] }
  0x8c   : > { %871 = vmatpush.msrb.mxu0 %v544_v39  ;;  %911 = vmatpush.msrb.mxu2 %v545_v41  ;;  %v1101_v29 = vld [vmem:[%s6507_s3] sm:$0xff]  ;;  %v571_v33 = vld [vmem:[#allocation5 + $0x228] sm:$0xff] }
  0x8d   : > { %837 = vmatmul.f32.vlgmr.msra.gmra.mxu2 %v5798_v43  ;;  %891 = vmatpush.msrb.mxu1 %v672_v45  ;;  %v570_v31 = vld [vmem:[#allocation5 + $0x220] sm:$0xff]  ;;  %v707_v34 = vld [vmem:[#allocation5 + $0x668] sm:$0xff] }
  0x8e   : > { %872 = vmatpush.msrb.mxu0 %v536_v44  ;;  %912 = vmatpush.msrb.mxu2 %v537_v46  ;;  %v706_v32 = vld [vmem:[#allocation5 + $0x660] sm:$0xff]  ;;  %v563_v37 = vld [vmem:[#allocation5 + $0x1e8] sm:$0xff] }
  0x8f   : > { %931 = vmatpush.msrb.mxu3 %v673_v47  ;;  %797 = vmatmul.f32.vlgmr.msra.gmra.mxu0 %v5798_v43  ;;  %v562_v35 = vld [vmem:[#allocation5 + $0x1e0] sm:$0xff]  ;;  %v699_v38 = vld [vmem:[#allocation5 + $0x628] sm:$0xff] }
  0x90   : > { %857 = vmatmul.f32.vlgmr.msra.gmra.mxu3 %v5800_v48  ;;  %873 = vmatpush.msrb.mxu0 %v528_v49  ;;  %v698_v36 = vld [vmem:[#allocation5 + $0x620] sm:$0xff]  ;;  %v555_v41 = vld [vmem:[#allocation5 + $0x1a8] sm:$0xff] }
  0x91   : > { %892 = vmatpush.msrb.mxu1 %v664_v50  ;;  %913 = vmatpush.msrb.mxu2 %v529_v51  ;;  %v554_v39 = vld [vmem:[#allocation5 + $0x1a0] sm:$0xff]  ;;  %v691_v42 = vld [vmem:[#allocation5 + $0x5e8] sm:$0xff] }
  0x92   : > { %932 = vmatpush.msrb.mxu3 %v665_v52  ;;  %817 = vmatmul.f32.vlgmr.msra.gmra.mxu1 %v5800_v48  ;;  %v690_v40 = vld [vmem:[#allocation5 + $0x5e0] sm:$0xff]  ;;  %v547_v46 = vld [vmem:[#allocation5 + $0x168] sm:$0xff] }
  0x93   : > { %874 = vmatpush.msrb.mxu0 %v520_v53  ;;  %893 = vmatpush.msrb.mxu1 %v656_v54  ;;  %v546_v44 = vld [vmem:[#allocation5 + $0x160] sm:$0xff]  ;;  %v683_v47 = vld [vmem:[#allocation5 + $0x5a8] sm:$0xff] }
  0x94   : > { %914 = vmatpush.msrb.mxu2 %v521_v55  ;;  %933 = vmatpush.msrb.mxu3 %v657_v56  ;;  %v682_v45 = vld [vmem:[#allocation5 + $0x5a0] sm:$0xff]  ;;  %v539_v52 = vld [vmem:[#allocation5 + $0x128] sm:$0xff] }
  0x95   : > { %875 = vmatpush.msrb.mxu0 %v512_v57  ;;  %894 = vmatpush.msrb.mxu1 %v648_v58  ;;  %v1102_v49 = vld [vmem:[%s6507_s3 + $0x8] sm:$0xff] }
  0x96   : > { %915 = vmatpush.msrb.mxu2 %v513_v59  ;;  %934 = vmatpush.msrb.mxu3 %v649_v60  ;;  %v538_v50 = vld [vmem:[#allocation5 + $0x120] sm:$0xff]  ;;  %v675_v53 = vld [vmem:[#allocation5 + $0x568] sm:$0xff] }
  0x97   : > { %876 = vmatpush.msrb.mxu0 %v504_v61  ;;  %895 = vmatpush.msrb.mxu1 %v640_v62  ;;  %v674_v51 = vld [vmem:[#allocation5 + $0x560] sm:$0xff]  ;;  %v531_v56 = vld [vmem:[#allocation5 + $0xe8] sm:$0xff] }
  0x98   : > { %916 = vmatpush.msrb.mxu2 %v505_v63  ;;  %935 = vmatpush.msrb.mxu3 %v641_v0  ;;  %v530_v54 = vld [vmem:[#allocation5 + $0xe0] sm:$0xff]  ;;  %v667_v57 = vld [vmem:[#allocation5 + $0x528] sm:$0xff] }
  0x99   : > { %877 = vmatmul.f32.vlgmr.msrb.gmra.mxu0 %v5798_v43  ;;  %917 = vmatmul.f32.vlgmr.msrb.gmra.mxu2 %v5798_v43  ;;  %v666_v55 = vld [vmem:[#allocation5 + $0x520] sm:$0xff]  ;;  %v523_v60 = vld [vmem:[#allocation5 + $0xa8] sm:$0xff] }
  0x9a   : > { %941 = vmatpush.msra.mxu0 %v626_v1  ;;  %981 = vmatpush.msra.mxu2 %v627_v2  ;;  %v522_v58 = vld [vmem:[#allocation5 + $0xa0] sm:$0xff]  ;;  %v659_v61 = vld [vmem:[#allocation5 + $0x4e8] sm:$0xff] }
  0x9b   : > { %896 = vmatpush.msrb.mxu1 %v632_v3  ;;  %936 = vmatpush.msrb.mxu3 %v633_v4  ;;  %v658_v59 = vld [vmem:[#allocation5 + $0x4e0] sm:$0xff]  ;;  %v515_v0 = vld [vmem:[#allocation5 + $0x68] sm:$0xff] }
  0x9c   : > { %897 = vmatmul.f32.vlgmr.msrb.gmra.mxu1 %v5800_v48  ;;  %937 = vmatmul.f32.vlgmr.msrb.gmra.mxu3 %v5800_v48  ;;  %v514_v62 = vld [vmem:[#allocation5 + $0x60] sm:$0xff]  ;;  %v651_v1 = vld [vmem:[#allocation5 + $0x4a8] sm:$0xff] }
  0x9d   : > { %942 = vmatpush.msra.mxu0 %v618_v5  ;;  %961 = vmatpush.msra.mxu1 %v754_v6  ;;  %v650_v63 = vld [vmem:[#allocation5 + $0x4a0] sm:$0xff]  ;;  %v507_v4 = vld [vmem:[#allocation5 + $0x28] sm:$0xff]  ;;  %v628_v6 = vld [vmem:[#allocation5 + $0x3f0] sm:$0xff] }
  0x9e   : > { %982 = vmatpush.msra.mxu2 %v619_v7  ;;  %1001 = vmatpush.msra.mxu3 %v755_v8  ;;  %v506_v2 = vld [vmem:[#allocation5 + $0x20] sm:$0xff]  ;;  %v643_v5 = vld [vmem:[#allocation5 + $0x468] sm:$0xff]  ;;  %v629_v7 = vld [vmem:[#allocation5 + $0x3f8] sm:$0xff] }
  0x9f   : > { %943 = vmatpush.msra.mxu0 %v610_v9  ;;  %962 = vmatpush.msra.mxu1 %v746_v10  ;;  %v642_v3 = vld [vmem:[#allocation5 + $0x460] sm:$0xff]  ;;  %v635_v9 = vld [vmem:[#allocation5 + $0x428] sm:$0xff]  ;;  %v620_v10 = vld [vmem:[#allocation5 + $0x3b0] sm:$0xff] }
  0xa0   : > { %983 = vmatpush.msra.mxu2 %v611_v11  ;;  %1002 = vmatpush.msra.mxu3 %v747_v12  ;;  %v634_v8 = vld [vmem:[#allocation5 + $0x420] sm:$0xff]  ;;  %v756_v11 = vld [vmem:[#allocation5 + $0x7f0] sm:$0xff]  ;;  %v621_v12 = vld [vmem:[#allocation5 + $0x3b8] sm:$0xff] }
  0xa1   : > { %944 = vmatpush.msra.mxu0 %v602_v13  ;;  %963 = vmatpush.msra.mxu1 %v738_v14  ;;  %v757_v13 = vld [vmem:[#allocation5 + $0x7f8] sm:$0xff]  ;;  %v612_v14 = vld [vmem:[#allocation5 + $0x370] sm:$0xff] }
  0xa2   : > { %984 = vmatpush.msra.mxu2 %v603_v15  ;;  %1003 = vmatpush.msra.mxu3 %v739_v16  ;;  %v748_v15 = vld [vmem:[#allocation5 + $0x7b0] sm:$0xff]  ;;  %v613_v16 = vld [vmem:[#allocation5 + $0x378] sm:$0xff] }
  0xa3   : > { %945 = vmatpush.msra.mxu0 %v594_v17  ;;  %964 = vmatpush.msra.mxu1 %v730_v18  ;;  %v749_v17 = vld [vmem:[#allocation5 + $0x7b8] sm:$0xff]  ;;  %v604_v18 = vld [vmem:[#allocation5 + $0x330] sm:$0xff] }
  0xa4   : > { %985 = vmatpush.msra.mxu2 %v595_v19  ;;  %1004 = vmatpush.msra.mxu3 %v731_v20  ;;  %v740_v19 = vld [vmem:[#allocation5 + $0x770] sm:$0xff]  ;;  %v605_v20 = vld [vmem:[#allocation5 + $0x338] sm:$0xff] }
  0xa5   : > { %946 = vmatpush.msra.mxu0 %v586_v21  ;;  %965 = vmatpush.msra.mxu1 %v722_v22  ;;  %v741_v21 = vld [vmem:[#allocation5 + $0x778] sm:$0xff]  ;;  %v596_v22 = vld [vmem:[#allocation5 + $0x2f0] sm:$0xff] }
  0xa6   : > { %986 = vmatpush.msra.mxu2 %v587_v23  ;;  %1005 = vmatpush.msra.mxu3 %v723_v24  ;;  %v732_v23 = vld [vmem:[#allocation5 + $0x730] sm:$0xff]  ;;  %v597_v24 = vld [vmem:[#allocation5 + $0x2f8] sm:$0xff] }
  0xa7   : > { %5205 = vset.pattern.permute.xlu0 %v5575_v30  ;;  %947 = vmatpush.msra.mxu0 %v578_v25  ;;  %v733_v25 = vld [vmem:[#allocation5 + $0x738] sm:$0xff]  ;;  %v580_v30 = vld [vmem:[#allocation5 + $0x270] sm:$0xff] }
  0xa8   : > { %966 = vmatpush.msra.mxu1 %v714_v26  ;;  %987 = vmatpush.msra.mxu2 %v579_v27  ;;  %v588_v26 = vld [vmem:[#allocation5 + $0x2b0] sm:$0xff] }
  0xa9   : > { %1006 = vmatpush.msra.mxu3 %v715_v28  ;;  %1105 = vperm.xlu0 %5205, %v1101_v29   ;;  %v724_v27 = vld [vmem:[#allocation5 + $0x6f0] sm:$0xff]  ;;  %v589_v28 = vld [vmem:[#allocation5 + $0x2b8] sm:$0xff] }
  0xaa   : > { %948 = vmatpush.msra.mxu0 %v570_v31  ;;  %967 = vmatpush.msra.mxu1 %v706_v32  ;;  %v725_v29 = vld [vmem:[#allocation5 + $0x6f8] sm:$0xff]  ;;  %v716_v31 = vld [vmem:[#allocation5 + $0x6b0] sm:$0xff] }
  0xab   : > { %988 = vmatpush.msra.mxu2 %v571_v33  ;;  %1007 = vmatpush.msra.mxu3 %v707_v34  ;;  %v581_v32 = vld [vmem:[#allocation5 + $0x278] sm:$0xff]  ;;  %v572_v34 = vld [vmem:[#allocation5 + $0x230] sm:$0xff] }
  0xac   : > { %949 = vmatpush.msra.mxu0 %v562_v35  ;;  %968 = vmatpush.msra.mxu1 %v698_v36  ;;  %v717_v33 = vld [vmem:[#allocation5 + $0x6b8] sm:$0xff]  ;;  %v708_v35 = vld [vmem:[#allocation5 + $0x670] sm:$0xff] }
  0xad   : > { %989 = vmatpush.msra.mxu2 %v563_v37  ;;  %1008 = vmatpush.msra.mxu3 %v699_v38  ;;  %v573_v36 = vld [vmem:[#allocation5 + $0x238] sm:$0xff]  ;;  %v564_v38 = vld [vmem:[#allocation5 + $0x1f0] sm:$0xff] }
  0xae   : > { %950 = vmatpush.msra.mxu0 %v554_v39  ;;  %969 = vmatpush.msra.mxu1 %v690_v40  ;;  %v709_v37 = vld [vmem:[#allocation5 + $0x678] sm:$0xff]  ;;  %v700_v39 = vld [vmem:[#allocation5 + $0x630] sm:$0xff] }
  0xaf   : > { %990 = vmatpush.msra.mxu2 %v555_v41  ;;  %1009 = vmatpush.msra.mxu3 %v691_v42  ;;  %v565_v40 = vld [vmem:[#allocation5 + $0x1f8] sm:$0xff]  ;;  %v556_v42 = vld [vmem:[#allocation5 + $0x1b0] sm:$0xff] }
  0xb0   : > { %951 = vmatpush.msra.mxu0 %v546_v44  ;;  %970 = vmatpush.msra.mxu1 %v682_v45  ;;  %v701_v41 = vld [vmem:[#allocation5 + $0x638] sm:$0xff]  ;;  %v692_v44 = vld [vmem:[#allocation5 + $0x5f0] sm:$0xff] }
  0xb1   : > { %991 = vmatpush.msra.mxu2 %v547_v46  ;;  %1010 = vmatpush.msra.mxu3 %v683_v47  ;;  %v557_v45 = vld [vmem:[#allocation5 + $0x1b8] sm:$0xff]  ;;  %v548_v47 = vld [vmem:[#allocation5 + $0x170] sm:$0xff] }
  0xb2   : > { %1110 = vperm.xlu0 %5205, %v1102_v49   ;;  %952 = vmatpush.msra.mxu0 %v538_v50  ;;  %v693_v46 = vld [vmem:[#allocation5 + $0x5f8] sm:$0xff]  ;;  %v684_v49 = vld [vmem:[#allocation5 + $0x5b0] sm:$0xff] }
  0xb3   : > { %971 = vmatpush.msra.mxu1 %v674_v51  ;;  %992 = vmatpush.msra.mxu2 %v539_v52  ;;  %v549_v50 = vld [vmem:[#allocation5 + $0x178] sm:$0xff]  ;;  %v540_v52 = vld [vmem:[#allocation5 + $0x130] sm:$0xff] }
  0xb4   : > { %1011 = vmatpush.msra.mxu3 %v675_v53  ;;  %953 = vmatpush.msra.mxu0 %v530_v54  ;;  %v685_v51 = vld [vmem:[#allocation5 + $0x5b8] sm:$0xff]  ;;  %v676_v53 = vld [vmem:[#allocation5 + $0x570] sm:$0xff] }
  0xb5   : > { %972 = vmatpush.msra.mxu1 %v666_v55  ;;  %993 = vmatpush.msra.mxu2 %v531_v56  ;;  %v541_v54 = vld [vmem:[#allocation5 + $0x138] sm:$0xff]  ;;  %v532_v56 = vld [vmem:[#allocation5 + $0xf0] sm:$0xff] }
  0xb6   : > { %1012 = vmatpush.msra.mxu3 %v667_v57  ;;  %954 = vmatpush.msra.mxu0 %v522_v58  ;;  %v677_v55 = vld [vmem:[#allocation5 + $0x578] sm:$0xff]  ;;  %v668_v57 = vld [vmem:[#allocation5 + $0x530] sm:$0xff] }
  0xb7   : > { %973 = vmatpush.msra.mxu1 %v658_v59  ;;  %994 = vmatpush.msra.mxu2 %v523_v60  ;;  %v533_v58 = vld [vmem:[#allocation5 + $0xf8] sm:$0xff]  ;;  %v524_v60 = vld [vmem:[#allocation5 + $0xb0] sm:$0xff] }
  0xb8   : > { %1013 = vmatpush.msra.mxu3 %v659_v61  ;;  %955 = vmatpush.msra.mxu0 %v514_v62  ;;  %v669_v59 = vld [vmem:[#allocation5 + $0x538] sm:$0xff]  ;;  %v660_v61 = vld [vmem:[#allocation5 + $0x4f0] sm:$0xff] }
  0xb9   : > { %974 = vmatpush.msra.mxu1 %v650_v63  ;;  %995 = vmatpush.msra.mxu2 %v515_v0  ;;  %v525_v62 = vld [vmem:[#allocation5 + $0xb8] sm:$0xff]  ;;  %v516_v0 = vld [vmem:[#allocation5 + $0x70] sm:$0xff] }
  0xba   : > { %1014 = vmatpush.msra.mxu3 %v651_v1  ;;  %956 = vmatpush.msra.mxu0 %v506_v2  ;;  %v661_v63 = vld [vmem:[#allocation5 + $0x4f8] sm:$0xff]  ;;  %v652_v1 = vld [vmem:[#allocation5 + $0x4b0] sm:$0xff] }
  0xbb   : > { %975 = vmatpush.msra.mxu1 %v642_v3  ;;  %996 = vmatpush.msra.mxu2 %v507_v4  ;;  %v517_v2 = vld [vmem:[#allocation5 + $0x78] sm:$0xff]  ;;  %v508_v4 = vld [vmem:[#allocation5 + $0x30] sm:$0xff] }
  0xbc   : > { %1015 = vmatpush.msra.mxu3 %v643_v5  ;;  %957 = vmatmul.f32.vlgmr.msra.gmra.mxu0 %v5798_v43  ;;  %v653_v3 = vld [vmem:[#allocation5 + $0x4b8] sm:$0xff]  ;;  %v644_v5 = vld [vmem:[#allocation5 + $0x470] sm:$0xff] }
  0xbd   : > { %997 = vmatmul.f32.vlgmr.msra.gmra.mxu2 %v5798_v43  ;;  %1021 = vmatpush.msrb.mxu0 %v628_v6  ;;  %v509_v6 = vld [vmem:[#allocation5 + $0x38] sm:$0xff] }
  0xbe   : > { %1061 = vmatpush.msrb.mxu2 %v629_v7  ;;  %976 = vmatpush.msra.mxu1 %v634_v8  ;;  %v645_v7 = vld [vmem:[#allocation5 + $0x478] sm:$0xff]  ;;  %v636_v8 = vld [vmem:[#allocation5 + $0x430] sm:$0xff] }
  0xbf   : > { %1016 = vmatpush.msra.mxu3 %v635_v9  ;;  %977 = vmatmul.f32.vlgmr.msra.gmra.mxu1 %v5800_v48  ;;  %v637_v9 = vld [vmem:[#allocation5 + $0x438] sm:$0xff] }
  0xc0   : > { %1017 = vmatmul.f32.vlgmr.msra.gmra.mxu3 %v5800_v48  ;;  %1022 = vmatpush.msrb.mxu0 %v620_v10  ;;  %v1307_v10 = vld [vmem:[#allocation11 + $0x3c0] sm:$0xff] }
  0xc1   : > { %1041 = vmatpush.msrb.mxu1 %v756_v11  ;;  %1062 = vmatpush.msrb.mxu2 %v621_v12  ;;  %v1435_v11 = vld [vmem:[#allocation11 + $0x7c0] sm:$0xff] }
  0xc2   : > { %1081 = vmatpush.msrb.mxu3 %v757_v13  ;;  %1023 = vmatpush.msrb.mxu0 %v612_v14  ;;  %v1563_v12 = vld [vmem:[#allocation11 + $0xbc0] sm:$0xff] }
  0xc3   : > { %1042 = vmatpush.msrb.mxu1 %v748_v15  ;;  %1063 = vmatpush.msrb.mxu2 %v613_v16  ;;  %v1299_v13 = vld [vmem:[#allocation11 + $0x380] sm:$0xff] }
  0xc4   : > { %1082 = vmatpush.msrb.mxu3 %v749_v17  ;;  %1024 = vmatpush.msrb.mxu0 %v604_v18  ;;  %v1427_v14 = vld [vmem:[#allocation11 + $0x780] sm:$0xff] }
  0xc5   : > { %1043 = vmatpush.msrb.mxu1 %v740_v19  ;;  %1064 = vmatpush.msrb.mxu2 %v605_v20  ;;  %v1555_v15 = vld [vmem:[#allocation11 + $0xb80] sm:$0xff] }
  0xc6   : > { %1083 = vmatpush.msrb.mxu3 %v741_v21  ;;  %1025 = vmatpush.msrb.mxu0 %v596_v22  ;;  %v1291_v16 = vld [vmem:[#allocation11 + $0x340] sm:$0xff] }
  0xc7   : > { %1044 = vmatpush.msrb.mxu1 %v732_v23  ;;  %1065 = vmatpush.msrb.mxu2 %v597_v24  ;;  %v1419_v17 = vld [vmem:[#allocation11 + $0x740] sm:$0xff] }
  0xc8   : > { %1084 = vmatpush.msrb.mxu3 %v733_v25  ;;  %1026 = vmatpush.msrb.mxu0 %v588_v26  ;;  %v1547_v18 = vld [vmem:[#allocation11 + $0xb40] sm:$0xff] }
  0xc9   : > { %1045 = vmatpush.msrb.mxu1 %v724_v27  ;;  %1066 = vmatpush.msrb.mxu2 %v589_v28  ;;  %v1283_v19 = vld [vmem:[#allocation11 + $0x300] sm:$0xff] }
  0xca   : > { %1085 = vmatpush.msrb.mxu3 %v725_v29  ;;  %1027 = vmatpush.msrb.mxu0 %v580_v30  ;;  %v1411_v20 = vld [vmem:[#allocation11 + $0x700] sm:$0xff] }
  0xcb   : > { %1046 = vmatpush.msrb.mxu1 %v716_v31  ;;  %1067 = vmatpush.msrb.mxu2 %v581_v32  ;;  %v1539_v21 = vld [vmem:[#allocation11 + $0xb00] sm:$0xff] }
  0xcc   : > { %1086 = vmatpush.msrb.mxu3 %v717_v33  ;;  %1028 = vmatpush.msrb.mxu0 %v572_v34  ;;  %v1275_v22 = vld [vmem:[#allocation11 + $0x2c0] sm:$0xff] }
  0xcd   : > { %1047 = vmatpush.msrb.mxu1 %v708_v35  ;;  %1068 = vmatpush.msrb.mxu2 %v573_v36  ;;  %v1403_v23 = vld [vmem:[#allocation11 + $0x6c0] sm:$0xff] }
  0xce   : > { %1087 = vmatpush.msrb.mxu3 %v709_v37  ;;  %1029 = vmatpush.msrb.mxu0 %v564_v38  ;;  %v1531_v24 = vld [vmem:[#allocation11 + $0xac0] sm:$0xff] }
  0xcf   : > { %1048 = vmatpush.msrb.mxu1 %v700_v39  ;;  %1069 = vmatpush.msrb.mxu2 %v565_v40  ;;  %v1267_v25 = vld [vmem:[#allocation11 + $0x280] sm:$0xff] }
  0xd0   : > { %1088 = vmatpush.msrb.mxu3 %v701_v41  ;;  %1030 = vmatpush.msrb.mxu0 %v556_v42  ;;  %v1395_v26 = vld [vmem:[#allocation11 + $0x680] sm:$0xff] }
  0xd1   : > { %1049 = vmatpush.msrb.mxu1 %v692_v44  ;;  %1070 = vmatpush.msrb.mxu2 %v557_v45  ;;  %v1259_v27 = vld [vmem:[#allocation11 + $0x240] sm:$0xff] }
  0xd2   : > { %1089 = vmatpush.msrb.mxu3 %v693_v46  ;;  %1031 = vmatpush.msrb.mxu0 %v548_v47  ;;  %v1387_v28 = vld [vmem:[#allocation11 + $0x640] sm:$0xff] }
  0xd3   : > { %1050 = vmatpush.msrb.mxu1 %v684_v49  ;;  %1071 = vmatpush.msrb.mxu2 %v549_v50  ;;  %v1251_v29 = vld [vmem:[#allocation11 + $0x200] sm:$0xff] }
  0xd4   : > { %1090 = vmatpush.msrb.mxu3 %v685_v51  ;;  %1032 = vmatpush.msrb.mxu0 %v540_v52  ;;  %v1379_v30 = vld [vmem:[#allocation11 + $0x600] sm:$0xff] }
  0xd5   : > { %1051 = vmatpush.msrb.mxu1 %v676_v53  ;;  %1072 = vmatpush.msrb.mxu2 %v541_v54  ;;  %v1523_v31 = vld [vmem:[#allocation11 + $0xa80] sm:$0xff] }
  0xd6   : > { %1091 = vmatpush.msrb.mxu3 %v677_v55  ;;  %1033 = vmatpush.msrb.mxu0 %v532_v56  ;;  %v1675_v32 = vld [vmem:[#allocation11 + $0xf40] sm:$0xff] }
  0xd7   : > { %1052 = vmatpush.msrb.mxu1 %v668_v57  ;;  %1073 = vmatpush.msrb.mxu2 %v533_v58  ;;  %v1243_v33 = vld [vmem:[#allocation11 + $0x1c0] sm:$0xff] }
  0xd8   : > { %1092 = vmatpush.msrb.mxu3 %v669_v59  ;;  %1034 = vmatpush.msrb.mxu0 %v524_v60  ;;  %v1371_v34 = vld [vmem:[#allocation11 + $0x5c0] sm:$0xff] }
  0xd9   : > { %1053 = vmatpush.msrb.mxu1 %v660_v61  ;;  %1074 = vmatpush.msrb.mxu2 %v525_v62  ;;  %v1235_v35 = vld [vmem:[#allocation11 + $0x180] sm:$0xff] }
  0xda   : > { %1093 = vmatpush.msrb.mxu3 %v661_v63  ;;  %1035 = vmatpush.msrb.mxu0 %v516_v0  ;;  %v1363_v36 = vld [vmem:[#allocation11 + $0x580] sm:$0xff] }
  0xdb   : > { %1054 = vmatpush.msrb.mxu1 %v652_v1  ;;  %1075 = vmatpush.msrb.mxu2 %v517_v2  ;;  %v1227_v37 = vld [vmem:[#allocation11 + $0x140] sm:$0xff] }
  0xdc   : > { %1094 = vmatpush.msrb.mxu3 %v653_v3  ;;  %1036 = vmatpush.msrb.mxu0 %v508_v4  ;;  %v1515_v38 = vld [vmem:[#allocation11 + $0xa40] sm:$0xff] }
  0xdd   : > { %1055 = vmatpush.msrb.mxu1 %v644_v5  ;;  %1076 = vmatpush.msrb.mxu2 %v509_v6  ;;  %v1667_v39 = vld [vmem:[#allocation11 + $0xf00] sm:$0xff] }
  0xde   : > { %1095 = vmatpush.msrb.mxu3 %v645_v7  ;;  %1037 = vmatmul.f32.vlgmr.msrb.gmra.mxu0 %v5798_v43  ;;  %v1355_v40 = vld [vmem:[#allocation11 + $0x540] sm:$0xff] }
  0xdf   : > { %1077 = vmatmul.f32.vlgmr.msrb.gmra.mxu2 %v5798_v43  ;;  %1056 = vmatpush.msrb.mxu1 %v636_v8  ;;  %v1691_v43 = vld [vmem:[#allocation11 + $0xfc0] sm:$0xff] }
  0xe0   : > { %1096 = vmatpush.msrb.mxu3 %v637_v9  ;;  %1057 = vmatmul.f32.vlgmr.msrb.gmra.mxu1 %v5800_v48  ;;  %v1507_v41 = vld [vmem:[#allocation11 + $0xa00] sm:$0xff] }
  0xe1   : > { %1097 = vmatmul.f32.vlgmr.msrb.gmra.mxu3 %v5800_v48  ;;  %2211 = vmatpush.msra.mxu0 %v1307_v10  ;;  %v1683_v48 = vld [vmem:[#allocation11 + $0xf80] sm:$0xff] }
  0xe2   : > { %2234 = vmatpush.msra.mxu1 %v1435_v11  ;;  %2257 = vmatpush.msra.mxu2 %v1563_v12  ;;  %v1659_v42 = vld [vmem:[#allocation11 + $0xec0] sm:$0xff] }
  0xe3   : > { %2212 = vmatpush.msra.mxu0 %v1299_v13  ;;  %2280 = vmatpush.msra.mxu3 %v1691_v43  ;;  %v1219_v44 = vld [vmem:[#allocation11 + $0x100] sm:$0xff] }
  0xe4   : > { %2235 = vmatpush.msra.mxu1 %v1427_v14  ;;  %2258 = vmatpush.msra.mxu2 %v1555_v15  ;;  %v1347_v45 = vld [vmem:[#allocation11 + $0x500] sm:$0xff] }
  0xe5   : > { %2213 = vmatpush.msra.mxu0 %v1291_v16  ;;  %2281 = vmatpush.msra.mxu3 %v1683_v48  ;;  %v1211_v46 = vld [vmem:[#allocation11 + $0xc0] sm:$0xff] }
  0xe6   : > { %2236 = vmatpush.msra.mxu1 %v1419_v17  ;;  %2259 = vmatpush.msra.mxu2 %v1547_v18  ;;  %v1499_v47 = vld [vmem:[#allocation11 + $0x9c0] sm:$0xff] }
  0xe7   : > { %2214 = vmatpush.msra.mxu0 %v1283_v19  ;;  %2282 = vmatpush.msra.mxu3 %v1675_v32  ;;  %v1651_v49 = vld [vmem:[#allocation11 + $0xe80] sm:$0xff] }
  0xe8   : > { %2237 = vmatpush.msra.mxu1 %v1411_v20  ;;  %2260 = vmatpush.msra.mxu2 %v1539_v21  ;;  %v1339_v50 = vld [vmem:[#allocation11 + $0x4c0] sm:$0xff] }
  0xe9   : > { %2215 = vmatpush.msra.mxu0 %v1275_v22  ;;  %2283 = vmatpush.msra.mxu3 %v1667_v39  ;;  %v1491_v51 = vld [vmem:[#allocation11 + $0x980] sm:$0xff] }
  0xea   : > { %2238 = vmatpush.msra.mxu1 %v1403_v23  ;;  %2261 = vmatpush.msra.mxu2 %v1531_v24  ;;  %v1643_v52 = vld [vmem:[#allocation11 + $0xe40] sm:$0xff] }
  0xeb   : > { %2216 = vmatpush.msra.mxu0 %v1267_v25  ;;  %2284 = vmatpush.msra.mxu3 %v1659_v42  ;;  %v1203_v53 = vld [vmem:[#allocation11 + $0x80] sm:$0xff] }
  0xec   : > { %2239 = vmatpush.msra.mxu1 %v1395_v26  ;;  %2262 = vmatpush.msra.mxu2 %v1523_v31  ;;  %v1331_v54 = vld [vmem:[#allocation11 + $0x480] sm:$0xff] }
  0xed   : > { %2217 = vmatpush.msra.mxu0 %v1259_v27  ;;  %2285 = vmatpush.msra.mxu3 %v1651_v49  ;;  %v1195_v55 = vld [vmem:[#allocation11 + $0x40] sm:$0xff] }
  0xee   : > { %2240 = vmatpush.msra.mxu1 %v1387_v28  ;;  %2263 = vmatpush.msra.mxu2 %v1515_v38  ;;  %v1323_v56 = vld [vmem:[#allocation11 + $0x440] sm:$0xff] }
  0xef   : > { %2218 = vmatpush.msra.mxu0 %v1251_v29  ;;  %2286 = vmatpush.msra.mxu3 %v1643_v52  ;;  %v1187_v57 = vld [vmem:[#allocation11] sm:$0xff] }
  0xf0   : > { %2241 = vmatpush.msra.mxu1 %v1379_v30  ;;  %2264 = vmatpush.msra.mxu2 %v1507_v41  ;;  %v1819_v58 = vld [vmem:[#allocation11 + $0x13c0] sm:$0xff] }
  0xf1   : > { %2219 = vmatpush.msra.mxu0 %v1243_v33  ;;  %v1315_v59 = vld [vmem:[#allocation11 + $0x400] sm:$0xff] }
  0xf2   : > { %2242 = vmatpush.msra.mxu1 %v1371_v34  ;;  %2265 = vmatpush.msra.mxu2 %v1499_v47  ;;  %v1947_v60 = vld [vmem:[#allocation11 + $0x17c0] sm:$0xff] }
  0xf3   : > { %2220 = vmatpush.msra.mxu0 %v1235_v35  ;;  %v1811_v61 = vld [vmem:[#allocation11 + $0x1380] sm:$0xff] }
  0xf4   : > { %2243 = vmatpush.msra.mxu1 %v1363_v36  ;;  %2266 = vmatpush.msra.mxu2 %v1491_v51  ;;  %v1483_v62 = vld [vmem:[#allocation11 + $0x940] sm:$0xff] }
  0xf5   : > { %2221 = vmatpush.msra.mxu0 %v1227_v37  ;;  %v1635_v63 = vld [vmem:[#allocation11 + $0xe00] sm:$0xff] }
  0xf6   : > { %2244 = vmatpush.msra.mxu1 %v1355_v40  ;;  %v1939_v0 = vld [vmem:[#allocation11 + $0x1780] sm:$0xff]  ;;  %2267 = vmatpush.msra.mxu2 %v1483_v62 }
  0xf7   : > { %2222 = vmatpush.msra.mxu0 %v1219_v44  ;;  %v1803_v1 = vld [vmem:[#allocation11 + $0x1340] sm:$0xff]  ;;  %2287 = vmatpush.msra.mxu3 %v1635_v63 }
  0xf8   : > { %2245 = vmatpush.msra.mxu1 %v1347_v45  ;;  %v1475_v2 = vld [vmem:[#allocation11 + $0x900] sm:$0xff] }
  0xf9   : > { %2223 = vmatpush.msra.mxu0 %v1211_v46  ;;  %v1627_v3 = vld [vmem:[#allocation11 + $0xdc0] sm:$0xff]  ;;  %2268 = vmatpush.msra.mxu2 %v1475_v2 }
  0xfa   : > { %2246 = vmatpush.msra.mxu1 %v1339_v50  ;;  %v1931_v4 = vld [vmem:[#allocation11 + $0x1740] sm:$0xff]  ;;  %2288 = vmatpush.msra.mxu3 %v1627_v3 }
  0xfb   : > { %2224 = vmatpush.msra.mxu0 %v1203_v53  ;;  %v1467_v5 = vld [vmem:[#allocation11 + $0x8c0] sm:$0xff] }
  0xfc   : > { %2247 = vmatpush.msra.mxu1 %v1331_v54  ;;  %v1795_v6 = vld [vmem:[#allocation11 + $0x1300] sm:$0xff]  ;;  %2269 = vmatpush.msra.mxu2 %v1467_v5 }
  0xfd   : > { %2225 = vmatpush.msra.mxu0 %v1195_v55  ;;  %v1619_v7 = vld [vmem:[#allocation11 + $0xd80] sm:$0xff] }
  0xfe   : > { %2248 = vmatpush.msra.mxu1 %v1323_v56  ;;  %v1923_v8 = vld [vmem:[#allocation11 + $0x1700] sm:$0xff]  ;;  %2289 = vmatpush.msra.mxu3 %v1619_v7 }
  0xff   : > { %2226 = vmatpush.msra.mxu0 %v1187_v57  ;;  %v1787_v9 = vld [vmem:[#allocation11 + $0x12c0] sm:$0xff] }
 0x100   : > { %2249 = vmatpush.msra.mxu1 %v1315_v59  ;;  %v1459_v10 = vld [vmem:[#allocation11 + $0x880] sm:$0xff] }
 0x101   : > { %2303 = vmatpush.msrb.mxu0 %v1819_v58  ;;  %v1611_v11 = vld [vmem:[#allocation11 + $0xd40] sm:$0xff]  ;;  %2270 = vmatpush.msra.mxu2 %v1459_v10 }
 0x102   : > { %2326 = vmatpush.msrb.mxu1 %v1947_v60  ;;  %v1915_v12 = vld [vmem:[#allocation11 + $0x16c0] sm:$0xff]  ;;  %2290 = vmatpush.msra.mxu3 %v1611_v11  ;;  %v5833_v60 = vld [vmem:[#allocation8] sm:$0xff] }
 0x103   : > { %2304 = vmatpush.msrb.mxu0 %v1811_v61  ;;  %v1779_v13 = vld [vmem:[#allocation11 + $0x1280] sm:$0xff]  ;;  %v1139_v7 = vperm.slane %v5833_v60, 0 }
 0x104   : > { %2327 = vmatpush.msrb.mxu1 %v1939_v0  ;;  %v1451_v14 = vld [vmem:[#allocation11 + $0x840] sm:$0xff] }
 0x105   : > { %2305 = vmatpush.msrb.mxu0 %v1803_v1  ;;  %v1603_v15 = vld [vmem:[#allocation11 + $0xd00] sm:$0xff]  ;;  %2271 = vmatpush.msra.mxu2 %v1451_v14 }
 0x106   : > { %2328 = vmatpush.msrb.mxu1 %v1931_v4  ;;  %v5824_v16 = vld [vmem:[#allocation7] sm:$0xff]  ;;  %2291 = vmatpush.msra.mxu3 %v1603_v15 }
 0x107   : > { %2306 = vmatpush.msrb.mxu0 %v1795_v6  ;;  %v1907_v17 = vld [vmem:[#allocation11 + $0x1680] sm:$0xff]  ;;  %v765_v23 = vperm.slane %v5824_v16, 0  ;;  %v766_v27 = vperm.slane %v5824_v16, 1  ;;  %v767_v46 = vperm.slane %v5824_v16, 2  ;;  %v768_v4 = vperm.slane %v5824_v16, 3 }
 0x108   : > { %2329 = vmatpush.msrb.mxu1 %v1923_v8  ;;  %v1771_v18 = vld [vmem:[#allocation11 + $0x1240] sm:$0xff]  ;;  %v1140_v8 = vperm.slane %v5833_v60, 1 }
 0x109   : > { %2307 = vmatpush.msrb.mxu0 %v1787_v9  ;;  %v1443_v19 = vld [vmem:[#allocation11 + $0x800] sm:$0xff] }
 0x10a   : > { %2330 = vmatpush.msrb.mxu1 %v1915_v12  ;;  %v1595_v43 = vld [vmem:[#allocation11 + $0xcc0] sm:$0xff]  ;;  %2272 = vmatpush.msra.mxu2 %v1443_v19  ;;  %v1141_v19 = vperm.slane %v5833_v60, 2 }
 0x10b   : > { %2308 = vmatpush.msrb.mxu0 %v1779_v13  ;;  %v1899_v20 = vld [vmem:[#allocation11 + $0x1640] sm:$0xff]  ;;  %2292 = vmatpush.msra.mxu3 %v1595_v43 }
 0x10c   : > { %v2075_v21 = vld [vmem:[#allocation11 + $0x1bc0] sm:$0xff]  ;;  %2331 = vmatpush.msrb.mxu1 %v1907_v17  ;;  %v798_v24 = vpop.f32.mrf.mxu0 }
 0x10d   : > { %v1763_v22 = vld [vmem:[#allocation11 + $0x1200] sm:$0xff]  ;;  %2309 = vmatpush.msrb.mxu0 %v1771_v18  ;;  %2349 = vmatpush.msrb.mxu2 %v2075_v21  ;;  %v799_v35 = vadd.f32 %v798_v24, %v765_v23 }
 0x10e   : > { %v1587_v48 = vld [vmem:[#allocation11 + $0xc80] sm:$0xff]  ;;  %2332 = vmatpush.msrb.mxu1 %v1899_v20 }
 0x10f   : > { %v1891_v25 = vld [vmem:[#allocation11 + $0x1600] sm:$0xff]  ;;  %2310 = vmatpush.msrb.mxu0 %v1763_v22  ;;  %2293 = vmatpush.msra.mxu3 %v1587_v48  ;;  %v818_v32 = vpop.f32.mrf.mxu1 }
 0x110   : > { %v2067_v26 = vld [vmem:[#allocation11 + $0x1b80] sm:$0xff]  ;;  %2333 = vmatpush.msrb.mxu1 %v1891_v25  ;;  %v838_v36 = vpop.f32.mrf.mxu2  ;;  %v5829_v50 = vadd.f32 %v818_v32, %v799_v35  ;;  %v1308_v32 = vld [vmem:[#allocation11 + $0x3c8] sm:$0xff] }
 0x111   : > { %v1755_v28 = vld [vmem:[#allocation11 + $0x11c0] sm:$0xff]  ;;  %2350 = vmatpush.msrb.mxu2 %v2067_v26  ;;  %v839_v39 = vadd.f32 %v838_v36, %v766_v27 }
 0x112   : > { %v1579_v29 = vld [vmem:[#allocation11 + $0xc40] sm:$0xff]  ;;  %2311 = vmatpush.msrb.mxu0 %v1755_v28  ;;  %v1113_v63 = vperm.slane %v5829_v50, 0 }
 0x113   : > { %v1883_v30 = vld [vmem:[#allocation11 + $0x15c0] sm:$0xff]  ;;  %2294 = vmatpush.msra.mxu3 %v1579_v29  ;;  %v858_v45 = vpop.f32.mrf.mxu3 }
 0x114   : > { %v2059_v31 = vld [vmem:[#allocation11 + $0x1b40] sm:$0xff]  ;;  %2334 = vmatpush.msrb.mxu1 %v1883_v30  ;;  %v5831_v51 = vadd.f32 %v858_v45, %v839_v39  ;;  %v1428_v39 = vld [vmem:[#allocation11 + $0x788] sm:$0xff] }
 0x115   : > { %v1747_v33 = vld [vmem:[#allocation11 + $0x1180] sm:$0xff]  ;;  %2351 = vmatpush.msrb.mxu2 %v2059_v31 }
 0x116   : > { %v1571_v34 = vld [vmem:[#allocation11 + $0xc00] sm:$0xff]  ;;  %2312 = vmatpush.msrb.mxu0 %v1747_v33  ;;  %v878_v56 = vpop.f32.mrf.mxu0  ;;  %v1114_v0 = vperm.slane %v5831_v51, 0  ;;  %v1436_v33 = vld [vmem:[#allocation11 + $0x7c8] sm:$0xff] }
 0x117   : > { %v1875_v37 = vld [vmem:[#allocation11 + $0x1580] sm:$0xff]  ;;  %2295 = vmatpush.msra.mxu3 %v1571_v34  ;;  %v879_v59 = vadd.f32 %v878_v56, %v767_v46 }
 0x118   : > { %v2051_v38 = vld [vmem:[#allocation11 + $0x1b00] sm:$0xff]  ;;  %2335 = vmatpush.msrb.mxu1 %v1875_v37  ;;  %v1142_v37 = vperm.slane %v5833_v60, 3 }
 0x119   : > { %v1739_v40 = vld [vmem:[#allocation11 + $0x1140] sm:$0xff]  ;;  %2352 = vmatpush.msrb.mxu2 %v2051_v38  ;;  %v898_v3 = vpop.f32.mrf.mxu1  ;;  %v1300_v38 = vld [vmem:[#allocation11 + $0x388] sm:$0xff] }
 0x11a   : > { %v2203_v41 = vld [vmem:[#allocation11 + $0x1fc0] sm:$0xff]  ;;  %2313 = vmatpush.msrb.mxu0 %v1739_v40  ;;  %v899_v9 = vadd.f32 %v898_v3, %v879_v59 }
 0x11b   : > { %v1867_v42 = vld [vmem:[#allocation11 + $0x1540] sm:$0xff]  ;;  %2372 = vmatpush.msrb.mxu3 %v2203_v41  ;;  %v5840_v12 = vpop.permute.xlu0 %1105 }
 0x11c   : > { %v2043_v44 = vld [vmem:[#allocation11 + $0x1ac0] sm:$0xff]  ;;  %2336 = vmatpush.msrb.mxu1 %v1867_v42  ;;  %v1121_v15 = vmul.f32 %v1113_v63, %v5840_v12  ;;  %v1122_v17 = vmul.f32 %v1114_v0, %v5840_v12  ;;  %v1115_v18 = vperm.slane %v899_v9, 0  ;;  %v918_v43 = vpop.f32.mrf.mxu2 }
 0x11d   : > { %v1731_v47 = vld [vmem:[#allocation11 + $0x1100] sm:$0xff]  ;;  %2353 = vmatpush.msrb.mxu2 %v2043_v44  ;;  %v919_v22 = vadd.f32 %v918_v43, %v768_v4  ;;  %v1292_v44 = vld [vmem:[#allocation11 + $0x348] sm:$0xff] }
 0x11e   : > { %v2195_v49 = vld [vmem:[#allocation11 + $0x1f80] sm:$0xff]  ;;  %2314 = vmatpush.msrb.mxu0 %v1731_v47  ;;  %v1155_v23 = vadd.f32 %v1139_v7, %v1121_v15  ;;  %v1156_v24 = vadd.f32 %v1140_v8, %v1122_v17  ;;  %v1123_v25 = vmul.f32 %v1115_v18, %v5840_v12  ;;  %v1268_v4 = vld [vmem:[#allocation11 + $0x288] sm:$0xff] }
 0x11f   : > { %v1859_v52 = vld [vmem:[#allocation11 + $0x1500] sm:$0xff]  ;;  %2373 = vmatpush.msrb.mxu3 %v2195_v49  ;;  %v938_v27 = vpop.f32.mrf.mxu3  ;;  %v1420_v49 = vld [vmem:[#allocation11 + $0x748] sm:$0xff] }
 0x120   : > { %v2035_v53 = vld [vmem:[#allocation11 + $0x1a80] sm:$0xff]  ;;  %2337 = vmatpush.msrb.mxu1 %v1859_v52  ;;  %v5854_v28 = vmax.f32 %v1155_v23, 0.0  ;;  %v5856_v29 = vmax.f32 %v1156_v24, 0.0  ;;  %v1157_v30 = vadd.f32 %v1141_v19, %v1123_v25  ;;  %v939_v31 = vadd.f32 %v938_v27, %v919_v22  ;;  %v1380_v15 = vld [vmem:[#allocation11 + $0x608] sm:$0xff] }
 0x121   : > { %v1723_v54 = vld [vmem:[#allocation11 + $0x10c0] sm:$0xff]  ;;  %2354 = vmatpush.msrb.mxu2 %v2035_v53  ;;  %v1372_v43 = vld [vmem:[#allocation11 + $0x5c8] sm:$0xff] }
 0x122   : > { %v2187_v55 = vld [vmem:[#allocation11 + $0x1f40] sm:$0xff]  ;;  %2315 = vmatpush.msrb.mxu0 %v1723_v54  ;;  %v5858_v35 = vmax.f32 %v1157_v30, 0.0  ;;  %v1116_v36 = vperm.slane %v939_v31, 0  ;;  %2250 = vmatmul.f32.vlgmr.msra.gmra.mxu1 %v5856_v29  ;;  %v1556_v23 = vld [vmem:[#allocation11 + $0xb88] sm:$0xff] }
 0x123   : > { %v1851_v57 = vld [vmem:[#allocation11 + $0x14c0] sm:$0xff]  ;;  %2374 = vmatpush.msrb.mxu3 %v2187_v55  ;;  %2227 = vmatmul.f32.vlgmr.msra.gmra.mxu0 %v5854_v28  ;;  %v1284_v55 = vld [vmem:[#allocation11 + $0x308] sm:$0xff] }
 0x124   : > { %v2027_v58 = vld [vmem:[#allocation11 + $0x1a40] sm:$0xff]  ;;  %2338 = vmatpush.msrb.mxu1 %v1851_v57  ;;  %v1124_v41 = vmul.f32 %v1116_v36, %v5840_v12  ;;  %v5864_v42 = vpop.permute.xlu0 %1110  ;;  %2273 = vmatmul.f32.vlgmr.msra.gmra.mxu2 %v5858_v35  ;;  %v1228_v24 = vld [vmem:[#allocation11 + $0x148] sm:$0xff] }
 0x125   : > { %v1715_v61 = vld [vmem:[#allocation11 + $0x1080] sm:$0xff]  ;;  %2355 = vmatpush.msrb.mxu2 %v2027_v58  ;;  %v1129_v45 = vmul.f32 %v1113_v63, %v5864_v42  ;;  %v1130_v46 = vmul.f32 %v1114_v0, %v5864_v42  ;;  %v1131_v47 = vmul.f32 %v1115_v18, %v5864_v42  ;;  %v1132_v54 = vmul.f32 %v1116_v36, %v5864_v42  ;;  %v1412_v58 = vld [vmem:[#allocation11 + $0x708] sm:$0xff] }
 0x126   : > { %v2179_v62 = vld [vmem:[#allocation11 + $0x1f00] sm:$0xff]  ;;  %2316 = vmatpush.msrb.mxu0 %v1715_v61  ;;  %v1158_v53 = vadd.f32 %v1142_v37, %v1124_v41  ;;  %v1276_v0 = vld [vmem:[#allocation11 + $0x2c8] sm:$0xff] }
 0x127   : > { %v1843_v1 = vld [vmem:[#allocation11 + $0x1480] sm:$0xff]  ;;  %2375 = vmatpush.msrb.mxu3 %v2179_v62  ;;  %v1163_v50 = vadd.f32 %v1139_v7, %v1129_v45  ;;  %v1164_v57 = vadd.f32 %v1140_v8, %v1130_v46  ;;  %v1165_v51 = vadd.f32 %v1141_v19, %v1131_v47  ;;  %v1260_v8 = vld [vmem:[#allocation11 + $0x248] sm:$0xff] }
 0x128   : > { %v2019_v2 = vld [vmem:[#allocation11 + $0x1a00] sm:$0xff]  ;;  %2339 = vmatpush.msrb.mxu1 %v1843_v1  ;;  %v5879_v59 = vmax.f32 %v1158_v53, 0.0  ;;  %v1166_v1 = vadd.f32 %v1142_v37, %v1132_v54  ;;  %v1244_v18 = vld [vmem:[#allocation11 + $0x1c8] sm:$0xff]  ;;  %v770_v53 = vperm.slane %v5824_v16, 5 }
 0x129   : > { %v1707_v5 = vld [vmem:[#allocation11 + $0x1040] sm:$0xff]  ;;  %2356 = vmatpush.msrb.mxu2 %v2019_v2  ;;  %v5881_v61 = vmax.f32 %v1163_v50, 0.0  ;;  %v5883_v62 = vmax.f32 %v1164_v57, 0.0  ;;  %v5885_v63 = vmax.f32 %v1165_v51, 0.0  ;;  %v1404_v2 = vld [vmem:[#allocation11 + $0x6c8] sm:$0xff]  ;;  %v1143_v51 = vperm.slane %v5833_v60, 4 }
 0x12a   : > { %v2171_v6 = vld [vmem:[#allocation11 + $0x1ec0] sm:$0xff]  ;;  %2317 = vmatpush.msrb.mxu0 %v1707_v5  ;;  %2296 = vmatmul.f32.vlgmr.msra.gmra.mxu3 %v5879_v59  ;;  %v1356_v27 = vld [vmem:[#allocation11 + $0x548] sm:$0xff] }
 0x12b   : > { %v1835_v10 = vld [vmem:[#allocation11 + $0x1440] sm:$0xff]  ;;  %2376 = vmatpush.msrb.mxu3 %v2171_v6  ;;  %2230 = vmatmul.f32.gmra.mxu0 %v5881_v61  ;;  %v1396_v6 = vld [vmem:[#allocation11 + $0x688] sm:$0xff] }
 0x12c   : > { %v2011_v11 = vld [vmem:[#allocation11 + $0x19c0] sm:$0xff]  ;;  %2340 = vmatpush.msrb.mxu1 %v1835_v10  ;;  %2276 = vmatmul.f32.gmra.mxu2 %v5885_v63  ;;  %v5891_v10 = vmax.f32 %v1166_v1, 0.0  ;;  %v1548_v30 = vld [vmem:[#allocation11 + $0xb48] sm:$0xff] }
 0x12d   : > { %v1699_v13 = vld [vmem:[#allocation11 + $0x1000] sm:$0xff]  ;;  %2357 = vmatpush.msrb.mxu2 %v2011_v11  ;;  %2253 = vmatmul.f32.gmra.mxu1 %v5883_v62  ;;  %v1388_v11 = vld [vmem:[#allocation11 + $0x648] sm:$0xff] }
 0x12e   : > { %v2163_v14 = vld [vmem:[#allocation11 + $0x1e80] sm:$0xff]  ;;  %2318 = vmatpush.msrb.mxu0 %v1699_v13  ;;  %v1220_v31 = vld [vmem:[#allocation11 + $0x108] sm:$0xff] }
 0x12f   : > { %v1827_v20 = vld [vmem:[#allocation11 + $0x1400] sm:$0xff]  ;;  %2377 = vmatpush.msrb.mxu3 %v2163_v14  ;;  %v1252_v14 = vld [vmem:[#allocation11 + $0x208] sm:$0xff] }
 0x130   : > { %v2003_v21 = vld [vmem:[#allocation11 + $0x1980] sm:$0xff]  ;;  %2341 = vmatpush.msrb.mxu1 %v1827_v20  ;;  %2395 = vmatpush.msra.mxu0 %v1308_v32  ;;  %v1564_v20 = vld [vmem:[#allocation11 + $0xbc8] sm:$0xff] }
 0x131   : > { %v2155_v48 = vld [vmem:[#allocation11 + $0x1e40] sm:$0xff]  ;;  %2358 = vmatpush.msrb.mxu2 %v2003_v21  ;;  %v1236_v21 = vld [vmem:[#allocation11 + $0x188] sm:$0xff] }
 0x132   : > { %v1995_v26 = vld [vmem:[#allocation11 + $0x1940] sm:$0xff]  ;;  %2378 = vmatpush.msrb.mxu3 %v2155_v48  ;;  %2418 = vmatpush.msra.mxu1 %v1436_v33  ;;  %v1364_v48 = vld [vmem:[#allocation11 + $0x588] sm:$0xff] }
 0x133   : > { %2359 = vmatpush.msrb.mxu2 %v1995_v26  ;;  %v2147_v34 = vld [vmem:[#allocation11 + $0x1e00] sm:$0xff]  ;;  %2396 = vmatpush.msra.mxu0 %v1300_v38  ;;  %v769_v26 = vperm.slane %v5824_v16, 4  ;;  %v1348_v33 = vld [vmem:[#allocation11 + $0x508] sm:$0xff] }
 0x134   : > { %v1987_v40 = vld [vmem:[#allocation11 + $0x1900] sm:$0xff]  ;;  %2379 = vmatpush.msrb.mxu3 %v2147_v34  ;;  %2419 = vmatpush.msra.mxu1 %v1428_v39  ;;  %v1540_v34 = vld [vmem:[#allocation11 + $0xb08] sm:$0xff] }
 0x135   : > { %v2139_v52 = vld [vmem:[#allocation11 + $0x1dc0] sm:$0xff]  ;;  %2360 = vmatpush.msrb.mxu2 %v1987_v40  ;;  %2397 = vmatpush.msra.mxu0 %v1292_v44  ;;  %v1212_v37 = vld [vmem:[#allocation11 + $0xc8] sm:$0xff] }
 0x136   : > { %v1979_v56 = vld [vmem:[#allocation11 + $0x18c0] sm:$0xff]  ;;  %2420 = vmatpush.msra.mxu1 %v1420_v49  ;;  %2380 = vmatpush.msrb.mxu3 %v2139_v52  ;;  %v1692_v38 = vld [vmem:[#allocation11 + $0xfc8] sm:$0xff] }
 0x137   : > { %2398 = vmatpush.msra.mxu0 %v1284_v55  ;;  %2361 = vmatpush.msrb.mxu2 %v1979_v56  ;;  %v2131_v3 = vld [vmem:[#allocation11 + $0x1d80] sm:$0xff]  ;;  %v1340_v40 = vld [vmem:[#allocation11 + $0x4c8] sm:$0xff] }
 0x138   : > { %2421 = vmatpush.msra.mxu1 %v1412_v58  ;;  %v1971_v5 = vld [vmem:[#allocation11 + $0x1880] sm:$0xff]  ;;  %2381 = vmatpush.msrb.mxu3 %v2131_v3  ;;  %v1532_v41 = vld [vmem:[#allocation11 + $0xac8] sm:$0xff] }
 0x139   : > { %2399 = vmatpush.msra.mxu0 %v1276_v0  ;;  %v2123_v7 = vld [vmem:[#allocation11 + $0x1d40] sm:$0xff]  ;;  %2362 = vmatpush.msrb.mxu2 %v1971_v5  ;;  %v958_v36 = vpop.f32.mrf.mxu0  ;;  %v1204_v44 = vld [vmem:[#allocation11 + $0x88] sm:$0xff] }
 0x13a   : > { %2422 = vmatpush.msra.mxu1 %v1404_v2  ;;  %v1963_v9 = vld [vmem:[#allocation11 + $0x1840] sm:$0xff]  ;;  %2382 = vmatpush.msrb.mxu3 %v2123_v7  ;;  %v959_v39 = vadd.f32 %v958_v36, %v769_v26  ;;  %v1684_v45 = vld [vmem:[#allocation11 + $0xf88] sm:$0xff] }
 0x13b   : > { %2400 = vmatpush.msra.mxu0 %v1268_v4  ;;  %v2115_v13 = vld [vmem:[#allocation11 + $0x1d00] sm:$0xff]  ;;  %2363 = vmatpush.msrb.mxu2 %v1963_v9  ;;  %v1332_v47 = vld [vmem:[#allocation11 + $0x488] sm:$0xff] }
 0x13c   : > { %2423 = vmatpush.msra.mxu1 %v1396_v6  ;;  %v1955_v17 = vld [vmem:[#allocation11 + $0x1800] sm:$0xff]  ;;  %2383 = vmatpush.msrb.mxu3 %v2115_v13  ;;  %v978_v46 = vpop.f32.mrf.mxu1  ;;  %v1524_v49 = vld [vmem:[#allocation11 + $0xa88] sm:$0xff] }
 0x13d   : > { %2401 = vmatpush.msra.mxu0 %v1260_v8  ;;  %v2107_v19 = vld [vmem:[#allocation11 + $0x1cc0] sm:$0xff]  ;;  %2299 = vmatmul.f32.gmra.mxu3 %v5891_v10  ;;  %v979_v52 = vadd.f32 %v978_v46, %v959_v39  ;;  %v1196_v54 = vld [vmem:[#allocation11 + $0x48] sm:$0xff] }
 0x13e   : > { %2424 = vmatpush.msra.mxu1 %v1388_v11  ;;  %2364 = vmatpush.msrb.mxu2 %v1955_v17  ;;  %v2099_v22 = vld [vmem:[#allocation11 + $0x1c80] sm:$0xff]  ;;  %v1676_v55 = vld [vmem:[#allocation11 + $0xf48] sm:$0xff] }
 0x13f   : > { %2402 = vmatpush.msra.mxu0 %v1252_v14  ;;  %2384 = vmatpush.msrb.mxu3 %v2107_v19  ;;  %v2091_v25 = vld [vmem:[#allocation11 + $0x1c40] sm:$0xff]  ;;  %v1324_v56 = vld [vmem:[#allocation11 + $0x448] sm:$0xff]  ;;  %v1117_v57 = vperm.slane %v979_v52, 0 }
 0x140   : > { %2425 = vmatpush.msra.mxu1 %v1380_v15  ;;  %2441 = vmatpush.msra.mxu2 %v1564_v20  ;;  %v2083_v32 = vld [vmem:[#allocation11 + $0x1c00] sm:$0xff]  ;;  %v1516_v50 = vld [vmem:[#allocation11 + $0xa48] sm:$0xff]  ;;  %v998_v1 = vpop.f32.mrf.mxu2  ;;  %v1144_v20 = vperm.slane %v5833_v60, 5 }
 0x141   : > { %2403 = vmatpush.msra.mxu0 %v1244_v18  ;;  %2385 = vmatpush.msrb.mxu3 %v2099_v22  ;;  %v1188_v58 = vld [vmem:[#allocation11 + $0x8] sm:$0xff]  ;;  %v1125_v4 = vmul.f32 %v1117_v57, %v5840_v12  ;;  %v999_v5 = vadd.f32 %v998_v1, %v770_v53  ;;  %v1133_v15 = vmul.f32 %v1117_v57, %v5864_v42 }
 0x142   : > { %2426 = vmatpush.msra.mxu1 %v1372_v43  ;;  %2442 = vmatpush.msra.mxu2 %v1556_v23  ;;  %v1668_v0 = vld [vmem:[#allocation11 + $0xf08] sm:$0xff] }
 0x143   : > { %2404 = vmatpush.msra.mxu0 %v1236_v21  ;;  %2386 = vmatpush.msrb.mxu3 %v2091_v25  ;;  %v1316_v2 = vld [vmem:[#allocation11 + $0x408] sm:$0xff]  ;;  %v1159_v8 = vadd.f32 %v1143_v51, %v1125_v4  ;;  %v1018_v9 = vpop.f32.mrf.mxu3  ;;  %v1167_v25 = vadd.f32 %v1143_v51, %v1133_v15 }
 0x144   : > { %2427 = vmatpush.msra.mxu1 %v1364_v48  ;;  %2443 = vmatpush.msra.mxu2 %v1548_v30  ;;  %v1508_v3 = vld [vmem:[#allocation11 + $0xa08] sm:$0xff]  ;;  %v1019_v13 = vadd.f32 %v1018_v9, %v999_v5 }
 0x145   : > { %2405 = vmatpush.msra.mxu0 %v1228_v24  ;;  %2387 = vmatpush.msrb.mxu3 %v2083_v32  ;;  %v1660_v6 = vld [vmem:[#allocation11 + $0xec8] sm:$0xff]  ;;  %v5899_v17 = vmax.f32 %v1159_v8, 0.0 }
 0x146   : > { %2428 = vmatpush.msra.mxu1 %v1356_v27  ;;  %2444 = vmatpush.msra.mxu2 %v1540_v34  ;;  %v1500_v7 = vld [vmem:[#allocation11 + $0x9c8] sm:$0xff]  ;;  %v1118_v43 = vperm.slane %v1019_v13, 0 }
 0x147   : > { %2406 = vmatpush.msra.mxu0 %v1220_v31  ;;  %2464 = vmatpush.msra.mxu3 %v1692_v38  ;;  %v1652_v11 = vld [vmem:[#allocation11 + $0xe88] sm:$0xff] }
 0x148   : > { %2429 = vmatpush.msra.mxu1 %v1348_v33  ;;  %2445 = vmatpush.msra.mxu2 %v1532_v41  ;;  %v1492_v14 = vld [vmem:[#allocation11 + $0x988] sm:$0xff]  ;;  %v1126_v23 = vmul.f32 %v1118_v43, %v5840_v12  ;;  %v1134_v33 = vmul.f32 %v1118_v43, %v5864_v42 }
 0x149   : > { %2407 = vmatpush.msra.mxu0 %v1212_v37  ;;  %2465 = vmatpush.msra.mxu3 %v1684_v45  ;;  %v1820_v18 = vld [vmem:[#allocation11 + $0x13c8] sm:$0xff]  ;;  %v5907_v37 = vmax.f32 %v1167_v25, 0.0 }
 0x14a   : > { %2430 = vmatpush.msra.mxu1 %v1340_v40  ;;  %2446 = vmatpush.msra.mxu2 %v1524_v49  ;;  %v1644_v19 = vld [vmem:[#allocation11 + $0xe48] sm:$0xff]  ;;  %v1160_v30 = vadd.f32 %v1144_v20, %v1126_v23  ;;  %v1168_v46 = vadd.f32 %v1144_v20, %v1134_v33  ;;  %v772_v20 = vperm.slane %v5824_v16, 7 }
 0x14b   : > { %2408 = vmatpush.msra.mxu0 %v1204_v44  ;;  %2466 = vmatpush.msra.mxu3 %v1676_v55  ;;  %v1484_v21 = vld [vmem:[#allocation11 + $0x948] sm:$0xff] }
 0x14c   : > { %2431 = vmatpush.msra.mxu1 %v1332_v47  ;;  %2447 = vmatpush.msra.mxu2 %v1516_v50  ;;  %v1812_v22 = vld [vmem:[#allocation11 + $0x1388] sm:$0xff]  ;;  %v5905_v34 = vmax.f32 %v1160_v30, 0.0  ;;  %v5911_v50 = vmax.f32 %v1168_v46, 0.0  ;;  %v1146_v46 = vperm.slane %v5833_v60, 7 }
 0x14d   : > { %2409 = vmatpush.msra.mxu0 %v1196_v54  ;;  %2467 = vmatpush.msra.mxu3 %v1668_v0  ;;  %v1636_v48 = vld [vmem:[#allocation11 + $0xe08] sm:$0xff] }
 0x14e   : > { %2432 = vmatpush.msra.mxu1 %v1324_v56  ;;  %2448 = vmatpush.msra.mxu2 %v1508_v3  ;;  %v1476_v24 = vld [vmem:[#allocation11 + $0x908] sm:$0xff]  ;;  %v771_v3 = vperm.slane %v5824_v16, 6 }
 0x14f   : > { %2410 = vmatpush.msra.mxu0 %v1188_v58  ;;  %2468 = vmatpush.msra.mxu3 %v1660_v6  ;;  %v1804_v26 = vld [vmem:[#allocation11 + $0x1348] sm:$0xff] }
 0x150   : > { %2433 = vmatpush.msra.mxu1 %v1316_v2  ;;  %2449 = vmatpush.msra.mxu2 %v1500_v7  ;;  %v1628_v27 = vld [vmem:[#allocation11 + $0xdc8] sm:$0xff] }
 0x151   : > { %2469 = vmatpush.msra.mxu3 %v1652_v11  ;;  %2319 = vmatmul.f32.vlgmr.msrb.gmra.mxu0 %v5899_v17  ;;  %v1468_v31 = vld [vmem:[#allocation11 + $0x8c8] sm:$0xff] }
 0x152   : > { %2450 = vmatpush.msra.mxu2 %v1492_v14  ;;  %2487 = vmatpush.msrb.mxu0 %v1820_v18  ;;  %v1796_v32 = vld [vmem:[#allocation11 + $0x1308] sm:$0xff] }
 0x153   : > { %2470 = vmatpush.msra.mxu3 %v1644_v19  ;;  %v1948_v36 = vld [vmem:[#allocation11 + $0x17c8] sm:$0xff]  ;;  %2342 = vmatmul.f32.vlgmr.msrb.gmra.mxu1 %v5905_v34 }
 0x154   : > { %2451 = vmatpush.msra.mxu2 %v1484_v21  ;;  %2488 = vmatpush.msrb.mxu0 %v1812_v22  ;;  %v1788_v38 = vld [vmem:[#allocation11 + $0x12c8] sm:$0xff] }
 0x155   : > { %2471 = vmatpush.msra.mxu3 %v1636_v48  ;;  %v1620_v39 = vld [vmem:[#allocation11 + $0xd88] sm:$0xff]  ;;  %2510 = vmatpush.msrb.mxu1 %v1948_v36  ;;  %v1145_v48 = vperm.slane %v5833_v60, 6  ;;  %v1309_v36 = vld [vmem:[#allocation11 + $0x3d0] sm:$0xff] }
 0x156   : > { %2452 = vmatpush.msra.mxu2 %v1476_v24  ;;  %2489 = vmatpush.msrb.mxu0 %v1804_v26  ;;  %v1940_v40 = vld [vmem:[#allocation11 + $0x1788] sm:$0xff]  ;;  %v1285_v60 = vld [vmem:[#allocation11 + $0x310] sm:$0xff] }
 0x157   : > { %2472 = vmatpush.msra.mxu3 %v1628_v27  ;;  %v1460_v41 = vld [vmem:[#allocation11 + $0x888] sm:$0xff]  ;;  %2511 = vmatpush.msrb.mxu1 %v1940_v40 }
 0x158   : > { %2453 = vmatpush.msra.mxu2 %v1468_v31  ;;  %2490 = vmatpush.msrb.mxu0 %v1796_v32  ;;  %v1780_v44 = vld [vmem:[#allocation11 + $0x1288] sm:$0xff] }
 0x159   : > { %2322 = vmatmul.f32.gmra.mxu0 %v5907_v37  ;;  %v1612_v45 = vld [vmem:[#allocation11 + $0xd48] sm:$0xff]  ;;  %2473 = vmatpush.msra.mxu3 %v1620_v39 }
 0x15a   : > { %2491 = vmatpush.msrb.mxu0 %v1788_v38  ;;  %v1932_v47 = vld [vmem:[#allocation11 + $0x1748] sm:$0xff]  ;;  %2454 = vmatpush.msra.mxu2 %v1460_v41 }
 0x15b   : > { %v1452_v49 = vld [vmem:[#allocation11 + $0x848] sm:$0xff]  ;;  %2474 = vmatpush.msra.mxu3 %v1612_v45  ;;  %2512 = vmatpush.msrb.mxu1 %v1932_v47  ;;  %v1038_v8 = vpop.f32.mrf.mxu0  ;;  %v1301_v47 = vld [vmem:[#allocation11 + $0x390] sm:$0xff] }
 0x15c   : > { %v1772_v52 = vld [vmem:[#allocation11 + $0x1248] sm:$0xff]  ;;  %2492 = vmatpush.msrb.mxu0 %v1780_v44  ;;  %2455 = vmatpush.msra.mxu2 %v1452_v49  ;;  %v1039_v11 = vadd.f32 %v1038_v8, %v771_v3  ;;  %v1277_v3 = vld [vmem:[#allocation11 + $0x2d0] sm:$0xff] }
 0x15d   : > { %v1604_v53 = vld [vmem:[#allocation11 + $0xd08] sm:$0xff]  ;;  %2345 = vmatmul.f32.gmra.mxu1 %v5911_v50  ;;  %v1058_v14 = vpop.f32.mrf.mxu1 }
 0x15e   : > { %v1924_v54 = vld [vmem:[#allocation11 + $0x1708] sm:$0xff]  ;;  %2493 = vmatpush.msrb.mxu0 %v1772_v52  ;;  %2475 = vmatpush.msra.mxu3 %v1604_v53  ;;  %v1059_v19 = vadd.f32 %v1058_v14, %v1039_v11  ;;  %v1269_v11 = vld [vmem:[#allocation11 + $0x290] sm:$0xff] }
 0x15f   : > { %v1444_v55 = vld [vmem:[#allocation11 + $0x808] sm:$0xff]  ;;  %2513 = vmatpush.msrb.mxu1 %v1924_v54  ;;  %v1293_v54 = vld [vmem:[#allocation11 + $0x350] sm:$0xff] }
 0x160   : > { %v1764_v56 = vld [vmem:[#allocation11 + $0x1208] sm:$0xff]  ;;  %2456 = vmatpush.msra.mxu2 %v1444_v55  ;;  %v1119_v22 = vperm.slane %v1059_v19, 0  ;;  %v1413_v19 = vld [vmem:[#allocation11 + $0x710] sm:$0xff] }
 0x161   : > { %v1916_v57 = vld [vmem:[#allocation11 + $0x16c8] sm:$0xff]  ;;  %2494 = vmatpush.msrb.mxu0 %v1764_v56 }
 0x162   : > { %v1756_v51 = vld [vmem:[#allocation11 + $0x11c8] sm:$0xff]  ;;  %2514 = vmatpush.msrb.mxu1 %v1916_v57  ;;  %2411 = vmatmul.f32.vlgmr.msra.gmra.mxu0 %v5854_v28  ;;  %v1127_v25 = vmul.f32 %v1119_v22, %v5840_v12  ;;  %v1078_v26 = vpop.f32.mrf.mxu2  ;;  %v1135_v44 = vmul.f32 %v1119_v22, %v5864_v42  ;;  %v1253_v22 = vld [vmem:[#allocation11 + $0x210] sm:$0xff] }
 0x163   : > { %v1596_v58 = vld [vmem:[#allocation11 + $0xcc8] sm:$0xff]  ;;  %2495 = vmatpush.msrb.mxu0 %v1756_v51  ;;  %v1079_v30 = vadd.f32 %v1078_v26, %v772_v20  ;;  %v1397_v26 = vld [vmem:[#allocation11 + $0x690] sm:$0xff] }
 0x164   : > { %v1908_v0 = vld [vmem:[#allocation11 + $0x1688] sm:$0xff]  ;;  %2476 = vmatpush.msra.mxu3 %v1596_v58  ;;  %v1161_v16 = vadd.f32 %v1145_v48, %v1127_v25  ;;  %v1098_v32 = vpop.f32.mrf.mxu3  ;;  %v1169_v57 = vadd.f32 %v1145_v48, %v1135_v44  ;;  %v1437_v58 = vld [vmem:[#allocation11 + $0x7d0] sm:$0xff] }
 0x165   : > { %v1748_v1 = vld [vmem:[#allocation11 + $0x1188] sm:$0xff]  ;;  %2515 = vmatpush.msrb.mxu1 %v1908_v0  ;;  %v1099_v38 = vadd.f32 %v1098_v32, %v1079_v30  ;;  %v1405_v48 = vld [vmem:[#allocation11 + $0x6d0] sm:$0xff] }
 0x166   : > { %v1588_v2 = vld [vmem:[#allocation11 + $0xc88] sm:$0xff]  ;;  %2496 = vmatpush.msrb.mxu0 %v1748_v1  ;;  %2434 = vmatmul.f32.vlgmr.msra.gmra.mxu1 %v5856_v29  ;;  %v5921_v39 = vmax.f32 %v1161_v16, 0.0  ;;  %v1245_v25 = vld [vmem:[#allocation11 + $0x1d0] sm:$0xff] }
 0x167   : > { %v1900_v4 = vld [vmem:[#allocation11 + $0x1648] sm:$0xff]  ;;  %2477 = vmatpush.msra.mxu3 %v1588_v2  ;;  %v1120_v45 = vperm.slane %v1099_v38, 0  ;;  %v1389_v16 = vld [vmem:[#allocation11 + $0x650] sm:$0xff] }
 0x168   : > { %v1740_v5 = vld [vmem:[#allocation11 + $0x1148] sm:$0xff]  ;;  %2516 = vmatpush.msrb.mxu1 %v1900_v4  ;;  %6536 = vst [vmem:[#allocation24_spill] sm:$0xff] %v5921_v39  ;;  %2365 = vmatmul.f32.vlgmr.msrb.gmra.mxu2 %v5921_v39  ;;  %v5932_v4 = vmax.f32 %v1169_v57, 0.0  ;;  %v1381_v38 = vld [vmem:[#allocation11 + $0x610] sm:$0xff] }
 0x169   : > { %v1580_v6 = vld [vmem:[#allocation11 + $0xc48] sm:$0xff]  ;;  %2497 = vmatpush.msrb.mxu0 %v1740_v5  ;;  %v1128_v53 = vmul.f32 %v1120_v45, %v5840_v12  ;;  %v1136_v12 = vmul.f32 %v1120_v45, %v5864_v42  ;;  %v1221_v44 = vld [vmem:[#allocation11 + $0x110] sm:$0xff] }
 0x16a   : > { %v1892_v7 = vld [vmem:[#allocation11 + $0x1608] sm:$0xff]  ;;  %2478 = vmatpush.msra.mxu3 %v1580_v6  ;;  %2414 = vmatmul.f32.gmra.mxu0 %v5881_v61  ;;  %6538 = vst [vmem:[#allocation26_spill] sm:$0xff] %v5932_v4  ;;  %v1373_v45 = vld [vmem:[#allocation11 + $0x5d0] sm:$0xff] }
 0x16b   : > { %v1732_v9 = vld [vmem:[#allocation11 + $0x1108] sm:$0xff]  ;;  %2517 = vmatpush.msrb.mxu1 %v1892_v7  ;;  %v1162_v51 = vadd.f32 %v1146_v46, %v1128_v53  ;;  %v1429_v7 = vld [vmem:[#allocation11 + $0x790] sm:$0xff]  ;;  %v1170_v42 = vadd.f32 %v1146_v46, %v1136_v12 }
 0x16c   : > { %v1884_v13 = vld [vmem:[#allocation11 + $0x15c8] sm:$0xff]  ;;  %2498 = vmatpush.msrb.mxu0 %v1732_v9  ;;  %v1189_v12 = vld [vmem:[#allocation11 + $0x10] sm:$0xff] }
 0x16d   : > { %v1724_v15 = vld [vmem:[#allocation11 + $0x10c8] sm:$0xff]  ;;  %2518 = vmatpush.msrb.mxu1 %v1884_v13  ;;  %v5929_v1 = vmax.f32 %v1162_v51, 0.0  ;;  %v1421_v13 = vld [vmem:[#allocation11 + $0x750] sm:$0xff]  ;;  %v5938_v20 = vmax.f32 %v1170_v42, 0.0 }
 0x16e   : > { %v1572_v18 = vld [vmem:[#allocation11 + $0xc08] sm:$0xff]  ;;  %2499 = vmatpush.msrb.mxu0 %v1724_v15  ;;  %2437 = vmatmul.f32.gmra.mxu1 %v5883_v62  ;;  %v1813_v42 = vld [vmem:[#allocation11 + $0x1390] sm:$0xff] }
 0x16f   : > { %v1876_v43 = vld [vmem:[#allocation11 + $0x1588] sm:$0xff]  ;;  %2479 = vmatpush.msra.mxu3 %v1572_v18  ;;  %6537 = vst [vmem:[#allocation25_spill] sm:$0xff] %v5929_v1  ;;  %v1261_v18 = vld [vmem:[#allocation11 + $0x250] sm:$0xff] }
 0x170   : > { %v1716_v21 = vld [vmem:[#allocation11 + $0x1088] sm:$0xff]  ;;  %2519 = vmatpush.msrb.mxu1 %v1876_v43  ;;  %2388 = vmatmul.f32.vlgmr.msrb.gmra.mxu3 %v5929_v1  ;;  %6539 = vst [vmem:[#allocation27_spill] sm:$0xff] %v5938_v20 }
 0x171   : > { %v1868_v23 = vld [vmem:[#allocation11 + $0x1548] sm:$0xff]  ;;  %2500 = vmatpush.msrb.mxu0 %v1716_v21  ;;  %2368 = vmatmul.f32.gmra.mxu2 %v5932_v4 }
 0x172   : > { %v1708_v24 = vld [vmem:[#allocation11 + $0x1048] sm:$0xff]  ;;  %2520 = vmatpush.msrb.mxu1 %v1868_v23 }
 0x173   : > { %v1860_v27 = vld [vmem:[#allocation11 + $0x1508] sm:$0xff]  ;;  %2501 = vmatpush.msrb.mxu0 %v1708_v24 }
 0x174   : > { %v1700_v31 = vld [vmem:[#allocation11 + $0x1008] sm:$0xff]  ;;  %2521 = vmatpush.msrb.mxu1 %v1860_v27 }
 0x175   : > { %v1852_v33 = vld [vmem:[#allocation11 + $0x14c8] sm:$0xff]  ;;  %2502 = vmatpush.msrb.mxu0 %v1700_v31  ;;  %v1237_v31 = vld [vmem:[#allocation11 + $0x190] sm:$0xff] }
 0x176   : > { %v2076_v40 = vld [vmem:[#allocation11 + $0x1bc8] sm:$0xff]  ;;  %2522 = vmatpush.msrb.mxu1 %v1852_v33  ;;  %2503 = vmatmul.f32.vlgmr.msrb.gmra.mxu0 %v5899_v17 }
 0x177   : > { %v1844_v41 = vld [vmem:[#allocation11 + $0x1488] sm:$0xff]  ;;  %2579 = vmatpush.msra.mxu0 %v1309_v36  ;;  %2533 = vmatpush.msrb.mxu2 %v2076_v40  ;;  %v1229_v36 = vld [vmem:[#allocation11 + $0x150] sm:$0xff] }
 0x178   : > { %v2068_v49 = vld [vmem:[#allocation11 + $0x1b88] sm:$0xff]  ;;  %2523 = vmatpush.msrb.mxu1 %v1844_v41  ;;  %2391 = vmatmul.f32.gmra.mxu3 %v5938_v20 }
 0x179   : > { %v1836_v52 = vld [vmem:[#allocation11 + $0x1448] sm:$0xff]  ;;  %2580 = vmatpush.msra.mxu0 %v1301_v47  ;;  %2534 = vmatpush.msrb.mxu2 %v2068_v49  ;;  %v1213_v49 = vld [vmem:[#allocation11 + $0xd0] sm:$0xff] }
 0x17a   : > { %v2060_v55 = vld [vmem:[#allocation11 + $0x1b48] sm:$0xff]  ;;  %2524 = vmatpush.msrb.mxu1 %v1836_v52  ;;  %2457 = vmatmul.f32.vlgmr.msra.gmra.mxu2 %v5858_v35  ;;  %v1365_v52 = vld [vmem:[#allocation11 + $0x590] sm:$0xff] }
 0x17b   : > { %v1828_v56 = vld [vmem:[#allocation11 + $0x1408] sm:$0xff]  ;;  %2581 = vmatpush.msra.mxu0 %v1293_v54  ;;  %2535 = vmatpush.msrb.mxu2 %v2060_v55  ;;  %v1205_v55 = vld [vmem:[#allocation11 + $0x90] sm:$0xff] }
 0x17c   : > { %v2052_v0 = vld [vmem:[#allocation11 + $0x1b08] sm:$0xff]  ;;  %2525 = vmatpush.msrb.mxu1 %v1828_v56  ;;  %v1357_v56 = vld [vmem:[#allocation11 + $0x550] sm:$0xff] }
 0x17d   : > { %v2204_v2 = vld [vmem:[#allocation11 + $0x1fc8] sm:$0xff]  ;;  %2582 = vmatpush.msra.mxu0 %v1285_v60  ;;  %2536 = vmatpush.msrb.mxu2 %v2052_v0  ;;  %v1197_v60 = vld [vmem:[#allocation11 + $0x50] sm:$0xff] }
 0x17e   : > { %2602 = vmatpush.msra.mxu1 %v1437_v58  ;;  %v2044_v5 = vld [vmem:[#allocation11 + $0x1ac8] sm:$0xff]  ;;  %2556 = vmatpush.msrb.mxu3 %v2204_v2  ;;  %v1349_v58 = vld [vmem:[#allocation11 + $0x510] sm:$0xff] }
 0x17f   : > { %v2196_v6 = vld [vmem:[#allocation11 + $0x1f88] sm:$0xff]  ;;  %2526 = vmatmul.f32.vlgmr.msrb.gmra.mxu1 %v5905_v34  ;;  %2583 = vmatpush.msra.mxu0 %v1277_v3  ;;  %v1341_v3 = vld [vmem:[#allocation11 + $0x4d0] sm:$0xff] }
 0x180   : > { %v2036_v8 = vld [vmem:[#allocation11 + $0x1a88] sm:$0xff]  ;;  %2537 = vmatpush.msrb.mxu2 %v2044_v5  ;;  %2557 = vmatpush.msrb.mxu3 %v2196_v6  ;;  %v1565_v5 = vld [vmem:[#allocation11 + $0xbd0] sm:$0xff] }
 0x181   : > { %v2188_v9 = vld [vmem:[#allocation11 + $0x1f48] sm:$0xff]  ;;  %2603 = vmatpush.msra.mxu1 %v1429_v7  ;;  %2506 = vmatmul.f32.gmra.mxu0 %v5907_v37  ;;  %v1821_v6 = vld [vmem:[#allocation11 + $0x13d0] sm:$0xff] }
 0x182   : > { %v2028_v14 = vld [vmem:[#allocation11 + $0x1a48] sm:$0xff]  ;;  %2538 = vmatpush.msrb.mxu2 %v2036_v8  ;;  %2558 = vmatpush.msrb.mxu3 %v2188_v9  ;;  %v1333_v8 = vld [vmem:[#allocation11 + $0x490] sm:$0xff] }
 0x183   : > { %v2180_v15 = vld [vmem:[#allocation11 + $0x1f08] sm:$0xff]  ;;  %2584 = vmatpush.msra.mxu0 %v1269_v11  ;;  %2604 = vmatpush.msra.mxu1 %v1421_v13  ;;  %v1557_v9 = vld [vmem:[#allocation11 + $0xb90] sm:$0xff] }
 0x184   : > { %v2020_v43 = vld [vmem:[#allocation11 + $0x1a08] sm:$0xff]  ;;  %2539 = vmatpush.msrb.mxu2 %v2028_v14  ;;  %2559 = vmatpush.msrb.mxu3 %v2180_v15  ;;  %v1325_v13 = vld [vmem:[#allocation11 + $0x450] sm:$0xff] }
 0x185   : > { %v2172_v21 = vld [vmem:[#allocation11 + $0x1ec8] sm:$0xff]  ;;  %2585 = vmatpush.msra.mxu0 %v1261_v18  ;;  %2605 = vmatpush.msra.mxu1 %v1413_v19  ;;  %v1549_v14 = vld [vmem:[#allocation11 + $0xb50] sm:$0xff] }
 0x186   : > { %2540 = vmatpush.msrb.mxu2 %v2020_v43  ;;  %v2012_v23 = vld [vmem:[#allocation11 + $0x19c8] sm:$0xff]  ;;  %2560 = vmatpush.msrb.mxu3 %v2172_v21  ;;  %v1805_v15 = vld [vmem:[#allocation11 + $0x1350] sm:$0xff] }
 0x187   : > { %2586 = vmatpush.msra.mxu0 %v1253_v22  ;;  %v2164_v24 = vld [vmem:[#allocation11 + $0x1e88] sm:$0xff]  ;;  %2606 = vmatpush.msra.mxu1 %v1405_v48  ;;  %v1317_v19 = vld [vmem:[#allocation11 + $0x410] sm:$0xff] }
 0x188   : > { %v2004_v27 = vld [vmem:[#allocation11 + $0x1988] sm:$0xff]  ;;  %2529 = vmatmul.f32.gmra.mxu1 %v5911_v50  ;;  %2541 = vmatpush.msrb.mxu2 %v2012_v23  ;;  %v1541_v43 = vld [vmem:[#allocation11 + $0xb10] sm:$0xff] }
 0x189   : > { %v2156_v30 = vld [vmem:[#allocation11 + $0x1e48] sm:$0xff]  ;;  %2561 = vmatpush.msrb.mxu3 %v2164_v24  ;;  %2587 = vmatpush.msra.mxu0 %v1245_v25  ;;  %v1693_v21 = vld [vmem:[#allocation11 + $0xfd0] sm:$0xff] }
 0x18a   : > { %v1996_v32 = vld [vmem:[#allocation11 + $0x1948] sm:$0xff]  ;;  %2607 = vmatpush.msra.mxu1 %v1397_v26  ;;  %2542 = vmatpush.msrb.mxu2 %v2004_v27  ;;  %v1797_v22 = vld [vmem:[#allocation11 + $0x1310] sm:$0xff] }
 0x18b   : > { %v2148_v33 = vld [vmem:[#allocation11 + $0x1e08] sm:$0xff]  ;;  %2562 = vmatpush.msrb.mxu3 %v2156_v30  ;;  %2588 = vmatpush.msra.mxu0 %v1237_v31  ;;  %v1949_v48 = vld [vmem:[#allocation11 + $0x17d0] sm:$0xff] }
 0x18c   : > { %2608 = vmatpush.msra.mxu1 %v1389_v16  ;;  %2543 = vmatpush.msrb.mxu2 %v1996_v32  ;;  %v1988_v40 = vld [vmem:[#allocation11 + $0x1908] sm:$0xff]  ;;  %v1533_v23 = vld [vmem:[#allocation11 + $0xad0] sm:$0xff] }
 0x18d   : > { %v2140_v41 = vld [vmem:[#allocation11 + $0x1dc8] sm:$0xff]  ;;  %2563 = vmatpush.msrb.mxu3 %v2148_v33  ;;  %2589 = vmatpush.msra.mxu0 %v1229_v36  ;;  %v1685_v24 = vld [vmem:[#allocation11 + $0xf90] sm:$0xff] }
 0x18e   : > { %2609 = vmatpush.msra.mxu1 %v1381_v38  ;;  %2480 = vmatmul.f32.vlgmr.msra.gmra.mxu3 %v5879_v59  ;;  %v2132_v46 = vld [vmem:[#allocation11 + $0x1d88] sm:$0xff]  ;;  %v1789_v25 = vld [vmem:[#allocation11 + $0x12d0] sm:$0xff] }
 0x18f   : > { %2544 = vmatpush.msrb.mxu2 %v1988_v40  ;;  %2564 = vmatpush.msrb.mxu3 %v2140_v41  ;;  %v1980_v47 = vld [vmem:[#allocation11 + $0x18c8] sm:$0xff]  ;;  %v1941_v26 = vld [vmem:[#allocation11 + $0x1790] sm:$0xff] }
 0x190   : > { %2590 = vmatpush.msra.mxu0 %v1221_v44  ;;  %2610 = vmatpush.msra.mxu1 %v1373_v45  ;;  %v2124_v53 = vld [vmem:[#allocation11 + $0x1d48] sm:$0xff]  ;;  %v1525_v27 = vld [vmem:[#allocation11 + $0xa90] sm:$0xff] }
 0x191   : > { %2460 = vmatmul.f32.gmra.mxu2 %v5885_v63  ;;  %2565 = vmatpush.msrb.mxu3 %v2132_v46  ;;  %v1972_v54 = vld [vmem:[#allocation11 + $0x1888] sm:$0xff]  ;;  %v1677_v30 = vld [vmem:[#allocation11 + $0xf50] sm:$0xff] }
 0x192   : > { %2545 = vmatpush.msrb.mxu2 %v1980_v47  ;;  %2591 = vmatpush.msra.mxu0 %v1213_v49  ;;  %v2116_v57 = vld [vmem:[#allocation11 + $0x1d08] sm:$0xff]  ;;  %v1781_v31 = vld [vmem:[#allocation11 + $0x1290] sm:$0xff] }
 0x193   : > { %2611 = vmatpush.msra.mxu1 %v1365_v52  ;;  %2566 = vmatpush.msrb.mxu3 %v2124_v53  ;;  %v1964_v51 = vld [vmem:[#allocation11 + $0x1848] sm:$0xff]  ;;  %v1933_v16 = vld [vmem:[#allocation11 + $0x1750] sm:$0xff] }
 0x194   : > { %2546 = vmatpush.msrb.mxu2 %v1972_v54  ;;  %2592 = vmatpush.msra.mxu0 %v1205_v55  ;;  %v1956_v0 = vld [vmem:[#allocation11 + $0x1808] sm:$0xff]  ;;  %v1517_v32 = vld [vmem:[#allocation11 + $0xa50] sm:$0xff] }
 0x195   : > { %2612 = vmatpush.msra.mxu1 %v1357_v56  ;;  %2567 = vmatpush.msrb.mxu3 %v2116_v57  ;;  %v2108_v2 = vld [vmem:[#allocation11 + $0x1cc8] sm:$0xff]  ;;  %v1669_v33 = vld [vmem:[#allocation11 + $0xf10] sm:$0xff] }
 0x196   : > { %2547 = vmatpush.msrb.mxu2 %v1964_v51  ;;  %2593 = vmatpush.msra.mxu0 %v1197_v60  ;;  %v2100_v7 = vld [vmem:[#allocation11 + $0x1c88] sm:$0xff]  ;;  %v1773_v36 = vld [vmem:[#allocation11 + $0x1250] sm:$0xff] }
 0x197   : > { %2613 = vmatpush.msra.mxu1 %v1349_v58  ;;  %2483 = vmatmul.f32.gmra.mxu3 %v5891_v10  ;;  %v2092_v11 = vld [vmem:[#allocation11 + $0x1c48] sm:$0xff]  ;;  %v1925_v38 = vld [vmem:[#allocation11 + $0x1710] sm:$0xff] }
 0x198   : > { %2548 = vmatpush.msrb.mxu2 %v1956_v0  ;;  %2568 = vmatpush.msrb.mxu3 %v2108_v2  ;;  %v2084_v18 = vld [vmem:[#allocation11 + $0x1c08] sm:$0xff]  ;;  %v1509_v40 = vld [vmem:[#allocation11 + $0xa10] sm:$0xff] }
 0x199   : > { %2594 = vmatpush.msra.mxu0 %v1189_v12  ;;  %2614 = vmatpush.msra.mxu1 %v1341_v3  ;;  %v1661_v41 = vld [vmem:[#allocation11 + $0xed0] sm:$0xff] }
 0x19a   : > { %2595 = vmatmul.f32.vlgmr.msra.gmra.mxu0 %v5854_v28  ;;  %2625 = vmatpush.msra.mxu2 %v1565_v5  ;;  %v1765_v44 = vld [vmem:[#allocation11 + $0x1210] sm:$0xff] }
 0x19b   : > { %2671 = vmatpush.msrb.mxu0 %v1821_v6  ;;  %2549 = vmatmul.f32.vlgmr.msrb.gmra.mxu2 %v5921_v39  ;;  %v1917_v45 = vld [vmem:[#allocation11 + $0x16d0] sm:$0xff] }
 0x19c   : > { %2569 = vmatpush.msrb.mxu3 %v2100_v7  ;;  %2615 = vmatpush.msra.mxu1 %v1333_v8  ;;  %v1501_v46 = vld [vmem:[#allocation11 + $0x9d0] sm:$0xff] }
 0x19d   : > { %2626 = vmatpush.msra.mxu2 %v1557_v9  ;;  %2672 = vmatpush.msrb.mxu0 %v1813_v42  ;;  %v1653_v47 = vld [vmem:[#allocation11 + $0xe90] sm:$0xff] }
 0x19e   : > { %2570 = vmatpush.msrb.mxu3 %v2092_v11  ;;  %2616 = vmatpush.msra.mxu1 %v1325_v13  ;;  %v1757_v49 = vld [vmem:[#allocation11 + $0x11d0] sm:$0xff] }
 0x19f   : > { %2627 = vmatpush.msra.mxu2 %v1549_v14  ;;  %2673 = vmatpush.msrb.mxu0 %v1805_v15  ;;  %v1909_v52 = vld [vmem:[#allocation11 + $0x1690] sm:$0xff] }
 0x1a0   : > { %2571 = vmatpush.msrb.mxu3 %v2084_v18  ;;  %2617 = vmatpush.msra.mxu1 %v1317_v19  ;;  %v1493_v53 = vld [vmem:[#allocation11 + $0x990] sm:$0xff] }
 0x1a1   : > { %2618 = vmatmul.f32.vlgmr.msra.gmra.mxu1 %v5856_v29  ;;  %2628 = vmatpush.msra.mxu2 %v1541_v43  ;;  %v1645_v54 = vld [vmem:[#allocation11 + $0xe50] sm:$0xff] }
 0x1a2   : > { %2648 = vmatpush.msra.mxu3 %v1693_v21  ;;  %2674 = vmatpush.msrb.mxu0 %v1797_v22  ;;  %v1749_v55 = vld [vmem:[#allocation11 + $0x1190] sm:$0xff] }
 0x1a3   : > { %2694 = vmatpush.msrb.mxu1 %v1949_v48  ;;  %2572 = vmatmul.f32.vlgmr.msrb.gmra.mxu3 %v5929_v1  ;;  %v1901_v56 = vld [vmem:[#allocation11 + $0x1650] sm:$0xff] }
 0x1a4   : > { %2598 = vmatmul.f32.gmra.mxu0 %v5881_v61  ;;  %2629 = vmatpush.msra.mxu2 %v1533_v23  ;;  %v1485_v57 = vld [vmem:[#allocation11 + $0x950] sm:$0xff] }
 0x1a5   : > { %2649 = vmatpush.msra.mxu3 %v1685_v24  ;;  %2675 = vmatpush.msrb.mxu0 %v1789_v25  ;;  %v1637_v51 = vld [vmem:[#allocation11 + $0xe10] sm:$0xff]  ;;  %v1310_v24 = vld [vmem:[#allocation11 + $0x3d8] sm:$0xff] }
 0x1a6   : > { %2695 = vmatpush.msrb.mxu1 %v1941_v26  ;;  %2552 = vmatmul.f32.gmra.mxu2 %v5932_v4  ;;  %v1741_v60 = vld [vmem:[#allocation11 + $0x1150] sm:$0xff] }
 0x1a7   : > { %2630 = vmatpush.msra.mxu2 %v1525_v27  ;;  %2650 = vmatpush.msra.mxu3 %v1677_v30  ;;  %v1893_v58 = vld [vmem:[#allocation11 + $0x1610] sm:$0xff]  ;;  %v1302_v30 = vld [vmem:[#allocation11 + $0x398] sm:$0xff] }
 0x1a8   : > { %2676 = vmatpush.msrb.mxu0 %v1781_v31  ;;  %2696 = vmatpush.msrb.mxu1 %v1933_v16  ;;  %v1477_v0 = vld [vmem:[#allocation11 + $0x910] sm:$0xff] }
 0x1a9   : > { %2631 = vmatpush.msra.mxu2 %v1517_v32  ;;  %2651 = vmatpush.msra.mxu3 %v1669_v33  ;;  %v1629_v2 = vld [vmem:[#allocation11 + $0xdd0] sm:$0xff]  ;;  %v1294_v33 = vld [vmem:[#allocation11 + $0x358] sm:$0xff] }
 0x1aa   : > { %2677 = vmatpush.msrb.mxu0 %v1773_v36  ;;  %2697 = vmatpush.msrb.mxu1 %v1925_v38  ;;  %v1733_v12 = vld [vmem:[#allocation11 + $0x1110] sm:$0xff] }
 0x1ab   : > { %2621 = vmatmul.f32.gmra.mxu1 %v5883_v62  ;;  %2632 = vmatpush.msra.mxu2 %v1509_v40  ;;  %v1885_v3 = vld [vmem:[#allocation11 + $0x15d0] sm:$0xff] }
 0x1ac   : > { %2652 = vmatpush.msra.mxu3 %v1661_v41  ;;  %2678 = vmatpush.msrb.mxu0 %v1765_v44  ;;  %v1469_v5 = vld [vmem:[#allocation11 + $0x8d0] sm:$0xff]  ;;  %v1286_v44 = vld [vmem:[#allocation11 + $0x318] sm:$0xff] }
 0x1ad   : > { %2698 = vmatpush.msrb.mxu1 %v1917_v45  ;;  %2575 = vmatmul.f32.gmra.mxu3 %v5938_v20  ;;  %v1621_v6 = vld [vmem:[#allocation11 + $0xd90] sm:$0xff]  ;;  %v1438_v45 = vld [vmem:[#allocation11 + $0x7d8] sm:$0xff] }
 0x1ae   : > { %2633 = vmatpush.msra.mxu2 %v1501_v46  ;;  %2653 = vmatpush.msra.mxu3 %v1653_v47  ;;  %v1725_v7 = vld [vmem:[#allocation11 + $0x10d0] sm:$0xff] }
 0x1af   : > { %2679 = vmatpush.msrb.mxu0 %v1757_v49  ;;  %2699 = vmatpush.msrb.mxu1 %v1909_v52  ;;  %v1877_v8 = vld [vmem:[#allocation11 + $0x1590] sm:$0xff]  ;;  %v1278_v49 = vld [vmem:[#allocation11 + $0x2d8] sm:$0xff] }
 0x1b0   : > { %2634 = vmatpush.msra.mxu2 %v1493_v53  ;;  %2654 = vmatpush.msra.mxu3 %v1645_v54  ;;  %v1461_v9 = vld [vmem:[#allocation11 + $0x890] sm:$0xff]  ;;  %v1430_v52 = vld [vmem:[#allocation11 + $0x798] sm:$0xff] }
 0x1b1   : > { %2680 = vmatpush.msrb.mxu0 %v1749_v55  ;;  %2700 = vmatpush.msrb.mxu1 %v1901_v56  ;;  %v1613_v42 = vld [vmem:[#allocation11 + $0xd50] sm:$0xff]  ;;  %v1270_v55 = vld [vmem:[#allocation11 + $0x298] sm:$0xff] }
 0x1b2   : > { %2635 = vmatpush.msra.mxu2 %v1485_v57  ;;  %2655 = vmatpush.msra.mxu3 %v1637_v51  ;;  %v1717_v11 = vld [vmem:[#allocation11 + $0x1090] sm:$0xff]  ;;  %v1422_v56 = vld [vmem:[#allocation11 + $0x758] sm:$0xff] }
 0x1b3   : > { %2681 = vmatpush.msrb.mxu0 %v1741_v60  ;;  %2701 = vmatpush.msrb.mxu1 %v1893_v58  ;;  %v1869_v13 = vld [vmem:[#allocation11 + $0x1550] sm:$0xff]  ;;  %v1262_v60 = vld [vmem:[#allocation11 + $0x258] sm:$0xff] }
 0x1b4   : > { %2636 = vmatpush.msra.mxu2 %v1477_v0  ;;  %2656 = vmatpush.msra.mxu3 %v1629_v2  ;;  %v1453_v14 = vld [vmem:[#allocation11 + $0x850] sm:$0xff]  ;;  %v1414_v58 = vld [vmem:[#allocation11 + $0x718] sm:$0xff] }
 0x1b5   : > { %2682 = vmatpush.msrb.mxu0 %v1733_v12  ;;  %2702 = vmatpush.msrb.mxu1 %v1885_v3  ;;  %v1605_v15 = vld [vmem:[#allocation11 + $0xd10] sm:$0xff]  ;;  %v1254_v12 = vld [vmem:[#allocation11 + $0x218] sm:$0xff] }
 0x1b6   : > { %2637 = vmatpush.msra.mxu2 %v1469_v5  ;;  %2657 = vmatpush.msra.mxu3 %v1621_v6  ;;  %v1709_v18 = vld [vmem:[#allocation11 + $0x1050] sm:$0xff]  ;;  %v1406_v3 = vld [vmem:[#allocation11 + $0x6d8] sm:$0xff] }
 0x1b7   : > { %2683 = vmatpush.msrb.mxu0 %v1725_v7  ;;  %2703 = vmatpush.msrb.mxu1 %v1877_v8  ;;  %v1861_v19 = vld [vmem:[#allocation11 + $0x1510] sm:$0xff]  ;;  %v1246_v7 = vld [vmem:[#allocation11 + $0x1d8] sm:$0xff] }
 0x1b8   : > { %2638 = vmatpush.msra.mxu2 %v1461_v9  ;;  %2658 = vmatpush.msra.mxu3 %v1613_v42  ;;  %v1445_v43 = vld [vmem:[#allocation11 + $0x810] sm:$0xff]  ;;  %v1398_v8 = vld [vmem:[#allocation11 + $0x698] sm:$0xff] }
 0x1b9   : > { %2684 = vmatpush.msrb.mxu0 %v1717_v11  ;;  %2704 = vmatpush.msrb.mxu1 %v1869_v13  ;;  %v1597_v21 = vld [vmem:[#allocation11 + $0xcd0] sm:$0xff]  ;;  %v1238_v11 = vld [vmem:[#allocation11 + $0x198] sm:$0xff] }
 0x1ba   : > { %2639 = vmatpush.msra.mxu2 %v1453_v14  ;;  %2659 = vmatpush.msra.mxu3 %v1605_v15  ;;  %v1701_v22 = vld [vmem:[#allocation11 + $0x1010] sm:$0xff]  ;;  %v1390_v13 = vld [vmem:[#allocation11 + $0x658] sm:$0xff] }
 0x1bb   : > { %v1853_v48 = vld [vmem:[#allocation11 + $0x14d0] sm:$0xff]  ;;  %2685 = vmatpush.msrb.mxu0 %v1709_v18  ;;  %2705 = vmatpush.msrb.mxu1 %v1861_v19  ;;  %v1230_v18 = vld [vmem:[#allocation11 + $0x158] sm:$0xff] }
 0x1bc   : > { %2640 = vmatpush.msra.mxu2 %v1445_v43  ;;  %2660 = vmatpush.msra.mxu3 %v1597_v21  ;;  %v2077_v23 = vld [vmem:[#allocation11 + $0x1bd0] sm:$0xff]  ;;  %v1382_v19 = vld [vmem:[#allocation11 + $0x618] sm:$0xff] }
 0x1bd   : > { %2686 = vmatpush.msrb.mxu0 %v1701_v22  ;;  %2706 = vmatpush.msrb.mxu1 %v1853_v48  ;;  %v1589_v25 = vld [vmem:[#allocation11 + $0xc90] sm:$0xff]  ;;  %v1222_v22 = vld [vmem:[#allocation11 + $0x118] sm:$0xff] }
 0x1be   : > { %v1845_v26 = vld [vmem:[#allocation11 + $0x1490] sm:$0xff]  ;;  %2641 = vmatmul.f32.vlgmr.msra.gmra.mxu2 %v5858_v35  ;;  %2687 = vmatmul.f32.vlgmr.msrb.gmra.mxu0 %v5899_v17  ;;  %v1374_v48 = vld [vmem:[#allocation11 + $0x5d8] sm:$0xff] }
 0x1bf   : > { %v2069_v27 = vld [vmem:[#allocation11 + $0x1b90] sm:$0xff]  ;;  %2717 = vmatpush.msrb.mxu2 %v2077_v23  ;;  %2763 = vmatpush.msra.mxu0 %v1310_v24 }
 0x1c0   : > { %v1581_v31 = vld [vmem:[#allocation11 + $0xc50] sm:$0xff]  ;;  %2661 = vmatpush.msra.mxu3 %v1589_v25  ;;  %2707 = vmatpush.msrb.mxu1 %v1845_v26  ;;  %v1214_v25 = vld [vmem:[#allocation11 + $0xd8] sm:$0xff] }
 0x1c1   : > { %v1837_v16 = vld [vmem:[#allocation11 + $0x1450] sm:$0xff]  ;;  %2718 = vmatpush.msrb.mxu2 %v2069_v27  ;;  %2764 = vmatpush.msra.mxu0 %v1302_v30  ;;  %v1366_v26 = vld [vmem:[#allocation11 + $0x598] sm:$0xff] }
 0x1c2   : > { %v2061_v32 = vld [vmem:[#allocation11 + $0x1b50] sm:$0xff]  ;;  %2662 = vmatpush.msra.mxu3 %v1581_v31  ;;  %2708 = vmatpush.msrb.mxu1 %v1837_v16  ;;  %v1206_v31 = vld [vmem:[#allocation11 + $0x98] sm:$0xff] }
 0x1c3   : > { %v1573_v36 = vld [vmem:[#allocation11 + $0xc10] sm:$0xff]  ;;  %2719 = vmatpush.msrb.mxu2 %v2061_v32  ;;  %2765 = vmatpush.msra.mxu0 %v1294_v33  ;;  %v1358_v16 = vld [vmem:[#allocation11 + $0x558] sm:$0xff] }
 0x1c4   : > { %v1829_v38 = vld [vmem:[#allocation11 + $0x1410] sm:$0xff]  ;;  %2663 = vmatpush.msra.mxu3 %v1573_v36  ;;  %v1198_v36 = vld [vmem:[#allocation11 + $0x58] sm:$0xff] }
 0x1c5   : > { %v2053_v40 = vld [vmem:[#allocation11 + $0x1b10] sm:$0xff]  ;;  %2709 = vmatpush.msrb.mxu1 %v1829_v38  ;;  %2664 = vmatmul.f32.vlgmr.msra.gmra.mxu3 %v5879_v59  ;;  %v1350_v38 = vld [vmem:[#allocation11 + $0x518] sm:$0xff] }
 0x1c6   : > { %v2205_v41 = vld [vmem:[#allocation11 + $0x1fd0] sm:$0xff]  ;;  %2710 = vmatmul.f32.vlgmr.msrb.gmra.mxu1 %v5905_v34  ;;  %2720 = vmatpush.msrb.mxu2 %v2053_v40 }
 0x1c7   : > { %2740 = vmatpush.msrb.mxu3 %v2205_v41  ;;  %v2045_v46 = vld [vmem:[#allocation11 + $0x1ad0] sm:$0xff]  ;;  %2766 = vmatpush.msra.mxu0 %v1286_v44  ;;  %v1190_v44 = vld [vmem:[#allocation11 + $0x18] sm:$0xff] }
 0x1c8   : > { %v2197_v47 = vld [vmem:[#allocation11 + $0x1f90] sm:$0xff]  ;;  %2786 = vmatpush.msra.mxu1 %v1438_v45  ;;  %2644 = vmatmul.f32.gmra.mxu2 %v5885_v63  ;;  %v1342_v45 = vld [vmem:[#allocation11 + $0x4d8] sm:$0xff] }
 0x1c9   : > { %2690 = vmatmul.f32.gmra.mxu0 %v5907_v37  ;;  %v2037_v53 = vld [vmem:[#allocation11 + $0x1a90] sm:$0xff]  ;;  %2721 = vmatpush.msrb.mxu2 %v2045_v46  ;;  %v1566_v46 = vld [vmem:[#allocation11 + $0xbd8] sm:$0xff] }
 0x1ca   : > { %v2189_v54 = vld [vmem:[#allocation11 + $0x1f50] sm:$0xff]  ;;  %2741 = vmatpush.msrb.mxu3 %v2197_v47  ;;  %2767 = vmatpush.msra.mxu0 %v1278_v49  ;;  %v1822_v47 = vld [vmem:[#allocation11 + $0x13d8] sm:$0xff] }
 0x1cb   : > { %2787 = vmatpush.msra.mxu1 %v1430_v52  ;;  %v2029_v57 = vld [vmem:[#allocation11 + $0x1a50] sm:$0xff]  ;;  %2722 = vmatpush.msrb.mxu2 %v2037_v53  ;;  %v1334_v52 = vld [vmem:[#allocation11 + $0x498] sm:$0xff] }
 0x1cc   : > { %v2181_v51 = vld [vmem:[#allocation11 + $0x1f10] sm:$0xff]  ;;  %2742 = vmatpush.msrb.mxu3 %v2189_v54  ;;  %2768 = vmatpush.msra.mxu0 %v1270_v55  ;;  %v1558_v53 = vld [vmem:[#allocation11 + $0xb98] sm:$0xff] }
 0x1cd   : > { %2788 = vmatpush.msra.mxu1 %v1422_v56  ;;  %2723 = vmatpush.msrb.mxu2 %v2029_v57  ;;  %v2021_v0 = vld [vmem:[#allocation11 + $0x1a10] sm:$0xff]  ;;  %v1814_v54 = vld [vmem:[#allocation11 + $0x1398] sm:$0xff] }
 0x1ce   : > { %2743 = vmatpush.msrb.mxu3 %v2181_v51  ;;  %v2173_v2 = vld [vmem:[#allocation11 + $0x1ed0] sm:$0xff]  ;;  %2769 = vmatpush.msra.mxu0 %v1262_v60  ;;  %v1326_v56 = vld [vmem:[#allocation11 + $0x458] sm:$0xff] }
 0x1cf   : > { %2789 = vmatpush.msra.mxu1 %v1414_v58  ;;  %2667 = vmatmul.f32.gmra.mxu3 %v5891_v10  ;;  %v2013_v5 = vld [vmem:[#allocation11 + $0x19d0] sm:$0xff]  ;;  %v1550_v57 = vld [vmem:[#allocation11 + $0xb58] sm:$0xff] }
 0x1d0   : > { %2713 = vmatmul.f32.gmra.mxu1 %v5911_v50  ;;  %v2165_v6 = vld [vmem:[#allocation11 + $0x1e90] sm:$0xff]  ;;  %2724 = vmatpush.msrb.mxu2 %v2021_v0  ;;  %v1806_v51 = vld [vmem:[#allocation11 + $0x1358] sm:$0xff] }
 0x1d1   : > { %2744 = vmatpush.msrb.mxu3 %v2173_v2  ;;  %2770 = vmatpush.msra.mxu0 %v1254_v12  ;;  %v2005_v9 = vld [vmem:[#allocation11 + $0x1990] sm:$0xff]  ;;  %v1318_v58 = vld [vmem:[#allocation11 + $0x418] sm:$0xff] }
 0x1d2   : > { %2790 = vmatpush.msra.mxu1 %v1406_v3  ;;  %v2157_v42 = vld [vmem:[#allocation11 + $0x1e50] sm:$0xff]  ;;  %2725 = vmatpush.msrb.mxu2 %v2013_v5  ;;  %v1542_v0 = vld [vmem:[#allocation11 + $0xb18] sm:$0xff] }
 0x1d3   : > { %2745 = vmatpush.msrb.mxu3 %v2165_v6  ;;  %2771 = vmatpush.msra.mxu0 %v1246_v7  ;;  %v1997_v14 = vld [vmem:[#allocation11 + $0x1950] sm:$0xff]  ;;  %v1694_v2 = vld [vmem:[#allocation11 + $0xfd8] sm:$0xff] }
 0x1d4   : > { %2791 = vmatpush.msra.mxu1 %v1398_v8  ;;  %v2149_v15 = vld [vmem:[#allocation11 + $0x1e10] sm:$0xff]  ;;  %2726 = vmatpush.msrb.mxu2 %v2005_v9  ;;  %v1798_v12 = vld [vmem:[#allocation11 + $0x1318] sm:$0xff] }
 0x1d5   : > { %2746 = vmatpush.msrb.mxu3 %v2157_v42  ;;  %2772 = vmatpush.msra.mxu0 %v1238_v11  ;;  %v1989_v43 = vld [vmem:[#allocation11 + $0x1910] sm:$0xff]  ;;  %v1950_v3 = vld [vmem:[#allocation11 + $0x17d8] sm:$0xff] }
 0x1d6   : > { %2792 = vmatpush.msra.mxu1 %v1390_v13  ;;  %v2141_v21 = vld [vmem:[#allocation11 + $0x1dd0] sm:$0xff]  ;;  %2727 = vmatpush.msrb.mxu2 %v1997_v14  ;;  %v1534_v5 = vld [vmem:[#allocation11 + $0xad8] sm:$0xff] }
 0x1d7   : > { %2747 = vmatpush.msrb.mxu3 %v2149_v15  ;;  %2773 = vmatpush.msra.mxu0 %v1230_v18  ;;  %v1981_v23 = vld [vmem:[#allocation11 + $0x18d0] sm:$0xff]  ;;  %v1686_v6 = vld [vmem:[#allocation11 + $0xf98] sm:$0xff] }
 0x1d8   : > { %2793 = vmatpush.msra.mxu1 %v1382_v19  ;;  %v2133_v24 = vld [vmem:[#allocation11 + $0x1d90] sm:$0xff]  ;;  %2728 = vmatpush.msrb.mxu2 %v1989_v43  ;;  %v1790_v7 = vld [vmem:[#allocation11 + $0x12d8] sm:$0xff] }
 0x1d9   : > { %2748 = vmatpush.msrb.mxu3 %v2141_v21  ;;  %2774 = vmatpush.msra.mxu0 %v1222_v22  ;;  %v1973_v27 = vld [vmem:[#allocation11 + $0x1890] sm:$0xff]  ;;  %v1942_v8 = vld [vmem:[#allocation11 + $0x1798] sm:$0xff] }
 0x1da   : > { %2794 = vmatpush.msra.mxu1 %v1374_v48  ;;  %v2125_v30 = vld [vmem:[#allocation11 + $0x1d50] sm:$0xff]  ;;  %2729 = vmatpush.msrb.mxu2 %v1981_v23  ;;  %v1526_v9 = vld [vmem:[#allocation11 + $0xa98] sm:$0xff] }
 0x1db   : > { %2749 = vmatpush.msrb.mxu3 %v2133_v24  ;;  %2775 = vmatpush.msra.mxu0 %v1214_v25  ;;  %v1965_v32 = vld [vmem:[#allocation11 + $0x1850] sm:$0xff]  ;;  %v1678_v42 = vld [vmem:[#allocation11 + $0xf58] sm:$0xff] }
 0x1dc   : > { %2795 = vmatpush.msra.mxu1 %v1366_v26  ;;  %v2117_v33 = vld [vmem:[#allocation11 + $0x1d10] sm:$0xff]  ;;  %2730 = vmatpush.msrb.mxu2 %v1973_v27  ;;  %v1782_v11 = vld [vmem:[#allocation11 + $0x1298] sm:$0xff] }
 0x1dd   : > { %2750 = vmatpush.msrb.mxu3 %v2125_v30  ;;  %2776 = vmatpush.msra.mxu0 %v1206_v31  ;;  %v1957_v40 = vld [vmem:[#allocation11 + $0x1810] sm:$0xff]  ;;  %v1934_v13 = vld [vmem:[#allocation11 + $0x1758] sm:$0xff] }
 0x1de   : > { %2796 = vmatpush.msra.mxu1 %v1358_v16  ;;  %v2109_v41 = vld [vmem:[#allocation11 + $0x1cd0] sm:$0xff]  ;;  %2731 = vmatpush.msrb.mxu2 %v1965_v32  ;;  %v1518_v14 = vld [vmem:[#allocation11 + $0xa58] sm:$0xff] }
 0x1df   : > { %2751 = vmatpush.msrb.mxu3 %v2117_v33  ;;  %2777 = vmatpush.msra.mxu0 %v1198_v36  ;;  %v2101_v49 = vld [vmem:[#allocation11 + $0x1c90] sm:$0xff]  ;;  %v1670_v15 = vld [vmem:[#allocation11 + $0xf18] sm:$0xff] }
 0x1e0   : > { %2797 = vmatpush.msra.mxu1 %v1350_v38  ;;  %2732 = vmatpush.msrb.mxu2 %v1957_v40  ;;  %v2093_v55 = vld [vmem:[#allocation11 + $0x1c50] sm:$0xff]  ;;  %v1774_v18 = vld [vmem:[#allocation11 + $0x1258] sm:$0xff] }
 0x1e1   : > { %2752 = vmatpush.msrb.mxu3 %v2109_v41  ;;  %2778 = vmatpush.msra.mxu0 %v1190_v44  ;;  %v2085_v60 = vld [vmem:[#allocation11 + $0x1c10] sm:$0xff]  ;;  %v1926_v19 = vld [vmem:[#allocation11 + $0x1718] sm:$0xff] }
 0x1e2   : > { %2798 = vmatpush.msra.mxu1 %v1342_v45  ;;  %2733 = vmatmul.f32.vlgmr.msrb.gmra.mxu2 %v5921_v39  ;;  %v1510_v43 = vld [vmem:[#allocation11 + $0xa18] sm:$0xff] }
 0x1e3   : > { %2779 = vmatmul.f32.vlgmr.msra.gmra.mxu0 %v5854_v28  ;;  %2809 = vmatpush.msra.mxu2 %v1566_v46  ;;  %v1662_v21 = vld [vmem:[#allocation11 + $0xed8] sm:$0xff] }
 0x1e4   : > { %2855 = vmatpush.msrb.mxu0 %v1822_v47  ;;  %2753 = vmatpush.msrb.mxu3 %v2101_v49  ;;  %v1766_v22 = vld [vmem:[#allocation11 + $0x1218] sm:$0xff] }
 0x1e5   : > { %2799 = vmatpush.msra.mxu1 %v1334_v52  ;;  %2810 = vmatpush.msra.mxu2 %v1558_v53  ;;  %v1918_v48 = vld [vmem:[#allocation11 + $0x16d8] sm:$0xff] }
 0x1e6   : > { %2856 = vmatpush.msrb.mxu0 %v1814_v54  ;;  %2754 = vmatpush.msrb.mxu3 %v2093_v55  ;;  %v1502_v23 = vld [vmem:[#allocation11 + $0x9d8] sm:$0xff] }
 0x1e7   : > { %2800 = vmatpush.msra.mxu1 %v1326_v56  ;;  %2811 = vmatpush.msra.mxu2 %v1550_v57  ;;  %v1654_v24 = vld [vmem:[#allocation11 + $0xe98] sm:$0xff] }
 0x1e8   : > { %2857 = vmatpush.msrb.mxu0 %v1806_v51  ;;  %2755 = vmatpush.msrb.mxu3 %v2085_v60  ;;  %v1758_v25 = vld [vmem:[#allocation11 + $0x11d8] sm:$0xff] }
 0x1e9   : > { %2801 = vmatpush.msra.mxu1 %v1318_v58  ;;  %2756 = vmatmul.f32.vlgmr.msrb.gmra.mxu3 %v5929_v1  ;;  %v1910_v26 = vld [vmem:[#allocation11 + $0x1698] sm:$0xff] }
 0x1ea   : > { %2802 = vmatmul.f32.vlgmr.msra.gmra.mxu1 %v5856_v29  ;;  %2812 = vmatpush.msra.mxu2 %v1542_v0  ;;  %v1494_v27 = vld [vmem:[#allocation11 + $0x998] sm:$0xff] }
 0x1eb   : > { %2832 = vmatpush.msra.mxu3 %v1694_v2  ;;  %2858 = vmatpush.msrb.mxu0 %v1798_v12  ;;  %v1646_v30 = vld [vmem:[#allocation11 + $0xe58] sm:$0xff] }
 0x1ec   : > { %2878 = vmatpush.msrb.mxu1 %v1950_v3  ;;  %2736 = vmatmul.f32.gmra.mxu2 %v5932_v4  ;;  %v1750_v31 = vld [vmem:[#allocation11 + $0x1198] sm:$0xff] }
 0x1ed   : > { %2782 = vmatmul.f32.gmra.mxu0 %v5881_v61  ;;  %2813 = vmatpush.msra.mxu2 %v1534_v5  ;;  %v1902_v16 = vld [vmem:[#allocation11 + $0x1658] sm:$0xff] }
 0x1ee   : > { %2833 = vmatpush.msra.mxu3 %v1686_v6  ;;  %2859 = vmatpush.msrb.mxu0 %v1790_v7  ;;  %v1486_v32 = vld [vmem:[#allocation11 + $0x958] sm:$0xff]  ;;  %v1311_v6 = vld [vmem:[#allocation11 + $0x3e0] sm:$0xff] }
 0x1ef   : > { %2879 = vmatpush.msrb.mxu1 %v1942_v8  ;;  %2814 = vmatpush.msra.mxu2 %v1526_v9  ;;  %v1638_v33 = vld [vmem:[#allocation11 + $0xe18] sm:$0xff] }
 0x1f0   : > { %2834 = vmatpush.msra.mxu3 %v1678_v42  ;;  %2860 = vmatpush.msrb.mxu0 %v1782_v11  ;;  %v1742_v36 = vld [vmem:[#allocation11 + $0x1158] sm:$0xff]  ;;  %v1303_v42 = vld [vmem:[#allocation11 + $0x3a0] sm:$0xff] }
 0x1f1   : > { %2880 = vmatpush.msrb.mxu1 %v1934_v13  ;;  %2815 = vmatpush.msra.mxu2 %v1518_v14  ;;  %v1894_v38 = vld [vmem:[#allocation11 + $0x1618] sm:$0xff] }
 0x1f2   : > { %2835 = vmatpush.msra.mxu3 %v1670_v15  ;;  %2861 = vmatpush.msrb.mxu0 %v1774_v18  ;;  %v1478_v40 = vld [vmem:[#allocation11 + $0x918] sm:$0xff]  ;;  %v1295_v15 = vld [vmem:[#allocation11 + $0x360] sm:$0xff] }
 0x1f3   : > { %2881 = vmatpush.msrb.mxu1 %v1926_v19  ;;  %2759 = vmatmul.f32.gmra.mxu3 %v5938_v20  ;;  %v1630_v41 = vld [vmem:[#allocation11 + $0xdd8] sm:$0xff] }
 0x1f4   : > { %2805 = vmatmul.f32.gmra.mxu1 %v5883_v62  ;;  %2816 = vmatpush.msra.mxu2 %v1510_v43  ;;  %v1734_v44 = vld [vmem:[#allocation11 + $0x1118] sm:$0xff] }
 0x1f5   : > { %2836 = vmatpush.msra.mxu3 %v1662_v21  ;;  %2862 = vmatpush.msrb.mxu0 %v1766_v22  ;;  %v1886_v45 = vld [vmem:[#allocation11 + $0x15d8] sm:$0xff]  ;;  %v1287_v22 = vld [vmem:[#allocation11 + $0x320] sm:$0xff] }
 0x1f6   : > { %2882 = vmatpush.msrb.mxu1 %v1918_v48  ;;  %2817 = vmatpush.msra.mxu2 %v1502_v23  ;;  %v1470_v46 = vld [vmem:[#allocation11 + $0x8d8] sm:$0xff]  ;;  %v1439_v48 = vld [vmem:[#allocation11 + $0x7e0] sm:$0xff] }
 0x1f7   : > { %2837 = vmatpush.msra.mxu3 %v1654_v24  ;;  %2863 = vmatpush.msrb.mxu0 %v1758_v25  ;;  %v1622_v47 = vld [vmem:[#allocation11 + $0xd98] sm:$0xff]  ;;  %v1279_v25 = vld [vmem:[#allocation11 + $0x2e0] sm:$0xff] }
 0x1f8   : > { %2883 = vmatpush.msrb.mxu1 %v1910_v26  ;;  %2818 = vmatpush.msra.mxu2 %v1494_v27  ;;  %v1726_v49 = vld [vmem:[#allocation11 + $0x10d8] sm:$0xff]  ;;  %v1431_v26 = vld [vmem:[#allocation11 + $0x7a0] sm:$0xff] }
 0x1f9   : > { %2838 = vmatpush.msra.mxu3 %v1646_v30  ;;  %2864 = vmatpush.msrb.mxu0 %v1750_v31  ;;  %v1878_v52 = vld [vmem:[#allocation11 + $0x1598] sm:$0xff]  ;;  %v1271_v31 = vld [vmem:[#allocation11 + $0x2a0] sm:$0xff] }
 0x1fa   : > { %2884 = vmatpush.msrb.mxu1 %v1902_v16  ;;  %2819 = vmatpush.msra.mxu2 %v1486_v32  ;;  %v1462_v53 = vld [vmem:[#allocation11 + $0x898] sm:$0xff]  ;;  %v1423_v16 = vld [vmem:[#allocation11 + $0x760] sm:$0xff] }
 0x1fb   : > { %2839 = vmatpush.msra.mxu3 %v1638_v33  ;;  %2865 = vmatpush.msrb.mxu0 %v1742_v36  ;;  %v1614_v54 = vld [vmem:[#allocation11 + $0xd58] sm:$0xff]  ;;  %v1263_v36 = vld [vmem:[#allocation11 + $0x260] sm:$0xff] }
 0x1fc   : > { %2885 = vmatpush.msrb.mxu1 %v1894_v38  ;;  %2820 = vmatpush.msra.mxu2 %v1478_v40  ;;  %v1718_v55 = vld [vmem:[#allocation11 + $0x1098] sm:$0xff]  ;;  %v1415_v38 = vld [vmem:[#allocation11 + $0x720] sm:$0xff] }
 0x1fd   : > { %2840 = vmatpush.msra.mxu3 %v1630_v41  ;;  %2866 = vmatpush.msrb.mxu0 %v1734_v44  ;;  %v1870_v56 = vld [vmem:[#allocation11 + $0x1558] sm:$0xff]  ;;  %v1255_v44 = vld [vmem:[#allocation11 + $0x220] sm:$0xff] }
 0x1fe   : > { %2886 = vmatpush.msrb.mxu1 %v1886_v45  ;;  %2821 = vmatpush.msra.mxu2 %v1470_v46  ;;  %v1454_v57 = vld [vmem:[#allocation11 + $0x858] sm:$0xff]  ;;  %v1407_v45 = vld [vmem:[#allocation11 + $0x6e0] sm:$0xff] }
 0x1ff   : > { %2841 = vmatpush.msra.mxu3 %v1622_v47  ;;  %2867 = vmatpush.msrb.mxu0 %v1726_v49  ;;  %v1606_v51 = vld [vmem:[#allocation11 + $0xd18] sm:$0xff]  ;;  %v1247_v49 = vld [vmem:[#allocation11 + $0x1e0] sm:$0xff] }
 0x200   : > { %2887 = vmatpush.msrb.mxu1 %v1878_v52  ;;  %2822 = vmatpush.msra.mxu2 %v1462_v53  ;;  %v1710_v60 = vld [vmem:[#allocation11 + $0x1058] sm:$0xff]  ;;  %v1399_v52 = vld [vmem:[#allocation11 + $0x6a0] sm:$0xff] }
 0x201   : > { %2842 = vmatpush.msra.mxu3 %v1614_v54  ;;  %v1862_v58 = vld [vmem:[#allocation11 + $0x1518] sm:$0xff]  ;;  %2868 = vmatpush.msrb.mxu0 %v1718_v55  ;;  %v1239_v55 = vld [vmem:[#allocation11 + $0x1a0] sm:$0xff] }
 0x202   : > { %2888 = vmatpush.msrb.mxu1 %v1870_v56  ;;  %v1446_v0 = vld [vmem:[#allocation11 + $0x818] sm:$0xff]  ;;  %2823 = vmatpush.msra.mxu2 %v1454_v57  ;;  %v1391_v56 = vld [vmem:[#allocation11 + $0x660] sm:$0xff] }
 0x203   : > { %v1598_v2 = vld [vmem:[#allocation11 + $0xcd8] sm:$0xff]  ;;  %2843 = vmatpush.msra.mxu3 %v1606_v51  ;;  %2869 = vmatpush.msrb.mxu0 %v1710_v60  ;;  %v1231_v60 = vld [vmem:[#allocation11 + $0x160] sm:$0xff] }
 0x204   : > { %v1702_v12 = vld [vmem:[#allocation11 + $0x1018] sm:$0xff]  ;;  %2889 = vmatpush.msrb.mxu1 %v1862_v58  ;;  %2824 = vmatpush.msra.mxu2 %v1446_v0  ;;  %v1383_v58 = vld [vmem:[#allocation11 + $0x620] sm:$0xff] }
 0x205   : > { %v1854_v3 = vld [vmem:[#allocation11 + $0x14d8] sm:$0xff]  ;;  %2844 = vmatpush.msra.mxu3 %v1598_v2  ;;  %2870 = vmatpush.msrb.mxu0 %v1702_v12  ;;  %v1223_v12 = vld [vmem:[#allocation11 + $0x120] sm:$0xff] }
 0x206   : > { %v2078_v5 = vld [vmem:[#allocation11 + $0x1bd8] sm:$0xff]  ;;  %2890 = vmatpush.msrb.mxu1 %v1854_v3  ;;  %2825 = vmatmul.f32.vlgmr.msra.gmra.mxu2 %v5858_v35  ;;  %v1375_v3 = vld [vmem:[#allocation11 + $0x5e0] sm:$0xff] }
 0x207   : > { %v1590_v7 = vld [vmem:[#allocation11 + $0xc98] sm:$0xff]  ;;  %2871 = vmatmul.f32.vlgmr.msrb.gmra.mxu0 %v5899_v17  ;;  %2901 = vmatpush.msrb.mxu2 %v2078_v5 }
 0x208   : > { %v1846_v8 = vld [vmem:[#allocation11 + $0x1498] sm:$0xff]  ;;  %2947 = vmatpush.msra.mxu0 %v1311_v6  ;;  %2845 = vmatpush.msra.mxu3 %v1590_v7  ;;  %v1215_v7 = vld [vmem:[#allocation11 + $0xe0] sm:$0xff] }
 0x209   : > { %v2070_v9 = vld [vmem:[#allocation11 + $0x1b98] sm:$0xff]  ;;  %2891 = vmatpush.msrb.mxu1 %v1846_v8  ;;  %v1367_v8 = vld [vmem:[#allocation11 + $0x5a0] sm:$0xff] }
 0x20a   : > { %v1582_v11 = vld [vmem:[#allocation11 + $0xc58] sm:$0xff]  ;;  %2902 = vmatpush.msrb.mxu2 %v2070_v9  ;;  %2948 = vmatpush.msra.mxu0 %v1303_v42 }
 0x20b   : > { %v1838_v13 = vld [vmem:[#allocation11 + $0x1458] sm:$0xff]  ;;  %2846 = vmatpush.msra.mxu3 %v1582_v11  ;;  %v1207_v11 = vld [vmem:[#allocation11 + $0xa0] sm:$0xff] }
 0x20c   : > { %v2062_v14 = vld [vmem:[#allocation11 + $0x1b58] sm:$0xff]  ;;  %2892 = vmatpush.msrb.mxu1 %v1838_v13  ;;  %2949 = vmatpush.msra.mxu0 %v1295_v15  ;;  %v1359_v13 = vld [vmem:[#allocation11 + $0x560] sm:$0xff] }
 0x20d   : > { %v1574_v18 = vld [vmem:[#allocation11 + $0xc18] sm:$0xff]  ;;  %2903 = vmatpush.msrb.mxu2 %v2062_v14 }
 0x20e   : > { %v1830_v19 = vld [vmem:[#allocation11 + $0x1418] sm:$0xff]  ;;  %2847 = vmatpush.msra.mxu3 %v1574_v18  ;;  %2950 = vmatpush.msra.mxu0 %v1287_v22  ;;  %v1199_v18 = vld [vmem:[#allocation11 + $0x60] sm:$0xff] }
 0x20f   : > { %v2054_v43 = vld [vmem:[#allocation11 + $0x1b18] sm:$0xff]  ;;  %2893 = vmatpush.msrb.mxu1 %v1830_v19  ;;  %2848 = vmatmul.f32.vlgmr.msra.gmra.mxu3 %v5879_v59  ;;  %v1351_v19 = vld [vmem:[#allocation11 + $0x520] sm:$0xff] }
 0x210   : > { %v2206_v21 = vld [vmem:[#allocation11 + $0x1fd8] sm:$0xff]  ;;  %2894 = vmatmul.f32.vlgmr.msrb.gmra.mxu1 %v5905_v34  ;;  %2904 = vmatpush.msrb.mxu2 %v2054_v43  ;;  %v1191_v22 = vld [vmem:[#allocation11 + $0x20] sm:$0xff] }
 0x211   : > { %2924 = vmatpush.msrb.mxu3 %v2206_v21  ;;  %v2046_v23 = vld [vmem:[#allocation11 + $0x1ad8] sm:$0xff]  ;;  %2970 = vmatpush.msra.mxu1 %v1439_v48  ;;  %v1343_v48 = vld [vmem:[#allocation11 + $0x4e0] sm:$0xff] }
 0x212   : > { %v2198_v24 = vld [vmem:[#allocation11 + $0x1f98] sm:$0xff]  ;;  %2828 = vmatmul.f32.gmra.mxu2 %v5885_v63  ;;  %2874 = vmatmul.f32.gmra.mxu0 %v5907_v37 }
 0x213   : > { %v2038_v27 = vld [vmem:[#allocation11 + $0x1a98] sm:$0xff]  ;;  %2905 = vmatpush.msrb.mxu2 %v2046_v23  ;;  %2925 = vmatpush.msrb.mxu3 %v2198_v24  ;;  %v1567_v23 = vld [vmem:[#allocation11 + $0xbe0] sm:$0xff] }
 0x214   : > { %v2190_v30 = vld [vmem:[#allocation11 + $0x1f58] sm:$0xff]  ;;  %2951 = vmatpush.msra.mxu0 %v1279_v25  ;;  %2971 = vmatpush.msra.mxu1 %v1431_v26  ;;  %v1823_v24 = vld [vmem:[#allocation11 + $0x13e0] sm:$0xff] }
 0x215   : > { %v2030_v32 = vld [vmem:[#allocation11 + $0x1a58] sm:$0xff]  ;;  %2906 = vmatpush.msrb.mxu2 %v2038_v27  ;;  %2926 = vmatpush.msrb.mxu3 %v2190_v30  ;;  %v1335_v26 = vld [vmem:[#allocation11 + $0x4a0] sm:$0xff] }
 0x216   : > { %v2182_v33 = vld [vmem:[#allocation11 + $0x1f18] sm:$0xff]  ;;  %2952 = vmatpush.msra.mxu0 %v1271_v31  ;;  %2972 = vmatpush.msra.mxu1 %v1423_v16  ;;  %v1559_v27 = vld [vmem:[#allocation11 + $0xba0] sm:$0xff] }
 0x217   : > { %2907 = vmatpush.msrb.mxu2 %v2030_v32  ;;  %2927 = vmatpush.msrb.mxu3 %v2182_v33  ;;  %v2022_v40 = vld [vmem:[#allocation11 + $0x1a18] sm:$0xff]  ;;  %v1815_v30 = vld [vmem:[#allocation11 + $0x13a0] sm:$0xff] }
 0x218   : > { %v2174_v41 = vld [vmem:[#allocation11 + $0x1ed8] sm:$0xff]  ;;  %2953 = vmatpush.msra.mxu0 %v1263_v36  ;;  %2973 = vmatpush.msra.mxu1 %v1415_v38  ;;  %v1327_v16 = vld [vmem:[#allocation11 + $0x460] sm:$0xff] }
 0x219   : > { %2851 = vmatmul.f32.gmra.mxu3 %v5891_v10  ;;  %2897 = vmatmul.f32.gmra.mxu1 %v5911_v50  ;;  %v2014_v46 = vld [vmem:[#allocation11 + $0x19d8] sm:$0xff]  ;;  %v1551_v32 = vld [vmem:[#allocation11 + $0xb60] sm:$0xff] }
 0x21a   : > { %v2166_v47 = vld [vmem:[#allocation11 + $0x1e98] sm:$0xff]  ;;  %2908 = vmatpush.msrb.mxu2 %v2022_v40  ;;  %2928 = vmatpush.msrb.mxu3 %v2174_v41  ;;  %v1807_v33 = vld [vmem:[#allocation11 + $0x1360] sm:$0xff] }
 0x21b   : > { %2954 = vmatpush.msra.mxu0 %v1255_v44  ;;  %2974 = vmatpush.msra.mxu1 %v1407_v45  ;;  %v2006_v53 = vld [vmem:[#allocation11 + $0x1998] sm:$0xff]  ;;  %v1319_v38 = vld [vmem:[#allocation11 + $0x420] sm:$0xff] }
 0x21c   : > { %v2158_v54 = vld [vmem:[#allocation11 + $0x1e58] sm:$0xff]  ;;  %2909 = vmatpush.msrb.mxu2 %v2014_v46  ;;  %2929 = vmatpush.msrb.mxu3 %v2166_v47  ;;  %v1543_v40 = vld [vmem:[#allocation11 + $0xb20] sm:$0xff] }
 0x21d   : > { %2955 = vmatpush.msra.mxu0 %v1247_v49  ;;  %2975 = vmatpush.msra.mxu1 %v1399_v52  ;;  %v1998_v57 = vld [vmem:[#allocation11 + $0x1958] sm:$0xff]  ;;  %v1695_v41 = vld [vmem:[#allocation11 + $0xfe0] sm:$0xff] }
 0x21e   : > { %v2150_v51 = vld [vmem:[#allocation11 + $0x1e18] sm:$0xff]  ;;  %2910 = vmatpush.msrb.mxu2 %v2006_v53  ;;  %2930 = vmatpush.msrb.mxu3 %v2158_v54  ;;  %v1799_v44 = vld [vmem:[#allocation11 + $0x1320] sm:$0xff] }
 0x21f   : > { %2956 = vmatpush.msra.mxu0 %v1239_v55  ;;  %2976 = vmatpush.msra.mxu1 %v1391_v56  ;;  %v1990_v0 = vld [vmem:[#allocation11 + $0x1918] sm:$0xff]  ;;  %v1951_v45 = vld [vmem:[#allocation11 + $0x17e0] sm:$0xff] }
 0x220   : > { %v2142_v2 = vld [vmem:[#allocation11 + $0x1dd8] sm:$0xff]  ;;  %2911 = vmatpush.msrb.mxu2 %v1998_v57  ;;  %2931 = vmatpush.msrb.mxu3 %v2150_v51  ;;  %v1535_v46 = vld [vmem:[#allocation11 + $0xae0] sm:$0xff] }
 0x221   : > { %2957 = vmatpush.msra.mxu0 %v1231_v60  ;;  %2977 = vmatpush.msra.mxu1 %v1383_v58  ;;  %v1982_v5 = vld [vmem:[#allocation11 + $0x18d8] sm:$0xff]  ;;  %v1687_v47 = vld [vmem:[#allocation11 + $0xfa0] sm:$0xff] }
 0x222   : > { %v2134_v6 = vld [vmem:[#allocation11 + $0x1d98] sm:$0xff]  ;;  %2912 = vmatpush.msrb.mxu2 %v1990_v0  ;;  %2932 = vmatpush.msrb.mxu3 %v2142_v2  ;;  %v1791_v49 = vld [vmem:[#allocation11 + $0x12e0] sm:$0xff] }
 0x223   : > { %2958 = vmatpush.msra.mxu0 %v1223_v12  ;;  %2978 = vmatpush.msra.mxu1 %v1375_v3  ;;  %v1974_v9 = vld [vmem:[#allocation11 + $0x1898] sm:$0xff]  ;;  %v1943_v52 = vld [vmem:[#allocation11 + $0x17a0] sm:$0xff] }
 0x224   : > { %v2126_v42 = vld [vmem:[#allocation11 + $0x1d58] sm:$0xff]  ;;  %2913 = vmatpush.msrb.mxu2 %v1982_v5  ;;  %2933 = vmatpush.msrb.mxu3 %v2134_v6  ;;  %v1527_v53 = vld [vmem:[#allocation11 + $0xaa0] sm:$0xff] }
 0x225   : > { %2959 = vmatpush.msra.mxu0 %v1215_v7  ;;  %2979 = vmatpush.msra.mxu1 %v1367_v8  ;;  %v1966_v14 = vld [vmem:[#allocation11 + $0x1858] sm:$0xff]  ;;  %v1679_v54 = vld [vmem:[#allocation11 + $0xf60] sm:$0xff] }
 0x226   : > { %v2118_v15 = vld [vmem:[#allocation11 + $0x1d18] sm:$0xff]  ;;  %2914 = vmatpush.msrb.mxu2 %v1974_v9  ;;  %2934 = vmatpush.msrb.mxu3 %v2126_v42  ;;  %v1783_v55 = vld [vmem:[#allocation11 + $0x12a0] sm:$0xff] }
 0x227   : > { %2960 = vmatpush.msra.mxu0 %v1207_v11  ;;  %2980 = vmatpush.msra.mxu1 %v1359_v13  ;;  %v1958_v43 = vld [vmem:[#allocation11 + $0x1818] sm:$0xff]  ;;  %v1935_v56 = vld [vmem:[#allocation11 + $0x1760] sm:$0xff] }
 0x228   : > { %v2110_v21 = vld [vmem:[#allocation11 + $0x1cd8] sm:$0xff]  ;;  %2915 = vmatpush.msrb.mxu2 %v1966_v14  ;;  %2935 = vmatpush.msrb.mxu3 %v2118_v15  ;;  %v1519_v57 = vld [vmem:[#allocation11 + $0xa60] sm:$0xff] }
 0x229   : > { %2961 = vmatpush.msra.mxu0 %v1199_v18  ;;  %2981 = vmatpush.msra.mxu1 %v1351_v19  ;;  %v2102_v25 = vld [vmem:[#allocation11 + $0x1c98] sm:$0xff]  ;;  %v1671_v51 = vld [vmem:[#allocation11 + $0xf20] sm:$0xff] }
 0x22a   : > { %2916 = vmatpush.msrb.mxu2 %v1958_v43  ;;  %2936 = vmatpush.msrb.mxu3 %v2110_v21  ;;  %v2094_v31 = vld [vmem:[#allocation11 + $0x1c58] sm:$0xff]  ;;  %v1775_v60 = vld [vmem:[#allocation11 + $0x1260] sm:$0xff] }
 0x22b   : > { %2962 = vmatpush.msra.mxu0 %v1191_v22  ;;  %2982 = vmatpush.msra.mxu1 %v1343_v48  ;;  %v2086_v36 = vld [vmem:[#allocation11 + $0x1c18] sm:$0xff]  ;;  %v1927_v58 = vld [vmem:[#allocation11 + $0x1720] sm:$0xff] }
 0x22c   : > { %2917 = vmatmul.f32.vlgmr.msrb.gmra.mxu2 %v5921_v39  ;;  %2963 = vmatmul.f32.vlgmr.msra.gmra.mxu0 %v5854_v28  ;;  %v1511_v0 = vld [vmem:[#allocation11 + $0xa20] sm:$0xff] }
 0x22d   : > { %2993 = vmatpush.msra.mxu2 %v1567_v23  ;;  %3039 = vmatpush.msrb.mxu0 %v1823_v24  ;;  %v1663_v2 = vld [vmem:[#allocation11 + $0xee0] sm:$0xff] }
 0x22e   : > { %2937 = vmatpush.msrb.mxu3 %v2102_v25  ;;  %2983 = vmatpush.msra.mxu1 %v1335_v26  ;;  %v1767_v12 = vld [vmem:[#allocation11 + $0x1220] sm:$0xff] }
 0x22f   : > { %2994 = vmatpush.msra.mxu2 %v1559_v27  ;;  %3040 = vmatpush.msrb.mxu0 %v1815_v30  ;;  %v1919_v3 = vld [vmem:[#allocation11 + $0x16e0] sm:$0xff] }
 0x230   : > { %2938 = vmatpush.msrb.mxu3 %v2094_v31  ;;  %2984 = vmatpush.msra.mxu1 %v1327_v16  ;;  %v1503_v5 = vld [vmem:[#allocation11 + $0x9e0] sm:$0xff] }
 0x231   : > { %2995 = vmatpush.msra.mxu2 %v1551_v32  ;;  %3041 = vmatpush.msrb.mxu0 %v1807_v33  ;;  %v1655_v6 = vld [vmem:[#allocation11 + $0xea0] sm:$0xff] }
 0x232   : > { %2939 = vmatpush.msrb.mxu3 %v2086_v36  ;;  %2985 = vmatpush.msra.mxu1 %v1319_v38  ;;  %v1759_v7 = vld [vmem:[#allocation11 + $0x11e0] sm:$0xff] }
 0x233   : > { %2940 = vmatmul.f32.vlgmr.msrb.gmra.mxu3 %v5929_v1  ;;  %2986 = vmatmul.f32.vlgmr.msra.gmra.mxu1 %v5856_v29  ;;  %v1911_v8 = vld [vmem:[#allocation11 + $0x16a0] sm:$0xff] }
 0x234   : > { %2996 = vmatpush.msra.mxu2 %v1543_v40  ;;  %3016 = vmatpush.msra.mxu3 %v1695_v41  ;;  %v1495_v9 = vld [vmem:[#allocation11 + $0x9a0] sm:$0xff] }
 0x235   : > { %3042 = vmatpush.msrb.mxu0 %v1799_v44  ;;  %3062 = vmatpush.msrb.mxu1 %v1951_v45  ;;  %v1647_v42 = vld [vmem:[#allocation11 + $0xe60] sm:$0xff] }
 0x236   : > { %2920 = vmatmul.f32.gmra.mxu2 %v5932_v4  ;;  %2966 = vmatmul.f32.gmra.mxu0 %v5881_v61  ;;  %v1751_v11 = vld [vmem:[#allocation11 + $0x11a0] sm:$0xff] }
 0x237   : > { %2997 = vmatpush.msra.mxu2 %v1535_v46  ;;  %3017 = vmatpush.msra.mxu3 %v1687_v47  ;;  %v1903_v13 = vld [vmem:[#allocation11 + $0x1660] sm:$0xff]  ;;  %v1312_v47 = vld [vmem:[#allocation11 + $0x3e8] sm:$0xff] }
 0x238   : > { %3043 = vmatpush.msrb.mxu0 %v1791_v49  ;;  %3063 = vmatpush.msrb.mxu1 %v1943_v52  ;;  %v1487_v14 = vld [vmem:[#allocation11 + $0x960] sm:$0xff] }
 0x239   : > { %2998 = vmatpush.msra.mxu2 %v1527_v53  ;;  %3018 = vmatpush.msra.mxu3 %v1679_v54  ;;  %v1639_v15 = vld [vmem:[#allocation11 + $0xe20] sm:$0xff]  ;;  %v1304_v54 = vld [vmem:[#allocation11 + $0x3a8] sm:$0xff] }
 0x23a   : > { %3044 = vmatpush.msrb.mxu0 %v1783_v55  ;;  %3064 = vmatpush.msrb.mxu1 %v1935_v56  ;;  %v1743_v18 = vld [vmem:[#allocation11 + $0x1160] sm:$0xff] }
 0x23b   : > { %2999 = vmatpush.msra.mxu2 %v1519_v57  ;;  %3019 = vmatpush.msra.mxu3 %v1671_v51  ;;  %v1895_v19 = vld [vmem:[#allocation11 + $0x1620] sm:$0xff]  ;;  %v1296_v51 = vld [vmem:[#allocation11 + $0x368] sm:$0xff] }
 0x23c   : > { %3045 = vmatpush.msrb.mxu0 %v1775_v60  ;;  %3065 = vmatpush.msrb.mxu1 %v1927_v58  ;;  %v1479_v43 = vld [vmem:[#allocation11 + $0x920] sm:$0xff] }
 0x23d   : > { %2943 = vmatmul.f32.gmra.mxu3 %v5938_v20  ;;  %2989 = vmatmul.f32.gmra.mxu1 %v5883_v62  ;;  %v1631_v21 = vld [vmem:[#allocation11 + $0xde0] sm:$0xff] }
 0x23e   : > { %3000 = vmatpush.msra.mxu2 %v1511_v0  ;;  %3020 = vmatpush.msra.mxu3 %v1663_v2  ;;  %v1735_v22 = vld [vmem:[#allocation11 + $0x1120] sm:$0xff] }
 0x23f   : > { %3046 = vmatpush.msrb.mxu0 %v1767_v12  ;;  %3066 = vmatpush.msrb.mxu1 %v1919_v3  ;;  %v1887_v48 = vld [vmem:[#allocation11 + $0x15e0] sm:$0xff]  ;;  %v1288_v12 = vld [vmem:[#allocation11 + $0x328] sm:$0xff] }
 0x240   : > { %3001 = vmatpush.msra.mxu2 %v1503_v5  ;;  %3021 = vmatpush.msra.mxu3 %v1655_v6  ;;  %v1471_v23 = vld [vmem:[#allocation11 + $0x8e0] sm:$0xff]  ;;  %v1440_v3 = vld [vmem:[#allocation11 + $0x7e8] sm:$0xff] }
 0x241   : > { %3047 = vmatpush.msrb.mxu0 %v1759_v7  ;;  %3067 = vmatpush.msrb.mxu1 %v1911_v8  ;;  %v1623_v24 = vld [vmem:[#allocation11 + $0xda0] sm:$0xff]  ;;  %v1280_v7 = vld [vmem:[#allocation11 + $0x2e8] sm:$0xff] }
 0x242   : > { %3002 = vmatpush.msra.mxu2 %v1495_v9  ;;  %3022 = vmatpush.msra.mxu3 %v1647_v42  ;;  %v1727_v25 = vld [vmem:[#allocation11 + $0x10e0] sm:$0xff]  ;;  %v1432_v8 = vld [vmem:[#allocation11 + $0x7a8] sm:$0xff] }
 0x243   : > { %3048 = vmatpush.msrb.mxu0 %v1751_v11  ;;  %3068 = vmatpush.msrb.mxu1 %v1903_v13  ;;  %v1879_v26 = vld [vmem:[#allocation11 + $0x15a0] sm:$0xff]  ;;  %v1272_v11 = vld [vmem:[#allocation11 + $0x2a8] sm:$0xff] }
 0x244   : > { %3003 = vmatpush.msra.mxu2 %v1487_v14  ;;  %3023 = vmatpush.msra.mxu3 %v1639_v15  ;;  %v1463_v27 = vld [vmem:[#allocation11 + $0x8a0] sm:$0xff]  ;;  %v1424_v13 = vld [vmem:[#allocation11 + $0x768] sm:$0xff] }
 0x245   : > { %3049 = vmatpush.msrb.mxu0 %v1743_v18  ;;  %3069 = vmatpush.msrb.mxu1 %v1895_v19  ;;  %v1615_v30 = vld [vmem:[#allocation11 + $0xd60] sm:$0xff]  ;;  %v1264_v18 = vld [vmem:[#allocation11 + $0x268] sm:$0xff] }
 0x246   : > { %3004 = vmatpush.msra.mxu2 %v1479_v43  ;;  %3024 = vmatpush.msra.mxu3 %v1631_v21  ;;  %v1719_v31 = vld [vmem:[#allocation11 + $0x10a0] sm:$0xff]  ;;  %v1416_v19 = vld [vmem:[#allocation11 + $0x728] sm:$0xff] }
 0x247   : > { %3050 = vmatpush.msrb.mxu0 %v1735_v22  ;;  %3070 = vmatpush.msrb.mxu1 %v1887_v48  ;;  %v1871_v16 = vld [vmem:[#allocation11 + $0x1560] sm:$0xff]  ;;  %v1256_v22 = vld [vmem:[#allocation11 + $0x228] sm:$0xff] }
 0x248   : > { %3005 = vmatpush.msra.mxu2 %v1471_v23  ;;  %3025 = vmatpush.msra.mxu3 %v1623_v24  ;;  %v1455_v32 = vld [vmem:[#allocation11 + $0x860] sm:$0xff]  ;;  %v1408_v48 = vld [vmem:[#allocation11 + $0x6e8] sm:$0xff] }
 0x249   : > { %3051 = vmatpush.msrb.mxu0 %v1727_v25  ;;  %3071 = vmatpush.msrb.mxu1 %v1879_v26  ;;  %v1607_v33 = vld [vmem:[#allocation11 + $0xd20] sm:$0xff]  ;;  %v1248_v25 = vld [vmem:[#allocation11 + $0x1e8] sm:$0xff] }
 0x24a   : > { %3006 = vmatpush.msra.mxu2 %v1463_v27  ;;  %3026 = vmatpush.msra.mxu3 %v1615_v30  ;;  %v1711_v36 = vld [vmem:[#allocation11 + $0x1060] sm:$0xff]  ;;  %v1400_v26 = vld [vmem:[#allocation11 + $0x6a8] sm:$0xff] }
 0x24b   : > { %v1863_v38 = vld [vmem:[#allocation11 + $0x1520] sm:$0xff]  ;;  %3052 = vmatpush.msrb.mxu0 %v1719_v31  ;;  %3072 = vmatpush.msrb.mxu1 %v1871_v16  ;;  %v1240_v31 = vld [vmem:[#allocation11 + $0x1a8] sm:$0xff] }
 0x24c   : > { %v1447_v40 = vld [vmem:[#allocation11 + $0x820] sm:$0xff]  ;;  %3007 = vmatpush.msra.mxu2 %v1455_v32  ;;  %3027 = vmatpush.msra.mxu3 %v1607_v33  ;;  %v1392_v16 = vld [vmem:[#allocation11 + $0x668] sm:$0xff] }
 0x24d   : > { %v1599_v41 = vld [vmem:[#allocation11 + $0xce0] sm:$0xff]  ;;  %3053 = vmatpush.msrb.mxu0 %v1711_v36  ;;  %3073 = vmatpush.msrb.mxu1 %v1863_v38  ;;  %v1232_v36 = vld [vmem:[#allocation11 + $0x168] sm:$0xff] }
 0x24e   : > { %v1703_v44 = vld [vmem:[#allocation11 + $0x1020] sm:$0xff]  ;;  %3008 = vmatpush.msra.mxu2 %v1447_v40  ;;  %3028 = vmatpush.msra.mxu3 %v1599_v41  ;;  %v1384_v38 = vld [vmem:[#allocation11 + $0x628] sm:$0xff] }
 0x24f   : > { %v1855_v45 = vld [vmem:[#allocation11 + $0x14e0] sm:$0xff]  ;;  %3054 = vmatpush.msrb.mxu0 %v1703_v44  ;;  %3009 = vmatmul.f32.vlgmr.msra.gmra.mxu2 %v5858_v35  ;;  %v1224_v44 = vld [vmem:[#allocation11 + $0x128] sm:$0xff] }
 0x250   : > { %v2079_v46 = vld [vmem:[#allocation11 + $0x1be0] sm:$0xff]  ;;  %3074 = vmatpush.msrb.mxu1 %v1855_v45  ;;  %3055 = vmatmul.f32.vlgmr.msrb.gmra.mxu0 %v5899_v17  ;;  %v1376_v45 = vld [vmem:[#allocation11 + $0x5e8] sm:$0xff] }
 0x251   : > { %v1591_v49 = vld [vmem:[#allocation11 + $0xca0] sm:$0xff]  ;;  %3085 = vmatpush.msrb.mxu2 %v2079_v46  ;;  %3131 = vmatpush.msra.mxu0 %v1312_v47 }
 0x252   : > { %v1847_v52 = vld [vmem:[#allocation11 + $0x14a0] sm:$0xff]  ;;  %3029 = vmatpush.msra.mxu3 %v1591_v49  ;;  %v1216_v49 = vld [vmem:[#allocation11 + $0xe8] sm:$0xff] }
 0x253   : > { %v2071_v53 = vld [vmem:[#allocation11 + $0x1ba0] sm:$0xff]  ;;  %3075 = vmatpush.msrb.mxu1 %v1847_v52  ;;  %3132 = vmatpush.msra.mxu0 %v1304_v54  ;;  %v1368_v52 = vld [vmem:[#allocation11 + $0x5a8] sm:$0xff] }
 0x254   : > { %v1583_v55 = vld [vmem:[#allocation11 + $0xc60] sm:$0xff]  ;;  %3086 = vmatpush.msrb.mxu2 %v2071_v53 }
 0x255   : > { %v1839_v56 = vld [vmem:[#allocation11 + $0x1460] sm:$0xff]  ;;  %3030 = vmatpush.msra.mxu3 %v1583_v55  ;;  %3133 = vmatpush.msra.mxu0 %v1296_v51  ;;  %v1208_v55 = vld [vmem:[#allocation11 + $0xa8] sm:$0xff] }
 0x256   : > { %v2063_v57 = vld [vmem:[#allocation11 + $0x1b60] sm:$0xff]  ;;  %3076 = vmatpush.msrb.mxu1 %v1839_v56  ;;  %v1360_v56 = vld [vmem:[#allocation11 + $0x568] sm:$0xff] }
 0x257   : > { %v1575_v60 = vld [vmem:[#allocation11 + $0xc20] sm:$0xff]  ;;  %3087 = vmatpush.msrb.mxu2 %v2063_v57  ;;  %3134 = vmatpush.msra.mxu0 %v1288_v12  ;;  %v1192_v12 = vld [vmem:[#allocation11 + $0x28] sm:$0xff] }
 0x258   : > { %v1831_v58 = vld [vmem:[#allocation11 + $0x1420] sm:$0xff]  ;;  %3031 = vmatpush.msra.mxu3 %v1575_v60  ;;  %3012 = vmatmul.f32.gmra.mxu2 %v5885_v63  ;;  %v1200_v60 = vld [vmem:[#allocation11 + $0x68] sm:$0xff] }
 0x259   : > { %v2055_v0 = vld [vmem:[#allocation11 + $0x1b20] sm:$0xff]  ;;  %3077 = vmatpush.msrb.mxu1 %v1831_v58  ;;  %3032 = vmatmul.f32.vlgmr.msra.gmra.mxu3 %v5879_v59  ;;  %v1352_v58 = vld [vmem:[#allocation11 + $0x528] sm:$0xff] }
 0x25a   : > { %v2207_v2 = vld [vmem:[#allocation11 + $0x1fe0] sm:$0xff]  ;;  %3078 = vmatmul.f32.vlgmr.msrb.gmra.mxu1 %v5905_v34  ;;  %3088 = vmatpush.msrb.mxu2 %v2055_v0 }
 0x25b   : > { %3108 = vmatpush.msrb.mxu3 %v2207_v2  ;;  %v2047_v5 = vld [vmem:[#allocation11 + $0x1ae0] sm:$0xff]  ;;  %3154 = vmatpush.msra.mxu1 %v1440_v3  ;;  %v1344_v3 = vld [vmem:[#allocation11 + $0x4e8] sm:$0xff] }
 0x25c   : > { %v2199_v6 = vld [vmem:[#allocation11 + $0x1fa0] sm:$0xff]  ;;  %3058 = vmatmul.f32.gmra.mxu0 %v5907_v37  ;;  %3089 = vmatpush.msrb.mxu2 %v2047_v5  ;;  %v5994_v5 = vpop.f32.mrf.mxu0 }
 0x25d   : > { %v2039_v9 = vld [vmem:[#allocation11 + $0x1aa0] sm:$0xff]  ;;  %3109 = vmatpush.msrb.mxu3 %v2199_v6  ;;  %3135 = vmatpush.msra.mxu0 %v1280_v7  ;;  %v1568_v6 = vld [vmem:[#allocation11 + $0xbe8] sm:$0xff] }
 0x25e   : > { %v2191_v42 = vld [vmem:[#allocation11 + $0x1f60] sm:$0xff]  ;;  %3155 = vmatpush.msra.mxu1 %v1432_v8  ;;  %3090 = vmatpush.msrb.mxu2 %v2039_v9  ;;  %v1824_v7 = vld [vmem:[#allocation11 + $0x13e8] sm:$0xff] }
 0x25f   : > { %v2031_v14 = vld [vmem:[#allocation11 + $0x1a60] sm:$0xff]  ;;  %3110 = vmatpush.msrb.mxu3 %v2191_v42  ;;  %3136 = vmatpush.msra.mxu0 %v1272_v11  ;;  %v1336_v9 = vld [vmem:[#allocation11 + $0x4a8] sm:$0xff] }
 0x260   : > { %v2183_v15 = vld [vmem:[#allocation11 + $0x1f20] sm:$0xff]  ;;  %3156 = vmatpush.msra.mxu1 %v1424_v13  ;;  %3091 = vmatpush.msrb.mxu2 %v2031_v14  ;;  %v1560_v42 = vld [vmem:[#allocation11 + $0xba8] sm:$0xff] }
 0x261   : > { %3111 = vmatpush.msrb.mxu3 %v2183_v15  ;;  %v2023_v43 = vld [vmem:[#allocation11 + $0x1a20] sm:$0xff]  ;;  %3137 = vmatpush.msra.mxu0 %v1264_v18  ;;  %v1816_v11 = vld [vmem:[#allocation11 + $0x13a8] sm:$0xff]  ;;  %v5998_v15 = vpop.f32.mrf.mxu1  ;;  %v6000_v18 = vpop.f32.mrf.mxu2 }
 0x262   : > { %v2175_v21 = vld [vmem:[#allocation11 + $0x1ee0] sm:$0xff]  ;;  %3157 = vmatpush.msra.mxu1 %v1416_v19  ;;  %3035 = vmatmul.f32.gmra.mxu3 %v5891_v10  ;;  %v1328_v14 = vld [vmem:[#allocation11 + $0x468] sm:$0xff] }
 0x263   : > { %3081 = vmatmul.f32.gmra.mxu1 %v5911_v50  ;;  %v2015_v23 = vld [vmem:[#allocation11 + $0x19e0] sm:$0xff]  ;;  %3092 = vmatpush.msrb.mxu2 %v2023_v43  ;;  %v1552_v19 = vld [vmem:[#allocation11 + $0xb68] sm:$0xff] }
 0x264   : > { %v2167_v24 = vld [vmem:[#allocation11 + $0x1ea0] sm:$0xff]  ;;  %3112 = vmatpush.msrb.mxu3 %v2175_v21  ;;  %3138 = vmatpush.msra.mxu0 %v1256_v22  ;;  %v1808_v43 = vld [vmem:[#allocation11 + $0x1368] sm:$0xff] }
 0x265   : > { %3158 = vmatpush.msra.mxu1 %v1408_v48  ;;  %v2007_v27 = vld [vmem:[#allocation11 + $0x19a0] sm:$0xff]  ;;  %3093 = vmatpush.msrb.mxu2 %v2015_v23  ;;  %v1320_v22 = vld [vmem:[#allocation11 + $0x428] sm:$0xff]  ;;  %v6002_v48 = vpop.f32.mrf.mxu3 }
 0x266   : > { %v2159_v30 = vld [vmem:[#allocation11 + $0x1e60] sm:$0xff]  ;;  %3113 = vmatpush.msrb.mxu3 %v2167_v24  ;;  %3139 = vmatpush.msra.mxu0 %v1248_v25  ;;  %v1544_v23 = vld [vmem:[#allocation11 + $0xb28] sm:$0xff] }
 0x267   : > { %3159 = vmatpush.msra.mxu1 %v1400_v26  ;;  %v1999_v32 = vld [vmem:[#allocation11 + $0x1960] sm:$0xff]  ;;  %3094 = vmatpush.msrb.mxu2 %v2007_v27  ;;  %v1696_v24 = vld [vmem:[#allocation11 + $0xfe8] sm:$0xff]  ;;  %v6006_v27 = vpop.f32.mrf.mxu0 }
 0x268   : > { %v2151_v33 = vld [vmem:[#allocation11 + $0x1e20] sm:$0xff]  ;;  %3114 = vmatpush.msrb.mxu3 %v2159_v30  ;;  %3140 = vmatpush.msra.mxu0 %v1240_v31  ;;  %v1800_v25 = vld [vmem:[#allocation11 + $0x1328] sm:$0xff] }
 0x269   : > { %3160 = vmatpush.msra.mxu1 %v1392_v16  ;;  %v1991_v40 = vld [vmem:[#allocation11 + $0x1920] sm:$0xff]  ;;  %3095 = vmatpush.msrb.mxu2 %v1999_v32  ;;  %v1952_v26 = vld [vmem:[#allocation11 + $0x17e8] sm:$0xff] }
 0x26a   : > { %v2143_v41 = vld [vmem:[#allocation11 + $0x1de0] sm:$0xff]  ;;  %3115 = vmatpush.msrb.mxu3 %v2151_v33  ;;  %3141 = vmatpush.msra.mxu0 %v1232_v36  ;;  %v1536_v30 = vld [vmem:[#allocation11 + $0xae8] sm:$0xff] }
 0x26b   : > { %3161 = vmatpush.msra.mxu1 %v1384_v38  ;;  %v1983_v46 = vld [vmem:[#allocation11 + $0x18e0] sm:$0xff]  ;;  %3096 = vmatpush.msrb.mxu2 %v1991_v40  ;;  %v1688_v31 = vld [vmem:[#allocation11 + $0xfa8] sm:$0xff] }
 0x26c   : > { %v2135_v47 = vld [vmem:[#allocation11 + $0x1da0] sm:$0xff]  ;;  %3116 = vmatpush.msrb.mxu3 %v2143_v41  ;;  %3142 = vmatpush.msra.mxu0 %v1224_v44  ;;  %v1792_v16 = vld [vmem:[#allocation11 + $0x12e8] sm:$0xff]  ;;  %v6010_v41 = vpop.f32.mrf.mxu1  ;;  %v6012_v44 = vpop.f32.mrf.mxu2 }
 0x26d   : > { %3162 = vmatpush.msra.mxu1 %v1376_v45  ;;  %v1975_v53 = vld [vmem:[#allocation11 + $0x18a0] sm:$0xff]  ;;  %3097 = vmatpush.msrb.mxu2 %v1983_v46  ;;  %v1944_v32 = vld [vmem:[#allocation11 + $0x17a8] sm:$0xff] }
 0x26e   : > { %v2127_v54 = vld [vmem:[#allocation11 + $0x1d60] sm:$0xff]  ;;  %3117 = vmatpush.msrb.mxu3 %v2135_v47  ;;  %3143 = vmatpush.msra.mxu0 %v1216_v49  ;;  %v1528_v33 = vld [vmem:[#allocation11 + $0xaa8] sm:$0xff] }
 0x26f   : > { %3163 = vmatpush.msra.mxu1 %v1368_v52  ;;  %v1967_v57 = vld [vmem:[#allocation11 + $0x1860] sm:$0xff]  ;;  %3098 = vmatpush.msrb.mxu2 %v1975_v53  ;;  %v1680_v36 = vld [vmem:[#allocation11 + $0xf68] sm:$0xff]  ;;  %v6014_v52 = vpop.f32.mrf.mxu3 }
 0x270   : > { %v2119_v51 = vld [vmem:[#allocation11 + $0x1d20] sm:$0xff]  ;;  %3118 = vmatpush.msrb.mxu3 %v2127_v54  ;;  %3144 = vmatpush.msra.mxu0 %v1208_v55  ;;  %v1784_v38 = vld [vmem:[#allocation11 + $0x12a8] sm:$0xff]  ;;  %v6016_v55 = vpop.f32.mrf.mxu0 }
 0x271   : > { %3164 = vmatpush.msra.mxu1 %v1360_v56  ;;  %v1959_v0 = vld [vmem:[#allocation11 + $0x1820] sm:$0xff]  ;;  %3099 = vmatpush.msrb.mxu2 %v1967_v57  ;;  %v1936_v40 = vld [vmem:[#allocation11 + $0x1768] sm:$0xff] }
 0x272   : > { %v2111_v2 = vld [vmem:[#allocation11 + $0x1ce0] sm:$0xff]  ;;  %3119 = vmatpush.msrb.mxu3 %v2119_v51  ;;  %3145 = vmatpush.msra.mxu0 %v1200_v60  ;;  %v1520_v45 = vld [vmem:[#allocation11 + $0xa68] sm:$0xff] }
 0x273   : > { %3165 = vmatpush.msra.mxu1 %v1352_v58  ;;  %3100 = vmatpush.msrb.mxu2 %v1959_v0  ;;  %v2103_v8 = vld [vmem:[#allocation11 + $0x1ca0] sm:$0xff]  ;;  %v1672_v46 = vld [vmem:[#allocation11 + $0xf28] sm:$0xff] }
 0x274   : > { %3120 = vmatpush.msrb.mxu3 %v2111_v2  ;;  %3146 = vmatpush.msra.mxu0 %v1192_v12  ;;  %v2095_v13 = vld [vmem:[#allocation11 + $0x1c60] sm:$0xff]  ;;  %v1776_v47 = vld [vmem:[#allocation11 + $0x1268] sm:$0xff] }
 0x275   : > { %3166 = vmatpush.msra.mxu1 %v1344_v3  ;;  %3101 = vmatmul.f32.vlgmr.msrb.gmra.mxu2 %v5921_v39  ;;  %v2087_v21 = vld [vmem:[#allocation11 + $0x1c20] sm:$0xff]  ;;  %v1928_v49 = vld [vmem:[#allocation11 + $0x1728] sm:$0xff]  ;;  %v6020_v3 = vpop.f32.mrf.mxu1 }
 0x276   : > { %3147 = vmatmul.f32.vlgmr.msra.gmra.mxu0 %v5854_v28  ;;  %3177 = vmatpush.msra.mxu2 %v1568_v6  ;;  %v1512_v53 = vld [vmem:[#allocation11 + $0xa28] sm:$0xff]  ;;  %v6022_v6 = vpop.f32.mrf.mxu2 }
 0x277   : > { %3223 = vmatpush.msrb.mxu0 %v1824_v7  ;;  %3121 = vmatpush.msrb.mxu3 %v2103_v8  ;;  %v1664_v54 = vld [vmem:[#allocation11 + $0xee8] sm:$0xff] }
 0x278   : > { %3167 = vmatpush.msra.mxu1 %v1336_v9  ;;  %3178 = vmatpush.msra.mxu2 %v1560_v42  ;;  %v1768_v56 = vld [vmem:[#allocation11 + $0x1228] sm:$0xff] }
 0x279   : > { %3224 = vmatpush.msrb.mxu0 %v1816_v11  ;;  %3122 = vmatpush.msrb.mxu3 %v2095_v13  ;;  %v1920_v57 = vld [vmem:[#allocation11 + $0x16e8] sm:$0xff]  ;;  %v6024_v11 = vpop.f32.mrf.mxu3 }
 0x27a   : > { %3168 = vmatpush.msra.mxu1 %v1328_v14  ;;  %3179 = vmatpush.msra.mxu2 %v1552_v19  ;;  %v1504_v51 = vld [vmem:[#allocation11 + $0x9e8] sm:$0xff] }
 0x27b   : > { %3225 = vmatpush.msrb.mxu0 %v1808_v43  ;;  %3123 = vmatpush.msrb.mxu3 %v2087_v21  ;;  %v1656_v60 = vld [vmem:[#allocation11 + $0xea8] sm:$0xff] }
 0x27c   : > { %3169 = vmatpush.msra.mxu1 %v1320_v22  ;;  %3124 = vmatmul.f32.vlgmr.msrb.gmra.mxu3 %v5929_v1  ;;  %v1760_v58 = vld [vmem:[#allocation11 + $0x11e8] sm:$0xff] }
 0x27d   : > { %3170 = vmatmul.f32.vlgmr.msra.gmra.mxu1 %v5856_v29  ;;  %3180 = vmatpush.msra.mxu2 %v1544_v23  ;;  %v1912_v0 = vld [vmem:[#allocation11 + $0x16a8] sm:$0xff] }
 0x27e   : > { %3200 = vmatpush.msra.mxu3 %v1696_v24  ;;  %3226 = vmatpush.msrb.mxu0 %v1800_v25  ;;  %v1496_v2 = vld [vmem:[#allocation11 + $0x9a8] sm:$0xff]  ;;  %v6026_v25 = vpop.f32.mrf.mxu0 }
 0x27f   : > { %3246 = vmatpush.msrb.mxu1 %v1952_v26  ;;  %3104 = vmatmul.f32.gmra.mxu2 %v5932_v4  ;;  %v1648_v12 = vld [vmem:[#allocation11 + $0xe68] sm:$0xff] }
 0x280   : > { %3150 = vmatmul.f32.gmra.mxu0 %v5881_v61  ;;  %3181 = vmatpush.msra.mxu2 %v1536_v30  ;;  %v1752_v7 = vld [vmem:[#allocation11 + $0x11a8] sm:$0xff] }
 0x281   : > { %3201 = vmatpush.msra.mxu3 %v1688_v31  ;;  %3227 = vmatpush.msrb.mxu0 %v1792_v16  ;;  %v1904_v8 = vld [vmem:[#allocation11 + $0x1668] sm:$0xff] }
 0x282   : > { %3247 = vmatpush.msrb.mxu1 %v1944_v32  ;;  %3182 = vmatpush.msra.mxu2 %v1528_v33  ;;  %v1488_v9 = vld [vmem:[#allocation11 + $0x968] sm:$0xff] }
 0x283   : > { %3202 = vmatpush.msra.mxu3 %v1680_v36  ;;  %3228 = vmatpush.msrb.mxu0 %v1784_v38  ;;  %v1640_v42 = vld [vmem:[#allocation11 + $0xe28] sm:$0xff] }
 0x284   : > { %3248 = vmatpush.msrb.mxu1 %v1936_v40  ;;  %3183 = vmatpush.msra.mxu2 %v1520_v45  ;;  %v1744_v13 = vld [vmem:[#allocation11 + $0x1168] sm:$0xff]  ;;  %v6028_v40 = vpop.f32.mrf.mxu1  ;;  %v6030_v45 = vpop.f32.mrf.mxu2 }
 0x285   : > { %3203 = vmatpush.msra.mxu3 %v1672_v46  ;;  %3229 = vmatpush.msrb.mxu0 %v1776_v47  ;;  %v1896_v14 = vld [vmem:[#allocation11 + $0x1628] sm:$0xff] }
 0x286   : > { %3249 = vmatpush.msrb.mxu1 %v1928_v49  ;;  %3127 = vmatmul.f32.gmra.mxu3 %v5938_v20  ;;  %v1480_v19 = vld [vmem:[#allocation11 + $0x928] sm:$0xff] }
 0x287   : > { %3173 = vmatmul.f32.gmra.mxu1 %v5883_v62  ;;  %3184 = vmatpush.msra.mxu2 %v1512_v53  ;;  %v1632_v43 = vld [vmem:[#allocation11 + $0xde8] sm:$0xff] }
 0x288   : > { %3204 = vmatpush.msra.mxu3 %v1664_v54  ;;  %3230 = vmatpush.msrb.mxu0 %v1768_v56  ;;  %v1736_v21 = vld [vmem:[#allocation11 + $0x1128] sm:$0xff]  ;;  %v6032_v54 = vpop.f32.mrf.mxu3 }
 0x289   : > { %3250 = vmatpush.msrb.mxu1 %v1920_v57  ;;  %3185 = vmatpush.msra.mxu2 %v1504_v51  ;;  %v1888_v22 = vld [vmem:[#allocation11 + $0x15e8] sm:$0xff] }
 0x28a   : > { %3205 = vmatpush.msra.mxu3 %v1656_v60  ;;  %3231 = vmatpush.msrb.mxu0 %v1760_v58  ;;  %v1472_v23 = vld [vmem:[#allocation11 + $0x8e8] sm:$0xff]  ;;  %v1313_v60 = vld [vmem:[#allocation11 + $0x3f0] sm:$0xff] }
 0x28b   : > { %3251 = vmatpush.msrb.mxu1 %v1912_v0  ;;  %3186 = vmatpush.msra.mxu2 %v1496_v2  ;;  %v1624_v24 = vld [vmem:[#allocation11 + $0xda8] sm:$0xff]  ;;  %v6034_v2 = vpop.f32.mrf.mxu0 }
 0x28c   : > { %3206 = vmatpush.msra.mxu3 %v1648_v12  ;;  %3232 = vmatpush.msrb.mxu0 %v1752_v7  ;;  %v1728_v26 = vld [vmem:[#allocation11 + $0x10e8] sm:$0xff]  ;;  %v1305_v7 = vld [vmem:[#allocation11 + $0x3b0] sm:$0xff] }
 0x28d   : > { %3252 = vmatpush.msrb.mxu1 %v1904_v8  ;;  %3187 = vmatpush.msra.mxu2 %v1488_v9  ;;  %v1880_v30 = vld [vmem:[#allocation11 + $0x15a8] sm:$0xff] }
 0x28e   : > { %3207 = vmatpush.msra.mxu3 %v1640_v42  ;;  %3233 = vmatpush.msrb.mxu0 %v1744_v13  ;;  %v1464_v31 = vld [vmem:[#allocation11 + $0x8a8] sm:$0xff]  ;;  %v1297_v13 = vld [vmem:[#allocation11 + $0x370] sm:$0xff] }
 0x28f   : > { %3253 = vmatpush.msrb.mxu1 %v1896_v14  ;;  %3188 = vmatpush.msra.mxu2 %v1480_v19  ;;  %v1616_v16 = vld [vmem:[#allocation11 + $0xd68] sm:$0xff] }
 0x290   : > { %3208 = vmatpush.msra.mxu3 %v1632_v43  ;;  %3234 = vmatpush.msrb.mxu0 %v1736_v21  ;;  %v1720_v32 = vld [vmem:[#allocation11 + $0x10a8] sm:$0xff]  ;;  %v6038_v43 = vpop.f32.mrf.mxu1  ;;  %v6040_v21 = vpop.f32.mrf.mxu2 }
 0x291   : > { %3254 = vmatpush.msrb.mxu1 %v1888_v22  ;;  %3189 = vmatpush.msra.mxu2 %v1472_v23  ;;  %v1872_v33 = vld [vmem:[#allocation11 + $0x1568] sm:$0xff] }
 0x292   : > { %3209 = vmatpush.msra.mxu3 %v1624_v24  ;;  %3235 = vmatpush.msrb.mxu0 %v1728_v26  ;;  %v1456_v36 = vld [vmem:[#allocation11 + $0x868] sm:$0xff]  ;;  %v6042_v24 = vpop.f32.mrf.mxu3  ;;  %v1289_v26 = vld [vmem:[#allocation11 + $0x330] sm:$0xff] }
 0x293   : > { %3255 = vmatpush.msrb.mxu1 %v1880_v30  ;;  %v1608_v38 = vld [vmem:[#allocation11 + $0xd28] sm:$0xff]  ;;  %3190 = vmatpush.msra.mxu2 %v1464_v31  ;;  %v1441_v30 = vld [vmem:[#allocation11 + $0x7f0] sm:$0xff] }
 0x294   : > { %3210 = vmatpush.msra.mxu3 %v1616_v16  ;;  %v1712_v46 = vld [vmem:[#allocation11 + $0x1068] sm:$0xff]  ;;  %3236 = vmatpush.msrb.mxu0 %v1720_v32  ;;  %v1281_v32 = vld [vmem:[#allocation11 + $0x2f0] sm:$0xff] }
 0x295   : > { %v1864_v47 = vld [vmem:[#allocation11 + $0x1528] sm:$0xff]  ;;  %3256 = vmatpush.msrb.mxu1 %v1872_v33  ;;  %3191 = vmatpush.msra.mxu2 %v1456_v36  ;;  %v1433_v33 = vld [vmem:[#allocation11 + $0x7b0] sm:$0xff]  ;;  %v6046_v36 = vpop.f32.mrf.mxu0 }
 0x296   : > { %v1448_v49 = vld [vmem:[#allocation11 + $0x828] sm:$0xff]  ;;  %3211 = vmatpush.msra.mxu3 %v1608_v38  ;;  %3237 = vmatpush.msrb.mxu0 %v1712_v46 }
 0x297   : > { %v1600_v53 = vld [vmem:[#allocation11 + $0xce8] sm:$0xff]  ;;  %3257 = vmatpush.msrb.mxu1 %v1864_v47  ;;  %3192 = vmatpush.msra.mxu2 %v1448_v49  ;;  %v1273_v47 = vld [vmem:[#allocation11 + $0x2b0] sm:$0xff] }
 0x298   : > { %v1704_v56 = vld [vmem:[#allocation11 + $0x1028] sm:$0xff]  ;;  %3212 = vmatpush.msra.mxu3 %v1600_v53  ;;  %3193 = vmatmul.f32.vlgmr.msra.gmra.mxu2 %v5858_v35  ;;  %v1425_v49 = vld [vmem:[#allocation11 + $0x770] sm:$0xff] }
 0x299   : > { %v1856_v57 = vld [vmem:[#allocation11 + $0x14e8] sm:$0xff]  ;;  %3238 = vmatpush.msrb.mxu0 %v1704_v56 }
 0x29a   : > { %v2080_v51 = vld [vmem:[#allocation11 + $0x1be8] sm:$0xff]  ;;  %3258 = vmatpush.msrb.mxu1 %v1856_v57  ;;  %3239 = vmatmul.f32.vlgmr.msrb.gmra.mxu0 %v5899_v17  ;;  %v1265_v57 = vld [vmem:[#allocation11 + $0x270] sm:$0xff] }
 0x29b   : > { %v1592_v58 = vld [vmem:[#allocation11 + $0xca8] sm:$0xff]  ;;  %3269 = vmatpush.msrb.mxu2 %v2080_v51  ;;  %3315 = vmatpush.msra.mxu0 %v1313_v60  ;;  %v1417_v51 = vld [vmem:[#allocation11 + $0x730] sm:$0xff]  ;;  %v6050_v60 = vpop.f32.mrf.mxu1 }
 0x29c   : > { %v1848_v0 = vld [vmem:[#allocation11 + $0x14a8] sm:$0xff]  ;;  %3213 = vmatpush.msra.mxu3 %v1592_v58  ;;  %v6052_v58 = vpop.f32.mrf.mxu2 }
 0x29d   : > { %v2072_v12 = vld [vmem:[#allocation11 + $0x1ba8] sm:$0xff]  ;;  %3259 = vmatpush.msrb.mxu1 %v1848_v0  ;;  %3316 = vmatpush.msra.mxu0 %v1305_v7  ;;  %v6054_v7 = vpop.f32.mrf.mxu3 }
 0x29e   : > { %v1584_v8 = vld [vmem:[#allocation11 + $0xc68] sm:$0xff]  ;;  %3270 = vmatpush.msrb.mxu2 %v2072_v12 }
 0x29f   : > { %v1840_v9 = vld [vmem:[#allocation11 + $0x1468] sm:$0xff]  ;;  %3214 = vmatpush.msra.mxu3 %v1584_v8  ;;  %3317 = vmatpush.msra.mxu0 %v1297_v13  ;;  %v1257_v8 = vld [vmem:[#allocation11 + $0x230] sm:$0xff] }
 0x2a0   : > { %v2064_v42 = vld [vmem:[#allocation11 + $0x1b68] sm:$0xff]  ;;  %3260 = vmatpush.msrb.mxu1 %v1840_v9  ;;  %3196 = vmatmul.f32.gmra.mxu2 %v5885_v63  ;;  %v1409_v9 = vld [vmem:[#allocation11 + $0x6f0] sm:$0xff] }
 0x2a1   : > { %v1576_v14 = vld [vmem:[#allocation11 + $0xc28] sm:$0xff]  ;;  %3271 = vmatpush.msrb.mxu2 %v2064_v42  ;;  %3318 = vmatpush.msra.mxu0 %v1289_v26  ;;  %v6058_v26 = vpop.f32.mrf.mxu0 }
 0x2a2   : > { %v1832_v19 = vld [vmem:[#allocation11 + $0x1428] sm:$0xff]  ;;  %3215 = vmatpush.msra.mxu3 %v1576_v14  ;;  %3242 = vmatmul.f32.gmra.mxu0 %v5907_v37  ;;  %v1249_v14 = vld [vmem:[#allocation11 + $0x1f0] sm:$0xff] }
 0x2a3   : > { %v2056_v22 = vld [vmem:[#allocation11 + $0x1b28] sm:$0xff]  ;;  %3261 = vmatpush.msrb.mxu1 %v1832_v19  ;;  %3216 = vmatmul.f32.vlgmr.msra.gmra.mxu3 %v5879_v59  ;;  %v1401_v19 = vld [vmem:[#allocation11 + $0x6b0] sm:$0xff] }
 0x2a4   : > { %v2208_v23 = vld [vmem:[#allocation11 + $0x1fe8] sm:$0xff]  ;;  %3262 = vmatmul.f32.vlgmr.msrb.gmra.mxu1 %v5905_v34  ;;  %3272 = vmatpush.msrb.mxu2 %v2056_v22 }
 0x2a5   : > { %3292 = vmatpush.msrb.mxu3 %v2208_v23  ;;  %v2048_v31 = vld [vmem:[#allocation11 + $0x1ae8] sm:$0xff]  ;;  %3338 = vmatpush.msra.mxu1 %v1441_v30  ;;  %v1241_v30 = vld [vmem:[#allocation11 + $0x1b0] sm:$0xff] }
 0x2a6   : > { %v2200_v16 = vld [vmem:[#allocation11 + $0x1fa8] sm:$0xff]  ;;  %3273 = vmatpush.msrb.mxu2 %v2048_v31  ;;  %3319 = vmatpush.msra.mxu0 %v1281_v32  ;;  %v1393_v31 = vld [vmem:[#allocation11 + $0x670] sm:$0xff] }
 0x2a7   : > { %v2040_v38 = vld [vmem:[#allocation11 + $0x1aa8] sm:$0xff]  ;;  %3293 = vmatpush.msrb.mxu3 %v2200_v16  ;;  %3339 = vmatpush.msra.mxu1 %v1433_v33  ;;  %v1233_v33 = vld [vmem:[#allocation11 + $0x170] sm:$0xff] }
 0x2a8   : > { %v2192_v46 = vld [vmem:[#allocation11 + $0x1f68] sm:$0xff]  ;;  %3274 = vmatpush.msrb.mxu2 %v2040_v38  ;;  %3320 = vmatpush.msra.mxu0 %v1273_v47  ;;  %v1385_v38 = vld [vmem:[#allocation11 + $0x630] sm:$0xff] }
 0x2a9   : > { %v2032_v53 = vld [vmem:[#allocation11 + $0x1a68] sm:$0xff]  ;;  %3294 = vmatpush.msrb.mxu3 %v2192_v46  ;;  %3340 = vmatpush.msra.mxu1 %v1425_v49  ;;  %v6060_v49 = vpop.f32.mrf.mxu1 }
 0x2aa   : > { %v2184_v56 = vld [vmem:[#allocation11 + $0x1f28] sm:$0xff]  ;;  %3275 = vmatpush.msrb.mxu2 %v2032_v53  ;;  %3321 = vmatpush.msra.mxu0 %v1265_v57  ;;  %v6062_v53 = vpop.f32.mrf.mxu2  ;;  %v1377_v57 = vld [vmem:[#allocation11 + $0x5f0] sm:$0xff] }
 0x2ab   : > { %3295 = vmatpush.msrb.mxu3 %v2184_v56  ;;  %v2024_v0 = vld [vmem:[#allocation11 + $0x1a28] sm:$0xff]  ;;  %3341 = vmatpush.msra.mxu1 %v1417_v51  ;;  %v1225_v56 = vld [vmem:[#allocation11 + $0x130] sm:$0xff] }
 0x2ac   : > { %v2176_v12 = vld [vmem:[#allocation11 + $0x1ee8] sm:$0xff]  ;;  %3219 = vmatmul.f32.gmra.mxu3 %v5891_v10  ;;  %3265 = vmatmul.f32.gmra.mxu1 %v5911_v50 }
 0x2ad   : > { %v2016_v42 = vld [vmem:[#allocation11 + $0x19e8] sm:$0xff]  ;;  %3276 = vmatpush.msrb.mxu2 %v2024_v0  ;;  %3296 = vmatpush.msrb.mxu3 %v2176_v12  ;;  %v6064_v12 = vpop.f32.mrf.mxu3 }
 0x2ae   : > { %v2168_v13 = vld [vmem:[#allocation11 + $0x1ea8] sm:$0xff]  ;;  %3322 = vmatpush.msra.mxu0 %v1257_v8  ;;  %3342 = vmatpush.msra.mxu1 %v1409_v9  ;;  %6540 = vst [vmem:[#allocation28_spill] sm:$0xff] %v6064_v12  ;;  %v1217_v8 = vld [vmem:[#allocation11 + $0xf0] sm:$0xff] }
 0x2af   : > { %v2008_v22 = vld [vmem:[#allocation11 + $0x19a8] sm:$0xff]  ;;  %3277 = vmatpush.msrb.mxu2 %v2016_v42  ;;  %3297 = vmatpush.msrb.mxu3 %v2168_v13  ;;  %v1369_v9 = vld [vmem:[#allocation11 + $0x5b0] sm:$0xff] }
 0x2b0   : > { %v2160_v23 = vld [vmem:[#allocation11 + $0x1e68] sm:$0xff]  ;;  %3323 = vmatpush.msra.mxu0 %v1249_v14  ;;  %3343 = vmatpush.msra.mxu1 %v1401_v19  ;;  %v1209_v14 = vld [vmem:[#allocation11 + $0xb0] sm:$0xff] }
 0x2b1   : > { %v2000_v16 = vld [vmem:[#allocation11 + $0x1968] sm:$0xff]  ;;  %3278 = vmatpush.msrb.mxu2 %v2008_v22  ;;  %3298 = vmatpush.msrb.mxu3 %v2160_v23  ;;  %v1361_v19 = vld [vmem:[#allocation11 + $0x570] sm:$0xff] }
 0x2b2   : > { %v2152_v32 = vld [vmem:[#allocation11 + $0x1e28] sm:$0xff]  ;;  %3324 = vmatpush.msra.mxu0 %v1241_v30  ;;  %3344 = vmatpush.msra.mxu1 %v1393_v31  ;;  %v6066_v30 = vpop.f32.mrf.mxu0  ;;  %v1201_v31 = vld [vmem:[#allocation11 + $0x70] sm:$0xff] }
 0x2b3   : > { %v1992_v46 = vld [vmem:[#allocation11 + $0x1928] sm:$0xff]  ;;  %3279 = vmatpush.msrb.mxu2 %v2000_v16  ;;  %3299 = vmatpush.msrb.mxu3 %v2152_v32  ;;  %v1353_v16 = vld [vmem:[#allocation11 + $0x530] sm:$0xff] }
 0x2b4   : > { %v2144_v47 = vld [vmem:[#allocation11 + $0x1de8] sm:$0xff]  ;;  %3325 = vmatpush.msra.mxu0 %v1233_v33  ;;  %3345 = vmatpush.msra.mxu1 %v1385_v38  ;;  %v1193_v38 = vld [vmem:[#allocation11 + $0x30] sm:$0xff] }
 0x2b5   : > { %v1984_v51 = vld [vmem:[#allocation11 + $0x18e8] sm:$0xff]  ;;  %3280 = vmatpush.msrb.mxu2 %v1992_v46  ;;  %3300 = vmatpush.msrb.mxu3 %v2144_v47  ;;  %v1345_v46 = vld [vmem:[#allocation11 + $0x4f0] sm:$0xff]  ;;  %v6068_v47 = vpop.f32.mrf.mxu1 }
 0x2b6   : > { %v2136_v0 = vld [vmem:[#allocation11 + $0x1da8] sm:$0xff]  ;;  %3326 = vmatpush.msra.mxu0 %v1225_v56  ;;  %3346 = vmatpush.msra.mxu1 %v1377_v57  ;;  %v6070_v56 = vpop.f32.mrf.mxu2  ;;  %v1569_v57 = vld [vmem:[#allocation11 + $0xbf0] sm:$0xff] }
 0x2b7   : > { %v1976_v42 = vld [vmem:[#allocation11 + $0x18a8] sm:$0xff]  ;;  %3281 = vmatpush.msrb.mxu2 %v1984_v51  ;;  %3301 = vmatpush.msrb.mxu3 %v2136_v0  ;;  %v1825_v51 = vld [vmem:[#allocation11 + $0x13f0] sm:$0xff] }
 0x2b8   : > { %v2128_v13 = vld [vmem:[#allocation11 + $0x1d68] sm:$0xff]  ;;  %3327 = vmatpush.msra.mxu0 %v1217_v8  ;;  %3347 = vmatpush.msra.mxu1 %v1369_v9  ;;  %v1337_v8 = vld [vmem:[#allocation11 + $0x4b0] sm:$0xff]  ;;  %v6072_v9 = vpop.f32.mrf.mxu3 }
 0x2b9   : > { %v1968_v22 = vld [vmem:[#allocation11 + $0x1868] sm:$0xff]  ;;  %3282 = vmatpush.msrb.mxu2 %v1976_v42  ;;  %3302 = vmatpush.msrb.mxu3 %v2128_v13  ;;  %v1561_v42 = vld [vmem:[#allocation11 + $0xbb0] sm:$0xff] }
 0x2ba   : > { %v2120_v23 = vld [vmem:[#allocation11 + $0x1d28] sm:$0xff]  ;;  %3328 = vmatpush.msra.mxu0 %v1209_v14  ;;  %3348 = vmatpush.msra.mxu1 %v1361_v19  ;;  %v1817_v13 = vld [vmem:[#allocation11 + $0x13b0] sm:$0xff] }
 0x2bb   : > { %v1960_v32 = vld [vmem:[#allocation11 + $0x1828] sm:$0xff]  ;;  %3283 = vmatpush.msrb.mxu2 %v1968_v22  ;;  %3303 = vmatpush.msrb.mxu3 %v2120_v23  ;;  %v1329_v19 = vld [vmem:[#allocation11 + $0x470] sm:$0xff]  ;;  %v6076_v22 = vpop.f32.mrf.mxu0 }
 0x2bc   : > { %v2112_v33 = vld [vmem:[#allocation11 + $0x1ce8] sm:$0xff]  ;;  %3329 = vmatpush.msra.mxu0 %v1201_v31  ;;  %3349 = vmatpush.msra.mxu1 %v1353_v16  ;;  %6541 = vst [vmem:[#allocation29_spill] sm:$0xff] %v6076_v22  ;;  %v1553_v23 = vld [vmem:[#allocation11 + $0xb70] sm:$0xff] }
 0x2bd   : > { %3284 = vmatpush.msrb.mxu2 %v1960_v32  ;;  %3304 = vmatpush.msrb.mxu3 %v2112_v33  ;;  %v2104_v0 = vld [vmem:[#allocation11 + $0x1ca8] sm:$0xff]  ;;  %v1809_v31 = vld [vmem:[#allocation11 + $0x1370] sm:$0xff] }
 0x2be   : > { %3330 = vmatpush.msra.mxu0 %v1193_v38  ;;  %3350 = vmatpush.msra.mxu1 %v1345_v46  ;;  %v2096_v14 = vld [vmem:[#allocation11 + $0x1c68] sm:$0xff]  ;;  %v1321_v32 = vld [vmem:[#allocation11 + $0x430] sm:$0xff]  ;;  %v6078_v46 = vpop.f32.mrf.mxu1 }
 0x2bf   : > { %3285 = vmatmul.f32.vlgmr.msrb.gmra.mxu2 %v5921_v39  ;;  %3331 = vmatmul.f32.vlgmr.msra.gmra.mxu0 %v5854_v28  ;;  %v2088_v16 = vld [vmem:[#allocation11 + $0x1c28] sm:$0xff]  ;;  %v1545_v33 = vld [vmem:[#allocation11 + $0xb30] sm:$0xff]  ;;  %6542 = vst [vmem:[#allocation30_spill] sm:$0xff] %v6078_v46 }
 0x2c0   : > { %3361 = vmatpush.msra.mxu2 %v1569_v57  ;;  %3407 = vmatpush.msrb.mxu0 %v1825_v51  ;;  %v1697_v38 = vld [vmem:[#allocation11 + $0xff0] sm:$0xff]  ;;  %v6080_v57 = vpop.f32.mrf.mxu2 }
 0x2c1   : > { %3305 = vmatpush.msrb.mxu3 %v2104_v0  ;;  %3351 = vmatpush.msra.mxu1 %v1337_v8  ;;  %6543 = vst [vmem:[#allocation31_spill] sm:$0xff] %v6080_v57  ;;  %v1801_v51 = vld [vmem:[#allocation11 + $0x1330] sm:$0xff]  ;;  %v6084_v8 = vpop.f32.mrf.mxu3 }
 0x2c2   : > { %3362 = vmatpush.msra.mxu2 %v1561_v42  ;;  %3408 = vmatpush.msrb.mxu0 %v1817_v13  ;;  %v1953_v0 = vld [vmem:[#allocation11 + $0x17f0] sm:$0xff]  ;;  %6544 = vst [vmem:[#allocation32_spill] sm:$0xff] %v6084_v8 }
 0x2c3   : > { %3306 = vmatpush.msrb.mxu3 %v2096_v14  ;;  %3352 = vmatpush.msra.mxu1 %v1329_v19  ;;  %v1537_v42 = vld [vmem:[#allocation11 + $0xaf0] sm:$0xff]  ;;  %v6088_v57 = vpop.f32.mrf.mxu0 }
 0x2c4   : > { %3363 = vmatpush.msra.mxu2 %v1553_v23  ;;  %3409 = vmatpush.msrb.mxu0 %v1809_v31  ;;  %v1689_v13 = vld [vmem:[#allocation11 + $0xfb0] sm:$0xff]  ;;  %6545 = vst [vmem:[#allocation33_spill] sm:$0xff] %v6088_v57 }
 0x2c5   : > { %3307 = vmatpush.msrb.mxu3 %v2088_v16  ;;  %3353 = vmatpush.msra.mxu1 %v1321_v32  ;;  %v1793_v14 = vld [vmem:[#allocation11 + $0x12f0] sm:$0xff] }
 0x2c6   : > { %3308 = vmatmul.f32.vlgmr.msrb.gmra.mxu3 %v5929_v1  ;;  %3354 = vmatmul.f32.vlgmr.msra.gmra.mxu1 %v5856_v29  ;;  %v1945_v19 = vld [vmem:[#allocation11 + $0x17b0] sm:$0xff] }
 0x2c7   : > { %3364 = vmatpush.msra.mxu2 %v1545_v33  ;;  %3384 = vmatpush.msra.mxu3 %v1697_v38  ;;  %v1529_v23 = vld [vmem:[#allocation11 + $0xab0] sm:$0xff] }
 0x2c8   : > { %3410 = vmatpush.msrb.mxu0 %v1801_v51  ;;  %3430 = vmatpush.msrb.mxu1 %v1953_v0  ;;  %v1681_v31 = vld [vmem:[#allocation11 + $0xf70] sm:$0xff] }
 0x2c9   : > { %3288 = vmatmul.f32.gmra.mxu2 %v5932_v4  ;;  %3334 = vmatmul.f32.gmra.mxu0 %v5881_v61  ;;  %v1785_v16 = vld [vmem:[#allocation11 + $0x12b0] sm:$0xff] }
 0x2ca   : > { %3365 = vmatpush.msra.mxu2 %v1537_v42  ;;  %3385 = vmatpush.msra.mxu3 %v1689_v13  ;;  %v1937_v32 = vld [vmem:[#allocation11 + $0x1770] sm:$0xff]  ;;  %v6090_v42 = vpop.f32.mrf.mxu1  ;;  %v6092_v13 = vpop.f32.mrf.mxu2 }
 0x2cb   : > { %3411 = vmatpush.msrb.mxu0 %v1793_v14  ;;  %3431 = vmatpush.msrb.mxu1 %v1945_v19  ;;  %v1521_v33 = vld [vmem:[#allocation11 + $0xa70] sm:$0xff]  ;;  %6546 = vst [vmem:[#allocation34_spill] sm:$0xff] %v6090_v42 }
 0x2cc   : > { %v1673_v38 = vld [vmem:[#allocation11 + $0xf30] sm:$0xff]  ;;  %3366 = vmatpush.msra.mxu2 %v1529_v23  ;;  %3386 = vmatpush.msra.mxu3 %v1681_v31  ;;  %6547 = vst [vmem:[#allocation35_spill] sm:$0xff] %v6092_v13 }
 0x2cd   : > { %v1777_v51 = vld [vmem:[#allocation11 + $0x1270] sm:$0xff]  ;;  %3412 = vmatpush.msrb.mxu0 %v1785_v16  ;;  %3432 = vmatpush.msrb.mxu1 %v1937_v32  ;;  %v6096_v16 = vpop.f32.mrf.mxu3 }
 0x2ce   : > { %v1929_v0 = vld [vmem:[#allocation11 + $0x1730] sm:$0xff]  ;;  %3367 = vmatpush.msra.mxu2 %v1521_v33  ;;  %3387 = vmatpush.msra.mxu3 %v1673_v38  ;;  %6548 = vst [vmem:[#allocation36_spill] sm:$0xff] %v6096_v16 }
 0x2cf   : > { %v1513_v8 = vld [vmem:[#allocation11 + $0xa30] sm:$0xff]  ;;  %3413 = vmatpush.msrb.mxu0 %v1777_v51  ;;  %3433 = vmatpush.msrb.mxu1 %v1929_v0  ;;  %v6098_v51 = vpop.f32.mrf.mxu0 }
 0x2d0   : > { %v1665_v46 = vld [vmem:[#allocation11 + $0xef0] sm:$0xff]  ;;  %3311 = vmatmul.f32.gmra.mxu3 %v5938_v20  ;;  %3357 = vmatmul.f32.gmra.mxu1 %v5883_v62  ;;  %6549 = vst [vmem:[#allocation37_spill] sm:$0xff] %v6098_v51 }
 0x2d1   : > { %v1769_v14 = vld [vmem:[#allocation11 + $0x1230] sm:$0xff]  ;;  %3368 = vmatpush.msra.mxu2 %v1513_v8  ;;  %3388 = vmatpush.msra.mxu3 %v1665_v46 }
 0x2d2   : > { %v1921_v19 = vld [vmem:[#allocation11 + $0x16f0] sm:$0xff]  ;;  %3414 = vmatpush.msrb.mxu0 %v1769_v14  ;;  %v6100_v16 = vpop.f32.mrf.mxu1  ;;  %v6102_v12 = vpop.f32.mrf.mxu2 }
 0x2d3   : > { %v1505_v23 = vld [vmem:[#allocation11 + $0x9f0] sm:$0xff]  ;;  %3434 = vmatpush.msrb.mxu1 %v1921_v19  ;;  %6550 = vst [vmem:[#allocation38_spill] sm:$0xff] %v6100_v16 }
 0x2d4   : > { %v1657_v31 = vld [vmem:[#allocation11 + $0xeb0] sm:$0xff]  ;;  %3369 = vmatpush.msra.mxu2 %v1505_v23  ;;  %6551 = vst [vmem:[#allocation39_spill] sm:$0xff] %v6102_v12 }
 0x2d5   : > { %v1761_v32 = vld [vmem:[#allocation11 + $0x11f0] sm:$0xff]  ;;  %3389 = vmatpush.msra.mxu3 %v1657_v31 }
 0x2d6   : > { %v1913_v33 = vld [vmem:[#allocation11 + $0x16b0] sm:$0xff]  ;;  %3415 = vmatpush.msrb.mxu0 %v1761_v32 }
 0x2d7   : > { %v1497_v38 = vld [vmem:[#allocation11 + $0x9b0] sm:$0xff]  ;;  %3435 = vmatpush.msrb.mxu1 %v1913_v33  ;;  %v6106_v12 = vpop.f32.mrf.mxu0 }
 0x2d8   : > { %v1649_v13 = vld [vmem:[#allocation11 + $0xe70] sm:$0xff]  ;;  %3370 = vmatpush.msra.mxu2 %v1497_v38  ;;  %v6104_v38 = vpop.f32.mrf.mxu3  ;;  %6553 = vst [vmem:[#allocation41_spill] sm:$0xff] %v6106_v12 }
 0x2d9   : > { %v1753_v0 = vld [vmem:[#allocation11 + $0x11b0] sm:$0xff]  ;;  %3390 = vmatpush.msra.mxu3 %v1649_v13  ;;  %6552 = vst [vmem:[#allocation40_spill] sm:$0xff] %v6104_v38 }
 0x2da   : > { %v1905_v22 = vld [vmem:[#allocation11 + $0x1670] sm:$0xff]  ;;  %3416 = vmatpush.msrb.mxu0 %v1753_v0 }
 0x2db   : > { %v1489_v42 = vld [vmem:[#allocation11 + $0x970] sm:$0xff]  ;;  %3436 = vmatpush.msrb.mxu1 %v1905_v22 }
 0x2dc   : > { %v1641_v57 = vld [vmem:[#allocation11 + $0xe30] sm:$0xff]  ;;  %3371 = vmatpush.msra.mxu2 %v1489_v42 }
 0x2dd   : > { %v1745_v8 = vld [vmem:[#allocation11 + $0x1170] sm:$0xff]  ;;  %3391 = vmatpush.msra.mxu3 %v1641_v57 }
 0x2de   : > { %v1897_v46 = vld [vmem:[#allocation11 + $0x1630] sm:$0xff]  ;;  %3417 = vmatpush.msrb.mxu0 %v1745_v8 }
 0x2df   : > { %v1481_v14 = vld [vmem:[#allocation11 + $0x930] sm:$0xff]  ;;  %3437 = vmatpush.msrb.mxu1 %v1897_v46 }
 0x2e0   : > { %v1633_v19 = vld [vmem:[#allocation11 + $0xdf0] sm:$0xff]  ;;  %3372 = vmatpush.msra.mxu2 %v1481_v14  ;;  %v6112_v38 = vpop.f32.mrf.mxu3 }
 0x2e1   : > { %v1737_v23 = vld [vmem:[#allocation11 + $0x1130] sm:$0xff]  ;;  %3392 = vmatpush.msra.mxu3 %v1633_v19  ;;  %6556 = vst [vmem:[#allocation44_spill] sm:$0xff] %v6112_v38 }
 0x2e2   : > { %v1889_v31 = vld [vmem:[#allocation11 + $0x15f0] sm:$0xff]  ;;  %3418 = vmatpush.msrb.mxu0 %v1737_v23 }
 0x2e3   : > { %v1473_v32 = vld [vmem:[#allocation11 + $0x8f0] sm:$0xff]  ;;  %3438 = vmatpush.msrb.mxu1 %v1889_v31 }
 0x2e4   : > { %v1625_v33 = vld [vmem:[#allocation11 + $0xdb0] sm:$0xff]  ;;  %3373 = vmatpush.msra.mxu2 %v1473_v32 }
 0x2e5   : > { %v1729_v13 = vld [vmem:[#allocation11 + $0x10f0] sm:$0xff]  ;;  %3393 = vmatpush.msra.mxu3 %v1625_v33 }
 0x2e6   : > { %v1881_v22 = vld [vmem:[#allocation11 + $0x15b0] sm:$0xff]  ;;  %3419 = vmatpush.msrb.mxu0 %v1729_v13  ;;  %v6108_v13 = vpop.f32.mrf.mxu1 }
 0x2e7   : > { %v1465_v0 = vld [vmem:[#allocation11 + $0x8b0] sm:$0xff]  ;;  %3439 = vmatpush.msrb.mxu1 %v1881_v22  ;;  %6554 = vst [vmem:[#allocation42_spill] sm:$0xff] %v6108_v13  ;;  %v6110_v22 = vpop.f32.mrf.mxu2 }
 0x2e8   : > { %v1617_v16 = vld [vmem:[#allocation11 + $0xd70] sm:$0xff]  ;;  %3374 = vmatpush.msra.mxu2 %v1465_v0  ;;  %6555 = vst [vmem:[#allocation43_spill] sm:$0xff] %v6110_v22 }
 0x2e9   : > { %v1721_v42 = vld [vmem:[#allocation11 + $0x10b0] sm:$0xff]  ;;  %3394 = vmatpush.msra.mxu3 %v1617_v16  ;;  %v1314_v16 = vld [vmem:[#allocation11 + $0x3f8] sm:$0xff] }
 0x2ea   : > { %v1873_v57 = vld [vmem:[#allocation11 + $0x1570] sm:$0xff]  ;;  %3420 = vmatpush.msrb.mxu0 %v1721_v42 }
 0x2eb   : > { %v1457_v8 = vld [vmem:[#allocation11 + $0x870] sm:$0xff]  ;;  %3440 = vmatpush.msrb.mxu1 %v1873_v57 }
 0x2ec   : > { %v1609_v46 = vld [vmem:[#allocation11 + $0xd30] sm:$0xff]  ;;  %3375 = vmatpush.msra.mxu2 %v1457_v8 }
 0x2ed   : > { %v1713_v14 = vld [vmem:[#allocation11 + $0x1070] sm:$0xff]  ;;  %3395 = vmatpush.msra.mxu3 %v1609_v46  ;;  %v1306_v46 = vld [vmem:[#allocation11 + $0x3b8] sm:$0xff] }
 0x2ee   : > { %v1865_v19 = vld [vmem:[#allocation11 + $0x1530] sm:$0xff]  ;;  %3421 = vmatpush.msrb.mxu0 %v1713_v14 }
 0x2ef   : > { %v1449_v23 = vld [vmem:[#allocation11 + $0x830] sm:$0xff]  ;;  %3441 = vmatpush.msrb.mxu1 %v1865_v19 }
 0x2f0   : > { %v1601_v31 = vld [vmem:[#allocation11 + $0xcf0] sm:$0xff]  ;;  %3376 = vmatpush.msra.mxu2 %v1449_v23  ;;  %v6116_v23 = vpop.f32.mrf.mxu0 }
 0x2f1   : > { %v1705_v32 = vld [vmem:[#allocation11 + $0x1030] sm:$0xff]  ;;  %3396 = vmatpush.msra.mxu3 %v1601_v31  ;;  %3377 = vmatmul.f32.vlgmr.msra.gmra.mxu2 %v5858_v35  ;;  %6557 = vst [vmem:[#allocation45_spill] sm:$0xff] %v6116_v23  ;;  %v1394_v23 = vld [vmem:[#allocation11 + $0x678] sm:$0xff] }
 0x2f2   : > { %v1857_v33 = vld [vmem:[#allocation11 + $0x14f0] sm:$0xff]  ;;  %3422 = vmatpush.msrb.mxu0 %v1705_v32  ;;  %v1298_v32 = vld [vmem:[#allocation11 + $0x378] sm:$0xff] }
 0x2f3   : > { %v2081_v0 = vld [vmem:[#allocation11 + $0x1bf0] sm:$0xff]  ;;  %3442 = vmatpush.msrb.mxu1 %v1857_v33  ;;  %3423 = vmatmul.f32.vlgmr.msrb.gmra.mxu0 %v5899_v17 }
 0x2f4   : > { %v1593_v42 = vld [vmem:[#allocation11 + $0xcb0] sm:$0xff]  ;;  %3453 = vmatpush.msrb.mxu2 %v2081_v0  ;;  %3499 = vmatpush.msra.mxu0 %v1314_v16  ;;  %v6118_v0 = vpop.f32.mrf.mxu1  ;;  %v6120_v16 = vpop.f32.mrf.mxu2 }
 0x2f5   : > { %v1849_v57 = vld [vmem:[#allocation11 + $0x14b0] sm:$0xff]  ;;  %3397 = vmatpush.msra.mxu3 %v1593_v42  ;;  %6558 = vst [vmem:[#allocation46_spill] sm:$0xff] %v6118_v0  ;;  %v1290_v42 = vld [vmem:[#allocation11 + $0x338] sm:$0xff] }
 0x2f6   : > { %v2073_v8 = vld [vmem:[#allocation11 + $0x1bb0] sm:$0xff]  ;;  %3443 = vmatpush.msrb.mxu1 %v1849_v57  ;;  %3500 = vmatpush.msra.mxu0 %v1306_v46  ;;  %6559 = vst [vmem:[#allocation47_spill] sm:$0xff] %v6120_v16  ;;  %v1442_v57 = vld [vmem:[#allocation11 + $0x7f8] sm:$0xff] }
 0x2f7   : > { %v1585_v14 = vld [vmem:[#allocation11 + $0xc70] sm:$0xff]  ;;  %3454 = vmatpush.msrb.mxu2 %v2073_v8  ;;  %v6124_v8 = vpop.f32.mrf.mxu3  ;;  %v1426_v16 = vld [vmem:[#allocation11 + $0x778] sm:$0xff] }
 0x2f8   : > { %v1841_v19 = vld [vmem:[#allocation11 + $0x1470] sm:$0xff]  ;;  %3398 = vmatpush.msra.mxu3 %v1585_v14  ;;  %3501 = vmatpush.msra.mxu0 %v1298_v32  ;;  %6560 = vst [vmem:[#allocation48_spill] sm:$0xff] %v6124_v8  ;;  %v6128_v51 = vpop.f32.mrf.mxu0 }
 0x2f9   : > { %v2065_v31 = vld [vmem:[#allocation11 + $0x1b70] sm:$0xff]  ;;  %3444 = vmatpush.msrb.mxu1 %v1841_v19  ;;  %v1282_v19 = vld [vmem:[#allocation11 + $0x2f8] sm:$0xff]  ;;  %3380 = vmatmul.f32.gmra.mxu2 %v5885_v63  ;;  %6561 = vst [vmem:[#allocation49_spill] sm:$0xff] %v6128_v51 }
 0x2fa   : > { %v1577_v33 = vld [vmem:[#allocation11 + $0xc30] sm:$0xff]  ;;  %3455 = vmatpush.msrb.mxu2 %v2065_v31  ;;  %3502 = vmatpush.msra.mxu0 %v1290_v42  ;;  %v1434_v31 = vld [vmem:[#allocation11 + $0x7b8] sm:$0xff] }
 0x2fb   : > { %v1833_v38 = vld [vmem:[#allocation11 + $0x1430] sm:$0xff]  ;;  %3399 = vmatpush.msra.mxu3 %v1577_v33  ;;  %3426 = vmatmul.f32.gmra.mxu0 %v5907_v37  ;;  %v1274_v33 = vld [vmem:[#allocation11 + $0x2b8] sm:$0xff] }
 0x2fc   : > { %v2057_v22 = vld [vmem:[#allocation11 + $0x1b30] sm:$0xff]  ;;  %3445 = vmatpush.msrb.mxu1 %v1833_v38  ;;  %3400 = vmatmul.f32.vlgmr.msra.gmra.mxu3 %v5879_v59  ;;  %v1266_v42 = vld [vmem:[#allocation11 + $0x278] sm:$0xff] }
 0x2fd   : > { %v2209_v13 = vld [vmem:[#allocation11 + $0x1ff0] sm:$0xff]  ;;  %3446 = vmatmul.f32.vlgmr.msrb.gmra.mxu1 %v5905_v34  ;;  %3456 = vmatpush.msrb.mxu2 %v2057_v22 }
 0x2fe   : > { %3476 = vmatpush.msrb.mxu3 %v2209_v13  ;;  %v2049_v46 = vld [vmem:[#allocation11 + $0x1af0] sm:$0xff]  ;;  %3522 = vmatpush.msra.mxu1 %v1442_v57  ;;  %v1418_v57 = vld [vmem:[#allocation11 + $0x738] sm:$0xff] }
 0x2ff   : > { %v2201_v14 = vld [vmem:[#allocation11 + $0x1fb0] sm:$0xff]  ;;  %3457 = vmatpush.msrb.mxu2 %v2049_v46  ;;  %3503 = vmatpush.msra.mxu0 %v1282_v19  ;;  %v6130_v46 = vpop.f32.mrf.mxu1  ;;  %v1258_v19 = vld [vmem:[#allocation11 + $0x238] sm:$0xff] }
 0x300   : > { %v2041_v38 = vld [vmem:[#allocation11 + $0x1ab0] sm:$0xff]  ;;  %3477 = vmatpush.msrb.mxu3 %v2201_v14  ;;  %3523 = vmatpush.msra.mxu1 %v1434_v31  ;;  %6562 = vst [vmem:[#allocation50_spill] sm:$0xff] %v6130_v46  ;;  %v6132_v14 = vpop.f32.mrf.mxu2  ;;  %v1410_v31 = vld [vmem:[#allocation11 + $0x6f8] sm:$0xff] }
 0x301   : > { %v2193_v32 = vld [vmem:[#allocation11 + $0x1f70] sm:$0xff]  ;;  %3458 = vmatpush.msrb.mxu2 %v2041_v38  ;;  %3504 = vmatpush.msra.mxu0 %v1274_v33  ;;  %6563 = vst [vmem:[#allocation51_spill] sm:$0xff] %v6132_v14  ;;  %v6136_v33 = vpop.f32.mrf.mxu3 }
 0x302   : > { %v2033_v13 = vld [vmem:[#allocation11 + $0x1a70] sm:$0xff]  ;;  %3478 = vmatpush.msrb.mxu3 %v2193_v32  ;;  %3524 = vmatpush.msra.mxu1 %v1426_v16  ;;  %6564 = vst [vmem:[#allocation52_spill] sm:$0xff] %v6136_v33  ;;  %v1250_v16 = vld [vmem:[#allocation11 + $0x1f8] sm:$0xff] }
 0x303   : > { %v2185_v22 = vld [vmem:[#allocation11 + $0x1f30] sm:$0xff]  ;;  %3459 = vmatpush.msrb.mxu2 %v2033_v13  ;;  %3505 = vmatpush.msra.mxu0 %v1266_v42  ;;  %v1402_v13 = vld [vmem:[#allocation11 + $0x6b8] sm:$0xff]  ;;  %v6138_v42 = vpop.f32.mrf.mxu0 }
 0x304   : > { %3479 = vmatpush.msrb.mxu3 %v2185_v22  ;;  %v2025_v8 = vld [vmem:[#allocation11 + $0x1a30] sm:$0xff]  ;;  %3525 = vmatpush.msra.mxu1 %v1418_v57  ;;  %6565 = vst [vmem:[#allocation53_spill] sm:$0xff] %v6138_v42  ;;  %v1242_v57 = vld [vmem:[#allocation11 + $0x1b8] sm:$0xff] }
 0x305   : > { %v2177_v0 = vld [vmem:[#allocation11 + $0x1ef0] sm:$0xff]  ;;  %3403 = vmatmul.f32.gmra.mxu3 %v5891_v10  ;;  %3449 = vmatmul.f32.gmra.mxu1 %v5911_v50 }
 0x306   : > { %v2017_v38 = vld [vmem:[#allocation11 + $0x19f0] sm:$0xff]  ;;  %3460 = vmatpush.msrb.mxu2 %v2025_v8  ;;  %3480 = vmatpush.msrb.mxu3 %v2177_v0  ;;  %v1234_v8 = vld [vmem:[#allocation11 + $0x178] sm:$0xff] }
 0x307   : > { %v2169_v32 = vld [vmem:[#allocation11 + $0x1eb0] sm:$0xff]  ;;  %3506 = vmatpush.msra.mxu0 %v1258_v19  ;;  %3526 = vmatpush.msra.mxu1 %v1410_v31  ;;  %v1386_v0 = vld [vmem:[#allocation11 + $0x638] sm:$0xff]  ;;  %v6140_v33 = vpop.f32.mrf.mxu1 }
 0x308   : > { %v2009_v22 = vld [vmem:[#allocation11 + $0x19b0] sm:$0xff]  ;;  %3461 = vmatpush.msrb.mxu2 %v2017_v38  ;;  %3481 = vmatpush.msrb.mxu3 %v2169_v32  ;;  %6566 = vst [vmem:[#allocation54_spill] sm:$0xff] %v6140_v33  ;;  %v6142_v51 = vpop.f32.mrf.mxu2  ;;  %v1226_v38 = vld [vmem:[#allocation11 + $0x138] sm:$0xff] }
 0x309   : > { %v2161_v14 = vld [vmem:[#allocation11 + $0x1e70] sm:$0xff]  ;;  %3507 = vmatpush.msra.mxu0 %v1250_v16  ;;  %3527 = vmatpush.msra.mxu1 %v1402_v13  ;;  %6567 = vst [vmem:[#allocation55_spill] sm:$0xff] %v6142_v51  ;;  %v1378_v32 = vld [vmem:[#allocation11 + $0x5f8] sm:$0xff] }
 0x30a   : > { %v2001_v12 = vld [vmem:[#allocation11 + $0x1970] sm:$0xff]  ;;  %3462 = vmatpush.msrb.mxu2 %v2009_v22  ;;  %3482 = vmatpush.msrb.mxu3 %v2161_v14  ;;  %v6144_v22 = vpop.f32.mrf.mxu3  ;;  %v1218_v14 = vld [vmem:[#allocation11 + $0xf8] sm:$0xff] }
 0x30b   : > { %v2153_v46 = vld [vmem:[#allocation11 + $0x1e30] sm:$0xff]  ;;  %3508 = vmatpush.msra.mxu0 %v1242_v57  ;;  %3528 = vmatpush.msra.mxu1 %v1394_v23  ;;  %6568 = vst [vmem:[#allocation56_spill] sm:$0xff] %v6144_v22  ;;  %v1370_v23 = vld [vmem:[#allocation11 + $0x5b8] sm:$0xff]  ;;  %v6146_v51 = vpop.f32.mrf.mxu0 }
 0x30c   : > { %v1993_v19 = vld [vmem:[#allocation11 + $0x1930] sm:$0xff]  ;;  %3463 = vmatpush.msrb.mxu2 %v2001_v12  ;;  %3483 = vmatpush.msrb.mxu3 %v2153_v46  ;;  %v1210_v12 = vld [vmem:[#allocation11 + $0xb8] sm:$0xff]  ;;  %6569 = vst [vmem:[#allocation57_spill] sm:$0xff] %v6146_v51 }
 0x30d   : > { %v2145_v31 = vld [vmem:[#allocation11 + $0x1df0] sm:$0xff]  ;;  %3509 = vmatpush.msra.mxu0 %v1234_v8  ;;  %3529 = vmatpush.msra.mxu1 %v1386_v0  ;;  %v1362_v46 = vld [vmem:[#allocation11 + $0x578] sm:$0xff] }
 0x30e   : > { %v1985_v16 = vld [vmem:[#allocation11 + $0x18f0] sm:$0xff]  ;;  %3464 = vmatpush.msrb.mxu2 %v1993_v19  ;;  %3484 = vmatpush.msrb.mxu3 %v2145_v31  ;;  %v1202_v19 = vld [vmem:[#allocation11 + $0x78] sm:$0xff] }
 0x30f   : > { %v2137_v13 = vld [vmem:[#allocation11 + $0x1db0] sm:$0xff]  ;;  %3510 = vmatpush.msra.mxu0 %v1226_v38  ;;  %3530 = vmatpush.msra.mxu1 %v1378_v32  ;;  %v1354_v31 = vld [vmem:[#allocation11 + $0x538] sm:$0xff] }
 0x310   : > { %v1977_v57 = vld [vmem:[#allocation11 + $0x18b0] sm:$0xff]  ;;  %3465 = vmatpush.msrb.mxu2 %v1985_v16  ;;  %3485 = vmatpush.msrb.mxu3 %v2137_v13  ;;  %v1194_v16 = vld [vmem:[#allocation11 + $0x38] sm:$0xff] }
 0x311   : > { %v2129_v33 = vld [vmem:[#allocation11 + $0x1d70] sm:$0xff]  ;;  %3511 = vmatpush.msra.mxu0 %v1218_v14  ;;  %3531 = vmatpush.msra.mxu1 %v1370_v23  ;;  %v1346_v13 = vld [vmem:[#allocation11 + $0x4f8] sm:$0xff]  ;;  %v6148_v14 = vpop.f32.mrf.mxu1  ;;  %v6150_v23 = vpop.f32.mrf.mxu2 }
 0x312   : > { %v1969_v8 = vld [vmem:[#allocation11 + $0x1870] sm:$0xff]  ;;  %3466 = vmatpush.msrb.mxu2 %v1977_v57  ;;  %3486 = vmatpush.msrb.mxu3 %v2129_v33  ;;  %6570 = vst [vmem:[#allocation58_spill] sm:$0xff] %v6148_v14  ;;  %v1570_v57 = vld [vmem:[#allocation11 + $0xbf8] sm:$0xff]  ;;  %v6152_v22 = vpop.f32.mrf.mxu3 }
 0x313   : > { %v2121_v0 = vld [vmem:[#allocation11 + $0x1d30] sm:$0xff]  ;;  %3512 = vmatpush.msra.mxu0 %v1210_v12  ;;  %3532 = vmatpush.msra.mxu1 %v1362_v46  ;;  %6571 = vst [vmem:[#allocation59_spill] sm:$0xff] %v6150_v23  ;;  %v1826_v33 = vld [vmem:[#allocation11 + $0x13f8] sm:$0xff] }
 0x314   : > { %v1961_v38 = vld [vmem:[#allocation11 + $0x1830] sm:$0xff]  ;;  %3467 = vmatpush.msrb.mxu2 %v1969_v8  ;;  %3487 = vmatpush.msrb.mxu3 %v2121_v0  ;;  %v1338_v46 = vld [vmem:[#allocation11 + $0x4b8] sm:$0xff]  ;;  %6572 = vst [vmem:[#allocation60_spill] sm:$0xff] %v6152_v22 }
 0x315   : > { %v2113_v32 = vld [vmem:[#allocation11 + $0x1cf0] sm:$0xff]  ;;  %3513 = vmatpush.msra.mxu0 %v1202_v19  ;;  %3533 = vmatpush.msra.mxu1 %v1354_v31  ;;  %v1562_v8 = vld [vmem:[#allocation11 + $0xbb8] sm:$0xff] }
 0x316   : > { %3468 = vmatpush.msrb.mxu2 %v1961_v38  ;;  %3488 = vmatpush.msrb.mxu3 %v2113_v32  ;;  %v2105_v12 = vld [vmem:[#allocation11 + $0x1cb0] sm:$0xff]  ;;  %v1818_v0 = vld [vmem:[#allocation11 + $0x13b8] sm:$0xff]  ;;  %v6156_v38 = vpop.f32.mrf.mxu0 }
 0x317   : > { %3514 = vmatpush.msra.mxu0 %v1194_v16  ;;  %3534 = vmatpush.msra.mxu1 %v1346_v13  ;;  %v2097_v19 = vld [vmem:[#allocation11 + $0x1c70] sm:$0xff]  ;;  %v1330_v31 = vld [vmem:[#allocation11 + $0x478] sm:$0xff] }
 0x318   : > { %3469 = vmatmul.f32.vlgmr.msrb.gmra.mxu2 %v5921_v39  ;;  %3515 = vmatmul.f32.vlgmr.msra.gmra.mxu0 %v5854_v28  ;;  %v1554_v32 = vld [vmem:[#allocation11 + $0xb78] sm:$0xff]  ;;  %v2089_v13 = vld [vmem:[#allocation11 + $0x1c30] sm:$0xff] }
 0x319   : > { %3545 = vmatpush.msra.mxu2 %v1570_v57  ;;  %3591 = vmatpush.msrb.mxu0 %v1826_v33  ;;  %v1810_v16 = vld [vmem:[#allocation11 + $0x1378] sm:$0xff]  ;;  %v6158_v57 = vpop.f32.mrf.mxu1  ;;  %v6160_v33 = vpop.f32.mrf.mxu2 }
 0x31a   : > { %3489 = vmatpush.msrb.mxu3 %v2105_v12  ;;  %3535 = vmatpush.msra.mxu1 %v1338_v46  ;;  %v1322_v22 = vld [vmem:[#allocation11 + $0x438] sm:$0xff] }
 0x31b   : > { %3546 = vmatpush.msra.mxu2 %v1562_v8  ;;  %3592 = vmatpush.msrb.mxu0 %v1818_v0  ;;  %v1546_v28 = vld [vmem:[#allocation11 + $0xb38] sm:$0xff]  ;;  %v6164_v8 = vpop.f32.mrf.mxu3 }
 0x31c   : > { %3490 = vmatpush.msrb.mxu3 %v2097_v19  ;;  %3536 = vmatpush.msra.mxu1 %v1330_v31  ;;  %v1698_v23 = vld [vmem:[#allocation11 + $0xff8] sm:$0xff] }
 0x31d   : > { %3547 = vmatpush.msra.mxu2 %v1554_v32  ;;  %3593 = vmatpush.msrb.mxu0 %v1810_v16  ;;  %v1802_v12 = vld [vmem:[#allocation11 + $0x1338] sm:$0xff] }
 0x31e   : > { %3491 = vmatpush.msrb.mxu3 %v2089_v13  ;;  %3537 = vmatpush.msra.mxu1 %v1322_v22  ;;  %v1954_v46 = vld [vmem:[#allocation11 + $0x17f8] sm:$0xff] }
 0x31f   : > { %3492 = vmatmul.f32.vlgmr.msrb.gmra.mxu3 %v5929_v1  ;;  %3538 = vmatmul.f32.vlgmr.msra.gmra.mxu1 %v5856_v29  ;;  %v1538_v0 = vld [vmem:[#allocation11 + $0xaf8] sm:$0xff]  ;;  %v2967_v1 = vpop.f32.mrf.mxu0 }
 0x320   : > { %3548 = vmatpush.msra.mxu2 %v1546_v28  ;;  %3568 = vmatpush.msra.mxu3 %v1698_v23  ;;  %v1690_v19 = vld [vmem:[#allocation11 + $0xfb8] sm:$0xff] }
 0x321   : > { %3594 = vmatpush.msrb.mxu0 %v1802_v12  ;;  %3614 = vmatpush.msrb.mxu1 %v1954_v46  ;;  %v1794_v31 = vld [vmem:[#allocation11 + $0x12f8] sm:$0xff]  ;;  %v2990_v14 = vpop.f32.mrf.mxu1 }
 0x322   : > { %v1946_v32 = vld [vmem:[#allocation11 + $0x17b8] sm:$0xff]  ;;  %3472 = vmatmul.f32.gmra.mxu2 %v5932_v4  ;;  %3518 = vmatmul.f32.gmra.mxu0 %v5881_v61  ;;  %v2991_v42 = vadd.f32 %v2990_v14, %v2967_v1 }
 0x323   : > { %v1530_v22 = vld [vmem:[#allocation11 + $0xab8] sm:$0xff]  ;;  %3549 = vmatpush.msra.mxu2 %v1538_v0  ;;  %3569 = vmatpush.msra.mxu3 %v1690_v19  ;;  %v3013_v0 = vpop.f32.mrf.mxu2 }
 0x324   : > { %v1682_v16 = vld [vmem:[#allocation11 + $0xf78] sm:$0xff]  ;;  %3595 = vmatpush.msrb.mxu0 %v1794_v31  ;;  %3615 = vmatpush.msrb.mxu1 %v1946_v32 }
 0x325   : > { %v1786_v13 = vld [vmem:[#allocation11 + $0x12b8] sm:$0xff]  ;;  %3550 = vmatpush.msra.mxu2 %v1530_v22  ;;  %3570 = vmatpush.msra.mxu3 %v1682_v16  ;;  %v3036_v22 = vpop.f32.mrf.mxu3 }
 0x326   : > { %v1938_v29 = vld [vmem:[#allocation11 + $0x1778] sm:$0xff]  ;;  %3596 = vmatpush.msrb.mxu0 %v1786_v13 }
 0x327   : > { %v1522_v23 = vld [vmem:[#allocation11 + $0xa78] sm:$0xff]  ;;  %3616 = vmatpush.msrb.mxu1 %v1938_v29  ;;  %3495 = vmatmul.f32.gmra.mxu3 %v5938_v20 }
 0x328   : > { %v1674_v28 = vld [vmem:[#allocation11 + $0xf38] sm:$0xff]  ;;  %3551 = vmatpush.msra.mxu2 %v1522_v23  ;;  %3541 = vmatmul.f32.gmra.mxu1 %v5883_v62 }
 0x329   : > { %v1778_v12 = vld [vmem:[#allocation11 + $0x1278] sm:$0xff]  ;;  %3571 = vmatpush.msra.mxu3 %v1674_v28  ;;  %v6170_v28 = vpop.f32.mrf.mxu0 }
 0x32a   : > { %v1930_v46 = vld [vmem:[#allocation11 + $0x1738] sm:$0xff]  ;;  %3597 = vmatpush.msrb.mxu0 %v1778_v12 }
 0x32b   : > { %v1514_v61 = vld [vmem:[#allocation11 + $0xa38] sm:$0xff]  ;;  %3617 = vmatpush.msrb.mxu1 %v1930_v46  ;;  %v6179_v51 = vpop.f32.mrf.mxu2 }
 0x32c   : > { %v1666_v4 = vld [vmem:[#allocation11 + $0xef8] sm:$0xff]  ;;  %3552 = vmatpush.msra.mxu2 %v1514_v61  ;;  %v2252_v61 = vadd.f32 %v5998_v15, %v5994_v5 }
 0x32d   : > { %v1770_v19 = vld [vmem:[#allocation11 + $0x1238] sm:$0xff]  ;;  %3572 = vmatpush.msra.mxu3 %v1666_v4  ;;  %v2255_v4 = vadd.f32 %v6010_v41, %v6006_v27  ;;  %v2988_v27 = vadd.f32 %v6158_v57, %v6156_v38  ;;  %v3014_v41 = vadd.f32 %v3013_v0, %v2991_v42 }
 0x32e   : > { %v1922_v39 = vld [vmem:[#allocation11 + $0x16f8] sm:$0xff]  ;;  %3598 = vmatpush.msrb.mxu0 %v1770_v19 }
 0x32f   : > { %v1506_v31 = vld [vmem:[#allocation11 + $0x9f8] sm:$0xff]  ;;  %3618 = vmatpush.msrb.mxu1 %v1922_v39  ;;  %v3011_v38 = vadd.f32 %v6160_v33, %v2988_v27  ;;  %v3037_v42 = vadd.f32 %v3036_v22, %v3014_v41  ;;  %v2436_v22 = vadd.f32 %v6038_v43, %v6034_v2 }
 0x330   : > { %v1658_v32 = vld [vmem:[#allocation11 + $0xeb8] sm:$0xff]  ;;  %3553 = vmatpush.msra.mxu2 %v1506_v31 }
 0x331   : > { %v1762_v16 = vld [vmem:[#allocation11 + $0x11f8] sm:$0xff]  ;;  %3573 = vmatpush.msra.mxu3 %v1658_v32 }
 0x332   : > { %v1914_v13 = vld [vmem:[#allocation11 + $0x16b8] sm:$0xff]  ;;  %3599 = vmatpush.msrb.mxu0 %v1762_v16  ;;  %v2278_v16 = vadd.f32 %v6012_v44, %v2255_v4 }
 0x333   : > { %v1498_v29 = vld [vmem:[#allocation11 + $0x9b8] sm:$0xff]  ;;  %3619 = vmatpush.msrb.mxu1 %v1914_v13  ;;  %v6177_v13 = vpop.f32.mrf.mxu1 }
 0x334   : > { %v1650_v23 = vld [vmem:[#allocation11 + $0xe78] sm:$0xff]  ;;  %3554 = vmatpush.msra.mxu2 %v1498_v29  ;;  %v2275_v29 = vadd.f32 %v6000_v18, %v2252_v61  ;;  %v2301_v44 = vadd.f32 %v6014_v52, %v2278_v16 }
 0x335   : > { %v1754_v12 = vld [vmem:[#allocation11 + $0x11b8] sm:$0xff]  ;;  %3574 = vmatpush.msra.mxu3 %v1650_v23  ;;  %v6185_v23 = vpop.f32.mrf.mxu3 }
 0x336   : > { %v1906_v46 = vld [vmem:[#allocation11 + $0x1678] sm:$0xff]  ;;  %3600 = vmatpush.msrb.mxu0 %v1754_v12  ;;  %v2298_v18 = vadd.f32 %v6002_v48, %v2275_v29  ;;  %v2324_v61 = vadd.f32 %v6026_v25, %v2301_v44  ;;  %v3059_v48 = vpop.f32.mrf.mxu0 }
 0x337   : > { %v1490_v62 = vld [vmem:[#allocation11 + $0x978] sm:$0xff]  ;;  %3620 = vmatpush.msrb.mxu1 %v1906_v46  ;;  %v2439_v46 = vadd.f32 %v6050_v60, %v6046_v36 }
 0x338   : > { %v1642_v20 = vld [vmem:[#allocation11 + $0xe38] sm:$0xff]  ;;  %3555 = vmatpush.msra.mxu2 %v1490_v62  ;;  %v2321_v33 = vadd.f32 %v6016_v55, %v2298_v18  ;;  %v2347_v25 = vadd.f32 %v6028_v40, %v2324_v61  ;;  %v2459_v55 = vadd.f32 %v6040_v21, %v2436_v22 }
 0x339   : > { %v1746_v39 = vld [vmem:[#allocation11 + $0x1178] sm:$0xff]  ;;  %3575 = vmatpush.msra.mxu3 %v1642_v20  ;;  %v2462_v4 = vadd.f32 %v6052_v58, %v2439_v46 }
 0x33a   : > { %v1898_v19 = vld [vmem:[#allocation11 + $0x1638] sm:$0xff]  ;;  %3601 = vmatpush.msrb.mxu0 %v1746_v39  ;;  %v3034_v39 = vadd.f32 %v6164_v8, %v3011_v38 }
 0x33b   : > { %v1482_v31 = vld [vmem:[#allocation11 + $0x938] sm:$0xff]  ;;  %3621 = vmatpush.msrb.mxu1 %v1898_v19  ;;  %v2485_v58 = vadd.f32 %v6054_v7, %v2462_v4  ;;  %v2482_v7 = vadd.f32 %v6042_v24, %v2459_v55  ;;  %v3082_v41 = vpop.f32.mrf.mxu1 }
 0x33c   : > { %v1634_v32 = vld [vmem:[#allocation11 + $0xdf8] sm:$0xff]  ;;  %3556 = vmatpush.msra.mxu2 %v1482_v31  ;;  %v3057_v27 = vadd.f32 %v6170_v28, %v3034_v39 }
 0x33d   : > { %v1738_v5 = vld [vmem:[#allocation11 + $0x1138] sm:$0xff]  ;;  %3576 = vmatpush.msra.mxu3 %v1634_v32  ;;  %v3060_v32 = vadd.f32 %v3059_v48, %v3037_v42  ;;  %v3128_v44 = vpop.f32.mrf.mxu3  ;;  %v2505_v46 = vadd.f32 %v6058_v26, %v2482_v7 }
 0x33e   : > { %v1890_v15 = vld [vmem:[#allocation11 + $0x15f8] sm:$0xff]  ;;  %3602 = vmatpush.msrb.mxu0 %v1738_v5  ;;  %v2344_v5 = vadd.f32 %v6020_v3, %v2321_v33 }
 0x33f   : > { %v1474_v1 = vld [vmem:[#allocation11 + $0x8f8] sm:$0xff]  ;;  %3622 = vmatpush.msrb.mxu1 %v1890_v15  ;;  %v2370_v15 = vadd.f32 %v6030_v45, %v2347_v25  ;;  %v3083_v29 = vadd.f32 %v3082_v41, %v3060_v32  ;;  %v6241_v41 = vld [vmem:[#allocation10] sm:$0xff] }
 0x340   : > { %v1626_v14 = vld [vmem:[#allocation11 + $0xdb8] sm:$0xff]  ;;  %3557 = vmatpush.msra.mxu2 %v1474_v1  ;;  %v2367_v40 = vadd.f32 %v6022_v6, %v2344_v5  ;;  %v3105_v1 = vpop.f32.mrf.mxu2 }
 0x341   : > { %v1730_v12 = vld [vmem:[#allocation11 + $0x10f8] sm:$0xff]  ;;  %3577 = vmatpush.msra.mxu3 %v1626_v14  ;;  %v2393_v21 = vadd.f32 %v6032_v54, %v2370_v15  ;;  %v2508_v14 = vadd.f32 %v6066_v30, %v2485_v58  ;;  %v6579_v15 = vld [vmem:[#allocation31_spill] sm:$0xff] }
 0x342   : > { %v1882_v20 = vld [vmem:[#allocation11 + $0x15b8] sm:$0xff]  ;;  %3603 = vmatpush.msrb.mxu0 %v1730_v12  ;;  %v2390_v24 = vadd.f32 %v6024_v11, %v2367_v40  ;;  %v3080_v12 = vadd.f32 %v6177_v13, %v3057_v27  ;;  %v6214_v13 = vpop.f32.mrf.mxu0 }
 0x343   : > { %v1466_v57 = vld [vmem:[#allocation11 + $0x8b8] sm:$0xff]  ;;  %3623 = vmatpush.msrb.mxu1 %v1882_v20  ;;  %v3106_v20 = vadd.f32 %v3105_v1, %v3083_v29  ;;  %v2531_v42 = vadd.f32 %v6068_v47, %v2508_v14  ;;  %v2528_v47 = vadd.f32 %v6060_v49, %v2505_v46  ;;  %v6222_v61 = vpop.f32.mrf.mxu1  ;;  %v6573_v49 = vld [vmem:[#allocation28_spill] sm:$0xff] }
 0x344   : > { %v1618_v0 = vld [vmem:[#allocation11 + $0xd78] sm:$0xff]  ;;  %3558 = vmatpush.msra.mxu2 %v1466_v57  ;;  %v6581_v1 = vld [vmem:[#allocation32_spill] sm:$0xff] }
 0x345   : > { %v1722_v52 = vld [vmem:[#allocation11 + $0x10b8] sm:$0xff]  ;;  %3578 = vmatpush.msra.mxu3 %v1618_v0  ;;  %v2554_v0 = vadd.f32 %v6070_v56, %v2531_v42  ;;  %v6587_v42 = vld [vmem:[#allocation51_spill] sm:$0xff] }
 0x346   : > { %v1874_v62 = vld [vmem:[#allocation11 + $0x1578] sm:$0xff]  ;;  %3604 = vmatpush.msrb.mxu0 %v1722_v52 }
 0x347   : > { %v1458_v36 = vld [vmem:[#allocation11 + $0x878] sm:$0xff]  ;;  %3624 = vmatpush.msrb.mxu1 %v1874_v62  ;;  %v2577_v52 = vadd.f32 %v6072_v9, %v2554_v0  ;;  %v2551_v62 = vadd.f32 %v6062_v53, %v2528_v47  ;;  %v6589_v0 = vld [vmem:[#allocation47_spill] sm:$0xff] }
 0x348   : > { %v1610_v60 = vld [vmem:[#allocation11 + $0xd38] sm:$0xff]  ;;  %3559 = vmatpush.msra.mxu2 %v1458_v36  ;;  %v6225_v56 = vpop.f32.mrf.mxu2  ;;  %v6230_v36 = vpop.f32.mrf.mxu3 }
 0x349   : > { %v1714_v19 = vld [vmem:[#allocation11 + $0x1078] sm:$0xff]  ;;  %3579 = vmatpush.msra.mxu3 %v1610_v60  ;;  %v2574_v39 = vadd.f32 %v6573_v49, %v2551_v62  ;;  %v6590_v62 = vld [vmem:[#allocation52_spill] sm:$0xff] }
 0x34a   : > { %v1866_v31 = vld [vmem:[#allocation11 + $0x1538] sm:$0xff]  ;;  %3605 = vmatpush.msrb.mxu0 %v1714_v19  ;;  %v3151_v60 = vpop.f32.mrf.mxu0 }
 0x34b   : > { %v1450_v8 = vld [vmem:[#allocation11 + $0x838] sm:$0xff]  ;;  %3625 = vmatpush.msrb.mxu1 %v1866_v31  ;;  %v3174_v5 = vpop.f32.mrf.mxu1 }
 0x34c   : > { %v1602_v16 = vld [vmem:[#allocation11 + $0xcf8] sm:$0xff]  ;;  %3560 = vmatpush.msra.mxu2 %v1450_v8  ;;  %v6578_v8 = vld [vmem:[#allocation35_spill] sm:$0xff] }
 0x34d   : > { %v1706_v2 = vld [vmem:[#allocation11 + $0x1038] sm:$0xff]  ;;  %3580 = vmatpush.msra.mxu3 %v1602_v16  ;;  %3561 = vmatmul.f32.vlgmr.msra.gmra.mxu2 %v5858_v35  ;;  %v3103_v35 = vadd.f32 %v6179_v51, %v3080_v12 }
 0x34e   : > { %v1858_v43 = vld [vmem:[#allocation11 + $0x14f8] sm:$0xff]  ;;  %3606 = vmatpush.msrb.mxu0 %v1706_v2 }
 0x34f   : > { %v2082_v3 = vld [vmem:[#allocation11 + $0x1bf8] sm:$0xff]  ;;  %3626 = vmatpush.msrb.mxu1 %v1858_v43  ;;  %3607 = vmatmul.f32.vlgmr.msrb.gmra.mxu0 %v5899_v17  ;;  %v3129_v17 = vadd.f32 %v3128_v44, %v3106_v20  ;;  %v3126_v26 = vadd.f32 %v6185_v23, %v3103_v35 }
 0x350   : > { %v1594_v45 = vld [vmem:[#allocation11 + $0xcb8] sm:$0xff]  ;;  %3637 = vmatpush.msrb.mxu2 %v2082_v3  ;;  %3724 = vmatpush.msra.mxu0 %v2393_v21  ;;  %v3197_v55 = vpop.f32.mrf.mxu2  ;;  %v3220_v14 = vpop.f32.mrf.mxu3 }
 0x351   : > { %v1850_v28 = vld [vmem:[#allocation11 + $0x14b8] sm:$0xff]  ;;  %3581 = vmatpush.msra.mxu3 %v1594_v45 }
 0x352   : > { %v2074_v6 = vld [vmem:[#allocation11 + $0x1bb8] sm:$0xff]  ;;  %3627 = vmatpush.msrb.mxu1 %v1850_v28  ;;  %3725 = vmatpush.msra.mxu0 %v2390_v24  ;;  %v3240_v21 = vpop.f32.mrf.mxu0 }
 0x353   : > { %v1586_v54 = vld [vmem:[#allocation11 + $0xc78] sm:$0xff]  ;;  %3638 = vmatpush.msrb.mxu2 %v2074_v6 }
 0x354   : > { %v1842_v30 = vld [vmem:[#allocation11 + $0x1478] sm:$0xff]  ;;  %3582 = vmatpush.msra.mxu3 %v1586_v54  ;;  %3816 = vmatpush.msrb.mxu0 %v3129_v17  ;;  %v3175_v17 = vadd.f32 %v3174_v5, %v3151_v60 }
 0x355   : > { %v2066_v38 = vld [vmem:[#allocation11 + $0x1b78] sm:$0xff]  ;;  %3628 = vmatpush.msrb.mxu1 %v1842_v30  ;;  %3564 = vmatmul.f32.gmra.mxu2 %v5885_v63 }
 0x356   : > { %v1578_v11 = vld [vmem:[#allocation11 + $0xc38] sm:$0xff]  ;;  %3639 = vmatpush.msrb.mxu2 %v2066_v38  ;;  %3817 = vmatpush.msrb.mxu0 %v3126_v26  ;;  %v3198_v49 = vadd.f32 %v3197_v55, %v3175_v17  ;;  %v6597_v55 = vld [vmem:[#allocation44_spill] sm:$0xff] }
 0x357   : > { %v1834_v57 = vld [vmem:[#allocation11 + $0x1438] sm:$0xff]  ;;  %3583 = vmatpush.msra.mxu3 %v1578_v11  ;;  %3610 = vmatmul.f32.gmra.mxu0 %v5907_v37  ;;  %v6607_v17 = vld [vmem:[#allocation56_spill] sm:$0xff] }
 0x358   : > { %v2058_v18 = vld [vmem:[#allocation11 + $0x1b38] sm:$0xff]  ;;  %3629 = vmatpush.msrb.mxu1 %v1834_v57  ;;  %3584 = vmatmul.f32.vlgmr.msra.gmra.mxu3 %v5879_v59 }
 0x359   : > { %v2210_v51 = vld [vmem:[#allocation11 + $0x1ff8] sm:$0xff]  ;;  %3630 = vmatmul.f32.vlgmr.msrb.gmra.mxu1 %v5905_v34  ;;  %3640 = vmatpush.msrb.mxu2 %v2058_v18  ;;  %v3263_v18 = vpop.f32.mrf.mxu1 }
 0x35a   : > { %v2050_v23 = vld [vmem:[#allocation11 + $0x1af8] sm:$0xff]  ;;  %3660 = vmatpush.msrb.mxu3 %v2210_v51  ;;  %3747 = vmatpush.msra.mxu1 %v2577_v52  ;;  %v3286_v52 = vpop.f32.mrf.mxu2  ;;  %v3243_v5 = vpop.f32.mrf.mxu0 }
 0x35b   : > { %v2202_v4 = vld [vmem:[#allocation11 + $0x1fb8] sm:$0xff]  ;;  %3641 = vmatpush.msrb.mxu2 %v2050_v23 }
 0x35c   : > { %v2042_v59 = vld [vmem:[#allocation11 + $0x1ab8] sm:$0xff]  ;;  %3661 = vmatpush.msrb.mxu3 %v2202_v4  ;;  %3748 = vmatpush.msra.mxu1 %v2574_v39  ;;  %v3172_v4 = vadd.f32 %v6222_v61, %v6214_v13  ;;  %v6594_v13 = vld [vmem:[#allocation43_spill] sm:$0xff] }
 0x35d   : > { %v2194_v9 = vld [vmem:[#allocation11 + $0x1f78] sm:$0xff]  ;;  %3642 = vmatpush.msrb.mxu2 %v2042_v59 }
 0x35e   : > { %v2034_v53 = vld [vmem:[#allocation11 + $0x1a78] sm:$0xff]  ;;  %3662 = vmatpush.msrb.mxu3 %v2194_v9 }
 0x35f   : > { %v2186_v34 = vld [vmem:[#allocation11 + $0x1f38] sm:$0xff]  ;;  %3643 = vmatpush.msrb.mxu2 %v2034_v53  ;;  %5048 = vmatmul.msk.f32.vlgmr.msra.gmra.mxu0 %vm3703_vm0, %v6241_v41 }
 0x360   : > { %v2026_v33 = vld [vmem:[#allocation11 + $0x1a38] sm:$0xff]  ;;  %3663 = vmatpush.msrb.mxu3 %v2186_v34  ;;  %v6592_v34 = vld [vmem:[#allocation48_spill] sm:$0xff] }
 0x361   : > { %v2178_v22 = vld [vmem:[#allocation11 + $0x1ef8] sm:$0xff]  ;;  %3587 = vmatmul.f32.gmra.mxu3 %v5891_v10  ;;  %3633 = vmatmul.f32.gmra.mxu1 %v5911_v50  ;;  %v6580_v10 = vld [vmem:[#allocation36_spill] sm:$0xff] }
 0x362   : > { %v6574_v48 = vld [vmem:[#allocation33_spill] sm:$0xff]  ;;  %v6575_v63 = vld [vmem:[#allocation34_spill] sm:$0xff]  ;;  %3644 = vmatpush.msrb.mxu2 %v2026_v33  ;;  %3664 = vmatpush.msrb.mxu3 %v2178_v22  ;;  %v3195_v33 = vadd.f32 %v6225_v56, %v3172_v4  ;;  %v3221_v22 = vadd.f32 %v3220_v14, %v3198_v49  ;;  %v3266_v14 = vpop.f32.mrf.mxu1 }
 0x363   : > { %v2623_v19 = vadd.f32 %v6575_v63, %v6574_v48  ;;  %v2018_v37 = vld [vmem:[#allocation11 + $0x19f8] sm:$0xff] }
 0x364   : > { %v2170_v31 = vld [vmem:[#allocation11 + $0x1eb8] sm:$0xff]  ;;  %3645 = vmatpush.msrb.mxu2 %v2018_v37 }
 0x365   : > { %v6576_v25 = vld [vmem:[#allocation29_spill] sm:$0xff]  ;;  %v6577_v58 = vld [vmem:[#allocation30_spill] sm:$0xff]  ;;  %v2646_v16 = vadd.f32 %v6578_v8, %v2623_v19  ;;  %3665 = vmatpush.msrb.mxu3 %v2170_v31  ;;  %v3309_v31 = vpop.f32.mrf.mxu3  ;;  %v6596_v8 = vld [vmem:[#allocation39_spill] sm:$0xff] }
 0x366   : > { %v2620_v32 = vadd.f32 %v6577_v58, %v6576_v25  ;;  %v2010_v2 = vld [vmem:[#allocation11 + $0x19b8] sm:$0xff] }
 0x367   : > { %v2162_v43 = vld [vmem:[#allocation11 + $0x1e78] sm:$0xff]  ;;  %v2669_v40 = vadd.f32 %v6580_v10, %v2646_v16  ;;  %3646 = vmatpush.msrb.mxu2 %v2010_v2  ;;  %v6599_v10 = vld [vmem:[#allocation24_spill] sm:$0xff] }
 0x368   : > { %v2643_v27 = vadd.f32 %v6579_v15, %v2620_v32  ;;  %v2002_v50 = vld [vmem:[#allocation11 + $0x1978] sm:$0xff]  ;;  %3666 = vmatpush.msrb.mxu3 %v2162_v43  ;;  %v3218_v32 = vadd.f32 %v6230_v36, %v3195_v33 }
 0x369   : > { %v2154_v7 = vld [vmem:[#allocation11 + $0x1e38] sm:$0xff]  ;;  %3647 = vmatpush.msrb.mxu2 %v2002_v50  ;;  %5050 = vmatmul.msk.f32.vlgmr.msra.gmra.mxu1 %vm3703_vm0, %v6241_v41  ;;  %v6600_v50 = vld [vmem:[#allocation40_spill] sm:$0xff] }
 0x36a   : > { %v2666_v3 = vadd.f32 %v6581_v1, %v2643_v27  ;;  %v1994_v29 = vld [vmem:[#allocation11 + $0x1938] sm:$0xff]  ;;  %3667 = vmatpush.msrb.mxu3 %v2154_v7  ;;  %v3244_v27 = vadd.f32 %v3243_v5, %v3221_v22 }
 0x36b   : > { %v2146_v45 = vld [vmem:[#allocation11 + $0x1df8] sm:$0xff]  ;;  %3648 = vmatpush.msrb.mxu2 %v1994_v29 }
 0x36c   : > { %v6582_v28 = vld [vmem:[#allocation49_spill] sm:$0xff]  ;;  %v6583_v44 = vld [vmem:[#allocation50_spill] sm:$0xff]  ;;  %3668 = vmatpush.msrb.mxu3 %v2146_v45  ;;  %v3289_v45 = vpop.f32.mrf.mxu2 }
 0x36d   : > { %v2807_v6 = vadd.f32 %v6583_v44, %v6582_v28  ;;  %v6584_v24 = vld [vmem:[#allocation41_spill] sm:$0xff]  ;;  %v6586_v54 = vld [vmem:[#allocation46_spill] sm:$0xff] }
 0x36e   : > { %v2692_v12 = vadd.f32 %v6584_v24, %v2669_v40  ;;  %v6585_v20 = vld [vmem:[#allocation45_spill] sm:$0xff]  ;;  %v6591_v39 = vld [vmem:[#allocation42_spill] sm:$0xff] }
 0x36f   : > { %v2804_v30 = vadd.f32 %v6586_v54, %v6585_v20  ;;  %v1986_v46 = vld [vmem:[#allocation11 + $0x18f8] sm:$0xff]  ;;  %v2830_v35 = vadd.f32 %v6587_v42, %v2807_v6  ;;  %v6603_v6 = vld [vmem:[#allocation59_spill] sm:$0xff] }
 0x370   : > { %v2138_v38 = vld [vmem:[#allocation11 + $0x1db8] sm:$0xff]  ;;  %3649 = vmatpush.msrb.mxu2 %v1986_v46  ;;  %v2715_v59 = vadd.f32 %v6591_v39, %v2692_v12  ;;  %v3267_v12 = vadd.f32 %v3266_v14, %v3244_v27  ;;  %v6604_v20 = vld [vmem:[#allocation55_spill] sm:$0xff]  ;;  %v3943_v27 = vld [vmem:[#allocation14 + $0x108] sm:$0xff] }
 0x371   : > { %v6588_v11 = vld [vmem:[#allocation37_spill] sm:$0xff]  ;;  %v2827_v26 = vadd.f32 %v6589_v0, %v2804_v30  ;;  %v2853_v23 = vadd.f32 %v6590_v62, %v2830_v35  ;;  %3669 = vmatpush.msrb.mxu3 %v2138_v38  ;;  %v6593_v48 = vld [vmem:[#allocation38_spill] sm:$0xff]  ;;  %v6605_v30 = vld [vmem:[#allocation60_spill] sm:$0xff]  ;;  %v3312_v35 = vpop.f32.mrf.mxu3 }
 0x372   : > { %v2689_v57 = vadd.f32 %v6588_v11, %v2666_v3  ;;  %v1978_v47 = vld [vmem:[#allocation11 + $0x18b8] sm:$0xff]  ;;  %v2738_v61 = vadd.f32 %v6594_v13, %v2715_v59  ;;  %v3241_v3 = vadd.f32 %v3240_v21, %v3218_v32  ;;  %v3290_v42 = vadd.f32 %v3289_v45, %v3267_v12  ;;  %v6609_v62 = vld [vmem:[#allocation27_spill] sm:$0xff] }
 0x373   : > { %v2130_v51 = vld [vmem:[#allocation11 + $0x1d78] sm:$0xff]  ;;  %v2850_v60 = vadd.f32 %v6592_v34, %v2827_v26  ;;  %3650 = vmatpush.msrb.mxu2 %v1978_v47  ;;  %v3982_v12 = vld [vmem:[#allocation14 + $0x240] sm:$0xff] }
 0x374   : > { %v1970_v9 = vld [vmem:[#allocation11 + $0x1878] sm:$0xff]  ;;  %3670 = vmatpush.msrb.mxu3 %v2130_v51  ;;  %v2712_v63 = vadd.f32 %v6593_v48, %v2689_v57  ;;  %v2761_v2 = vadd.f32 %v6597_v55, %v2738_v61  ;;  %v3264_v38 = vadd.f32 %v3263_v18, %v3241_v3  ;;  %v3313_v0 = vadd.f32 %v3312_v35, %v3290_v42  ;;  %v3332_v18 = vpop.f32.mrf.mxu0  ;;  %v3922_v42 = vld [vmem:[#allocation14 + $0x60] sm:$0xff] }
 0x375   : > { %v2122_v53 = vld [vmem:[#allocation11 + $0x1d38] sm:$0xff]  ;;  %3651 = vmatpush.msrb.mxu2 %v1970_v9 }
 0x376   : > { %v1962_v19 = vld [vmem:[#allocation11 + $0x1838] sm:$0xff]  ;;  %3671 = vmatpush.msrb.mxu3 %v2122_v53  ;;  %v2735_v16 = vadd.f32 %v6596_v8, %v2712_v63  ;;  %v3287_v57 = vadd.f32 %v3286_v52, %v3264_v38  ;;  %3839 = vmatpush.msrb.mxu1 %v3313_v0  ;;  %v3355_v52 = vpop.f32.mrf.mxu1  ;;  %v3967_v0 = vld [vmem:[#allocation14 + $0x1c8] sm:$0xff] }
 0x377   : > { %v2114_v37 = vld [vmem:[#allocation11 + $0x1cf8] sm:$0xff]  ;;  %3652 = vmatpush.msrb.mxu2 %v1962_v19  ;;  %v3356_v22 = vadd.f32 %v3355_v52, %v3332_v18  ;;  %v3910_v18 = vld [vmem:[#allocation14] sm:$0xff]  ;;  %v3961_v52 = vld [vmem:[#allocation14 + $0x198] sm:$0xff] }
 0x378   : > { %v6595_v25 = vld [vmem:[#allocation57_spill] sm:$0xff]  ;;  %3672 = vmatpush.msrb.mxu3 %v2114_v37  ;;  %3653 = vmatmul.f32.vlgmr.msrb.gmra.mxu2 %v6599_v10  ;;  %v2758_v7 = vadd.f32 %v6600_v50, %v2735_v16  ;;  %v6601_v1 = vld [vmem:[#allocation58_spill] sm:$0xff]  ;;  %v3310_v47 = vadd.f32 %v3309_v31, %v3287_v57  ;;  %v3994_v10 = vld [vmem:[#allocation14 + $0x2a0] sm:$0xff] }
 0x379   : > { %v2876_v58 = vadd.f32 %v6595_v25, %v2853_v23  ;;  %v2106_v56 = vld [vmem:[#allocation11 + $0x1cb8] sm:$0xff]  ;;  %3770 = vmatpush.msra.mxu2 %v2761_v2  ;;  %v3378_v23 = vpop.f32.mrf.mxu2  ;;  %v3955_v37 = vld [vmem:[#allocation14 + $0x168] sm:$0xff] }
 0x37a   : > { %v6598_v43 = vld [vmem:[#allocation53_spill] sm:$0xff]  ;;  %3673 = vmatpush.msrb.mxu3 %v2106_v56  ;;  %v6602_v28 = vld [vmem:[#allocation54_spill] sm:$0xff]  ;;  %3840 = vmatpush.msrb.mxu1 %v3310_v47  ;;  %v3379_v63 = vadd.f32 %v3378_v23, %v3356_v22 }
 0x37b   : > { %v2873_v15 = vadd.f32 %v6598_v43, %v2850_v60  ;;  %v2098_v40 = vld [vmem:[#allocation11 + $0x1c78] sm:$0xff]  ;;  %v2899_v36 = vadd.f32 %v6601_v1, %v2876_v58  ;;  %3771 = vmatpush.msra.mxu2 %v2758_v7  ;;  %4302 = vmatpush.msra.mxu0 %v3955_v37  ;;  %v4003_v25 = vld [vmem:[#allocation14 + $0x2e8] sm:$0xff]  ;;  %v3949_v58 = vld [vmem:[#allocation14 + $0x138] sm:$0xff] }
 0x37c   : > { %v2090_v29 = vld [vmem:[#allocation11 + $0x1c38] sm:$0xff]  ;;  %3674 = vmatpush.msrb.mxu3 %v2098_v40  ;;  %v3335_v49 = vpop.f32.mrf.mxu0  ;;  %4325 = vmatpush.msra.mxu1 %v4003_v25  ;;  %v3946_v43 = vld [vmem:[#allocation14 + $0x120] sm:$0xff]  ;;  %v3991_v1 = vld [vmem:[#allocation14 + $0x288] sm:$0xff] }
 0x37d   : > { %v2896_v44 = vadd.f32 %v6602_v28, %v2873_v15  ;;  %v2922_v24 = vadd.f32 %v6603_v6, %v2899_v36  ;;  %v6606_v21 = vld [vmem:[#allocation25_spill] sm:$0xff]  ;;  %v6608_v26 = vld [vmem:[#allocation26_spill] sm:$0xff] }
 0x37e   : > { %3675 = vmatpush.msrb.mxu3 %v2090_v29  ;;  %v6279_v51 = vld [vmem:[#allocation10 + $0x8] sm:$0xff]  ;;  %v3358_v39 = vpop.f32.mrf.mxu1  ;;  %v3997_v15 = vld [vmem:[#allocation14 + $0x2b8] sm:$0xff]  ;;  %v4051_v23 = vld [vmem:[#allocation14 + $0x468] sm:$0xff] }
 0x37f   : > { %v2919_v54 = vadd.f32 %v6604_v20, %v2896_v44  ;;  %v2945_v46 = vadd.f32 %v6605_v30, %v2922_v24  ;;  %3676 = vmatmul.f32.vlgmr.msrb.gmra.mxu3 %v6606_v21  ;;  %5049 = vmatmul.msk.f32.gmra.mxu0 %vm3703_vm0, %v6279_v51  ;;  %v3401_v4 = vpop.f32.mrf.mxu3  ;;  %v3359_v34 = vadd.f32 %v3358_v39, %v3335_v49  ;;  %v3952_v61 = vld [vmem:[#allocation14 + $0x150] sm:$0xff]  ;;  %v3937_v29 = vld [vmem:[#allocation14 + $0xd8] sm:$0xff]  ;;  %v3934_v44 = vld [vmem:[#allocation14 + $0xc0] sm:$0xff] }
 0x380   : > { %3656 = vmatmul.f32.gmra.mxu2 %v6608_v26  ;;  %5051 = vmatmul.msk.f32.gmra.mxu1 %vm3703_vm0, %v6279_v51  ;;  %v3402_v13 = vadd.f32 %v3401_v4, %v3379_v63  ;;  %v4000_v8 = vld [vmem:[#allocation14 + $0x2d0] sm:$0xff]  ;;  %v3985_v6 = vld [vmem:[#allocation14 + $0x258] sm:$0xff]  ;;  %v3931_v24 = vld [vmem:[#allocation14 + $0xa8] sm:$0xff] }
 0x381   : > { %v2942_v11 = vadd.f32 %v6607_v17, %v2919_v54  ;;  %3793 = vmatpush.msra.mxu3 %v2945_v46  ;;  %v3381_v59 = vpop.f32.mrf.mxu2  ;;  %4303 = vmatpush.msra.mxu0 %v3952_v61  ;;  %v3940_v7 = vld [vmem:[#allocation14 + $0xf0] sm:$0xff]  ;;  %v3979_v30 = vld [vmem:[#allocation14 + $0x228] sm:$0xff]  ;;  %v3925_v46 = vld [vmem:[#allocation14 + $0x78] sm:$0xff] }
 0x382   : > { %v3382_v48 = vadd.f32 %v3381_v59, %v3359_v34  ;;  %4326 = vmatpush.msra.mxu1 %v4000_v8  ;;  %v3988_v45 = vld [vmem:[#allocation14 + $0x270] sm:$0xff]  ;;  %v3973_v21 = vld [vmem:[#allocation14 + $0x1f8] sm:$0xff]  ;;  %v3919_v17 = vld [vmem:[#allocation14 + $0x48] sm:$0xff] }
 0x383   : > { %3794 = vmatpush.msra.mxu3 %v2942_v11  ;;  %4304 = vmatpush.msra.mxu0 %v3949_v58  ;;  %v3928_v20 = vld [vmem:[#allocation14 + $0x90] sm:$0xff]  ;;  %v3970_v11 = vld [vmem:[#allocation14 + $0x1e0] sm:$0xff]  ;;  %v3913_v26 = vld [vmem:[#allocation14 + $0x18] sm:$0xff] }
 0x384   : > { %v3424_v9 = vpop.f32.mrf.mxu0  ;;  %4327 = vmatpush.msra.mxu1 %v3997_v15  ;;  %v3976_v38 = vld [vmem:[#allocation14 + $0x210] sm:$0xff]  ;;  %v4147_v4 = vld [vmem:[#allocation14 + $0x768] sm:$0xff]  ;;  %v3958_v49 = vld [vmem:[#allocation14 + $0x180] sm:$0xff] }
 0x385   : > { %v3425_v5 = vadd.f32 %v3424_v9, %v3402_v13  ;;  %4305 = vmatpush.msra.mxu0 %v3946_v43  ;;  %v3916_v57 = vld [vmem:[#allocation14 + $0x30] sm:$0xff]  ;;  %v4045_v34 = vld [vmem:[#allocation14 + $0x438] sm:$0xff]  ;;  %v4138_v63 = vld [vmem:[#allocation14 + $0x720] sm:$0xff] }
 0x386   : > { %v3447_v60 = vpop.f32.mrf.mxu1  ;;  %4328 = vmatpush.msra.mxu1 %v3994_v10  ;;  %v4048_v59 = vld [vmem:[#allocation14 + $0x450] sm:$0xff]  ;;  %v4039_v37 = vld [vmem:[#allocation14 + $0x408] sm:$0xff]  ;;  %v4186_v13 = vld [vmem:[#allocation14 + $0x8a0] sm:$0xff] }
 0x387   : > { %3679 = vmatmul.f32.gmra.mxu3 %v6609_v62  ;;  %5056 = vmatmul.msk.f32.vlgmr.msrb.gmra.mxu0 %vm3703_vm0, %v6241_v41  ;;  %v3448_v40 = vadd.f32 %v3447_v60, %v3425_v5  ;;  %v3964_v62 = vld [vmem:[#allocation14 + $0x1b0] sm:$0xff]  ;;  %v4141_v60 = vld [vmem:[#allocation14 + $0x738] sm:$0xff]  ;;  %v4126_v43 = vld [vmem:[#allocation14 + $0x6c0] sm:$0xff] }
 0x388   : > { %5052 = vmatmul.msk.f32.vlgmr.msra.gmra.mxu2 %vm3703_vm0, %v6241_v41  ;;  %5058 = vmatmul.msk.f32.vlgmr.msrb.gmra.mxu1 %vm3703_vm0, %v6241_v41  ;;  %v3404_v53 = vpop.f32.mrf.mxu3  ;;  %v4144_v9 = vld [vmem:[#allocation14 + $0x750] sm:$0xff]  ;;  %v4033_v8 = vld [vmem:[#allocation14 + $0x3d8] sm:$0xff]  ;;  %v4123_v10 = vld [vmem:[#allocation14 + $0x6a8] sm:$0xff] }
 0x389   : > { %v3405_v19 = vadd.f32 %v3404_v53, %v3382_v48  ;;  %4306 = vmatpush.msra.mxu0 %v3943_v27  ;;  %4329 = vmatpush.msra.mxu1 %v3991_v1  ;;  %v4195_v53 = vld [vmem:[#allocation14 + $0x8e8] sm:$0xff]  ;;  %v4042_v48 = vld [vmem:[#allocation14 + $0x420] sm:$0xff]  ;;  %v4036_v25 = vld [vmem:[#allocation14 + $0x3f0] sm:$0xff] }
 0x38a   : > { %v4132_v58 = vld [vmem:[#allocation14 + $0x6f0] sm:$0xff]  ;;  %v4177_v15 = vld [vmem:[#allocation14 + $0x858] sm:$0xff]  ;;  %v4027_v27 = vld [vmem:[#allocation14 + $0x3a8] sm:$0xff] }
 0x38b   : > { %4307 = vmatpush.msra.mxu0 %v3940_v7  ;;  %4330 = vmatpush.msra.mxu1 %v3988_v45  ;;  %v4180_v5 = vld [vmem:[#allocation14 + $0x870] sm:$0xff]  ;;  %v4171_v1 = vld [vmem:[#allocation14 + $0x828] sm:$0xff] }
 0x38c   : > { %v3427_v32 = vpop.f32.mrf.mxu0  ;;  %v4120_v7 = vld [vmem:[#allocation14 + $0x690] sm:$0xff] }
 0x38d   : > { %v3428_v16 = vadd.f32 %v3427_v32, %v3405_v19  ;;  %4308 = vmatpush.msra.mxu0 %v3937_v29  ;;  %4331 = vmatpush.msra.mxu1 %v3985_v6  ;;  %v4189_v19 = vld [vmem:[#allocation14 + $0x8b8] sm:$0xff]  ;;  %v4183_v32 = vld [vmem:[#allocation14 + $0x888] sm:$0xff]  ;;  %v4168_v45 = vld [vmem:[#allocation14 + $0x810] sm:$0xff] }
 0x38e   : > { %v3450_v56 = vpop.f32.mrf.mxu1  ;;  %v4117_v29 = vld [vmem:[#allocation14 + $0x678] sm:$0xff] }
 0x38f   : > { %5054 = vmatmul.msk.f32.vlgmr.msra.gmra.mxu3 %vm3703_vm0, %v6241_v41  ;;  %5057 = vmatmul.msk.f32.gmra.mxu0 %vm3703_vm0, %v6279_v51  ;;  %v3451_v2 = vadd.f32 %v3450_v56, %v3428_v16  ;;  %v4129_v16 = vld [vmem:[#allocation14 + $0x6d8] sm:$0xff] }
 0x390   : > { %5053 = vmatmul.msk.f32.gmra.mxu2 %vm3703_vm0, %v6279_v51  ;;  %5059 = vmatmul.msk.f32.gmra.mxu1 %vm3703_vm0, %v6279_v51  ;;  %v4165_v6 = vld [vmem:[#allocation14 + $0x7f8] sm:$0xff] }
 0x391   : > { %4309 = vmatpush.msra.mxu0 %v3934_v44  ;;  %4332 = vmatpush.msra.mxu1 %v3982_v12  ;;  %v4114_v44 = vld [vmem:[#allocation14 + $0x660] sm:$0xff]  ;;  %v6326_v12 = vld [vmem:[#allocation13] sm:$0xff] }
 0x393   : > { %4310 = vmatpush.msra.mxu0 %v3931_v24  ;;  %4333 = vmatpush.msra.mxu1 %v3979_v30  ;;  %v4015_v24 = vld [vmem:[#allocation14 + $0x348] sm:$0xff] }
 0x395   : > { %v6304_v54 = vpop.f32.mrf.mxu0  ;;  %4311 = vmatpush.msra.mxu0 %v3928_v20  ;;  %4334 = vmatpush.msra.mxu1 %v3976_v38  ;;  %v4162_v38 = vld [vmem:[#allocation14 + $0x7e0] sm:$0xff] }
 0x397   : > { %5055 = vmatmul.msk.f32.gmra.mxu3 %vm3703_vm0, %v6279_v51  ;;  %4312 = vmatpush.msra.mxu0 %v3925_v46  ;;  %v4111_v46 = vld [vmem:[#allocation14 + $0x648] sm:$0xff] }
 0x398   : > { %4335 = vmatpush.msra.mxu1 %v3973_v21  ;;  %v4012_v21 = vld [vmem:[#allocation14 + $0x330] sm:$0xff] }
 0x399   : > { %4313 = vmatpush.msra.mxu0 %v3922_v42  ;;  %v3687_v42 = vperm.slane %v6326_v12, 0 }
 0x39a   : > { %4336 = vmatpush.msra.mxu1 %v3970_v11  ;;  %v4108_v11 = vld [vmem:[#allocation14 + $0x630] sm:$0xff] }
 0x39b   : > { %v3470_v33 = vpop.f32.mrf.mxu2  ;;  %4314 = vmatpush.msra.mxu0 %v3919_v17 }
 0x39c   : > { %v3471_v3 = vadd.f32 %v3470_v33, %v3448_v40  ;;  %v6306_v35 = vpop.f32.mrf.mxu1  ;;  %4337 = vmatpush.msra.mxu1 %v3967_v0  ;;  %v4192_v33 = vld [vmem:[#allocation14 + $0x8d0] sm:$0xff]  ;;  %v4174_v40 = vld [vmem:[#allocation14 + $0x840] sm:$0xff] }
 0x39d   : > { %4315 = vmatpush.msra.mxu0 %v3916_v57  ;;  %v4159_v57 = vld [vmem:[#allocation14 + $0x7c8] sm:$0xff] }
 0x39e   : > { %4338 = vmatpush.msra.mxu1 %v3964_v62 }
 0x39f   : > { %v6310_v47 = vpop.f32.mrf.mxu0  ;;  %4316 = vmatpush.msra.mxu0 %v3913_v26  ;;  %v3688_v26 = vperm.slane %v6326_v12, 1 }
 0x3a0   : > { %4339 = vmatpush.msra.mxu1 %v3961_v52  ;;  %v4105_v52 = vld [vmem:[#allocation14 + $0x618] sm:$0xff] }
 0x3a1   : > { %4317 = vmatpush.msra.mxu0 %v3910_v18  ;;  %v4009_v18 = vld [vmem:[#allocation14 + $0x318] sm:$0xff] }
 0x3a2   : > { %v3493_v31 = vpop.f32.mrf.mxu3  ;;  %4340 = vmatpush.msra.mxu1 %v3958_v49 }
 0x3a3   : > { %v3494_v28 = vadd.f32 %v3493_v31, %v3471_v3  ;;  %4394 = vmatpush.msrb.mxu0 %v4147_v4  ;;  %v4135_v31 = vld [vmem:[#allocation14 + $0x708] sm:$0xff]  ;;  %v4006_v4 = vld [vmem:[#allocation14 + $0x300] sm:$0xff] }
 0x3a4   : > { %4417 = vmatpush.msrb.mxu1 %v4195_v53  ;;  %v4153_v53 = vld [vmem:[#allocation14 + $0x798] sm:$0xff] }
 0x3a5   : > { %v3473_v55 = vpop.f32.mrf.mxu2  ;;  %v6312_v39 = vpop.f32.mrf.mxu1  ;;  %4395 = vmatpush.msrb.mxu0 %v4144_v9  ;;  %v4102_v9 = vld [vmem:[#allocation14 + $0x600] sm:$0xff] }
 0x3a6   : > { %v3474_v50 = vadd.f32 %v3473_v55, %v3451_v2  ;;  %4418 = vmatpush.msrb.mxu1 %v4192_v33  ;;  %v4030_v2 = vld [vmem:[#allocation14 + $0x3c0] sm:$0xff]  ;;  %v3956_v33 = vld [vmem:[#allocation14 + $0x170] sm:$0xff] }
 0x3a7   : > { %4396 = vmatpush.msrb.mxu0 %v4141_v60  ;;  %v4243_v60 = vld [vmem:[#allocation14 + $0xa68] sm:$0xff] }
 0x3a8   : > { %4419 = vmatpush.msrb.mxu1 %v4189_v19  ;;  %v4150_v19 = vld [vmem:[#allocation14 + $0x780] sm:$0xff] }
 0x3a9   : > { %4397 = vmatpush.msrb.mxu0 %v4138_v63 }
 0x3aa   : > { %v3496_v36 = vpop.f32.mrf.mxu3  ;;  %4420 = vmatpush.msrb.mxu1 %v4186_v13  ;;  %v4240_v13 = vld [vmem:[#allocation14 + $0xa50] sm:$0xff] }
 0x3ab   : > { %v3497_v14 = vadd.f32 %v3496_v36, %v3474_v50  ;;  %4398 = vmatpush.msrb.mxu0 %v4135_v31  ;;  %v4024_v50 = vld [vmem:[#allocation14 + $0x390] sm:$0xff] }
 0x3ac   : > { %4421 = vmatpush.msrb.mxu1 %v4183_v32  ;;  %v4237_v32 = vld [vmem:[#allocation14 + $0xa38] sm:$0xff] }
 0x3ad   : > { %3862 = vmatpush.msrb.mxu2 %v3497_v14  ;;  %4399 = vmatpush.msrb.mxu0 %v4132_v58  ;;  %v4021_v14 = vld [vmem:[#allocation14 + $0x378] sm:$0xff] }
 0x3ae   : > { %4422 = vmatpush.msrb.mxu1 %v4180_v5 }
 0x3af   : > { %3863 = vmatpush.msrb.mxu2 %v3494_v28  ;;  %4400 = vmatpush.msrb.mxu0 %v4129_v16  ;;  %v4018_v28 = vld [vmem:[#allocation14 + $0x360] sm:$0xff]  ;;  %v4001_v16 = vld [vmem:[#allocation14 + $0x2d8] sm:$0xff] }
 0x3b0   : > { %5060 = vmatmul.msk.f32.vlgmr.msrb.gmra.mxu2 %vm3703_vm0, %v6241_v41  ;;  %4423 = vmatpush.msrb.mxu1 %v4177_v15 }
 0x3b1   : > { %4348 = vmatpush.msra.mxu2 %v4051_v23  ;;  %4401 = vmatpush.msrb.mxu0 %v4126_v43  ;;  %v4156_v23 = vld [vmem:[#allocation14 + $0x7b0] sm:$0xff]  ;;  %v3998_v43 = vld [vmem:[#allocation14 + $0x2c0] sm:$0xff] }
 0x3b2   : > { %4424 = vmatpush.msrb.mxu1 %v4174_v40  ;;  %v3995_v40 = vld [vmem:[#allocation14 + $0x2a8] sm:$0xff] }
 0x3b3   : > { %4349 = vmatpush.msra.mxu2 %v4048_v59  ;;  %4402 = vmatpush.msrb.mxu0 %v4123_v10  ;;  %v3944_v10 = vld [vmem:[#allocation14 + $0x110] sm:$0xff] }
 0x3b4   : > { %4425 = vmatpush.msrb.mxu1 %v4171_v1  ;;  %v4228_v1 = vld [vmem:[#allocation14 + $0x9f0] sm:$0xff] }
 0x3b5   : > { %4350 = vmatpush.msra.mxu2 %v4045_v34  ;;  %4403 = vmatpush.msrb.mxu0 %v4120_v7  ;;  %v3543_v34 = vadd.f32 %v6312_v39, %v6310_v47  ;;  %v3953_v47 = vld [vmem:[#allocation14 + $0x158] sm:$0xff]  ;;  %v4004_v39 = vld [vmem:[#allocation14 + $0x2f0] sm:$0xff] }
 0x3b6   : > { %4426 = vmatpush.msrb.mxu1 %v4168_v45 }
 0x3b7   : > { %4351 = vmatpush.msra.mxu2 %v4042_v48  ;;  %4404 = vmatpush.msrb.mxu0 %v4117_v29  ;;  %v3941_v29 = vld [vmem:[#allocation14 + $0xf8] sm:$0xff] }
 0x3b8   : > { %5061 = vmatmul.msk.f32.gmra.mxu2 %vm3703_vm0, %v6279_v51  ;;  %4427 = vmatpush.msrb.mxu1 %v4165_v6 }
 0x3b9   : > { %4352 = vmatpush.msra.mxu2 %v4039_v37  ;;  %4405 = vmatpush.msrb.mxu0 %v4114_v44  ;;  %v3540_v37 = vadd.f32 %v6306_v35, %v6304_v54  ;;  %v4234_v35 = vld [vmem:[#allocation14 + $0xa20] sm:$0xff]  ;;  %v4225_v44 = vld [vmem:[#allocation14 + $0x9d8] sm:$0xff] }
 0x3ba   : > { %4428 = vmatpush.msrb.mxu1 %v4162_v38  ;;  %v4222_v38 = vld [vmem:[#allocation14 + $0x9c0] sm:$0xff] }
 0x3bb   : > { %4353 = vmatpush.msra.mxu2 %v4036_v25  ;;  %4406 = vmatpush.msrb.mxu0 %v4111_v46 }
 0x3bc   : > { %4429 = vmatpush.msrb.mxu1 %v4159_v57 }
 0x3bd   : > { %4354 = vmatpush.msra.mxu2 %v4033_v8  ;;  %4407 = vmatpush.msrb.mxu0 %v4108_v11  ;;  %v3950_v8 = vld [vmem:[#allocation14 + $0x140] sm:$0xff] }
 0x3be   : > { %4430 = vmatpush.msrb.mxu1 %v4156_v23 }
 0x3bf   : > { %4355 = vmatpush.msra.mxu2 %v4030_v2  ;;  %4408 = vmatpush.msrb.mxu0 %v4105_v52  ;;  %v3947_v2 = vld [vmem:[#allocation14 + $0x128] sm:$0xff] }
 0x3c0   : > { %4431 = vmatpush.msrb.mxu1 %v4153_v53 }
 0x3c1   : > { %4356 = vmatpush.msra.mxu2 %v4027_v27  ;;  %4409 = vmatpush.msrb.mxu0 %v4102_v9  ;;  %v3929_v9 = vld [vmem:[#allocation14 + $0x98] sm:$0xff] }
 0x3c2   : > { %4432 = vmatpush.msrb.mxu1 %v4150_v19  ;;  %v3977_v19 = vld [vmem:[#allocation14 + $0x218] sm:$0xff] }
 0x3c3   : > { %4357 = vmatpush.msra.mxu2 %v4024_v50 }
 0x3c5   : > { %4358 = vmatpush.msra.mxu2 %v4021_v14 }
 0x3c7   : > { %4359 = vmatpush.msra.mxu2 %v4018_v28 }
 0x3c9   : > { %4360 = vmatpush.msra.mxu2 %v4015_v24  ;;  %v3989_v24 = vld [vmem:[#allocation14 + $0x278] sm:$0xff] }
 0x3cb   : > { %4361 = vmatpush.msra.mxu2 %v4012_v21 }
 0x3cc   : > { %v6314_v22 = vpop.f32.mrf.mxu0 }
 0x3cd   : > { %4362 = vmatpush.msra.mxu2 %v4009_v18 }
 0x3cf   : > { %4363 = vmatpush.msra.mxu2 %v4006_v4  ;;  %v3983_v4 = vld [vmem:[#allocation14 + $0x248] sm:$0xff] }
 0x3d0   : > { %v6318_v56 = vpop.f32.mrf.mxu2 }
 0x3d1   : > { %4440 = vmatpush.msrb.mxu2 %v4243_v60  ;;  %v3563_v25 = vadd.f32 %v6318_v56, %v3540_v37  ;;  %v4231_v56 = vld [vmem:[#allocation14 + $0xa08] sm:$0xff] }
 0x3d2   : > { %v4099_v37 = vld [vmem:[#allocation14 + $0x5e8] sm:$0xff] }
 0x3d3   : > { %4441 = vmatpush.msrb.mxu2 %v4240_v13  ;;  %v3923_v13 = vld [vmem:[#allocation14 + $0x68] sm:$0xff] }
 0x3d4   : > { %v6320_v55 = vpop.f32.mrf.mxu0 }
 0x3d5   : > { %4442 = vmatpush.msrb.mxu2 %v4237_v32 }
 0x3d6   : > { %v6316_v61 = vpop.f32.mrf.mxu1 }
 0x3d7   : > { %4443 = vmatpush.msrb.mxu2 %v4234_v35  ;;  %v3968_v35 = vld [vmem:[#allocation14 + $0x1d0] sm:$0xff] }
 0x3d8   : > { %v3565_v30 = vpop.f32.mrf.mxu2 }
 0x3d9   : > { %v3566_v31 = vadd.f32 %v3565_v30, %v3543_v34  ;;  %4444 = vmatpush.msrb.mxu2 %v4231_v56  ;;  %v3980_v34 = vld [vmem:[#allocation14 + $0x230] sm:$0xff]  ;;  %v3965_v56 = vld [vmem:[#allocation14 + $0x1b8] sm:$0xff] }
 0x3db   : > { %v6322_v36 = vpop.f32.mrf.mxu3  ;;  %4445 = vmatpush.msrb.mxu2 %v4228_v1  ;;  %v4052_v1 = vld [vmem:[#allocation14 + $0x470] sm:$0xff] }
 0x3dc   : > { %v3727_v20 = vpop.f32.mrf.mxu0  ;;  %v3586_v54 = vadd.f32 %v6322_v36, %v3563_v25  ;;  %v3692_v25 = vperm.slane %v6326_v12, 5 }
 0x3dd   : > { %v3728_v17 = vadd.f32 %v3727_v20, %v3687_v42  ;;  %4446 = vmatpush.msrb.mxu2 %v4225_v44  ;;  %v4142_v44 = vld [vmem:[#allocation14 + $0x740] sm:$0xff] }
 0x3de   : > { %v6324_v3 = vpop.f32.mrf.mxu1  ;;  %v3609_v7 = vadd.f32 %v6314_v22, %v3586_v54  ;;  %v3938_v22 = vld [vmem:[#allocation14 + $0xe0] sm:$0xff]  ;;  %v3917_v54 = vld [vmem:[#allocation14 + $0x38] sm:$0xff] }
 0x3df   : > { %v6331_v0 = vmax.f32 %v3728_v17, 0.0  ;;  %v3691_v17 = vperm.slane %v6326_v12, 4  ;;  %4447 = vmatpush.msrb.mxu2 %v4222_v38  ;;  %v4190_v38 = vld [vmem:[#allocation14 + $0x8c0] sm:$0xff] }
 0x3e0   : > { %v3632_v30 = vadd.f32 %v6316_v61, %v3609_v7  ;;  %v4219_v61 = vld [vmem:[#allocation14 + $0x9a8] sm:$0xff]  ;;  %v3962_v7 = vld [vmem:[#allocation14 + $0x1a0] sm:$0xff] }
 0x3e1   : > { %4318 = vmatmul.f32.vlgmr.msra.gmra.mxu0 %v6331_v0  ;;  %4448 = vmatpush.msrb.mxu2 %v4219_v61  ;;  %v4081_v61 = vld [vmem:[#allocation14 + $0x558] sm:$0xff] }
 0x3e2   : > { %4486 = vmatpush.msra.mxu0 %v3956_v33  ;;  %v4213_v33 = vld [vmem:[#allocation14 + $0x978] sm:$0xff] }
 0x3e4   : > { %v3588_v49 = vpop.f32.mrf.mxu3  ;;  %4487 = vmatpush.msra.mxu0 %v3953_v47 }
 0x3e5   : > { %v3589_v58 = vadd.f32 %v3588_v49, %v3566_v31  ;;  %v4210_v31 = vld [vmem:[#allocation14 + $0x960] sm:$0xff] }
 0x3e6   : > { %v3750_v62 = vpop.f32.mrf.mxu1  ;;  %4488 = vmatpush.msra.mxu0 %v3950_v8  ;;  %v3971_v8 = vld [vmem:[#allocation14 + $0x1e8] sm:$0xff] }
 0x3e7   : > { %v3751_v59 = vadd.f32 %v3750_v62, %v3688_v26  ;;  %v3612_v15 = vadd.f32 %v6320_v55, %v3589_v58  ;;  %v3992_v55 = vld [vmem:[#allocation14 + $0x290] sm:$0xff] }
 0x3e8   : > { %4489 = vmatpush.msra.mxu0 %v3947_v2  ;;  %v3932_v62 = vld [vmem:[#allocation14 + $0xb0] sm:$0xff] }
 0x3e9   : > { %v6341_v63 = vmax.f32 %v3751_v59, 0.0  ;;  %v3635_v28 = vadd.f32 %v6324_v3, %v3612_v15  ;;  %v3935_v3 = vld [vmem:[#allocation14 + $0xc8] sm:$0xff]  ;;  %v4216_v59 = vld [vmem:[#allocation14 + $0x990] sm:$0xff]  ;;  %v3914_v15 = vld [vmem:[#allocation14 + $0x20] sm:$0xff] }
 0x3ea   : > { %4490 = vmatpush.msra.mxu0 %v3944_v10  ;;  %4449 = vmatpush.msrb.mxu2 %v4216_v59  ;;  %v3920_v58 = vld [vmem:[#allocation14 + $0x50] sm:$0xff]  ;;  %v4198_v10 = vld [vmem:[#allocation14 + $0x900] sm:$0xff]  ;;  %v4031_v59 = vld [vmem:[#allocation14 + $0x3c8] sm:$0xff] }
 0x3eb   : > { %4341 = vmatmul.f32.vlgmr.msra.gmra.mxu1 %v6341_v63  ;;  %v4096_v2 = vld [vmem:[#allocation14 + $0x5d0] sm:$0xff] }
 0x3ec   : > { %4509 = vmatpush.msra.mxu1 %v4004_v39  ;;  %4491 = vmatpush.msra.mxu0 %v3941_v29  ;;  %v3974_v39 = vld [vmem:[#allocation14 + $0x200] sm:$0xff]  ;;  %v4145_v29 = vld [vmem:[#allocation14 + $0x758] sm:$0xff] }
 0x3ed   : > { %4450 = vmatpush.msrb.mxu2 %v4213_v33  ;;  %v4178_v33 = vld [vmem:[#allocation14 + $0x860] sm:$0xff] }
 0x3ee   : > { %4510 = vmatpush.msra.mxu1 %v4001_v16  ;;  %4492 = vmatpush.msra.mxu0 %v3938_v22  ;;  %v4204_v16 = vld [vmem:[#allocation14 + $0x930] sm:$0xff]  ;;  %v4193_v22 = vld [vmem:[#allocation14 + $0x8d8] sm:$0xff] }
 0x3ef   : > { %4451 = vmatpush.msrb.mxu2 %v4210_v31  ;;  %v4124_v31 = vld [vmem:[#allocation14 + $0x6b0] sm:$0xff] }
 0x3f0   : > { %4511 = vmatpush.msra.mxu1 %v3998_v43  ;;  %4493 = vmatpush.msra.mxu0 %v3935_v3  ;;  %v4201_v43 = vld [vmem:[#allocation14 + $0x918] sm:$0xff]  ;;  %v4084_v3 = vld [vmem:[#allocation14 + $0x570] sm:$0xff] }
 0x3f2   : > { %4512 = vmatpush.msra.mxu1 %v3995_v40  ;;  %4494 = vmatpush.msra.mxu0 %v3932_v62  ;;  %v3911_v40 = vld [vmem:[#allocation14 + $0x8] sm:$0xff]  ;;  %v4133_v62 = vld [vmem:[#allocation14 + $0x6f8] sm:$0xff] }
 0x3f4   : > { %4513 = vmatpush.msra.mxu1 %v3992_v55  ;;  %4495 = vmatpush.msra.mxu0 %v3929_v9  ;;  %v4196_v55 = vld [vmem:[#allocation14 + $0x8f0] sm:$0xff]  ;;  %v4075_v9 = vld [vmem:[#allocation14 + $0x528] sm:$0xff] }
 0x3f6   : > { %4514 = vmatpush.msra.mxu1 %v3989_v24  ;;  %v4043_v24 = vld [vmem:[#allocation14 + $0x428] sm:$0xff] }
 0x3fb   : > { %v6339_v48 = vpop.f32.mrf.mxu2 }
 0x3fc   : > { %v3730_v50 = vpop.f32.mrf.mxu0  ;;  %v3655_v11 = vadd.f32 %v6339_v48, %v3632_v30  ;;  %v3926_v48 = vld [vmem:[#allocation14 + $0x80] sm:$0xff]  ;;  %v4087_v30 = vld [vmem:[#allocation14 + $0x588] sm:$0xff] }
 0x3fd   : > { %v3731_v36 = vadd.f32 %v3730_v50, %v3687_v42  ;;  %v3753_v14 = vpop.f32.mrf.mxu1  ;;  %v3689_v42 = vperm.slane %v6326_v12, 2  ;;  %4496 = vmatpush.msra.mxu0 %v3926_v48  ;;  %v4028_v48 = vld [vmem:[#allocation14 + $0x3b0] sm:$0xff] }
 0x3fe   : > { %v3754_v45 = vadd.f32 %v3753_v14, %v3688_v26  ;;  %v3986_v26 = vld [vmem:[#allocation14 + $0x260] sm:$0xff]  ;;  %v4049_v14 = vld [vmem:[#allocation14 + $0x458] sm:$0xff] }
 0x3ff   : > { %v6355_v6 = vmax.f32 %v3731_v36, 0.0  ;;  %4515 = vmatpush.msra.mxu1 %v3986_v26  ;;  %4497 = vmatpush.msra.mxu0 %v3923_v13  ;;  %v4148_v36 = vld [vmem:[#allocation14 + $0x770] sm:$0xff]  ;;  %v4037_v26 = vld [vmem:[#allocation14 + $0x3f8] sm:$0xff]  ;;  %v4175_v13 = vld [vmem:[#allocation14 + $0x848] sm:$0xff] }
 0x400   : > { %v6357_v20 = vmax.f32 %v3754_v45, 0.0  ;;  %v4046_v45 = vld [vmem:[#allocation14 + $0x440] sm:$0xff] }
 0x401   : > { %4321 = vmatmul.f32.gmra.mxu0 %v6355_v6  ;;  %4516 = vmatpush.msra.mxu1 %v3983_v4  ;;  %v4130_v4 = vld [vmem:[#allocation14 + $0x6e0] sm:$0xff] }
 0x402   : > { %v3677_v5 = vpop.f32.mrf.mxu3  ;;  %4344 = vmatmul.f32.gmra.mxu1 %v6357_v20  ;;  %4498 = vmatpush.msra.mxu0 %v3920_v58  ;;  %v4025_v58 = vld [vmem:[#allocation14 + $0x398] sm:$0xff] }
 0x403   : > { %v3657_v27 = vpop.f32.mrf.mxu2  ;;  %v3678_v23 = vadd.f32 %v3677_v5, %v3655_v11  ;;  %4517 = vmatpush.msra.mxu1 %v3980_v34  ;;  %v4136_v11 = vld [vmem:[#allocation14 + $0x710] sm:$0xff]  ;;  %v4127_v34 = vld [vmem:[#allocation14 + $0x6c8] sm:$0xff] }
 0x404   : > { %v3658_v46 = vadd.f32 %v3657_v27, %v3635_v28  ;;  %v3819_v52 = vpop.f32.mrf.mxu0  ;;  %4499 = vmatpush.msra.mxu0 %v3917_v54  ;;  %v4093_v27 = vld [vmem:[#allocation14 + $0x5b8] sm:$0xff]  ;;  %v4090_v28 = vld [vmem:[#allocation14 + $0x5a0] sm:$0xff]  ;;  %v4172_v54 = vld [vmem:[#allocation14 + $0x830] sm:$0xff] }
 0x405   : > { %v3820_v53 = vadd.f32 %v3819_v52, %v3691_v17  ;;  %4518 = vmatpush.msra.mxu1 %v3977_v19  ;;  %v3842_v32 = vpop.f32.mrf.mxu1  ;;  %v4034_v52 = vld [vmem:[#allocation14 + $0x3e0] sm:$0xff] }
 0x406   : > { %v3843_v5 = vadd.f32 %v3842_v32, %v3692_v25  ;;  %4500 = vmatpush.msra.mxu0 %v3914_v15  ;;  %v4069_v32 = vld [vmem:[#allocation14 + $0x4f8] sm:$0xff] }
 0x407   : > { %v6373_v47 = vmax.f32 %v3820_v53, 0.0  ;;  %4519 = vmatpush.msra.mxu1 %v3974_v39  ;;  %v4169_v15 = vld [vmem:[#allocation14 + $0x818] sm:$0xff] }
 0x408   : > { %v6382_v50 = vmax.f32 %v3843_v5, 0.0  ;;  %4501 = vmatpush.msra.mxu0 %v3911_v40  ;;  %v4022_v5 = vld [vmem:[#allocation14 + $0x380] sm:$0xff] }
 0x409   : > { %4410 = vmatmul.f32.vlgmr.msrb.gmra.mxu0 %v6373_v47  ;;  %4520 = vmatpush.msra.mxu1 %v3971_v8 }
 0x40a   : > { %v3680_v21 = vpop.f32.mrf.mxu3  ;;  %4578 = vmatpush.msrb.mxu0 %v4148_v36  ;;  %4433 = vmatmul.f32.vlgmr.msrb.gmra.mxu1 %v6382_v50  ;;  %v4163_v36 = vld [vmem:[#allocation14 + $0x7e8] sm:$0xff] }
 0x40b   : > { %v3681_v57 = vadd.f32 %v3680_v21, %v3658_v46  ;;  %v3773_v18 = vpop.f32.mrf.mxu2  ;;  %4521 = vmatpush.msra.mxu1 %v3968_v35  ;;  %v4139_v46 = vld [vmem:[#allocation14 + $0x728] sm:$0xff]  ;;  %v4040_v21 = vld [vmem:[#allocation14 + $0x410] sm:$0xff] }
 0x40c   : > { %v3774_v49 = vadd.f32 %v3773_v18, %v3689_v42  ;;  %4579 = vmatpush.msrb.mxu0 %v4145_v29  ;;  %v4184_v18 = vld [vmem:[#allocation14 + $0x890] sm:$0xff]  ;;  %v3822_v53 = vpop.f32.mrf.mxu0  ;;  %v4109_v29 = vld [vmem:[#allocation14 + $0x638] sm:$0xff] }
 0x40d   : > { %3885 = vmatpush.msrb.mxu3 %v3681_v57  ;;  %4522 = vmatpush.msra.mxu1 %v3965_v56  ;;  %v4187_v57 = vld [vmem:[#allocation14 + $0x8a8] sm:$0xff]  ;;  %v3823_v39 = vadd.f32 %v3822_v53, %v3691_v17  ;;  %v3996_v53 = vld [vmem:[#allocation14 + $0x2b0] sm:$0xff] }
 0x40e   : > { %v6369_v60 = vmax.f32 %v3774_v49, 0.0  ;;  %4580 = vmatpush.msrb.mxu0 %v4142_v44  ;;  %v4181_v49 = vld [vmem:[#allocation14 + $0x878] sm:$0xff]  ;;  %v4019_v56 = vld [vmem:[#allocation14 + $0x368] sm:$0xff]  ;;  %v4106_v44 = vld [vmem:[#allocation14 + $0x620] sm:$0xff] }
 0x40f   : > { %3886 = vmatpush.msrb.mxu3 %v3678_v23  ;;  %4523 = vmatpush.msra.mxu1 %v3962_v7  ;;  %v4078_v23 = vld [vmem:[#allocation14 + $0x540] sm:$0xff]  ;;  %v6391_v17 = vmax.f32 %v3823_v39, 0.0  ;;  %v4016_v7 = vld [vmem:[#allocation14 + $0x350] sm:$0xff] }
 0x410   : > { %5062 = vmatmul.msk.f32.vlgmr.msrb.gmra.mxu3 %vm3703_vm0, %v6241_v41  ;;  %4364 = vmatmul.f32.vlgmr.msra.gmra.mxu2 %v6369_v60  ;;  %v4207_v41 = vld [vmem:[#allocation14 + $0x948] sm:$0xff]  ;;  %v3936_v39 = vld [vmem:[#allocation14 + $0xd0] sm:$0xff] }
 0x411   : > { %4371 = vmatpush.msra.mxu3 %v4099_v37  ;;  %4452 = vmatpush.msrb.mxu2 %v4207_v41  ;;  %v4072_v37 = vld [vmem:[#allocation14 + $0x510] sm:$0xff]  ;;  %v3845_v41 = vpop.f32.mrf.mxu1 }
 0x412   : > { %4581 = vmatpush.msrb.mxu0 %v4139_v46  ;;  %v3846_v35 = vadd.f32 %v3845_v41, %v3692_v25  ;;  %v4063_v25 = vld [vmem:[#allocation14 + $0x4c8] sm:$0xff] }
 0x413   : > { %4453 = vmatpush.msrb.mxu2 %v4204_v16  ;;  %4372 = vmatpush.msra.mxu3 %v4096_v2  ;;  %v3776_v19 = vpop.f32.mrf.mxu2  ;;  %v4121_v16 = vld [vmem:[#allocation14 + $0x698] sm:$0xff]  ;;  %v4066_v2 = vld [vmem:[#allocation14 + $0x4e0] sm:$0xff]  ;;  %v4103_v46 = vld [vmem:[#allocation14 + $0x608] sm:$0xff] }
 0x414   : > { %4582 = vmatpush.msrb.mxu0 %v4136_v11  ;;  %v3777_v8 = vadd.f32 %v3776_v19, %v3689_v42  ;;  %v6395_v40 = vmax.f32 %v3846_v35, 0.0  ;;  %v4151_v11 = vld [vmem:[#allocation14 + $0x788] sm:$0xff]  ;;  %v4273_v19 = vld [vmem:[#allocation14 + $0xb58] sm:$0xff]  ;;  %v3930_v35 = vld [vmem:[#allocation14 + $0xa0] sm:$0xff] }
 0x415   : > { %4454 = vmatpush.msrb.mxu2 %v4201_v43  ;;  %4373 = vmatpush.msra.mxu3 %v4093_v27  ;;  %v4118_v43 = vld [vmem:[#allocation14 + $0x680] sm:$0xff]  ;;  %v4115_v27 = vld [vmem:[#allocation14 + $0x668] sm:$0xff] }
 0x416   : > { %4583 = vmatpush.msrb.mxu0 %v4133_v62  ;;  %v6393_v42 = vmax.f32 %v3777_v8, 0.0  ;;  %4436 = vmatmul.f32.gmra.mxu1 %v6395_v40  ;;  %v4285_v62 = vld [vmem:[#allocation14 + $0xbb8] sm:$0xff]  ;;  %v3987_v41 = vld [vmem:[#allocation14 + $0x268] sm:$0xff] }
 0x417   : > { %4455 = vmatpush.msrb.mxu2 %v4198_v10  ;;  %4374 = vmatpush.msra.mxu3 %v4090_v28  ;;  %v4166_v10 = vld [vmem:[#allocation14 + $0x800] sm:$0xff]  ;;  %v3933_v8 = vld [vmem:[#allocation14 + $0xb8] sm:$0xff] }
 0x418   : > { %5063 = vmatmul.msk.f32.gmra.mxu3 %vm3703_vm0, %v6279_v51  ;;  %v3959_v51 = vld [vmem:[#allocation14 + $0x188] sm:$0xff]  ;;  %4584 = vmatpush.msrb.mxu0 %v4130_v4  ;;  %v4010_v28 = vld [vmem:[#allocation14 + $0x320] sm:$0xff]  ;;  %v3948_v4 = vld [vmem:[#allocation14 + $0x130] sm:$0xff] }
 0x419   : > { %4532 = vmatpush.msra.mxu2 %v4052_v1  ;;  %4524 = vmatpush.msra.mxu1 %v3959_v51  ;;  %v4112_v1 = vld [vmem:[#allocation14 + $0x650] sm:$0xff] }
 0x41a   : > { %4375 = vmatpush.msra.mxu3 %v4087_v30  ;;  %4585 = vmatpush.msrb.mxu0 %v4127_v34  ;;  %v4060_v51 = vld [vmem:[#allocation14 + $0x4b0] sm:$0xff]  ;;  %v4007_v30 = vld [vmem:[#allocation14 + $0x308] sm:$0xff] }
 0x41b   : > { %4533 = vmatpush.msra.mxu2 %v4049_v14  ;;  %4601 = vmatpush.msrb.mxu1 %v4196_v55  ;;  %v4013_v14 = vld [vmem:[#allocation14 + $0x338] sm:$0xff]  ;;  %v4160_v55 = vld [vmem:[#allocation14 + $0x7d0] sm:$0xff] }
 0x41c   : > { %4376 = vmatpush.msra.mxu3 %v4084_v3  ;;  %4586 = vmatpush.msrb.mxu0 %v4124_v31  ;;  %v3957_v3 = vld [vmem:[#allocation14 + $0x178] sm:$0xff]  ;;  %v4276_v34 = vld [vmem:[#allocation14 + $0xb70] sm:$0xff]  ;;  %v3990_v31 = vld [vmem:[#allocation14 + $0x280] sm:$0xff] }
 0x41d   : > { %4534 = vmatpush.msra.mxu2 %v4046_v45  ;;  %4602 = vmatpush.msrb.mxu1 %v4193_v22  ;;  %v4057_v45 = vld [vmem:[#allocation14 + $0x498] sm:$0xff] }
 0x41e   : > { %4377 = vmatpush.msra.mxu3 %v4081_v61  ;;  %4587 = vmatpush.msrb.mxu0 %v4121_v16  ;;  %v4157_v22 = vld [vmem:[#allocation14 + $0x7b8] sm:$0xff]  ;;  %v3984_v16 = vld [vmem:[#allocation14 + $0x250] sm:$0xff] }
 0x41f   : > { %4535 = vmatpush.msra.mxu2 %v4043_v24  ;;  %4603 = vmatpush.msrb.mxu1 %v4190_v38  ;;  %v4054_v24 = vld [vmem:[#allocation14 + $0x480] sm:$0xff]  ;;  %v4005_v61 = vld [vmem:[#allocation14 + $0x2f8] sm:$0xff] }
 0x420   : > { %4378 = vmatpush.msra.mxu3 %v4078_v23  ;;  %4588 = vmatpush.msrb.mxu0 %v4118_v43  ;;  %v4154_v38 = vld [vmem:[#allocation14 + $0x7a0] sm:$0xff]  ;;  %v4261_v43 = vld [vmem:[#allocation14 + $0xaf8] sm:$0xff] }
 0x421   : > { %4536 = vmatpush.msra.mxu2 %v4040_v21  ;;  %4604 = vmatpush.msrb.mxu1 %v4187_v57  ;;  %v4291_v21 = vld [vmem:[#allocation14 + $0xbe8] sm:$0xff]  ;;  %v4288_v57 = vld [vmem:[#allocation14 + $0xbd0] sm:$0xff]  ;;  %v4282_v23 = vld [vmem:[#allocation14 + $0xba0] sm:$0xff] }
 0x422   : > { %4379 = vmatpush.msra.mxu3 %v4075_v9  ;;  %4413 = vmatmul.f32.gmra.mxu0 %v6391_v17  ;;  %v3945_v9 = vld [vmem:[#allocation14 + $0x118] sm:$0xff] }
 0x423   : > { %4537 = vmatpush.msra.mxu2 %v4037_v26  ;;  %4605 = vmatpush.msrb.mxu1 %v4184_v18  ;;  %v3954_v26 = vld [vmem:[#allocation14 + $0x160] sm:$0xff]  ;;  %v3951_v18 = vld [vmem:[#allocation14 + $0x148] sm:$0xff] }
 0x424   : > { %4380 = vmatpush.msra.mxu3 %v4072_v37  ;;  %4589 = vmatpush.msrb.mxu0 %v4115_v27  ;;  %v3939_v37 = vld [vmem:[#allocation14 + $0xe8] sm:$0xff]  ;;  %v3978_v27 = vld [vmem:[#allocation14 + $0x220] sm:$0xff] }
 0x425   : > { %4538 = vmatpush.msra.mxu2 %v4034_v52  ;;  %4606 = vmatpush.msrb.mxu1 %v4181_v49  ;;  %v4002_v52 = vld [vmem:[#allocation14 + $0x2e0] sm:$0xff]  ;;  %v3999_v49 = vld [vmem:[#allocation14 + $0x2c8] sm:$0xff] }
 0x426   : > { %4381 = vmatpush.msra.mxu3 %v4069_v32  ;;  %4367 = vmatmul.f32.gmra.mxu2 %v6393_v42  ;;  %v3693_v32 = vperm.slane %v6326_v12, 6 }
 0x427   : > { %4539 = vmatpush.msra.mxu2 %v4031_v59  ;;  %4607 = vmatpush.msrb.mxu1 %v4178_v33  ;;  %v4279_v59 = vld [vmem:[#allocation14 + $0xb88] sm:$0xff]  ;;  %v3942_v33 = vld [vmem:[#allocation14 + $0x100] sm:$0xff] }
 0x428   : > { %4382 = vmatpush.msra.mxu3 %v4066_v2  ;;  %4590 = vmatpush.msrb.mxu0 %v4112_v1  ;;  %v3924_v1 = vld [vmem:[#allocation14 + $0x70] sm:$0xff] }
 0x429   : > { %4540 = vmatpush.msra.mxu2 %v4028_v48  ;;  %4608 = vmatpush.msrb.mxu1 %v4175_v13  ;;  %v3993_v48 = vld [vmem:[#allocation14 + $0x298] sm:$0xff]  ;;  %v4270_v13 = vld [vmem:[#allocation14 + $0xb40] sm:$0xff] }
 0x42a   : > { %4383 = vmatpush.msra.mxu3 %v4063_v25  ;;  %4591 = vmatpush.msrb.mxu0 %v4109_v29  ;;  %v3690_v29 = vperm.slane %v6326_v12, 3  ;;  %v4167_v12 = vld [vmem:[#allocation14 + $0x808] sm:$0xff] }
 0x42b   : > { %4541 = vmatpush.msra.mxu2 %v4025_v58  ;;  %4609 = vmatpush.msrb.mxu1 %v4172_v54  ;;  %v4267_v58 = vld [vmem:[#allocation14 + $0xb28] sm:$0xff]  ;;  %v4264_v54 = vld [vmem:[#allocation14 + $0xb10] sm:$0xff] }
 0x42c   : > { %4384 = vmatpush.msra.mxu3 %v4060_v51  ;;  %4592 = vmatpush.msrb.mxu0 %v4106_v44  ;;  %v4241_v51 = vld [vmem:[#allocation14 + $0xa58] sm:$0xff]  ;;  %v4238_v44 = vld [vmem:[#allocation14 + $0xa40] sm:$0xff] }
 0x42d   : > { %4542 = vmatpush.msra.mxu2 %v4022_v5  ;;  %4610 = vmatpush.msrb.mxu1 %v4169_v15  ;;  %v3981_v5 = vld [vmem:[#allocation14 + $0x238] sm:$0xff] }
 0x42e   : > { %4385 = vmatpush.msra.mxu3 %v4057_v45  ;;  %4502 = vmatmul.f32.vlgmr.msra.gmra.mxu0 %v6331_v0  ;;  %v3972_v45 = vld [vmem:[#allocation14 + $0x1f0] sm:$0xff] }
 0x42f   : > { %4543 = vmatpush.msra.mxu2 %v4019_v56  ;;  %4611 = vmatpush.msrb.mxu1 %v4166_v10  ;;  %v3927_v56 = vld [vmem:[#allocation14 + $0x88] sm:$0xff]  ;;  %v4258_v10 = vld [vmem:[#allocation14 + $0xae0] sm:$0xff] }
 0x430   : > { %4386 = vmatpush.msra.mxu3 %v4054_v24  ;;  %4593 = vmatpush.msrb.mxu0 %v4103_v46  ;;  %v4252_v24 = vld [vmem:[#allocation14 + $0xab0] sm:$0xff]  ;;  %v4235_v46 = vld [vmem:[#allocation14 + $0xa28] sm:$0xff] }
 0x431   : > { %4544 = vmatpush.msra.mxu2 %v4016_v7  ;;  %4612 = vmatpush.msrb.mxu1 %v4163_v36  ;;  %v4244_v7 = vld [vmem:[#allocation14 + $0xa70] sm:$0xff]  ;;  %v3975_v36 = vld [vmem:[#allocation14 + $0x208] sm:$0xff] }
 0x432   : > { %4463 = vmatpush.msrb.mxu3 %v4291_v21  ;;  %4670 = vmatpush.msra.mxu0 %v3957_v3  ;;  %v3969_v3 = vld [vmem:[#allocation14 + $0x1d8] sm:$0xff] }
 0x433   : > { %4545 = vmatpush.msra.mxu2 %v4013_v14  ;;  %4613 = vmatpush.msrb.mxu1 %v4160_v55  ;;  %v3865_v2 = vpop.f32.mrf.mxu2  ;;  %v4255_v14 = vld [vmem:[#allocation14 + $0xac8] sm:$0xff]  ;;  %v3921_v55 = vld [vmem:[#allocation14 + $0x58] sm:$0xff] }
 0x434   : > { %4525 = vmatmul.f32.vlgmr.msra.gmra.mxu1 %v6341_v63  ;;  %4464 = vmatpush.msrb.mxu3 %v4288_v57  ;;  %v3866_v15 = vadd.f32 %v3865_v2, %v3693_v32  ;;  %v4232_v57 = vld [vmem:[#allocation14 + $0xa10] sm:$0xff] }
 0x435   : > { %4546 = vmatpush.msra.mxu2 %v4010_v28  ;;  %4614 = vmatpush.msrb.mxu1 %v4157_v22  ;;  %v3796_v28 = vpop.f32.mrf.mxu3  ;;  %v4208_v2 = vld [vmem:[#allocation14 + $0x950] sm:$0xff] }
 0x436   : > { %4671 = vmatpush.msra.mxu0 %v3954_v26  ;;  %4465 = vmatpush.msrb.mxu3 %v4285_v62  ;;  %v6407_v25 = vmax.f32 %v3866_v15, 0.0  ;;  %v3797_v21 = vadd.f32 %v3796_v28, %v3690_v29  ;;  %v3966_v62 = vld [vmem:[#allocation14 + $0x1c0] sm:$0xff]  ;;  %v4053_v28 = vld [vmem:[#allocation14 + $0x478] sm:$0xff] }
 0x437   : > { %4547 = vmatpush.msra.mxu2 %v4007_v30  ;;  %4615 = vmatpush.msrb.mxu1 %v4154_v38  ;;  %v3918_v30 = vld [vmem:[#allocation14 + $0x40] sm:$0xff] }
 0x438   : > { %4672 = vmatpush.msra.mxu0 %v3951_v18  ;;  %4466 = vmatpush.msrb.mxu3 %v4282_v23  ;;  %v4246_v18 = vld [vmem:[#allocation14 + $0xa80] sm:$0xff]  ;;  %v6418_v23 = vmax.f32 %v3797_v21, 0.0 }
 0x439   : > { %4616 = vmatpush.msrb.mxu1 %v4151_v11  ;;  %4505 = vmatmul.f32.gmra.mxu0 %v6355_v6  ;;  %v4249_v11 = vld [vmem:[#allocation14 + $0xa98] sm:$0xff]  ;;  %v4134_v15 = vld [vmem:[#allocation14 + $0x700] sm:$0xff] }
 0x43a   : > { %4673 = vmatpush.msra.mxu0 %v3948_v4  ;;  %4467 = vmatpush.msrb.mxu3 %v4279_v59  ;;  %v3912_v4 = vld [vmem:[#allocation14 + $0x10] sm:$0xff]  ;;  %v4226_v59 = vld [vmem:[#allocation14 + $0x9e0] sm:$0xff] }
 0x43b   : > { %4693 = vmatpush.msra.mxu1 %v4005_v61  ;;  %4456 = vmatmul.f32.vlgmr.msrb.gmra.mxu2 %v6407_v25  ;;  %v3868_v22 = vpop.f32.mrf.mxu2  ;;  %v3915_v61 = vld [vmem:[#allocation14 + $0x28] sm:$0xff]  ;;  %v4122_v21 = vld [vmem:[#allocation14 + $0x6a0] sm:$0xff] }
 0x43c   : > { %4674 = vmatpush.msra.mxu0 %v3945_v9  ;;  %4528 = vmatmul.f32.gmra.mxu1 %v6357_v20  ;;  %v3869_v38 = vadd.f32 %v3868_v22, %v3693_v32  ;;  %v4100_v9 = vld [vmem:[#allocation14 + $0x5f0] sm:$0xff]  ;;  %v4214_v32 = vld [vmem:[#allocation14 + $0x980] sm:$0xff]  ;;  %v4125_v22 = vld [vmem:[#allocation14 + $0x6b8] sm:$0xff] }
 0x43d   : > { %4694 = vmatpush.msra.mxu1 %v4002_v52  ;;  %4468 = vmatpush.msrb.mxu3 %v4276_v34  ;;  %v4229_v52 = vld [vmem:[#allocation14 + $0x9f8] sm:$0xff]  ;;  %v4223_v34 = vld [vmem:[#allocation14 + $0x9c8] sm:$0xff] }
 0x43e   : > { %4675 = vmatpush.msra.mxu0 %v3942_v33  ;;  %4624 = vmatpush.msrb.mxu2 %v4244_v7  ;;  %v6415_v26 = vmax.f32 %v3869_v38, 0.0  ;;  %v4149_v33 = vld [vmem:[#allocation14 + $0x778] sm:$0xff]  ;;  %v4131_v7 = vld [vmem:[#allocation14 + $0x6e8] sm:$0xff] }
 0x43f   : > { %4695 = vmatpush.msra.mxu1 %v3999_v49  ;;  %4469 = vmatpush.msrb.mxu3 %v4273_v19  ;;  %v3963_v49 = vld [vmem:[#allocation14 + $0x1a8] sm:$0xff]  ;;  %v4220_v19 = vld [vmem:[#allocation14 + $0x9b0] sm:$0xff]  ;;  %v4073_v38 = vld [vmem:[#allocation14 + $0x518] sm:$0xff] }
 0x440   : > { %4676 = vmatpush.msra.mxu0 %v3939_v37  ;;  %4625 = vmatpush.msrb.mxu2 %v4241_v51  ;;  %v4146_v37 = vld [vmem:[#allocation14 + $0x760] sm:$0xff]  ;;  %v4079_v51 = vld [vmem:[#allocation14 + $0x548] sm:$0xff] }
 0x441   : > { %4696 = vmatpush.msra.mxu1 %v3996_v53  ;;  %4470 = vmatpush.msrb.mxu3 %v4270_v13  ;;  %v3960_v53 = vld [vmem:[#allocation14 + $0x190] sm:$0xff]  ;;  %v4217_v13 = vld [vmem:[#allocation14 + $0x998] sm:$0xff] }
 0x442   : > { %4594 = vmatmul.f32.vlgmr.msrb.gmra.mxu0 %v6373_v47  ;;  %4626 = vmatpush.msrb.mxu2 %v4238_v44  ;;  %v4076_v44 = vld [vmem:[#allocation14 + $0x530] sm:$0xff] }
 0x443   : > { %4697 = vmatpush.msra.mxu1 %v3993_v48  ;;  %4677 = vmatpush.msra.mxu0 %v3936_v39  ;;  %v4097_v48 = vld [vmem:[#allocation14 + $0x5d8] sm:$0xff]  ;;  %v4094_v39 = vld [vmem:[#allocation14 + $0x5c0] sm:$0xff] }
 0x444   : > { %4471 = vmatpush.msrb.mxu3 %v4267_v58  ;;  %4617 = vmatmul.f32.vlgmr.msrb.gmra.mxu1 %v6382_v50  ;;  %v4194_v58 = vld [vmem:[#allocation14 + $0x8e0] sm:$0xff] }
 0x445   : > { %4698 = vmatpush.msra.mxu1 %v3990_v31  ;;  %4678 = vmatpush.msra.mxu0 %v3933_v8  ;;  %v4197_v31 = vld [vmem:[#allocation14 + $0x8f8] sm:$0xff]  ;;  %v4091_v8 = vld [vmem:[#allocation14 + $0x5a8] sm:$0xff] }
 0x446   : > { %4472 = vmatpush.msrb.mxu3 %v4264_v54  ;;  %4627 = vmatpush.msrb.mxu2 %v4235_v46  ;;  %v4211_v54 = vld [vmem:[#allocation14 + $0x968] sm:$0xff]  ;;  %v4176_v46 = vld [vmem:[#allocation14 + $0x850] sm:$0xff] }
 0x447   : > { %4699 = vmatpush.msra.mxu1 %v3987_v41  ;;  %4679 = vmatpush.msra.mxu0 %v3930_v35  ;;  %v4143_v41 = vld [vmem:[#allocation14 + $0x748] sm:$0xff]  ;;  %v4088_v35 = vld [vmem:[#allocation14 + $0x590] sm:$0xff] }
 0x448   : > { %4473 = vmatpush.msrb.mxu3 %v4261_v43  ;;  %4459 = vmatmul.f32.gmra.mxu2 %v6415_v26  ;;  %v4085_v43 = vld [vmem:[#allocation14 + $0x578] sm:$0xff] }
 0x449   : > { %4700 = vmatpush.msra.mxu1 %v3984_v16  ;;  %4680 = vmatpush.msra.mxu0 %v3927_v56  ;;  %v4191_v16 = vld [vmem:[#allocation14 + $0x8c8] sm:$0xff]  ;;  %v4205_v56 = vld [vmem:[#allocation14 + $0x938] sm:$0xff] }
 0x44a   : > { %4474 = vmatpush.msrb.mxu3 %v4258_v10  ;;  %4597 = vmatmul.f32.gmra.mxu0 %v6391_v17  ;;  %v4082_v10 = vld [vmem:[#allocation14 + $0x560] sm:$0xff] }
 0x44b   : > { %4701 = vmatpush.msra.mxu1 %v3981_v5  ;;  %4681 = vmatpush.msra.mxu0 %v3924_v1  ;;  %v4137_v5 = vld [vmem:[#allocation14 + $0x718] sm:$0xff]  ;;  %v4202_v1 = vld [vmem:[#allocation14 + $0x920] sm:$0xff] }
 0x44c   : > { %4475 = vmatpush.msrb.mxu3 %v4255_v14  ;;  %4620 = vmatmul.f32.gmra.mxu1 %v6395_v40  ;;  %v4128_v14 = vld [vmem:[#allocation14 + $0x6d0] sm:$0xff] }
 0x44d   : > { %4702 = vmatpush.msra.mxu1 %v3978_v27  ;;  %4682 = vmatpush.msra.mxu0 %v3921_v55  ;;  %v4185_v27 = vld [vmem:[#allocation14 + $0x898] sm:$0xff]  ;;  %v4199_v55 = vld [vmem:[#allocation14 + $0x908] sm:$0xff] }
 0x44e   : > { %4476 = vmatpush.msrb.mxu3 %v4252_v24  ;;  %4628 = vmatpush.msrb.mxu2 %v4232_v57  ;;  %v3799_v24 = vpop.f32.mrf.mxu3  ;;  %v4173_v57 = vld [vmem:[#allocation14 + $0x838] sm:$0xff] }
 0x44f   : > { %4703 = vmatpush.msra.mxu1 %v3975_v36  ;;  %4683 = vmatpush.msra.mxu0 %v3918_v30  ;;  %v4182_v36 = vld [vmem:[#allocation14 + $0x880] sm:$0xff] }
 0x450   : > { %4477 = vmatpush.msrb.mxu3 %v4249_v11  ;;  %4629 = vmatpush.msrb.mxu2 %v4229_v52  ;;  %v4050_v30 = vld [vmem:[#allocation14 + $0x460] sm:$0xff]  ;;  %v3800_v11 = vadd.f32 %v3799_v24, %v3690_v29  ;;  %v4227_v24 = vld [vmem:[#allocation14 + $0x9e8] sm:$0xff] }
 0x451   : > { %4704 = vmatpush.msra.mxu1 %v3972_v45  ;;  %4684 = vmatpush.msra.mxu0 %v3915_v61  ;;  %v4179_v45 = vld [vmem:[#allocation14 + $0x868] sm:$0xff]  ;;  %v4070_v61 = vld [vmem:[#allocation14 + $0x500] sm:$0xff] }
 0x452   : > { %4478 = vmatpush.msrb.mxu3 %v4246_v18  ;;  %4630 = vmatpush.msrb.mxu2 %v4226_v59  ;;  %v4044_v18 = vld [vmem:[#allocation14 + $0x430] sm:$0xff]  ;;  %v4170_v52 = vld [vmem:[#allocation14 + $0x820] sm:$0xff]  ;;  %v4041_v59 = vld [vmem:[#allocation14 + $0x418] sm:$0xff] }
 0x453   : > { %4705 = vmatpush.msra.mxu1 %v3969_v3  ;;  %4685 = vmatpush.msra.mxu0 %v3912_v4  ;;  %v4047_v3 = vld [vmem:[#allocation14 + $0x448] sm:$0xff]  ;;  %v4038_v29 = vld [vmem:[#allocation14 + $0x400] sm:$0xff] }
 0x454   : > { %4387 = vmatmul.f32.vlgmr.msra.gmra.mxu3 %v6418_v23  ;;  %4686 = vmatmul.f32.vlgmr.msra.gmra.mxu0 %v6331_v0  ;;  %v4140_v0 = vld [vmem:[#allocation14 + $0x730] sm:$0xff]  ;;  %v4067_v4 = vld [vmem:[#allocation14 + $0x4e8] sm:$0xff] }
 0x455   : > { %4706 = vmatpush.msra.mxu1 %v3966_v62  ;;  %4555 = vmatpush.msra.mxu3 %v4100_v9  ;;  %v4119_v62 = vld [vmem:[#allocation14 + $0x688] sm:$0xff]  ;;  %v6428_v9 = vmax.f32 %v3800_v11, 0.0  ;;  %v4268_v11 = vld [vmem:[#allocation14 + $0xb30] sm:$0xff] }
 0x456   : > { %4631 = vmatpush.msrb.mxu2 %v4223_v34  ;;  %4762 = vmatpush.msrb.mxu0 %v4149_v33  ;;  %v4113_v34 = vld [vmem:[#allocation14 + $0x658] sm:$0xff]  ;;  %v4035_v33 = vld [vmem:[#allocation14 + $0x3e8] sm:$0xff] }
 0x457   : > { %4707 = vmatpush.msra.mxu1 %v3963_v49  ;;  %4548 = vmatmul.f32.vlgmr.msra.gmra.mxu2 %v6369_v60  ;;  %v4116_v49 = vld [vmem:[#allocation14 + $0x670] sm:$0xff] }
 0x458   : > { %4556 = vmatpush.msra.mxu3 %v4097_v48  ;;  %4632 = vmatpush.msrb.mxu2 %v4220_v19  ;;  %v4164_v48 = vld [vmem:[#allocation14 + $0x7f0] sm:$0xff]  ;;  %v4061_v19 = vld [vmem:[#allocation14 + $0x4b8] sm:$0xff] }
 0x459   : > { %4708 = vmatpush.msra.mxu1 %v3960_v53  ;;  %4763 = vmatpush.msrb.mxu0 %v4146_v37  ;;  %v4064_v53 = vld [vmem:[#allocation14 + $0x4d0] sm:$0xff] }
 0x45a   : > { %4709 = vmatmul.f32.vlgmr.msra.gmra.mxu1 %v6341_v63  ;;  %4633 = vmatpush.msrb.mxu2 %v4217_v13  ;;  %v4188_v63 = vld [vmem:[#allocation14 + $0x8b0] sm:$0xff]  ;;  %v4161_v13 = vld [vmem:[#allocation14 + $0x7d8] sm:$0xff] }
 0x45b   : > { %4785 = vmatpush.msrb.mxu1 %v4197_v31  ;;  %4557 = vmatpush.msra.mxu3 %v4094_v39  ;;  %v4032_v37 = vld [vmem:[#allocation14 + $0x3d0] sm:$0xff]  ;;  %v4110_v31 = vld [vmem:[#allocation14 + $0x640] sm:$0xff] }
 0x45c   : > { %4764 = vmatpush.msrb.mxu0 %v4143_v41  ;;  %4634 = vmatpush.msrb.mxu2 %v4214_v32  ;;  %v4058_v39 = vld [vmem:[#allocation14 + $0x4a0] sm:$0xff]  ;;  %v4029_v41 = vld [vmem:[#allocation14 + $0x3b8] sm:$0xff] }
 0x45d   : > { %4786 = vmatpush.msrb.mxu1 %v4194_v58  ;;  %4558 = vmatpush.msra.mxu3 %v4091_v8  ;;  %v4107_v58 = vld [vmem:[#allocation14 + $0x628] sm:$0xff]  ;;  %v4158_v32 = vld [vmem:[#allocation14 + $0x7c0] sm:$0xff] }
 0x45e   : > { %4765 = vmatpush.msrb.mxu0 %v4140_v0  ;;  %4635 = vmatpush.msrb.mxu2 %v4211_v54  ;;  %v4055_v8 = vld [vmem:[#allocation14 + $0x488] sm:$0xff]  ;;  %v4026_v0 = vld [vmem:[#allocation14 + $0x3a0] sm:$0xff] }
 0x45f   : > { %4787 = vmatpush.msrb.mxu1 %v4191_v16  ;;  %4559 = vmatpush.msra.mxu3 %v4088_v35  ;;  %v4155_v16 = vld [vmem:[#allocation14 + $0x7a8] sm:$0xff]  ;;  %v4152_v35 = vld [vmem:[#allocation14 + $0x790] sm:$0xff] }
 0x460   : > { %4551 = vmatmul.f32.gmra.mxu2 %v6393_v42  ;;  %4766 = vmatpush.msrb.mxu0 %v4137_v5  ;;  %v4023_v54 = vld [vmem:[#allocation14 + $0x388] sm:$0xff]  ;;  %v4017_v5 = vld [vmem:[#allocation14 + $0x358] sm:$0xff] }
 0x461   : > { %4636 = vmatpush.msrb.mxu2 %v4208_v2  ;;  %4788 = vmatpush.msrb.mxu1 %v4188_v63  ;;  %v4014_v2 = vld [vmem:[#allocation14 + $0x340] sm:$0xff]  ;;  %v4011_v63 = vld [vmem:[#allocation14 + $0x328] sm:$0xff] }
 0x462   : > { %4560 = vmatpush.msra.mxu3 %v4085_v43  ;;  %4767 = vmatpush.msrb.mxu0 %v4134_v15  ;;  %v5206_v43 = vld [vmem:[#allocation13] sm:$0xff] }
 0x463   : > { %4637 = vmatpush.msrb.mxu2 %v4205_v56  ;;  %4789 = vmatpush.msrb.mxu1 %v4185_v27  ;;  %v3694_v15 = vperm.slane %v5206_v43, 7  ;;  %v4008_v56 = vld [vmem:[#allocation14 + $0x310] sm:$0xff]  ;;  %v4245_v27 = vld [vmem:[#allocation14 + $0xa78] sm:$0xff]  ;;  %v4278_v43 = vld [vmem:[#allocation14 + $0xb80] sm:$0xff] }
 0x464   : > { %4561 = vmatpush.msra.mxu3 %v4082_v10  ;;  %4768 = vmatpush.msrb.mxu0 %v4131_v7  ;;  %v4242_v7 = vld [vmem:[#allocation14 + $0xa60] sm:$0xff] }
 0x465   : > { %4638 = vmatpush.msrb.mxu2 %v4202_v1  ;;  %4790 = vmatpush.msrb.mxu1 %v4182_v36  ;;  %v4292_v1 = vld [vmem:[#allocation14 + $0xbf0] sm:$0xff]  ;;  %v4239_v36 = vld [vmem:[#allocation14 + $0xa48] sm:$0xff] }
 0x466   : > { %4562 = vmatpush.msra.mxu3 %v4079_v51  ;;  %4769 = vmatpush.msrb.mxu0 %v4128_v14  ;;  %v4289_v51 = vld [vmem:[#allocation14 + $0xbd8] sm:$0xff]  ;;  %v4286_v14 = vld [vmem:[#allocation14 + $0xbc0] sm:$0xff] }
 0x467   : > { %4639 = vmatpush.msrb.mxu2 %v4199_v55  ;;  %4791 = vmatpush.msrb.mxu1 %v4179_v45  ;;  %v4233_v55 = vld [vmem:[#allocation14 + $0xa18] sm:$0xff] }
 0x468   : > { %4563 = vmatpush.msra.mxu3 %v4076_v44  ;;  %4640 = vmatmul.f32.vlgmr.msrb.gmra.mxu2 %v6407_v25 }
 0x469   : > { %4716 = vmatpush.msra.mxu2 %v4053_v28  ;;  %4770 = vmatpush.msrb.mxu0 %v4125_v22  ;;  %v4230_v28 = vld [vmem:[#allocation14 + $0xa00] sm:$0xff]  ;;  %v4280_v22 = vld [vmem:[#allocation14 + $0xb90] sm:$0xff] }
 0x46a   : > { %4792 = vmatpush.msrb.mxu1 %v4176_v46  ;;  %4564 = vmatpush.msra.mxu3 %v4073_v38  ;;  %v4224_v46 = vld [vmem:[#allocation14 + $0x9d0] sm:$0xff]  ;;  %v4274_v38 = vld [vmem:[#allocation14 + $0xb60] sm:$0xff] }
 0x46b   : > { %4717 = vmatpush.msra.mxu2 %v4050_v30  ;;  %4771 = vmatpush.msrb.mxu0 %v4122_v21  ;;  %v4277_v30 = vld [vmem:[#allocation14 + $0xb78] sm:$0xff] }
 0x46c   : > { %4793 = vmatpush.msrb.mxu1 %v4173_v57  ;;  %4565 = vmatpush.msra.mxu3 %v4070_v61  ;;  %v4221_v21 = vld [vmem:[#allocation14 + $0x9b8] sm:$0xff]  ;;  %v4215_v57 = vld [vmem:[#allocation14 + $0x988] sm:$0xff] }
 0x46d   : > { %4718 = vmatpush.msra.mxu2 %v4047_v3  ;;  %4772 = vmatpush.msrb.mxu0 %v4119_v62  ;;  %v4218_v3 = vld [vmem:[#allocation14 + $0x9a0] sm:$0xff]  ;;  %v4265_v61 = vld [vmem:[#allocation14 + $0xb18] sm:$0xff]  ;;  %v4212_v62 = vld [vmem:[#allocation14 + $0x970] sm:$0xff] }
 0x46e   : > { %4794 = vmatpush.msrb.mxu1 %v4170_v52  ;;  %4566 = vmatpush.msra.mxu3 %v4067_v4  ;;  %v4209_v52 = vld [vmem:[#allocation14 + $0x958] sm:$0xff]  ;;  %v4259_v4 = vld [vmem:[#allocation14 + $0xae8] sm:$0xff] }
 0x46f   : > { %4719 = vmatpush.msra.mxu2 %v4044_v18  ;;  %4773 = vmatpush.msrb.mxu0 %v4116_v49  ;;  %v4262_v18 = vld [vmem:[#allocation14 + $0xb00] sm:$0xff] }
 0x470   : > { %4795 = vmatpush.msrb.mxu1 %v4167_v12  ;;  %4390 = vmatmul.f32.gmra.mxu3 %v6428_v9  ;;  %v4206_v49 = vld [vmem:[#allocation14 + $0x940] sm:$0xff]  ;;  %v4203_v12 = vld [vmem:[#allocation14 + $0x928] sm:$0xff] }
 0x471   : > { %4720 = vmatpush.msra.mxu2 %v4041_v59  ;;  %4689 = vmatmul.f32.gmra.mxu0 %v6355_v6  ;;  %v4104_v6 = vld [vmem:[#allocation14 + $0x610] sm:$0xff] }
 0x472   : > { %4643 = vmatmul.f32.gmra.mxu2 %v6415_v26  ;;  %4567 = vmatpush.msra.mxu3 %v4064_v53  ;;  %v4256_v59 = vld [vmem:[#allocation14 + $0xad0] sm:$0xff] }
 0x473   : > { %4721 = vmatpush.msra.mxu2 %v4038_v29  ;;  %4774 = vmatpush.msrb.mxu0 %v4113_v34  ;;  %v4253_v29 = vld [vmem:[#allocation14 + $0xab8] sm:$0xff]  ;;  %v4200_v53 = vld [vmem:[#allocation14 + $0x910] sm:$0xff]  ;;  %v4250_v34 = vld [vmem:[#allocation14 + $0xaa0] sm:$0xff] }
 0x474   : > { %4796 = vmatpush.msrb.mxu1 %v4164_v48  ;;  %4568 = vmatpush.msra.mxu3 %v4061_v19  ;;  %v4101_v48 = vld [vmem:[#allocation14 + $0x5f8] sm:$0xff]  ;;  %v4098_v19 = vld [vmem:[#allocation14 + $0x5e0] sm:$0xff] }
 0x475   : > { %4722 = vmatpush.msra.mxu2 %v4035_v33  ;;  %4712 = vmatmul.f32.gmra.mxu1 %v6357_v20  ;;  %v4020_v20 = vld [vmem:[#allocation14 + $0x370] sm:$0xff]  ;;  %v4247_v33 = vld [vmem:[#allocation14 + $0xa88] sm:$0xff] }
 0x476   : > { %4775 = vmatpush.msrb.mxu0 %v4110_v31  ;;  %4797 = vmatpush.msrb.mxu1 %v4161_v13  ;;  %v4092_v31 = vld [vmem:[#allocation14 + $0x5b0] sm:$0xff]  ;;  %v4089_v13 = vld [vmem:[#allocation14 + $0x598] sm:$0xff] }
 0x477   : > { %4723 = vmatpush.msra.mxu2 %v4032_v37  ;;  %4569 = vmatpush.msra.mxu3 %v4058_v39  ;;  %v4095_v37 = vld [vmem:[#allocation14 + $0x5c8] sm:$0xff]  ;;  %v4086_v39 = vld [vmem:[#allocation14 + $0x580] sm:$0xff] }
 0x478   : > { %4776 = vmatpush.msrb.mxu0 %v4107_v58  ;;  %4798 = vmatpush.msrb.mxu1 %v4158_v32  ;;  %v4077_v58 = vld [vmem:[#allocation14 + $0x538] sm:$0xff]  ;;  %v4074_v32 = vld [vmem:[#allocation14 + $0x520] sm:$0xff] }
 0x479   : > { %4724 = vmatpush.msra.mxu2 %v4029_v41  ;;  %4570 = vmatpush.msra.mxu3 %v4055_v8  ;;  %v4080_v41 = vld [vmem:[#allocation14 + $0x550] sm:$0xff]  ;;  %v4071_v8 = vld [vmem:[#allocation14 + $0x508] sm:$0xff] }
 0x47a   : > { %4777 = vmatpush.msrb.mxu0 %v4104_v6  ;;  %4799 = vmatpush.msrb.mxu1 %v4155_v16  ;;  %v4065_v6 = vld [vmem:[#allocation14 + $0x4d8] sm:$0xff]  ;;  %v4059_v16 = vld [vmem:[#allocation14 + $0x4a8] sm:$0xff] }
 0x47b   : > { %4725 = vmatpush.msra.mxu2 %v4026_v0  ;;  %4778 = vmatmul.f32.vlgmr.msrb.gmra.mxu0 %v6373_v47  ;;  %v4068_v0 = vld [vmem:[#allocation14 + $0x4f0] sm:$0xff] }
 0x47c   : > { %4800 = vmatpush.msrb.mxu1 %v4152_v35  ;;  %v4293_v35 = vld [vmem:[#allocation14 + $0xbf8] sm:$0xff] }
 0x47d   : > { %4726 = vmatpush.msra.mxu2 %v4023_v54  ;;  %4801 = vmatmul.f32.vlgmr.msrb.gmra.mxu1 %v6382_v50  ;;  %v4056_v54 = vld [vmem:[#allocation14 + $0x490] sm:$0xff] }
 0x47f   : > { %4727 = vmatpush.msra.mxu2 %v4020_v20  ;;  %v4290_v20 = vld [vmem:[#allocation14 + $0xbe0] sm:$0xff] }
 0x481   : > { %4728 = vmatpush.msra.mxu2 %v4017_v5  ;;  %v4287_v5 = vld [vmem:[#allocation14 + $0xbc8] sm:$0xff] }
 0x483   : > { %4729 = vmatpush.msra.mxu2 %v4014_v2  ;;  %4781 = vmatmul.f32.gmra.mxu0 %v6391_v17  ;;  %v4236_v17 = vld [vmem:[#allocation14 + $0xa30] sm:$0xff] }
 0x484   : > { %v4284_v2 = vld [vmem:[#allocation14 + $0xbb0] sm:$0xff] }
 0x485   : > { %4730 = vmatpush.msra.mxu2 %v4011_v63  ;;  %4804 = vmatmul.f32.gmra.mxu1 %v6395_v40  ;;  %v4281_v63 = vld [vmem:[#allocation14 + $0xb98] sm:$0xff] }
 0x487   : > { %4731 = vmatpush.msra.mxu2 %v4008_v56  ;;  %v4272_v56 = vld [vmem:[#allocation14 + $0xb50] sm:$0xff] }
 0x488   : > { %4732 = vmatmul.f32.vlgmr.msra.gmra.mxu2 %v6369_v60  ;;  %v4283_v60 = vld [vmem:[#allocation14 + $0xba8] sm:$0xff] }
 0x489   : > { %4808 = vmatpush.msrb.mxu2 %v4245_v27  ;;  %v4269_v27 = vld [vmem:[#allocation14 + $0xb38] sm:$0xff] }
 0x48b   : > { %4809 = vmatpush.msrb.mxu2 %v4242_v7  ;;  %v4257_v7 = vld [vmem:[#allocation14 + $0xad8] sm:$0xff] }
 0x48d   : > { %4810 = vmatpush.msrb.mxu2 %v4239_v36  ;;  %v4251_v36 = vld [vmem:[#allocation14 + $0xaa8] sm:$0xff] }
 0x48f   : > { %4811 = vmatpush.msrb.mxu2 %v4236_v17  ;;  %v4342_v17 = vpop.f32.mrf.mxu1 }
 0x490   : > { %4735 = vmatmul.f32.gmra.mxu2 %v6393_v42  ;;  %v4271_v42 = vld [vmem:[#allocation14 + $0xb48] sm:$0xff] }
 0x491   : > { %4812 = vmatpush.msrb.mxu2 %v4233_v55 }
 0x493   : > { %v3888_v10 = vpop.f32.mrf.mxu3  ;;  %4813 = vmatpush.msrb.mxu2 %v4230_v28  ;;  %v4365_v55 = vpop.f32.mrf.mxu2 }
 0x494   : > { %v3889_v47 = vadd.f32 %v3888_v10, %v3694_v15  ;;  %v4266_v10 = vld [vmem:[#allocation14 + $0xb20] sm:$0xff] }
 0x495   : > { %4814 = vmatpush.msrb.mxu2 %v4227_v24 }
 0x496   : > { %v6439_v50 = vmax.f32 %v3889_v47, 0.0  ;;  %v4260_v47 = vld [vmem:[#allocation14 + $0xaf0] sm:$0xff] }
 0x497   : > { %4815 = vmatpush.msrb.mxu2 %v4224_v46  ;;  %v4345_v28 = vpop.f32.mrf.mxu1 }
 0x498   : > { %4479 = vmatmul.f32.vlgmr.msrb.gmra.mxu3 %v6439_v50 }
 0x499   : > { %4647 = vmatpush.msrb.mxu3 %v4292_v1  ;;  %4816 = vmatpush.msrb.mxu2 %v4221_v21  ;;  %v4254_v1 = vld [vmem:[#allocation14 + $0xac0] sm:$0xff] }
 0x49b   : > { %4648 = vmatpush.msrb.mxu3 %v4289_v51  ;;  %v3891_v40 = vpop.f32.mrf.mxu3  ;;  %4817 = vmatpush.msrb.mxu2 %v4218_v3  ;;  %v4319_v51 = vpop.f32.mrf.mxu0 }
 0x49c   : > { %v3892_v45 = vadd.f32 %v3891_v40, %v3694_v15  ;;  %v4275_v15 = vld [vmem:[#allocation14 + $0xb68] sm:$0xff] }
 0x49d   : > { %4649 = vmatpush.msrb.mxu3 %v4286_v14  ;;  %4818 = vmatpush.msrb.mxu2 %v4215_v57  ;;  %v6455_v14 = vld [vmem:[#allocation16] sm:$0x7] }
 0x49e   : > { %v6443_v44 = vmax.f32 %v3892_v45, 0.0  ;;  %v4296_v40 = vperm.slane %v6455_v14, 0 }
 0x49f   : > { %4650 = vmatpush.msrb.mxu3 %v4283_v60  ;;  %4819 = vmatpush.msrb.mxu2 %v4212_v62 }
 0x4a0   : > { %4482 = vmatmul.f32.gmra.mxu3 %v6443_v44  ;;  %v4320_v60 = vadd.f32 %v4319_v51, %v4296_v40 }
 0x4a1   : > { %4651 = vmatpush.msrb.mxu3 %v4280_v22  ;;  %4820 = vmatpush.msrb.mxu2 %v4209_v52 }
 0x4a2   : > { %v4343_v22 = vadd.f32 %v4342_v17, %v4320_v60 }
 0x4a3   : > { %4652 = vmatpush.msrb.mxu3 %v4277_v30  ;;  %4821 = vmatpush.msrb.mxu2 %v4206_v49  ;;  %v4322_v45 = vpop.f32.mrf.mxu0 }
 0x4a4   : > { %v4366_v21 = vadd.f32 %v4365_v55, %v4343_v22 }
 0x4a5   : > { %4653 = vmatpush.msrb.mxu3 %v4274_v38  ;;  %4822 = vmatpush.msrb.mxu2 %v4203_v12  ;;  %v4323_v38 = vadd.f32 %v4322_v45, %v4296_v40  ;;  %v4298_v45 = vperm.slane %v6455_v14, 2 }
 0x4a7   : > { %4654 = vmatpush.msrb.mxu3 %v4271_v42  ;;  %4823 = vmatpush.msrb.mxu2 %v4200_v53  ;;  %v4434_v42 = vpop.f32.mrf.mxu1 }
 0x4a8   : > { %4571 = vmatmul.f32.vlgmr.msra.gmra.mxu3 %v6418_v23  ;;  %4824 = vmatmul.f32.vlgmr.msrb.gmra.mxu2 %v6407_v25  ;;  %v4083_v25 = vld [vmem:[#allocation14 + $0x568] sm:$0xff] }
 0x4a9   : > { %4655 = vmatpush.msrb.mxu3 %v4268_v11  ;;  %v4368_v24 = vpop.f32.mrf.mxu2 }
 0x4ab   : > { %4656 = vmatpush.msrb.mxu3 %v4265_v61  ;;  %v4411_v30 = vpop.f32.mrf.mxu0 }
 0x4ad   : > { %4657 = vmatpush.msrb.mxu3 %v4262_v18 }
 0x4af   : > { %4658 = vmatpush.msrb.mxu3 %v4259_v4  ;;  %v4437_v52 = vpop.f32.mrf.mxu1 }
 0x4b0   : > { %4574 = vmatmul.f32.gmra.mxu3 %v6428_v9  ;;  %4827 = vmatmul.f32.gmra.mxu2 %v6415_v26  ;;  %v4062_v26 = vld [vmem:[#allocation14 + $0x4c0] sm:$0xff] }
 0x4b1   : > { %4659 = vmatpush.msrb.mxu3 %v4256_v59 }
 0x4b3   : > { %4660 = vmatpush.msrb.mxu3 %v4253_v29  ;;  %v4414_v61 = vpop.f32.mrf.mxu0 }
 0x4b5   : > { %4661 = vmatpush.msrb.mxu3 %v4250_v34 }
 0x4b7   : > { %4662 = vmatpush.msrb.mxu3 %v4247_v33 }
 0x4b8   : > { %4663 = vmatmul.f32.vlgmr.msrb.gmra.mxu3 %v6439_v50 }
 0x4b9   : > { %4739 = vmatpush.msra.mxu3 %v4101_v48  ;;  %v4526_v48 = vpop.f32.mrf.mxu1 }
 0x4bb   : > { %4740 = vmatpush.msra.mxu3 %v4098_v19  ;;  %v4503_v53 = vpop.f32.mrf.mxu0  ;;  %v4297_v19 = vperm.slane %v6455_v14, 1 }
 0x4bd   : > { %4741 = vmatpush.msra.mxu3 %v4095_v37 }
 0x4be   : > { %v4457_v11 = vpop.f32.mrf.mxu2 }
 0x4bf   : > { %4742 = vmatpush.msra.mxu3 %v4092_v31 }
 0x4c0   : > { %4666 = vmatmul.f32.gmra.mxu3 %v6443_v44 }
 0x4c1   : > { %4743 = vmatpush.msra.mxu3 %v4089_v13 }
 0x4c3   : > { %4744 = vmatpush.msra.mxu3 %v4086_v39 }
 0x4c5   : > { %4745 = vmatpush.msra.mxu3 %v4083_v25  ;;  %v4504_v25 = vadd.f32 %v4503_v53, %v4297_v19 }
 0x4c7   : > { %4746 = vmatpush.msra.mxu3 %v4080_v41  ;;  %v4506_v41 = vpop.f32.mrf.mxu0 }
 0x4c9   : > { %4747 = vmatpush.msra.mxu3 %v4077_v58  ;;  %v4527_v58 = vadd.f32 %v4526_v48, %v4504_v25 }
 0x4cb   : > { %4748 = vmatpush.msra.mxu3 %v4074_v32  ;;  %v4460_v49 = vpop.f32.mrf.mxu2  ;;  %v4529_v32 = vpop.f32.mrf.mxu1 }
 0x4cd   : > { %4749 = vmatpush.msra.mxu3 %v4071_v8 }
 0x4cf   : > { %4750 = vmatpush.msra.mxu3 %v4068_v0  ;;  %v4507_v0 = vadd.f32 %v4506_v41, %v4297_v19 }
 0x4d1   : > { %4751 = vmatpush.msra.mxu3 %v4065_v6 }
 0x4d3   : > { %4752 = vmatpush.msra.mxu3 %v4062_v26 }
 0x4d5   : > { %4753 = vmatpush.msra.mxu3 %v4059_v16 }
 0x4d7   : > { %4754 = vmatpush.msra.mxu3 %v4056_v54  ;;  %v4388_v46 = vpop.f32.mrf.mxu3  ;;  %v4595_v54 = vpop.f32.mrf.mxu0 }
 0x4d8   : > { %4755 = vmatmul.f32.vlgmr.msra.gmra.mxu3 %v6418_v23  ;;  %v4263_v23 = vld [vmem:[#allocation14 + $0xb08] sm:$0xff]  ;;  %v4389_v3 = vadd.f32 %v4388_v46, %v4366_v21 }
 0x4d9   : > { %4831 = vmatpush.msrb.mxu3 %v4293_v35  ;;  %v4530_v35 = vadd.f32 %v4529_v32, %v4507_v0 }
 0x4da   : > { %v4412_v18 = vadd.f32 %v4411_v30, %v4389_v3  ;;  %v4549_v13 = vpop.f32.mrf.mxu2 }
 0x4db   : > { %4832 = vmatpush.msrb.mxu3 %v4290_v20  ;;  %v4550_v6 = vadd.f32 %v4549_v13, %v4527_v58 }
 0x4dd   : > { %4833 = vmatpush.msrb.mxu3 %v4287_v5 }
 0x4df   : > { %4834 = vmatpush.msrb.mxu3 %v4284_v2  ;;  %v4618_v2 = vpop.f32.mrf.mxu1 }
 0x4e0   : > { %4758 = vmatmul.f32.gmra.mxu3 %v6428_v9  ;;  %v4248_v9 = vld [vmem:[#allocation14 + $0xa90] sm:$0xff] }
 0x4e1   : > { %4835 = vmatpush.msrb.mxu3 %v4281_v63 }
 0x4e3   : > { %4836 = vmatpush.msrb.mxu3 %v4278_v43  ;;  %v4552_v26 = vpop.f32.mrf.mxu2 }
 0x4e4   : > { %v4553_v63 = vadd.f32 %v4552_v26, %v4530_v35 }
 0x4e5   : > { %4837 = vmatpush.msrb.mxu3 %v4275_v15 }
 0x4e7   : > { %4838 = vmatpush.msrb.mxu3 %v4272_v56 }
 0x4e9   : > { %4839 = vmatpush.msrb.mxu3 %v4269_v27  ;;  %v4598_v27 = vpop.f32.mrf.mxu0 }
 0x4eb   : > { %4840 = vmatpush.msrb.mxu3 %v4266_v10  ;;  %v4641_v56 = vpop.f32.mrf.mxu2 }
 0x4ed   : > { %4841 = vmatpush.msrb.mxu3 %v4263_v23 }
 0x4ef   : > { %4842 = vmatpush.msrb.mxu3 %v4260_v47 }
 0x4f1   : > { %4843 = vmatpush.msrb.mxu3 %v4257_v7  ;;  %v4687_v40 = vpop.f32.mrf.mxu0 }
 0x4f2   : > { %v4688_v22 = vadd.f32 %v4687_v40, %v4298_v45 }
 0x4f3   : > { %4844 = vmatpush.msrb.mxu3 %v4254_v1  ;;  %v4391_v57 = vpop.f32.mrf.mxu3  ;;  %v4621_v1 = vpop.f32.mrf.mxu1 }
 0x4f5   : > { %4845 = vmatpush.msrb.mxu3 %v4251_v36 }
 0x4f7   : > { %4846 = vmatpush.msrb.mxu3 %v4248_v9  ;;  %v4644_v9 = vpop.f32.mrf.mxu2 }
 0x4f8   : > { %4847 = vmatmul.f32.vlgmr.msrb.gmra.mxu3 %v6439_v50  ;;  %v4346_v50 = vadd.f32 %v4345_v28, %v4323_v38 }
 0x4fa   : > { %v4369_v62 = vadd.f32 %v4368_v24, %v4346_v50  ;;  %v4690_v24 = vpop.f32.mrf.mxu0 }
 0x4fb   : > { %v4710_v60 = vpop.f32.mrf.mxu1 }
 0x4fc   : > { %v4392_v4 = vadd.f32 %v4391_v57, %v4369_v62  ;;  %v4711_v46 = vadd.f32 %v4710_v60, %v4688_v22 }
 0x4fe   : > { %v4415_v59 = vadd.f32 %v4414_v61, %v4392_v4 }
 0x500   : > { %4850 = vmatmul.f32.gmra.mxu3 %v6443_v44  ;;  %v4435_v44 = vadd.f32 %v4434_v42, %v4412_v18  ;;  %v4438_v33 = vadd.f32 %v4437_v52, %v4415_v59  ;;  %v4691_v42 = vadd.f32 %v4690_v24, %v4298_v45 }
 0x502   : > { %v4458_v12 = vadd.f32 %v4457_v11, %v4435_v44  ;;  %v4461_v37 = vadd.f32 %v4460_v49, %v4438_v33  ;;  %v4779_v11 = vpop.f32.mrf.mxu0 }
 0x503   : > { %v4713_v38 = vpop.f32.mrf.mxu1 }
 0x504   : > { %v4714_v57 = vadd.f32 %v4713_v38, %v4691_v42 }
 0x50a   : > { %v4782_v49 = vpop.f32.mrf.mxu0 }
 0x50b   : > { %v4733_v28 = vpop.f32.mrf.mxu2  ;;  %v4802_v14 = vpop.f32.mrf.mxu1 }
 0x50c   : > { %v4734_v21 = vadd.f32 %v4733_v28, %v4711_v46 }
 0x513   : > { %v4736_v3 = vpop.f32.mrf.mxu2 }
 0x514   : > { %v4737_v18 = vadd.f32 %v4736_v3, %v4714_v57 }
 0x51b   : > { %v4480_v29 = vpop.f32.mrf.mxu3 }
 0x51c   : > { %v4481_v34 = vadd.f32 %v4480_v29, %v4458_v12 }
 0x51e   : > { %4854 = vst [vmem:[%s6460_s30] sm:$0xff] %v4481_v34  ;;  %v4805_v34 = vpop.f32.mrf.mxu1 }
 0x523   : > { %v4483_v31 = vpop.f32.mrf.mxu3 }
 0x524   : > { %v4484_v39 = vadd.f32 %v4483_v31, %v4461_v37 }
 0x526   : > { %4857 = vst [vmem:[%s6460_s30 + $0x18] sm:$0xff] %v4484_v39 }
 0x52b   : > { %v4572_v8 = vpop.f32.mrf.mxu3  ;;  %v4825_v44 = vpop.f32.mrf.mxu2 }
 0x52c   : > { %v4573_v16 = vadd.f32 %v4572_v8, %v4550_v6 }
 0x52e   : > { %v4596_v20 = vadd.f32 %v4595_v54, %v4573_v16 }
 0x530   : > { %v4619_v15 = vadd.f32 %v4618_v2, %v4596_v20 }
 0x532   : > { %v4642_v23 = vadd.f32 %v4641_v56, %v4619_v15 }
 0x533   : > { %v4575_v5 = vpop.f32.mrf.mxu3  ;;  %v4828_v48 = vpop.f32.mrf.mxu2 }
 0x534   : > { %v4576_v43 = vadd.f32 %v4575_v5, %v4553_v63 }
 0x536   : > { %v4599_v10 = vadd.f32 %v4598_v27, %v4576_v43 }
 0x538   : > { %v4622_v36 = vadd.f32 %v4621_v1, %v4599_v10 }
 0x53a   : > { %v4645_v51 = vadd.f32 %v4644_v9, %v4622_v36 }
 0x53b   : > { %v4664_v47 = vpop.f32.mrf.mxu3 }
 0x53c   : > { %v4665_v7 = vadd.f32 %v4664_v47, %v4642_v23 }
 0x53e   : > { %4855 = vst [vmem:[%s6460_s30 + $0x8] sm:$0xff] %v4665_v7 }
 0x543   : > { %v4667_v17 = vpop.f32.mrf.mxu3 }
 0x544   : > { %v4668_v55 = vadd.f32 %v4667_v17, %v4645_v51 }
 0x546   : > { %4858 = vst [vmem:[%s6460_s30 + $0x20] sm:$0xff] %v4668_v55 }
 0x55b   : > { %v4756_v30 = vpop.f32.mrf.mxu3 }
 0x55c   : > { %v4757_v50 = vadd.f32 %v4756_v30, %v4734_v21 }
 0x55e   : > { %v4780_v61 = vadd.f32 %v4779_v11, %v4757_v50 }
 0x560   : > { %v4803_v4 = vadd.f32 %v4802_v14, %v4780_v61 }
 0x562   : > { %v4826_v12 = vadd.f32 %v4825_v44, %v4803_v4 }
 0x563   : > { %v4759_v62 = vpop.f32.mrf.mxu3 }
 0x564   : > { %v4760_v52 = vadd.f32 %v4759_v62, %v4737_v18 }
 0x566   : > { %v4783_v59 = vadd.f32 %v4782_v49, %v4760_v52 }
 0x568   : > { %v4806_v33 = vadd.f32 %v4805_v34, %v4783_v59 }
 0x56a   : > { %v4829_v19 = vadd.f32 %v4828_v48, %v4806_v33 }
 0x57b   : > { %v4848_v29 = vpop.f32.mrf.mxu3 }
 0x57c   : > { %v4849_v53 = vadd.f32 %v4848_v29, %v4826_v12 }
 0x57e   : > { %4856 = vst [vmem:[%s6460_s30 + $0x10] sm:$0xff] %v4849_v53 }
 0x583   : > { %v4851_v37 = vpop.f32.mrf.mxu3 }
 0x584   : > { %v4852_v31 = vadd.f32 %v4851_v37, %v4829_v19 }
 0x586   : > { %4859 = vst [vmem:[%s6460_s30 + $0x28] sm:$0xff] %v4852_v31 }
 0x587   : > { %5504 = shalt.err (!%p5501_p9)
}
 0x588   : > { %s5576_s28 = smov 384   ;;  %s5577_s1 = smov 24  }
 0x589   : > { %5103 = dma.vmem_to_hbm [thread:$0]  (%p5740_p4), %s4874_s26, 768, %s4876_s25, %s4861_s20, %s5576_s28, %s5576_s28, %s5577_s1  }
 0x58a PF: > { %s4890_s30 = sand.u32 1, %s5547_s13   ;;  %p6610_p10 = scmp.ge.s32.totalorder %s5559_s16, 2 }
 0x58b   : > { %s4891_s24 = scalar_lea.sflag [#allocation4], %s4890_s30 }
 0x58c   : > { %p5135_p13 = pnand %p6610_p10, %p5744_p6 }
 0x58e   : > { %p5136_p11 = pneg %p5135_p13 }
 0x590   : > { %5542 = dma.done.wait (%p5136_p11), %s4891_s24, 768  }
 0x591   : > { %5544 = vsyncadd (%p5136_p11), %s4891_s24, 4294966528  ;;  %p27_p0 = scmp.ge.s32.totalorder %s5714_s4, 4   ;;  %s6611_s13 = smov %s5551_s14 }
 0x592   : > { %s6612_s14 = smov %s5555_s15  ;;  %s6613_s15 = smov %s5725_s18 }
 0x593   : > { %s6614_s16 = smov %s5714_s4  ;;  %29 = sbr.rel (!%p27_p0) target bundleno = 15 (0xf), region = 137 }
 0x598   :  { %4897 = vsyncpa [#allocation3], 1 }
 0x599   :  { %4899 = vsyncpa [#allocation3 + $0x1], 1 }
 0x59a   :  { %4900 = vsyncpa [#allocation6], 1 }
 0x59b   :  { %4901 = vsyncpa [#allocation9], 1 }
 0x59c   :  { %4902 = vsyncpa [#allocation12], 1 }
 0x59d   :  { %4903 = vsyncpa [#allocation15], 1 }
 0x59e   :  { %4904 = vsyncpa [#allocation4], 1 }
 0x59f   :  { %4906 = vsyncpa [#allocation4 + $0x1], 1 }

</bundles_post_ra>
